<compile_context>
chip_gen: v7x
topology: tpu7x:2x2x1
jax: 0.10.0
libtpu: 0.0.40
codegen_flags: <defaults>
</compile_context>

<pallas_src>
import jax
import jax.numpy as jnp
from jax.experimental import pallas as pl
from jax.experimental.pallas import tpu as pltpu

BN_EPS = 1e-5
_WPAD = 8  # left/right column pad in the scratches -> interior store is sublane-aligned


# ----------------------------------------------------------------------------
# In-kernel helpers
# ----------------------------------------------------------------------------
def _fill_padded(pad_ref, img, fill_value, h, w):
    """Write img (h, w, c) into a (h+2, w+2*_WPAD, c) scratch at offset (1, _WPAD)."""
    pad_ref[...] = jnp.full(pad_ref.shape, fill_value, pad_ref.dtype)
    pad_ref[pl.ds(1, h), pl.ds(_WPAD, w), :] = img.astype(pad_ref.dtype)


def _conv3x3_relu(pad_ref, w_ref, b_ref, h, w):
    """3x3 / stride-1 / pad-1 conv + bias + ReLU as 9 shifted MXU dots.

    pad_ref: (h+2, w+2*_WPAD, cin) f32 scratch, image at (1, _WPAD), zero halo.
    w_ref:   (9, cin, cout) bf16, tap-major (dy*3 + dx).
    b_ref:   (1, cout) f32 (BN-folded bias).
    Returns  (h*w, cout) f32.
    """
    cin = pad_ref.shape[-1]
    cout = w_ref.shape[-1]
    acc = jnp.zeros((h * w, cout), jnp.float32)
    for dy in range(3):
        for dx in range(3):
            patch = pad_ref[pl.ds(dy, h), pl.ds(_WPAD - 1 + dx, w), :]
            patch = patch.reshape(h * w, cin).astype(jnp.bfloat16)
            acc = acc + jnp.dot(patch, w_ref[dy * 3 + dx],
                                preferred_element_type=jnp.float32)
    return jnp.maximum(acc + b_ref[...], 0.0)


# ----------------------------------------------------------------------------
# The fused Inception kernel (one grid step = one image)
# ----------------------------------------------------------------------------
def _inception_kernel(x_ref,
                      w_b1, b_b1, w_b21, b_b21, w_b22, b_b22,
                      w_b31, b_b31, w_b32, b_b32, w_b33, b_b33,
                      w_b42, b_b42,
                      o_ref,
                      xpad, y2pad, y3pad, z3pad):
    _, h, w, cin = x_ref.shape
    m = h * w
    x = x_ref[0]                      # (h, w, cin) bf16, VMEM-resident
    xm = x.reshape(m, cin)

    # --- Branch 1: 1x1 (Cin->64) + folded BN bias + ReLU --------------------
    b1 = jnp.maximum(
        jnp.dot(xm, w_b1[...], preferred_element_type=jnp.float32) + b_b1[...],
        0.0)
    o_ref[0, :, 0:64] = b1

    # --- Branch 2: 1x1 (Cin->64) -> 3x3 (64->64) -----------------------------
    y2 = jnp.maximum(
        jnp.dot(xm, w_b21[...], preferred_element_type=jnp.float32) + b_b21[...],
        0.0)
    _fill_padded(y2pad, y2.reshape(h, w, 64), 0.0, h, w)
    o_ref[0, :, 64:128] = _conv3x3_relu(y2pad, w_b22, b_b22, h, w)

    # --- Branch 3: 1x1 (Cin->96) -> 3x3 (96->96) -> 3x3 (96->96) -------------
    y3 = jnp.maximum(
        jnp.dot(xm, w_b31[...], preferred_element_type=jnp.float32) + b_b31[...],
        0.0)
    _fill_padded(y3pad, y3.reshape(h, w, 96), 0.0, h, w)
    z3 = _conv3x3_relu(y3pad, w_b32, b_b32, h, w)
    _fill_padded(z3pad, z3.reshape(h, w, 96), 0.0, h, w)
    o_ref[0, :, 128:224] = _conv3x3_relu(z3pad, w_b33, b_b33, h, w)

    # --- Branch 4: maxpool 3x3/s1/p1 -> 1x1 (Cin->64) ------------------------
    _fill_padded(xpad, x, -jnp.inf, h, w)
    pooled = xpad[pl.ds(0, h), pl.ds(_WPAD - 1, w), :]
    for dy in range(3):
        for dx in range(3):
            if dy == 0 and dx == 0:
                continue
            pooled = jnp.maximum(
                pooled, xpad[pl.ds(dy, h), pl.ds(_WPAD - 1 + dx, w), :])
    pooled = pooled.reshape(m, cin).astype(jnp.bfloat16)
    b4 = jnp.maximum(
        jnp.dot(pooled, w_b42[...], preferred_element_type=jnp.float32) + b_b42[...],
        0.0)
    o_ref[0, :, 224:288] = b4


# ----------------------------------------------------------------------------
# Parameters (deterministic, synthetic) with eval-mode BatchNorm folding
# ----------------------------------------------------------------------------
def _init_conv_block(key, kh, kw, cin, cout):
    k1, k2, k3, k4, k5, k6 = jax.random.split(key, 6)
    wgt = jax.random.normal(k1, (kh, kw, cin, cout), jnp.float32) / jnp.sqrt(
        float(kh * kw * cin))
    b_conv = 0.05 * jax.random.normal(k2, (cout,), jnp.float32)
    gamma = 1.0 + 0.1 * jax.random.normal(k3, (cout,), jnp.float32)
    beta = 0.1 * jax.random.normal(k4, (cout,), jnp.float32)
    rmean = 0.05 * jax.random.normal(k5, (cout,), jnp.float32)
    rvar = 0.75 + 0.5 * jax.random.uniform(k6, (cout,), jnp.float32)
    # Fold eval-mode BN:  y = ((conv + b) - mean)/sqrt(var+eps)*gamma + beta
    s = gamma / jnp.sqrt(rvar + BN_EPS)
    w_folded = (wgt * s).astype(jnp.bfloat16)
    if kh == 1 and kw == 1:
        w_folded = w_folded.reshape(cin, cout)            # (Cin, Cout)
    else:
        w_folded = w_folded.reshape(kh * kw, cin, cout)    # (9, Cin, Cout) tap-major
    b_folded = ((b_conv - rmean) * s + beta).reshape(1, cout).astype(jnp.float32)
    return w_folded, b_folded


def init_params(key, in_channels):
    keys = jax.random.split(key, 7)
    return {
        "b1":   _init_conv_block(keys[0], 1, 1, in_channels, 64),   # convb1
        "b2_1": _init_conv_block(keys[1], 1, 1, in_channels, 64),   # convb2_1
        "b2_2": _init_conv_block(keys[2], 3, 3, 64, 64),            # convb2_2
        "b3_1": _init_conv_block(keys[3], 1, 1, in_channels, 96),   # convb3_1
        "b3_2": _init_conv_block(keys[4], 3, 3, 96, 96),            # convb3_2
        "b3_3": _init_conv_block(keys[5], 3, 3, 96, 96),            # convb3_3
        "b4_2": _init_conv_block(keys[6], 1, 1, in_channels, 64),   # convb4_2
    }


# ----------------------------------------------------------------------------
# Forward wrapper (NCHW in -> NCHW out)
# ----------------------------------------------------------------------------
def _resident_spec(arr):
    zeros = (0,) * arr.ndim
    return pl.BlockSpec(arr.shape, lambda i, _z=zeros: _z)


def inception_forward(params, x_nchw):
    n, c, h, w = x_nchw.shape
    m = h * w
    x_nhwc = jnp.transpose(x_nchw, (0, 2, 3, 1)).astype(jnp.bfloat16)

    operands = [x_nhwc]
    in_specs = [pl.BlockSpec((1, h, w, c), lambda i: (i, 0, 0, 0))]
    for name in ("b1", "b2_1", "b2_2", "b3_1", "b3_2", "b3_3", "b4_2"):
        wgt, bias = params[name]
        operands += [wgt, bias]
        in_specs += [_resident_spec(wgt), _resident_spec(bias)]

    out = pl.pallas_call(
        _inception_kernel,
        out_shape=jax.ShapeDtypeStruct((n, m, 288), jnp.float32),
        grid=(n,),
        in_specs=in_specs,
        out_specs=pl.BlockSpec((1, m, 288), lambda i: (i, 0, 0)),
        scratch_shapes=[
            pltpu.VMEM((h + 2, w + 2 * _WPAD, c), jnp.float32),    # xpad  (pool)
            pltpu.VMEM((h + 2, w + 2 * _WPAD, 64), jnp.float32),   # y2pad
            pltpu.VMEM((h + 2, w + 2 * _WPAD, 96), jnp.float32),   # y3pad
            pltpu.VMEM((h + 2, w + 2 * _WPAD, 96), jnp.float32),   # z3pad
        ],
        compiler_params=pltpu.CompilerParams(
            dimension_semantics=("parallel",)),
    )(*operands)

    out = out.reshape(n, h, w, 288)
    return jnp.transpose(out, (0, 3, 1, 2))                        # (N, 288, H, W)


# ----------------------------------------------------------------------------
if __name__ == "__main__":
    in_channels = 4
    batch, height, width = 2, 16, 16

    key = jax.random.PRNGKey(0)
    kp, kx = jax.random.split(key)
    params = init_params(kp, in_channels)
    x = jax.random.normal(kx, (batch, in_channels, height, width), jnp.float32)

    forward = jax.jit(inception_forward)
    out = forward(params, x)
    jax.block_until_ready(out)

    assert out.shape == (batch, 288, height, width), out.shape
    assert bool(jnp.all(jnp.isfinite(out)))
    print("KERNEL_OK")
</pallas_src>

<mosaic_0001>
module attributes {stable_mosaic.version = 11 : i64} {
  func.func @_inception_kernel(%arg0: i32, %arg1: memref<1x16x16x4xbf16, #tpu.memory_space<vmem>>, %arg2: memref<4x64xbf16, #tpu.memory_space<vmem>>, %arg3: memref<1x64xf32, #tpu.memory_space<vmem>>, %arg4: memref<4x64xbf16, #tpu.memory_space<vmem>>, %arg5: memref<1x64xf32, #tpu.memory_space<vmem>>, %arg6: memref<9x64x64xbf16, #tpu.memory_space<vmem>>, %arg7: memref<1x64xf32, #tpu.memory_space<vmem>>, %arg8: memref<4x96xbf16, #tpu.memory_space<vmem>>, %arg9: memref<1x96xf32, #tpu.memory_space<vmem>>, %arg10: memref<9x96x96xbf16, #tpu.memory_space<vmem>>, %arg11: memref<1x96xf32, #tpu.memory_space<vmem>>, %arg12: memref<9x96x96xbf16, #tpu.memory_space<vmem>>, %arg13: memref<1x96xf32, #tpu.memory_space<vmem>>, %arg14: memref<4x64xbf16, #tpu.memory_space<vmem>>, %arg15: memref<1x64xf32, #tpu.memory_space<vmem>>, %arg16: memref<1x256x288xf32, #tpu.memory_space<vmem>>, %arg17: memref<18x32x4xf32, #tpu.memory_space<vmem>>, %arg18: memref<18x32x64xf32, #tpu.memory_space<vmem>>, %arg19: memref<18x32x96xf32, #tpu.memory_space<vmem>>, %arg20: memref<18x32x96xf32, #tpu.memory_space<vmem>>) attributes {dimension_semantics = [#tpu.dimension_semantics<parallel>], iteration_bounds = array<i64: 2>, scalar_prefetch = 0 : i64, scratch_operands = 4 : i64, tpu.core_type = #tpu.core_type<tc>, window_params = [{transform_indices = @transform_0, window_bounds = array<i64: 1, 16, 16, 4>}, {pipeline_mode = #tpu.pipeline_mode<synchronous>, transform_indices = @transform_1, window_bounds = array<i64: 4, 64>}, {pipeline_mode = #tpu.pipeline_mode<synchronous>, transform_indices = @transform_2, window_bounds = array<i64: 1, 64>}, {pipeline_mode = #tpu.pipeline_mode<synchronous>, transform_indices = @transform_3, window_bounds = array<i64: 4, 64>}, {pipeline_mode = #tpu.pipeline_mode<synchronous>, transform_indices = @transform_4, window_bounds = array<i64: 1, 64>}, {pipeline_mode = #tpu.pipeline_mode<synchronous>, transform_indices = @transform_5, window_bounds = array<i64: 9, 64, 64>}, {pipeline_mode = #tpu.pipeline_mode<synchronous>, transform_indices = @transform_6, window_bounds = array<i64: 1, 64>}, {pipeline_mode = #tpu.pipeline_mode<synchronous>, transform_indices = @transform_7, window_bounds = array<i64: 4, 96>}, {pipeline_mode = #tpu.pipeline_mode<synchronous>, transform_indices = @transform_8, window_bounds = array<i64: 1, 96>}, {pipeline_mode = #tpu.pipeline_mode<synchronous>, transform_indices = @transform_9, window_bounds = array<i64: 9, 96, 96>}, {pipeline_mode = #tpu.pipeline_mode<synchronous>, transform_indices = @transform_10, window_bounds = array<i64: 1, 96>}, {pipeline_mode = #tpu.pipeline_mode<synchronous>, transform_indices = @transform_11, window_bounds = array<i64: 9, 96, 96>}, {pipeline_mode = #tpu.pipeline_mode<synchronous>, transform_indices = @transform_12, window_bounds = array<i64: 1, 96>}, {pipeline_mode = #tpu.pipeline_mode<synchronous>, transform_indices = @transform_13, window_bounds = array<i64: 4, 64>}, {pipeline_mode = #tpu.pipeline_mode<synchronous>, transform_indices = @transform_14, window_bounds = array<i64: 1, 64>}, {transform_indices = @transform_15, window_bounds = array<i64: 1, 256, 288>}]} {
    %c0 = arith.constant 0 : index
    %c0_0 = arith.constant 0 : index
    %c0_1 = arith.constant 0 : index
    %c0_2 = arith.constant 0 : index
    %0 = vector.load %arg1[%c0, %c0_0, %c0_1, %c0_2] : memref<1x16x16x4xbf16, #tpu.memory_space<vmem>>, vector<1x16x16x4xbf16>
    %1 = vector.shape_cast %0 : vector<1x16x16x4xbf16> to vector<16x16x4xbf16>
    %2 = vector.shape_cast %1 : vector<16x16x4xbf16> to vector<256x4xbf16>
    %c0_3 = arith.constant 0 : index
    %c0_4 = arith.constant 0 : index
    %3 = vector.load %arg2[%c0_3, %c0_4] : memref<4x64xbf16, #tpu.memory_space<vmem>>, vector<4x64xbf16>
    %cst = arith.constant dense<0.000000e+00> : vector<256x64xf32>
    %4 = tpu.matmul %2, %3, %cst {dimension_numbers = #tpu.dot_dimension_numbers<[1], [0], [0], [1], [0, 0, 1, 1], [], []>} : vector<256x4xbf16>, vector<4x64xbf16>, vector<256x64xf32> -> vector<256x64xf32>
    %c0_5 = arith.constant 0 : index
    %c0_6 = arith.constant 0 : index
    %5 = vector.load %arg3[%c0_5, %c0_6] : memref<1x64xf32, #tpu.memory_space<vmem>>, vector<1x64xf32>
    %6 = vector.broadcast %5 : vector<1x64xf32> to vector<256x64xf32>
    %7 = arith.addf %4, %6 : vector<256x64xf32>
    %cst_7 = arith.constant 0.000000e+00 : f32
    %8 = vector.broadcast %cst_7 : f32 to vector<256x64xf32>
    %9 = arith.maximumf %7, %8 : vector<256x64xf32>
    %c0_8 = arith.constant 0 : index
    %c0_9 = arith.constant 0 : index
    %c0_10 = arith.constant 0 : index
    %10 = vector.load %arg16[%c0_8, %c0_9, %c0_10] : memref<1x256x288xf32, #tpu.memory_space<vmem>>, vector<1x256x64xf32>
    %11 = vector.shape_cast %10 : vector<1x256x64xf32> to vector<256x64xf32>
    %12 = vector.shape_cast %9 : vector<256x64xf32> to vector<1x256x64xf32>
    tpu.vector_store %arg16[%c0_8, %c0_9, %c0_10], %12 {strides = array<i32>} : memref<1x256x288xf32, #tpu.memory_space<vmem>>, vector<1x256x64xf32>,
    %c0_11 = arith.constant 0 : index
    %c0_12 = arith.constant 0 : index
    %13 = vector.load %arg4[%c0_11, %c0_12] : memref<4x64xbf16, #tpu.memory_space<vmem>>, vector<4x64xbf16>
    %cst_13 = arith.constant dense<0.000000e+00> : vector<256x64xf32>
    %14 = tpu.matmul %2, %13, %cst_13 {dimension_numbers = #tpu.dot_dimension_numbers<[1], [0], [0], [1], [0, 0, 1, 1], [], []>} : vector<256x4xbf16>, vector<4x64xbf16>, vector<256x64xf32> -> vector<256x64xf32>
    %c0_14 = arith.constant 0 : index
    %c0_15 = arith.constant 0 : index
    %15 = vector.load %arg5[%c0_14, %c0_15] : memref<1x64xf32, #tpu.memory_space<vmem>>, vector<1x64xf32>
    %16 = vector.broadcast %15 : vector<1x64xf32> to vector<256x64xf32>
    %17 = arith.addf %14, %16 : vector<256x64xf32>
    %cst_16 = arith.constant 0.000000e+00 : f32
    %18 = vector.broadcast %cst_16 : f32 to vector<256x64xf32>
    %19 = arith.maximumf %17, %18 : vector<256x64xf32>
    %20 = vector.shape_cast %19 : vector<256x64xf32> to vector<16x16x64xf32>
    %cst_17 = arith.constant 0.000000e+00 : f32
    %21 = vector.broadcast %cst_17 : f32 to vector<18x32x64xf32>
    %c0_18 = arith.constant 0 : index
    %c0_19 = arith.constant 0 : index
    %c0_20 = arith.constant 0 : index
    %22 = vector.load %arg18[%c0_18, %c0_19, %c0_20] : memref<18x32x64xf32, #tpu.memory_space<vmem>>, vector<18x32x64xf32>
    tpu.vector_store %arg18[%c0_18, %c0_19, %c0_20], %21 {strides = array<i32>} : memref<18x32x64xf32, #tpu.memory_space<vmem>>, vector<18x32x64xf32>,
    %c1 = arith.constant 1 : index
    %c8 = arith.constant 8 : index
    %c0_21 = arith.constant 0 : index
    %23 = vector.load %arg18[%c1, %c8, %c0_21] : memref<18x32x64xf32, #tpu.memory_space<vmem>>, vector<16x16x64xf32>
    tpu.vector_store %arg18[%c1, %c8, %c0_21], %20 {strides = array<i32>} : memref<18x32x64xf32, #tpu.memory_space<vmem>>, vector<16x16x64xf32>,
    %cst_22 = arith.constant 0.000000e+00 : f32
    %24 = vector.broadcast %cst_22 : f32 to vector<256x64xf32>
    %c0_23 = arith.constant 0 : index
    %c7 = arith.constant 7 : index
    %c0_24 = arith.constant 0 : index
    %25 = vector.load %arg18[%c0_23, %c7, %c0_24] : memref<18x32x64xf32, #tpu.memory_space<vmem>>, vector<16x16x64xf32>
    %26 = vector.shape_cast %25 : vector<16x16x64xf32> to vector<256x64xf32>
    %27 = arith.truncf %26 : vector<256x64xf32> to vector<256x64xbf16>
    %c0_25 = arith.constant 0 : index
    %c0_26 = arith.constant 0 : index
    %c0_27 = arith.constant 0 : index
    %28 = vector.load %arg6[%c0_25, %c0_26, %c0_27] : memref<9x64x64xbf16, #tpu.memory_space<vmem>>, vector<1x64x64xbf16>
    %29 = vector.shape_cast %28 : vector<1x64x64xbf16> to vector<64x64xbf16>
    %cst_28 = arith.constant dense<0.000000e+00> : vector<256x64xf32>
    %30 = tpu.matmul %27, %29, %cst_28 {dimension_numbers = #tpu.dot_dimension_numbers<[1], [0], [0], [1], [0, 0, 1, 1], [], []>} : vector<256x64xbf16>, vector<64x64xbf16>, vector<256x64xf32> -> vector<256x64xf32>
    %31 = arith.addf %24, %30 : vector<256x64xf32>
    %c0_29 = arith.constant 0 : index
    %c8_30 = arith.constant 8 : index
    %c0_31 = arith.constant 0 : index
    %32 = vector.load %arg18[%c0_29, %c8_30, %c0_31] : memref<18x32x64xf32, #tpu.memory_space<vmem>>, vector<16x16x64xf32>
    %33 = vector.shape_cast %32 : vector<16x16x64xf32> to vector<256x64xf32>
    %34 = arith.truncf %33 : vector<256x64xf32> to vector<256x64xbf16>
    %c1_32 = arith.constant 1 : index
    %c0_33 = arith.constant 0 : index
    %c0_34 = arith.constant 0 : index
    %35 = vector.load %arg6[%c1_32, %c0_33, %c0_34] : memref<9x64x64xbf16, #tpu.memory_space<vmem>>, vector<1x64x64xbf16>
    %36 = vector.shape_cast %35 : vector<1x64x64xbf16> to vector<64x64xbf16>
    %cst_35 = arith.constant dense<0.000000e+00> : vector<256x64xf32>
    %37 = tpu.matmul %34, %36, %cst_35 {dimension_numbers = #tpu.dot_dimension_numbers<[1], [0], [0], [1], [0, 0, 1, 1], [], []>} : vector<256x64xbf16>, vector<64x64xbf16>, vector<256x64xf32> -> vector<256x64xf32>
    %38 = arith.addf %31, %37 : vector<256x64xf32>
    %c0_36 = arith.constant 0 : index
    %c9 = arith.constant 9 : index
    %c0_37 = arith.constant 0 : index
    %39 = vector.load %arg18[%c0_36, %c9, %c0_37] : memref<18x32x64xf32, #tpu.memory_space<vmem>>, vector<16x16x64xf32>
    %40 = vector.shape_cast %39 : vector<16x16x64xf32> to vector<256x64xf32>
    %41 = arith.truncf %40 : vector<256x64xf32> to vector<256x64xbf16>
    %c2 = arith.constant 2 : index
    %c0_38 = arith.constant 0 : index
    %c0_39 = arith.constant 0 : index
    %42 = vector.load %arg6[%c2, %c0_38, %c0_39] : memref<9x64x64xbf16, #tpu.memory_space<vmem>>, vector<1x64x64xbf16>
    %43 = vector.shape_cast %42 : vector<1x64x64xbf16> to vector<64x64xbf16>
    %cst_40 = arith.constant dense<0.000000e+00> : vector<256x64xf32>
    %44 = tpu.matmul %41, %43, %cst_40 {dimension_numbers = #tpu.dot_dimension_numbers<[1], [0], [0], [1], [0, 0, 1, 1], [], []>} : vector<256x64xbf16>, vector<64x64xbf16>, vector<256x64xf32> -> vector<256x64xf32>
    %45 = arith.addf %38, %44 : vector<256x64xf32>
    %c1_41 = arith.constant 1 : index
    %c7_42 = arith.constant 7 : index
    %c0_43 = arith.constant 0 : index
    %46 = vector.load %arg18[%c1_41, %c7_42, %c0_43] : memref<18x32x64xf32, #tpu.memory_space<vmem>>, vector<16x16x64xf32>
    %47 = vector.shape_cast %46 : vector<16x16x64xf32> to vector<256x64xf32>
    %48 = arith.truncf %47 : vector<256x64xf32> to vector<256x64xbf16>
    %c3 = arith.constant 3 : index
    %c0_44 = arith.constant 0 : index
    %c0_45 = arith.constant 0 : index
    %49 = vector.load %arg6[%c3, %c0_44, %c0_45] : memref<9x64x64xbf16, #tpu.memory_space<vmem>>, vector<1x64x64xbf16>
    %50 = vector.shape_cast %49 : vector<1x64x64xbf16> to vector<64x64xbf16>
    %cst_46 = arith.constant dense<0.000000e+00> : vector<256x64xf32>
    %51 = tpu.matmul %48, %50, %cst_46 {dimension_numbers = #tpu.dot_dimension_numbers<[1], [0], [0], [1], [0, 0, 1, 1], [], []>} : vector<256x64xbf16>, vector<64x64xbf16>, vector<256x64xf32> -> vector<256x64xf32>
    %52 = arith.addf %45, %51 : vector<256x64xf32>
    %c1_47 = arith.constant 1 : index
    %c8_48 = arith.constant 8 : index
    %c0_49 = arith.constant 0 : index
    %53 = vector.load %arg18[%c1_47, %c8_48, %c0_49] : memref<18x32x64xf32, #tpu.memory_space<vmem>>, vector<16x16x64xf32>
    %54 = vector.shape_cast %53 : vector<16x16x64xf32> to vector<256x64xf32>
    %55 = arith.truncf %54 : vector<256x64xf32> to vector<256x64xbf16>
    %c4 = arith.constant 4 : index
    %c0_50 = arith.constant 0 : index
    %c0_51 = arith.constant 0 : index
    %56 = vector.load %arg6[%c4, %c0_50, %c0_51] : memref<9x64x64xbf16, #tpu.memory_space<vmem>>, vector<1x64x64xbf16>
    %57 = vector.shape_cast %56 : vector<1x64x64xbf16> to vector<64x64xbf16>
    %cst_52 = arith.constant dense<0.000000e+00> : vector<256x64xf32>
    %58 = tpu.matmul %55, %57, %cst_52 {dimension_numbers = #tpu.dot_dimension_numbers<[1], [0], [0], [1], [0, 0, 1, 1], [], []>} : vector<256x64xbf16>, vector<64x64xbf16>, vector<256x64xf32> -> vector<256x64xf32>
    %59 = arith.addf %52, %58 : vector<256x64xf32>
    %c1_53 = arith.constant 1 : index
    %c9_54 = arith.constant 9 : index
    %c0_55 = arith.constant 0 : index
    %60 = vector.load %arg18[%c1_53, %c9_54, %c0_55] : memref<18x32x64xf32, #tpu.memory_space<vmem>>, vector<16x16x64xf32>
    %61 = vector.shape_cast %60 : vector<16x16x64xf32> to vector<256x64xf32>
    %62 = arith.truncf %61 : vector<256x64xf32> to vector<256x64xbf16>
    %c5 = arith.constant 5 : index
    %c0_56 = arith.constant 0 : index
    %c0_57 = arith.constant 0 : index
    %63 = vector.load %arg6[%c5, %c0_56, %c0_57] : memref<9x64x64xbf16, #tpu.memory_space<vmem>>, vector<1x64x64xbf16>
    %64 = vector.shape_cast %63 : vector<1x64x64xbf16> to vector<64x64xbf16>
    %cst_58 = arith.constant dense<0.000000e+00> : vector<256x64xf32>
    %65 = tpu.matmul %62, %64, %cst_58 {dimension_numbers = #tpu.dot_dimension_numbers<[1], [0], [0], [1], [0, 0, 1, 1], [], []>} : vector<256x64xbf16>, vector<64x64xbf16>, vector<256x64xf32> -> vector<256x64xf32>
    %66 = arith.addf %59, %65 : vector<256x64xf32>
    %c2_59 = arith.constant 2 : index
    %c7_60 = arith.constant 7 : index
    %c0_61 = arith.constant 0 : index
    %67 = vector.load %arg18[%c2_59, %c7_60, %c0_61] : memref<18x32x64xf32, #tpu.memory_space<vmem>>, vector<16x16x64xf32>
    %68 = vector.shape_cast %67 : vector<16x16x64xf32> to vector<256x64xf32>
    %69 = arith.truncf %68 : vector<256x64xf32> to vector<256x64xbf16>
    %c6 = arith.constant 6 : index
    %c0_62 = arith.constant 0 : index
    %c0_63 = arith.constant 0 : index
    %70 = vector.load %arg6[%c6, %c0_62, %c0_63] : memref<9x64x64xbf16, #tpu.memory_space<vmem>>, vector<1x64x64xbf16>
    %71 = vector.shape_cast %70 : vector<1x64x64xbf16> to vector<64x64xbf16>
    %cst_64 = arith.constant dense<0.000000e+00> : vector<256x64xf32>
    %72 = tpu.matmul %69, %71, %cst_64 {dimension_numbers = #tpu.dot_dimension_numbers<[1], [0], [0], [1], [0, 0, 1, 1], [], []>} : vector<256x64xbf16>, vector<64x64xbf16>, vector<256x64xf32> -> vector<256x64xf32>
    %73 = arith.addf %66, %72 : vector<256x64xf32>
    %c2_65 = arith.constant 2 : index
    %c8_66 = arith.constant 8 : index
    %c0_67 = arith.constant 0 : index
    %74 = vector.load %arg18[%c2_65, %c8_66, %c0_67] : memref<18x32x64xf32, #tpu.memory_space<vmem>>, vector<16x16x64xf32>
    %75 = vector.shape_cast %74 : vector<16x16x64xf32> to vector<256x64xf32>
    %76 = arith.truncf %75 : vector<256x64xf32> to vector<256x64xbf16>
    %c7_68 = arith.constant 7 : index
    %c0_69 = arith.constant 0 : index
    %c0_70 = arith.constant 0 : index
    %77 = vector.load %arg6[%c7_68, %c0_69, %c0_70] : memref<9x64x64xbf16, #tpu.memory_space<vmem>>, vector<1x64x64xbf16>
    %78 = vector.shape_cast %77 : vector<1x64x64xbf16> to vector<64x64xbf16>
    %cst_71 = arith.constant dense<0.000000e+00> : vector<256x64xf32>
    %79 = tpu.matmul %76, %78, %cst_71 {dimension_numbers = #tpu.dot_dimension_numbers<[1], [0], [0], [1], [0, 0, 1, 1], [], []>} : vector<256x64xbf16>, vector<64x64xbf16>, vector<256x64xf32> -> vector<256x64xf32>
    %80 = arith.addf %73, %79 : vector<256x64xf32>
    %c2_72 = arith.constant 2 : index
    %c9_73 = arith.constant 9 : index
    %c0_74 = arith.constant 0 : index
    %81 = vector.load %arg18[%c2_72, %c9_73, %c0_74] : memref<18x32x64xf32, #tpu.memory_space<vmem>>, vector<16x16x64xf32>
    %82 = vector.shape_cast %81 : vector<16x16x64xf32> to vector<256x64xf32>
    %83 = arith.truncf %82 : vector<256x64xf32> to vector<256x64xbf16>
    %c8_75 = arith.constant 8 : index
    %c0_76 = arith.constant 0 : index
    %c0_77 = arith.constant 0 : index
    %84 = vector.load %arg6[%c8_75, %c0_76, %c0_77] : memref<9x64x64xbf16, #tpu.memory_space<vmem>>, vector<1x64x64xbf16>
    %85 = vector.shape_cast %84 : vector<1x64x64xbf16> to vector<64x64xbf16>
    %cst_78 = arith.constant dense<0.000000e+00> : vector<256x64xf32>
    %86 = tpu.matmul %83, %85, %cst_78 {dimension_numbers = #tpu.dot_dimension_numbers<[1], [0], [0], [1], [0, 0, 1, 1], [], []>} : vector<256x64xbf16>, vector<64x64xbf16>, vector<256x64xf32> -> vector<256x64xf32>
    %87 = arith.addf %80, %86 : vector<256x64xf32>
    %c0_79 = arith.constant 0 : index
    %c0_80 = arith.constant 0 : index
    %88 = vector.load %arg7[%c0_79, %c0_80] : memref<1x64xf32, #tpu.memory_space<vmem>>, vector<1x64xf32>
    %89 = vector.broadcast %88 : vector<1x64xf32> to vector<256x64xf32>
    %90 = arith.addf %87, %89 : vector<256x64xf32>
    %cst_81 = arith.constant 0.000000e+00 : f32
    %91 = vector.broadcast %cst_81 : f32 to vector<256x64xf32>
    %92 = arith.maximumf %90, %91 : vector<256x64xf32>
    %c0_82 = arith.constant 0 : index
    %c0_83 = arith.constant 0 : index
    %c64 = arith.constant 64 : index
    %93 = vector.load %arg16[%c0_82, %c0_83, %c64] : memref<1x256x288xf32, #tpu.memory_space<vmem>>, vector<1x256x64xf32>
    %94 = vector.shape_cast %93 : vector<1x256x64xf32> to vector<256x64xf32>
    %95 = vector.shape_cast %92 : vector<256x64xf32> to vector<1x256x64xf32>
    tpu.vector_store %arg16[%c0_82, %c0_83, %c64], %95 {strides = array<i32>} : memref<1x256x288xf32, #tpu.memory_space<vmem>>, vector<1x256x64xf32>,
    %c0_84 = arith.constant 0 : index
    %c0_85 = arith.constant 0 : index
    %96 = vector.load %arg8[%c0_84, %c0_85] : memref<4x96xbf16, #tpu.memory_space<vmem>>, vector<4x96xbf16>
    %cst_86 = arith.constant dense<0.000000e+00> : vector<256x96xf32>
    %97 = tpu.matmul %2, %96, %cst_86 {dimension_numbers = #tpu.dot_dimension_numbers<[1], [0], [0], [1], [0, 0, 1, 1], [], []>} : vector<256x4xbf16>, vector<4x96xbf16>, vector<256x96xf32> -> vector<256x96xf32>
    %c0_87 = arith.constant 0 : index
    %c0_88 = arith.constant 0 : index
    %98 = vector.load %arg9[%c0_87, %c0_88] : memref<1x96xf32, #tpu.memory_space<vmem>>, vector<1x96xf32>
    %99 = vector.broadcast %98 : vector<1x96xf32> to vector<256x96xf32>
    %100 = arith.addf %97, %99 : vector<256x96xf32>
    %cst_89 = arith.constant 0.000000e+00 : f32
    %101 = vector.broadcast %cst_89 : f32 to vector<256x96xf32>
    %102 = arith.maximumf %100, %101 : vector<256x96xf32>
    %103 = vector.shape_cast %102 : vector<256x96xf32> to vector<16x16x96xf32>
    %cst_90 = arith.constant 0.000000e+00 : f32
    %104 = vector.broadcast %cst_90 : f32 to vector<18x32x96xf32>
    %c0_91 = arith.constant 0 : index
    %c0_92 = arith.constant 0 : index
    %c0_93 = arith.constant 0 : index
    %105 = vector.load %arg19[%c0_91, %c0_92, %c0_93] : memref<18x32x96xf32, #tpu.memory_space<vmem>>, vector<18x32x96xf32>
    tpu.vector_store %arg19[%c0_91, %c0_92, %c0_93], %104 {strides = array<i32>} : memref<18x32x96xf32, #tpu.memory_space<vmem>>, vector<18x32x96xf32>,
    %c1_94 = arith.constant 1 : index
    %c8_95 = arith.constant 8 : index
    %c0_96 = arith.constant 0 : index
    %106 = vector.load %arg19[%c1_94, %c8_95, %c0_96] : memref<18x32x96xf32, #tpu.memory_space<vmem>>, vector<16x16x96xf32>
    tpu.vector_store %arg19[%c1_94, %c8_95, %c0_96], %103 {strides = array<i32>} : memref<18x32x96xf32, #tpu.memory_space<vmem>>, vector<16x16x96xf32>,
    %cst_97 = arith.constant 0.000000e+00 : f32
    %107 = vector.broadcast %cst_97 : f32 to vector<256x96xf32>
    %c0_98 = arith.constant 0 : index
    %c7_99 = arith.constant 7 : index
    %c0_100 = arith.constant 0 : index
    %108 = vector.load %arg19[%c0_98, %c7_99, %c0_100] : memref<18x32x96xf32, #tpu.memory_space<vmem>>, vector<16x16x96xf32>
    %109 = vector.shape_cast %108 : vector<16x16x96xf32> to vector<256x96xf32>
    %110 = arith.truncf %109 : vector<256x96xf32> to vector<256x96xbf16>
    %c0_101 = arith.constant 0 : index
    %c0_102 = arith.constant 0 : index
    %c0_103 = arith.constant 0 : index
    %111 = vector.load %arg10[%c0_101, %c0_102, %c0_103] : memref<9x96x96xbf16, #tpu.memory_space<vmem>>, vector<1x96x96xbf16>
    %112 = vector.shape_cast %111 : vector<1x96x96xbf16> to vector<96x96xbf16>
    %cst_104 = arith.constant dense<0.000000e+00> : vector<256x96xf32>
    %113 = tpu.matmul %110, %112, %cst_104 {dimension_numbers = #tpu.dot_dimension_numbers<[1], [0], [0], [1], [0, 0, 1, 1], [], []>} : vector<256x96xbf16>, vector<96x96xbf16>, vector<256x96xf32> -> vector<256x96xf32>
    %114 = arith.addf %107, %113 : vector<256x96xf32>
    %c0_105 = arith.constant 0 : index
    %c8_106 = arith.constant 8 : index
    %c0_107 = arith.constant 0 : index
    %115 = vector.load %arg19[%c0_105, %c8_106, %c0_107] : memref<18x32x96xf32, #tpu.memory_space<vmem>>, vector<16x16x96xf32>
    %116 = vector.shape_cast %115 : vector<16x16x96xf32> to vector<256x96xf32>
    %117 = arith.truncf %116 : vector<256x96xf32> to vector<256x96xbf16>
    %c1_108 = arith.constant 1 : index
    %c0_109 = arith.constant 0 : index
    %c0_110 = arith.constant 0 : index
    %118 = vector.load %arg10[%c1_108, %c0_109, %c0_110] : memref<9x96x96xbf16, #tpu.memory_space<vmem>>, vector<1x96x96xbf16>
    %119 = vector.shape_cast %118 : vector<1x96x96xbf16> to vector<96x96xbf16>
    %cst_111 = arith.constant dense<0.000000e+00> : vector<256x96xf32>
    %120 = tpu.matmul %117, %119, %cst_111 {dimension_numbers = #tpu.dot_dimension_numbers<[1], [0], [0], [1], [0, 0, 1, 1], [], []>} : vector<256x96xbf16>, vector<96x96xbf16>, vector<256x96xf32> -> vector<256x96xf32>
    %121 = arith.addf %114, %120 : vector<256x96xf32>
    %c0_112 = arith.constant 0 : index
    %c9_113 = arith.constant 9 : index
    %c0_114 = arith.constant 0 : index
    %122 = vector.load %arg19[%c0_112, %c9_113, %c0_114] : memref<18x32x96xf32, #tpu.memory_space<vmem>>, vector<16x16x96xf32>
    %123 = vector.shape_cast %122 : vector<16x16x96xf32> to vector<256x96xf32>
    %124 = arith.truncf %123 : vector<256x96xf32> to vector<256x96xbf16>
    %c2_115 = arith.constant 2 : index
    %c0_116 = arith.constant 0 : index
    %c0_117 = arith.constant 0 : index
    %125 = vector.load %arg10[%c2_115, %c0_116, %c0_117] : memref<9x96x96xbf16, #tpu.memory_space<vmem>>, vector<1x96x96xbf16>
    %126 = vector.shape_cast %125 : vector<1x96x96xbf16> to vector<96x96xbf16>
    %cst_118 = arith.constant dense<0.000000e+00> : vector<256x96xf32>
    %127 = tpu.matmul %124, %126, %cst_118 {dimension_numbers = #tpu.dot_dimension_numbers<[1], [0], [0], [1], [0, 0, 1, 1], [], []>} : vector<256x96xbf16>, vector<96x96xbf16>, vector<256x96xf32> -> vector<256x96xf32>
    %128 = arith.addf %121, %127 : vector<256x96xf32>
    %c1_119 = arith.constant 1 : index
    %c7_120 = arith.constant 7 : index
    %c0_121 = arith.constant 0 : index
    %129 = vector.load %arg19[%c1_119, %c7_120, %c0_121] : memref<18x32x96xf32, #tpu.memory_space<vmem>>, vector<16x16x96xf32>
    %130 = vector.shape_cast %129 : vector<16x16x96xf32> to vector<256x96xf32>
    %131 = arith.truncf %130 : vector<256x96xf32> to vector<256x96xbf16>
    %c3_122 = arith.constant 3 : index
    %c0_123 = arith.constant 0 : index
    %c0_124 = arith.constant 0 : index
    %132 = vector.load %arg10[%c3_122, %c0_123, %c0_124] : memref<9x96x96xbf16, #tpu.memory_space<vmem>>, vector<1x96x96xbf16>
    %133 = vector.shape_cast %132 : vector<1x96x96xbf16> to vector<96x96xbf16>
    %cst_125 = arith.constant dense<0.000000e+00> : vector<256x96xf32>
    %134 = tpu.matmul %131, %133, %cst_125 {dimension_numbers = #tpu.dot_dimension_numbers<[1], [0], [0], [1], [0, 0, 1, 1], [], []>} : vector<256x96xbf16>, vector<96x96xbf16>, vector<256x96xf32> -> vector<256x96xf32>
    %135 = arith.addf %128, %134 : vector<256x96xf32>
    %c1_126 = arith.constant 1 : index
    %c8_127 = arith.constant 8 : index
    %c0_128 = arith.constant 0 : index
    %136 = vector.load %arg19[%c1_126, %c8_127, %c0_128] : memref<18x32x96xf32, #tpu.memory_space<vmem>>, vector<16x16x96xf32>
    %137 = vector.shape_cast %136 : vector<16x16x96xf32> to vector<256x96xf32>
    %138 = arith.truncf %137 : vector<256x96xf32> to vector<256x96xbf16>
    %c4_129 = arith.constant 4 : index
    %c0_130 = arith.constant 0 : index
    %c0_131 = arith.constant 0 : index
    %139 = vector.load %arg10[%c4_129, %c0_130, %c0_131] : memref<9x96x96xbf16, #tpu.memory_space<vmem>>, vector<1x96x96xbf16>
    %140 = vector.shape_cast %139 : vector<1x96x96xbf16> to vector<96x96xbf16>
    %cst_132 = arith.constant dense<0.000000e+00> : vector<256x96xf32>
    %141 = tpu.matmul %138, %140, %cst_132 {dimension_numbers = #tpu.dot_dimension_numbers<[1], [0], [0], [1], [0, 0, 1, 1], [], []>} : vector<256x96xbf16>, vector<96x96xbf16>, vector<256x96xf32> -> vector<256x96xf32>
    %142 = arith.addf %135, %141 : vector<256x96xf32>
    %c1_133 = arith.constant 1 : index
    %c9_134 = arith.constant 9 : index
    %c0_135 = arith.constant 0 : index
    %143 = vector.load %arg19[%c1_133, %c9_134, %c0_135] : memref<18x32x96xf32, #tpu.memory_space<vmem>>, vector<16x16x96xf32>
    %144 = vector.shape_cast %143 : vector<16x16x96xf32> to vector<256x96xf32>
    %145 = arith.truncf %144 : vector<256x96xf32> to vector<256x96xbf16>
    %c5_136 = arith.constant 5 : index
    %c0_137 = arith.constant 0 : index
    %c0_138 = arith.constant 0 : index
    %146 = vector.load %arg10[%c5_136, %c0_137, %c0_138] : memref<9x96x96xbf16, #tpu.memory_space<vmem>>, vector<1x96x96xbf16>
    %147 = vector.shape_cast %146 : vector<1x96x96xbf16> to vector<96x96xbf16>
    %cst_139 = arith.constant dense<0.000000e+00> : vector<256x96xf32>
    %148 = tpu.matmul %145, %147, %cst_139 {dimension_numbers = #tpu.dot_dimension_numbers<[1], [0], [0], [1], [0, 0, 1, 1], [], []>} : vector<256x96xbf16>, vector<96x96xbf16>, vector<256x96xf32> -> vector<256x96xf32>
    %149 = arith.addf %142, %148 : vector<256x96xf32>
    %c2_140 = arith.constant 2 : index
    %c7_141 = arith.constant 7 : index
    %c0_142 = arith.constant 0 : index
    %150 = vector.load %arg19[%c2_140, %c7_141, %c0_142] : memref<18x32x96xf32, #tpu.memory_space<vmem>>, vector<16x16x96xf32>
    %151 = vector.shape_cast %150 : vector<16x16x96xf32> to vector<256x96xf32>
    %152 = arith.truncf %151 : vector<256x96xf32> to vector<256x96xbf16>
    %c6_143 = arith.constant 6 : index
    %c0_144 = arith.constant 0 : index
    %c0_145 = arith.constant 0 : index
    %153 = vector.load %arg10[%c6_143, %c0_144, %c0_145] : memref<9x96x96xbf16, #tpu.memory_space<vmem>>, vector<1x96x96xbf16>
    %154 = vector.shape_cast %153 : vector<1x96x96xbf16> to vector<96x96xbf16>
    %cst_146 = arith.constant dense<0.000000e+00> : vector<256x96xf32>
    %155 = tpu.matmul %152, %154, %cst_146 {dimension_numbers = #tpu.dot_dimension_numbers<[1], [0], [0], [1], [0, 0, 1, 1], [], []>} : vector<256x96xbf16>, vector<96x96xbf16>, vector<256x96xf32> -> vector<256x96xf32>
    %156 = arith.addf %149, %155 : vector<256x96xf32>
    %c2_147 = arith.constant 2 : index
    %c8_148 = arith.constant 8 : index
    %c0_149 = arith.constant 0 : index
    %157 = vector.load %arg19[%c2_147, %c8_148, %c0_149] : memref<18x32x96xf32, #tpu.memory_space<vmem>>, vector<16x16x96xf32>
    %158 = vector.shape_cast %157 : vector<16x16x96xf32> to vector<256x96xf32>
    %159 = arith.truncf %158 : vector<256x96xf32> to vector<256x96xbf16>
    %c7_150 = arith.constant 7 : index
    %c0_151 = arith.constant 0 : index
    %c0_152 = arith.constant 0 : index
    %160 = vector.load %arg10[%c7_150, %c0_151, %c0_152] : memref<9x96x96xbf16, #tpu.memory_space<vmem>>, vector<1x96x96xbf16>
    %161 = vector.shape_cast %160 : vector<1x96x96xbf16> to vector<96x96xbf16>
    %cst_153 = arith.constant dense<0.000000e+00> : vector<256x96xf32>
    %162 = tpu.matmul %159, %161, %cst_153 {dimension_numbers = #tpu.dot_dimension_numbers<[1], [0], [0], [1], [0, 0, 1, 1], [], []>} : vector<256x96xbf16>, vector<96x96xbf16>, vector<256x96xf32> -> vector<256x96xf32>
    %163 = arith.addf %156, %162 : vector<256x96xf32>
    %c2_154 = arith.constant 2 : index
    %c9_155 = arith.constant 9 : index
    %c0_156 = arith.constant 0 : index
    %164 = vector.load %arg19[%c2_154, %c9_155, %c0_156] : memref<18x32x96xf32, #tpu.memory_space<vmem>>, vector<16x16x96xf32>
    %165 = vector.shape_cast %164 : vector<16x16x96xf32> to vector<256x96xf32>
    %166 = arith.truncf %165 : vector<256x96xf32> to vector<256x96xbf16>
    %c8_157 = arith.constant 8 : index
    %c0_158 = arith.constant 0 : index
    %c0_159 = arith.constant 0 : index
    %167 = vector.load %arg10[%c8_157, %c0_158, %c0_159] : memref<9x96x96xbf16, #tpu.memory_space<vmem>>, vector<1x96x96xbf16>
    %168 = vector.shape_cast %167 : vector<1x96x96xbf16> to vector<96x96xbf16>
    %cst_160 = arith.constant dense<0.000000e+00> : vector<256x96xf32>
    %169 = tpu.matmul %166, %168, %cst_160 {dimension_numbers = #tpu.dot_dimension_numbers<[1], [0], [0], [1], [0, 0, 1, 1], [], []>} : vector<256x96xbf16>, vector<96x96xbf16>, vector<256x96xf32> -> vector<256x96xf32>
    %170 = arith.addf %163, %169 : vector<256x96xf32>
    %c0_161 = arith.constant 0 : index
    %c0_162 = arith.constant 0 : index
    %171 = vector.load %arg11[%c0_161, %c0_162] : memref<1x96xf32, #tpu.memory_space<vmem>>, vector<1x96xf32>
    %172 = vector.broadcast %171 : vector<1x96xf32> to vector<256x96xf32>
    %173 = arith.addf %170, %172 : vector<256x96xf32>
    %cst_163 = arith.constant 0.000000e+00 : f32
    %174 = vector.broadcast %cst_163 : f32 to vector<256x96xf32>
    %175 = arith.maximumf %173, %174 : vector<256x96xf32>
    %176 = vector.shape_cast %175 : vector<256x96xf32> to vector<16x16x96xf32>
    %cst_164 = arith.constant 0.000000e+00 : f32
    %177 = vector.broadcast %cst_164 : f32 to vector<18x32x96xf32>
    %c0_165 = arith.constant 0 : index
    %c0_166 = arith.constant 0 : index
    %c0_167 = arith.constant 0 : index
    %178 = vector.load %arg20[%c0_165, %c0_166, %c0_167] : memref<18x32x96xf32, #tpu.memory_space<vmem>>, vector<18x32x96xf32>
    tpu.vector_store %arg20[%c0_165, %c0_166, %c0_167], %177 {strides = array<i32>} : memref<18x32x96xf32, #tpu.memory_space<vmem>>, vector<18x32x96xf32>,
    %c1_168 = arith.constant 1 : index
    %c8_169 = arith.constant 8 : index
    %c0_170 = arith.constant 0 : index
    %179 = vector.load %arg20[%c1_168, %c8_169, %c0_170] : memref<18x32x96xf32, #tpu.memory_space<vmem>>, vector<16x16x96xf32>
    tpu.vector_store %arg20[%c1_168, %c8_169, %c0_170], %176 {strides = array<i32>} : memref<18x32x96xf32, #tpu.memory_space<vmem>>, vector<16x16x96xf32>,
    %cst_171 = arith.constant 0.000000e+00 : f32
    %180 = vector.broadcast %cst_171 : f32 to vector<256x96xf32>
    %c0_172 = arith.constant 0 : index
    %c7_173 = arith.constant 7 : index
    %c0_174 = arith.constant 0 : index
    %181 = vector.load %arg20[%c0_172, %c7_173, %c0_174] : memref<18x32x96xf32, #tpu.memory_space<vmem>>, vector<16x16x96xf32>
    %182 = vector.shape_cast %181 : vector<16x16x96xf32> to vector<256x96xf32>
    %183 = arith.truncf %182 : vector<256x96xf32> to vector<256x96xbf16>
    %c0_175 = arith.constant 0 : index
    %c0_176 = arith.constant 0 : index
    %c0_177 = arith.constant 0 : index
    %184 = vector.load %arg12[%c0_175, %c0_176, %c0_177] : memref<9x96x96xbf16, #tpu.memory_space<vmem>>, vector<1x96x96xbf16>
    %185 = vector.shape_cast %184 : vector<1x96x96xbf16> to vector<96x96xbf16>
    %cst_178 = arith.constant dense<0.000000e+00> : vector<256x96xf32>
    %186 = tpu.matmul %183, %185, %cst_178 {dimension_numbers = #tpu.dot_dimension_numbers<[1], [0], [0], [1], [0, 0, 1, 1], [], []>} : vector<256x96xbf16>, vector<96x96xbf16>, vector<256x96xf32> -> vector<256x96xf32>
    %187 = arith.addf %180, %186 : vector<256x96xf32>
    %c0_179 = arith.constant 0 : index
    %c8_180 = arith.constant 8 : index
    %c0_181 = arith.constant 0 : index
    %188 = vector.load %arg20[%c0_179, %c8_180, %c0_181] : memref<18x32x96xf32, #tpu.memory_space<vmem>>, vector<16x16x96xf32>
    %189 = vector.shape_cast %188 : vector<16x16x96xf32> to vector<256x96xf32>
    %190 = arith.truncf %189 : vector<256x96xf32> to vector<256x96xbf16>
    %c1_182 = arith.constant 1 : index
    %c0_183 = arith.constant 0 : index
    %c0_184 = arith.constant 0 : index
    %191 = vector.load %arg12[%c1_182, %c0_183, %c0_184] : memref<9x96x96xbf16, #tpu.memory_space<vmem>>, vector<1x96x96xbf16>
    %192 = vector.shape_cast %191 : vector<1x96x96xbf16> to vector<96x96xbf16>
    %cst_185 = arith.constant dense<0.000000e+00> : vector<256x96xf32>
    %193 = tpu.matmul %190, %192, %cst_185 {dimension_numbers = #tpu.dot_dimension_numbers<[1], [0], [0], [1], [0, 0, 1, 1], [], []>} : vector<256x96xbf16>, vector<96x96xbf16>, vector<256x96xf32> -> vector<256x96xf32>
    %194 = arith.addf %187, %193 : vector<256x96xf32>
    %c0_186 = arith.constant 0 : index
    %c9_187 = arith.constant 9 : index
    %c0_188 = arith.constant 0 : index
    %195 = vector.load %arg20[%c0_186, %c9_187, %c0_188] : memref<18x32x96xf32, #tpu.memory_space<vmem>>, vector<16x16x96xf32>
    %196 = vector.shape_cast %195 : vector<16x16x96xf32> to vector<256x96xf32>
    %197 = arith.truncf %196 : vector<256x96xf32> to vector<256x96xbf16>
    %c2_189 = arith.constant 2 : index
    %c0_190 = arith.constant 0 : index
    %c0_191 = arith.constant 0 : index
    %198 = vector.load %arg12[%c2_189, %c0_190, %c0_191] : memref<9x96x96xbf16, #tpu.memory_space<vmem>>, vector<1x96x96xbf16>
    %199 = vector.shape_cast %198 : vector<1x96x96xbf16> to vector<96x96xbf16>
    %cst_192 = arith.constant dense<0.000000e+00> : vector<256x96xf32>
    %200 = tpu.matmul %197, %199, %cst_192 {dimension_numbers = #tpu.dot_dimension_numbers<[1], [0], [0], [1], [0, 0, 1, 1], [], []>} : vector<256x96xbf16>, vector<96x96xbf16>, vector<256x96xf32> -> vector<256x96xf32>
    %201 = arith.addf %194, %200 : vector<256x96xf32>
    %c1_193 = arith.constant 1 : index
    %c7_194 = arith.constant 7 : index
    %c0_195 = arith.constant 0 : index
    %202 = vector.load %arg20[%c1_193, %c7_194, %c0_195] : memref<18x32x96xf32, #tpu.memory_space<vmem>>, vector<16x16x96xf32>
    %203 = vector.shape_cast %202 : vector<16x16x96xf32> to vector<256x96xf32>
    %204 = arith.truncf %203 : vector<256x96xf32> to vector<256x96xbf16>
    %c3_196 = arith.constant 3 : index
    %c0_197 = arith.constant 0 : index
    %c0_198 = arith.constant 0 : index
    %205 = vector.load %arg12[%c3_196, %c0_197, %c0_198] : memref<9x96x96xbf16, #tpu.memory_space<vmem>>, vector<1x96x96xbf16>
    %206 = vector.shape_cast %205 : vector<1x96x96xbf16> to vector<96x96xbf16>
    %cst_199 = arith.constant dense<0.000000e+00> : vector<256x96xf32>
    %207 = tpu.matmul %204, %206, %cst_199 {dimension_numbers = #tpu.dot_dimension_numbers<[1], [0], [0], [1], [0, 0, 1, 1], [], []>} : vector<256x96xbf16>, vector<96x96xbf16>, vector<256x96xf32> -> vector<256x96xf32>
    %208 = arith.addf %201, %207 : vector<256x96xf32>
    %c1_200 = arith.constant 1 : index
    %c8_201 = arith.constant 8 : index
    %c0_202 = arith.constant 0 : index
    %209 = vector.load %arg20[%c1_200, %c8_201, %c0_202] : memref<18x32x96xf32, #tpu.memory_space<vmem>>, vector<16x16x96xf32>
    %210 = vector.shape_cast %209 : vector<16x16x96xf32> to vector<256x96xf32>
    %211 = arith.truncf %210 : vector<256x96xf32> to vector<256x96xbf16>
    %c4_203 = arith.constant 4 : index
    %c0_204 = arith.constant 0 : index
    %c0_205 = arith.constant 0 : index
    %212 = vector.load %arg12[%c4_203, %c0_204, %c0_205] : memref<9x96x96xbf16, #tpu.memory_space<vmem>>, vector<1x96x96xbf16>
    %213 = vector.shape_cast %212 : vector<1x96x96xbf16> to vector<96x96xbf16>
    %cst_206 = arith.constant dense<0.000000e+00> : vector<256x96xf32>
    %214 = tpu.matmul %211, %213, %cst_206 {dimension_numbers = #tpu.dot_dimension_numbers<[1], [0], [0], [1], [0, 0, 1, 1], [], []>} : vector<256x96xbf16>, vector<96x96xbf16>, vector<256x96xf32> -> vector<256x96xf32>
    %215 = arith.addf %208, %214 : vector<256x96xf32>
    %c1_207 = arith.constant 1 : index
    %c9_208 = arith.constant 9 : index
    %c0_209 = arith.constant 0 : index
    %216 = vector.load %arg20[%c1_207, %c9_208, %c0_209] : memref<18x32x96xf32, #tpu.memory_space<vmem>>, vector<16x16x96xf32>
    %217 = vector.shape_cast %216 : vector<16x16x96xf32> to vector<256x96xf32>
    %218 = arith.truncf %217 : vector<256x96xf32> to vector<256x96xbf16>
    %c5_210 = arith.constant 5 : index
    %c0_211 = arith.constant 0 : index
    %c0_212 = arith.constant 0 : index
    %219 = vector.load %arg12[%c5_210, %c0_211, %c0_212] : memref<9x96x96xbf16, #tpu.memory_space<vmem>>, vector<1x96x96xbf16>
    %220 = vector.shape_cast %219 : vector<1x96x96xbf16> to vector<96x96xbf16>
    %cst_213 = arith.constant dense<0.000000e+00> : vector<256x96xf32>
    %221 = tpu.matmul %218, %220, %cst_213 {dimension_numbers = #tpu.dot_dimension_numbers<[1], [0], [0], [1], [0, 0, 1, 1], [], []>} : vector<256x96xbf16>, vector<96x96xbf16>, vector<256x96xf32> -> vector<256x96xf32>
    %222 = arith.addf %215, %221 : vector<256x96xf32>
    %c2_214 = arith.constant 2 : index
    %c7_215 = arith.constant 7 : index
    %c0_216 = arith.constant 0 : index
    %223 = vector.load %arg20[%c2_214, %c7_215, %c0_216] : memref<18x32x96xf32, #tpu.memory_space<vmem>>, vector<16x16x96xf32>
    %224 = vector.shape_cast %223 : vector<16x16x96xf32> to vector<256x96xf32>
    %225 = arith.truncf %224 : vector<256x96xf32> to vector<256x96xbf16>
    %c6_217 = arith.constant 6 : index
    %c0_218 = arith.constant 0 : index
    %c0_219 = arith.constant 0 : index
    %226 = vector.load %arg12[%c6_217, %c0_218, %c0_219] : memref<9x96x96xbf16, #tpu.memory_space<vmem>>, vector<1x96x96xbf16>
    %227 = vector.shape_cast %226 : vector<1x96x96xbf16> to vector<96x96xbf16>
    %cst_220 = arith.constant dense<0.000000e+00> : vector<256x96xf32>
    %228 = tpu.matmul %225, %227, %cst_220 {dimension_numbers = #tpu.dot_dimension_numbers<[1], [0], [0], [1], [0, 0, 1, 1], [], []>} : vector<256x96xbf16>, vector<96x96xbf16>, vector<256x96xf32> -> vector<256x96xf32>
    %229 = arith.addf %222, %228 : vector<256x96xf32>
    %c2_221 = arith.constant 2 : index
    %c8_222 = arith.constant 8 : index
    %c0_223 = arith.constant 0 : index
    %230 = vector.load %arg20[%c2_221, %c8_222, %c0_223] : memref<18x32x96xf32, #tpu.memory_space<vmem>>, vector<16x16x96xf32>
    %231 = vector.shape_cast %230 : vector<16x16x96xf32> to vector<256x96xf32>
    %232 = arith.truncf %231 : vector<256x96xf32> to vector<256x96xbf16>
    %c7_224 = arith.constant 7 : index
    %c0_225 = arith.constant 0 : index
    %c0_226 = arith.constant 0 : index
    %233 = vector.load %arg12[%c7_224, %c0_225, %c0_226] : memref<9x96x96xbf16, #tpu.memory_space<vmem>>, vector<1x96x96xbf16>
    %234 = vector.shape_cast %233 : vector<1x96x96xbf16> to vector<96x96xbf16>
    %cst_227 = arith.constant dense<0.000000e+00> : vector<256x96xf32>
    %235 = tpu.matmul %232, %234, %cst_227 {dimension_numbers = #tpu.dot_dimension_numbers<[1], [0], [0], [1], [0, 0, 1, 1], [], []>} : vector<256x96xbf16>, vector<96x96xbf16>, vector<256x96xf32> -> vector<256x96xf32>
    %236 = arith.addf %229, %235 : vector<256x96xf32>
    %c2_228 = arith.constant 2 : index
    %c9_229 = arith.constant 9 : index
    %c0_230 = arith.constant 0 : index
    %237 = vector.load %arg20[%c2_228, %c9_229, %c0_230] : memref<18x32x96xf32, #tpu.memory_space<vmem>>, vector<16x16x96xf32>
    %238 = vector.shape_cast %237 : vector<16x16x96xf32> to vector<256x96xf32>
    %239 = arith.truncf %238 : vector<256x96xf32> to vector<256x96xbf16>
    %c8_231 = arith.constant 8 : index
    %c0_232 = arith.constant 0 : index
    %c0_233 = arith.constant 0 : index
    %240 = vector.load %arg12[%c8_231, %c0_232, %c0_233] : memref<9x96x96xbf16, #tpu.memory_space<vmem>>, vector<1x96x96xbf16>
    %241 = vector.shape_cast %240 : vector<1x96x96xbf16> to vector<96x96xbf16>
    %cst_234 = arith.constant dense<0.000000e+00> : vector<256x96xf32>
    %242 = tpu.matmul %239, %241, %cst_234 {dimension_numbers = #tpu.dot_dimension_numbers<[1], [0], [0], [1], [0, 0, 1, 1], [], []>} : vector<256x96xbf16>, vector<96x96xbf16>, vector<256x96xf32> -> vector<256x96xf32>
    %243 = arith.addf %236, %242 : vector<256x96xf32>
    %c0_235 = arith.constant 0 : index
    %c0_236 = arith.constant 0 : index
    %244 = vector.load %arg13[%c0_235, %c0_236] : memref<1x96xf32, #tpu.memory_space<vmem>>, vector<1x96xf32>
    %245 = vector.broadcast %244 : vector<1x96xf32> to vector<256x96xf32>
    %246 = arith.addf %243, %245 : vector<256x96xf32>
    %cst_237 = arith.constant 0.000000e+00 : f32
    %247 = vector.broadcast %cst_237 : f32 to vector<256x96xf32>
    %248 = arith.maximumf %246, %247 : vector<256x96xf32>
    %c0_238 = arith.constant 0 : index
    %c0_239 = arith.constant 0 : index
    %c128 = arith.constant 128 : index
    %249 = vector.load %arg16[%c0_238, %c0_239, %c128] : memref<1x256x288xf32, #tpu.memory_space<vmem>>, vector<1x256x96xf32>
    %250 = vector.shape_cast %249 : vector<1x256x96xf32> to vector<256x96xf32>
    %251 = vector.shape_cast %248 : vector<256x96xf32> to vector<1x256x96xf32>
    tpu.vector_store %arg16[%c0_238, %c0_239, %c128], %251 {strides = array<i32>} : memref<1x256x288xf32, #tpu.memory_space<vmem>>, vector<1x256x96xf32>,
    %cst_240 = arith.constant 0xFF800000 : f32
    %252 = vector.broadcast %cst_240 : f32 to vector<18x32x4xf32>
    %c0_241 = arith.constant 0 : index
    %c0_242 = arith.constant 0 : index
    %c0_243 = arith.constant 0 : index
    %253 = vector.load %arg17[%c0_241, %c0_242, %c0_243] : memref<18x32x4xf32, #tpu.memory_space<vmem>>, vector<18x32x4xf32>
    tpu.vector_store %arg17[%c0_241, %c0_242, %c0_243], %252 {strides = array<i32>} : memref<18x32x4xf32, #tpu.memory_space<vmem>>, vector<18x32x4xf32>,
    %254 = arith.extf %1 : vector<16x16x4xbf16> to vector<16x16x4xf32>
    %c1_244 = arith.constant 1 : index
    %c8_245 = arith.constant 8 : index
    %c0_246 = arith.constant 0 : index
    %255 = vector.load %arg17[%c1_244, %c8_245, %c0_246] : memref<18x32x4xf32, #tpu.memory_space<vmem>>, vector<16x16x4xf32>
    tpu.vector_store %arg17[%c1_244, %c8_245, %c0_246], %254 {strides = array<i32>} : memref<18x32x4xf32, #tpu.memory_space<vmem>>, vector<16x16x4xf32>,
    %c0_247 = arith.constant 0 : index
    %c7_248 = arith.constant 7 : index
    %c0_249 = arith.constant 0 : index
    %256 = vector.load %arg17[%c0_247, %c7_248, %c0_249] : memref<18x32x4xf32, #tpu.memory_space<vmem>>, vector<16x16x4xf32>
    %c0_250 = arith.constant 0 : index
    %c8_251 = arith.constant 8 : index
    %c0_252 = arith.constant 0 : index
    %257 = vector.load %arg17[%c0_250, %c8_251, %c0_252] : memref<18x32x4xf32, #tpu.memory_space<vmem>>, vector<16x16x4xf32>
    %258 = arith.maximumf %256, %257 : vector<16x16x4xf32>
    %c0_253 = arith.constant 0 : index
    %c9_254 = arith.constant 9 : index
    %c0_255 = arith.constant 0 : index
    %259 = vector.load %arg17[%c0_253, %c9_254, %c0_255] : memref<18x32x4xf32, #tpu.memory_space<vmem>>, vector<16x16x4xf32>
    %260 = arith.maximumf %258, %259 : vector<16x16x4xf32>
    %c1_256 = arith.constant 1 : index
    %c7_257 = arith.constant 7 : index
    %c0_258 = arith.constant 0 : index
    %261 = vector.load %arg17[%c1_256, %c7_257, %c0_258] : memref<18x32x4xf32, #tpu.memory_space<vmem>>, vector<16x16x4xf32>
    %262 = arith.maximumf %260, %261 : vector<16x16x4xf32>
    %c1_259 = arith.constant 1 : index
    %c8_260 = arith.constant 8 : index
    %c0_261 = arith.constant 0 : index
    %263 = vector.load %arg17[%c1_259, %c8_260, %c0_261] : memref<18x32x4xf32, #tpu.memory_space<vmem>>, vector<16x16x4xf32>
    %264 = arith.maximumf %262, %263 : vector<16x16x4xf32>
    %c1_262 = arith.constant 1 : index
    %c9_263 = arith.constant 9 : index
    %c0_264 = arith.constant 0 : index
    %265 = vector.load %arg17[%c1_262, %c9_263, %c0_264] : memref<18x32x4xf32, #tpu.memory_space<vmem>>, vector<16x16x4xf32>
    %266 = arith.maximumf %264, %265 : vector<16x16x4xf32>
    %c2_265 = arith.constant 2 : index
    %c7_266 = arith.constant 7 : index
    %c0_267 = arith.constant 0 : index
    %267 = vector.load %arg17[%c2_265, %c7_266, %c0_267] : memref<18x32x4xf32, #tpu.memory_space<vmem>>, vector<16x16x4xf32>
    %268 = arith.maximumf %266, %267 : vector<16x16x4xf32>
    %c2_268 = arith.constant 2 : index
    %c8_269 = arith.constant 8 : index
    %c0_270 = arith.constant 0 : index
    %269 = vector.load %arg17[%c2_268, %c8_269, %c0_270] : memref<18x32x4xf32, #tpu.memory_space<vmem>>, vector<16x16x4xf32>
    %270 = arith.maximumf %268, %269 : vector<16x16x4xf32>
    %c2_271 = arith.constant 2 : index
    %c9_272 = arith.constant 9 : index
    %c0_273 = arith.constant 0 : index
    %271 = vector.load %arg17[%c2_271, %c9_272, %c0_273] : memref<18x32x4xf32, #tpu.memory_space<vmem>>, vector<16x16x4xf32>
    %272 = arith.maximumf %270, %271 : vector<16x16x4xf32>
    %273 = vector.shape_cast %272 : vector<16x16x4xf32> to vector<256x4xf32>
    %274 = arith.truncf %273 : vector<256x4xf32> to vector<256x4xbf16>
    %c0_274 = arith.constant 0 : index
    %c0_275 = arith.constant 0 : index
    %275 = vector.load %arg14[%c0_274, %c0_275] : memref<4x64xbf16, #tpu.memory_space<vmem>>, vector<4x64xbf16>
    %cst_276 = arith.constant dense<0.000000e+00> : vector<256x64xf32>
    %276 = tpu.matmul %274, %275, %cst_276 {dimension_numbers = #tpu.dot_dimension_numbers<[1], [0], [0], [1], [0, 0, 1, 1], [], []>} : vector<256x4xbf16>, vector<4x64xbf16>, vector<256x64xf32> -> vector<256x64xf32>
    %c0_277 = arith.constant 0 : index
    %c0_278 = arith.constant 0 : index
    %277 = vector.load %arg15[%c0_277, %c0_278] : memref<1x64xf32, #tpu.memory_space<vmem>>, vector<1x64xf32>
    %278 = vector.broadcast %277 : vector<1x64xf32> to vector<256x64xf32>
    %279 = arith.addf %276, %278 : vector<256x64xf32>
    %cst_279 = arith.constant 0.000000e+00 : f32
    %280 = vector.broadcast %cst_279 : f32 to vector<256x64xf32>
    %281 = arith.maximumf %279, %280 : vector<256x64xf32>
    %c0_280 = arith.constant 0 : index
    %c0_281 = arith.constant 0 : index
    %c224 = arith.constant 224 : index
    %282 = vector.load %arg16[%c0_280, %c0_281, %c224] : memref<1x256x288xf32, #tpu.memory_space<vmem>>, vector<1x256x64xf32>
    %283 = vector.shape_cast %282 : vector<1x256x64xf32> to vector<256x64xf32>
    %284 = vector.shape_cast %281 : vector<256x64xf32> to vector<1x256x64xf32>
    tpu.vector_store %arg16[%c0_280, %c0_281, %c224], %284 {strides = array<i32>} : memref<1x256x288xf32, #tpu.memory_space<vmem>>, vector<1x256x64xf32>,
    return
  }
  func.func @transform_0(%arg0: i32) -> (i32, i32, i32, i32) {
    %c0_i32 = arith.constant 0 : i32
    %c0_i32_0 = arith.constant 0 : i32
    %c0_i32_1 = arith.constant 0 : i32
    %c0_i32_2 = arith.constant 0 : i32
    return %arg0, %c0_i32, %c0_i32_0, %c0_i32_1 : i32, i32, i32, i32
  }
  func.func @transform_1(%arg0: i32) -> (i32, i32) {
    %c0_i32 = arith.constant 0 : i32
    %c0_i32_0 = arith.constant 0 : i32
    %c0_i32_1 = arith.constant 0 : i32
    return %c0_i32, %c0_i32_0 : i32, i32
  }
  func.func @transform_2(%arg0: i32) -> (i32, i32) {
    %c0_i32 = arith.constant 0 : i32
    %c0_i32_0 = arith.constant 0 : i32
    %c0_i32_1 = arith.constant 0 : i32
    return %c0_i32, %c0_i32_0 : i32, i32
  }
  func.func @transform_3(%arg0: i32) -> (i32, i32) {
    %c0_i32 = arith.constant 0 : i32
    %c0_i32_0 = arith.constant 0 : i32
    %c0_i32_1 = arith.constant 0 : i32
    return %c0_i32, %c0_i32_0 : i32, i32
  }
  func.func @transform_4(%arg0: i32) -> (i32, i32) {
    %c0_i32 = arith.constant 0 : i32
    %c0_i32_0 = arith.constant 0 : i32
    %c0_i32_1 = arith.constant 0 : i32
    return %c0_i32, %c0_i32_0 : i32, i32
  }
  func.func @transform_5(%arg0: i32) -> (i32, i32, i32) {
    %c0_i32 = arith.constant 0 : i32
    %c0_i32_0 = arith.constant 0 : i32
    %c0_i32_1 = arith.constant 0 : i32
    %c0_i32_2 = arith.constant 0 : i32
    return %c0_i32, %c0_i32_0, %c0_i32_1 : i32, i32, i32
  }
  func.func @transform_6(%arg0: i32) -> (i32, i32) {
    %c0_i32 = arith.constant 0 : i32
    %c0_i32_0 = arith.constant 0 : i32
    %c0_i32_1 = arith.constant 0 : i32
    return %c0_i32, %c0_i32_0 : i32, i32
  }
  func.func @transform_7(%arg0: i32) -> (i32, i32) {
    %c0_i32 = arith.constant 0 : i32
    %c0_i32_0 = arith.constant 0 : i32
    %c0_i32_1 = arith.constant 0 : i32
    return %c0_i32, %c0_i32_0 : i32, i32
  }
  func.func @transform_8(%arg0: i32) -> (i32, i32) {
    %c0_i32 = arith.constant 0 : i32
    %c0_i32_0 = arith.constant 0 : i32
    %c0_i32_1 = arith.constant 0 : i32
    return %c0_i32, %c0_i32_0 : i32, i32
  }
  func.func @transform_9(%arg0: i32) -> (i32, i32, i32) {
    %c0_i32 = arith.constant 0 : i32
    %c0_i32_0 = arith.constant 0 : i32
    %c0_i32_1 = arith.constant 0 : i32
    %c0_i32_2 = arith.constant 0 : i32
    return %c0_i32, %c0_i32_0, %c0_i32_1 : i32, i32, i32
  }
  func.func @transform_10(%arg0: i32) -> (i32, i32) {
    %c0_i32 = arith.constant 0 : i32
    %c0_i32_0 = arith.constant 0 : i32
    %c0_i32_1 = arith.constant 0 : i32
    return %c0_i32, %c0_i32_0 : i32, i32
  }
  func.func @transform_11(%arg0: i32) -> (i32, i32, i32) {
    %c0_i32 = arith.constant 0 : i32
    %c0_i32_0 = arith.constant 0 : i32
    %c0_i32_1 = arith.constant 0 : i32
    %c0_i32_2 = arith.constant 0 : i32
    return %c0_i32, %c0_i32_0, %c0_i32_1 : i32, i32, i32
  }
  func.func @transform_12(%arg0: i32) -> (i32, i32) {
    %c0_i32 = arith.constant 0 : i32
    %c0_i32_0 = arith.constant 0 : i32
    %c0_i32_1 = arith.constant 0 : i32
    return %c0_i32, %c0_i32_0 : i32, i32
  }
  func.func @transform_13(%arg0: i32) -> (i32, i32) {
    %c0_i32 = arith.constant 0 : i32
    %c0_i32_0 = arith.constant 0 : i32
    %c0_i32_1 = arith.constant 0 : i32
    return %c0_i32, %c0_i32_0 : i32, i32
  }
  func.func @transform_14(%arg0: i32) -> (i32, i32) {
    %c0_i32 = arith.constant 0 : i32
    %c0_i32_0 = arith.constant 0 : i32
    %c0_i32_1 = arith.constant 0 : i32
    return %c0_i32, %c0_i32_0 : i32, i32
  }
  func.func @transform_15(%arg0: i32) -> (i32, i32, i32) {
    %c0_i32 = arith.constant 0 : i32
    %c0_i32_0 = arith.constant 0 : i32
    %c0_i32_1 = arith.constant 0 : i32
    return %arg0, %c0_i32, %c0_i32_0 : i32, i32, i32
  }
}

</mosaic_0001>

<bundles_post_ra>
// kernel: inception_forward.1
= control target key start
LH: loop header
LB: loop body
LE: loop exit
PB: predicated region body
PF: predicated region fallthrough
CT: control target
= control target key end

     0   :  { %s19242_s0 = inlined_call_operand.vmem [shape: bf16[2,16,16,4], index: 0, kind: input, shape index: {}]   ;;  %s19243_s1 = inlined_call_operand.vmem [shape: bf16[4,64], index: 1, kind: input, shape index: {}]   ;;  %s19244_s2 = inlined_call_operand.vmem [shape: f32[1,64], index: 2, kind: input, shape index: {}]   ;;  %s19245_s3 = inlined_call_operand.vmem [shape: bf16[4,64], index: 3, kind: input, shape index: {}]   ;;  %s19246_s4 = inlined_call_operand.vmem [shape: f32[1,64], index: 4, kind: input, shape index: {}]   ;;  %s19247_s5 = inlined_call_operand.hbm [shape: bf16[9,64,64], index: 5, kind: input, shape index: {}]   ;;  %s19248_s6 = inlined_call_operand.vmem [shape: f32[1,64], index: 6, kind: input, shape index: {}]   ;;  %s19249_s7 = inlined_call_operand.vmem [shape: bf16[4,96], index: 7, kind: input, shape index: {}]   ;;  %s19250_s8 = inlined_call_operand.vmem [shape: f32[1,96], index: 8, kind: input, shape index: {}]   ;;  %s19251_s9 = inlined_call_operand.vmem [shape: bf16[9,96,96], index: 9, kind: input, shape index: {}]   ;;  %s19252_s10 = inlined_call_operand.vmem [shape: f32[1,96], index: 10, kind: input, shape index: {}]   ;;  %s19253_s11 = inlined_call_operand.hbm [shape: bf16[9,96,96], index: 11, kind: input, shape index: {}]   ;;  %s19254_s12 = inlined_call_operand.vmem [shape: f32[1,96], index: 12, kind: input, shape index: {}]   ;;  %s19255_s13 = inlined_call_operand.vmem [shape: bf16[4,64], index: 13, kind: input, shape index: {}]   ;;  %s19256_s14 = inlined_call_operand.vmem [shape: f32[1,64], index: 14, kind: input, shape index: {}]   ;;  %s19257_s15 = inlined_call_operand.hbm [shape: f32[2,256,288], index: 15, kind: output, shape index: {}]  }
   0x1   :  { %19276 = sst [smem:[#allocation28_spill]] %s19254_s12 }
   0x2   :  { %19277 = sst [smem:[#allocation29_spill]] %s19257_s15 }
   0x3   :  { %20 = vsyncpa [#allocation7], 0 }
   0x4   :  { %21 = vsyncpa [#allocation10], 0 }
   0x5   :  { %22 = vsyncpa [#allocation8], 0 }
   0x6   :  { %24 = vsyncpa [#allocation8 + $0x1], 0  ;;  %s16031_s18 = smov 0   ;;  %s16033_s19 = smov 0  }
   0x7   :  { %s16035_s20 = smov 0   ;;  %s16037_s21 = smov 0  }
   0x8 LB: > { %19278 = sst [smem:[#allocation15_spill]] %s15926_s18  ;;  %s16052_s22 = sadd.s32 4294967295, %s15938_s21   ;;  %s15938_s21 = sphi %s16037_s21, %s19315_s21   ;;  %s15934_s20 = sphi %s16035_s20, %s19317_s20   ;;  %s15930_s19 = sphi %s16033_s19, %s19319_s19   ;;  %s15926_s18 = sphi %s16031_s18, %s19318_s18  }
   0x9   : > { %19279 = sst [smem:[#allocation16_spill]] %s15934_s20  ;;  %s12085_s23 = sadd.s32 4294967294, %s15938_s21  }
   0xa   : > { %19280 = sst [smem:[#allocation17_spill]] %s15938_s21  ;;  %s16056_s24 = sadd.s32 1, %s15938_s21  }
   0xb   : > { %19281 = sst [smem:[#allocation18_spill]] %s16056_s24  ;;  %s357_s25 = sadd.s32 1, %s15934_s20 }
   0xc   : > { %s354_s26 = ssub.s32 %s15938_s21, %s16056_s24  ;;  %p367_p0 = scmp.ne.s32.totalorder %s15934_s20, %s15930_s19 }
   0xd   : > { %p355_p1 = scmp.eq.s32.totalorder %s354_s26, 0  ;;  %p368_p2 = scmp.eq.s32.totalorder %s16052_s22, 1 }
   0xe   : > { %p373_p3 = scmp.ne.s32.totalorder %s15930_s19, %s15926_s18  ;;  %p374_p4 = scmp.eq.s32.totalorder %s12085_s23, 1 }
   0xf   : > { %s16067_s27 = scalar_select %p355_p1, %s15934_s20, %s357_s25  }
  0x10   : > { %p16069_p5 = por %p368_p2, %p367_p0  ;;  %p16073_p6 = por %p374_p4, %p373_p3 }
  0x11   : > { %19282 = sst [smem:[#allocation19_spill]] %s16067_s27  ;;  %p12086_p7 = scmp.ge.s32.totalorder %s15938_s21, 1 }
  0x12   : > { %s19283_s28 = scalar_select %p16069_p5, 1, 0 }
  0x13   : > { %s19285_s29 = scalar_select %p16073_p6, 1, 0 }
  0x14   : > { %19284 = sst [smem:[#allocation20_spill]] %s19283_s28  ;;  %p381_p8 = scmp.lt.s32.totalorder %s15938_s21, 3 }
  0x15   : > { %19286 = sst [smem:[#allocation21_spill]] %s19285_s29  ;;  %p19264_p9 = scmp.eq.s32.totalorder %s16052_s22, 0 }
  0x16   : > { %p16080_p10 = pnand %p12086_p7, %p381_p8  ;;  %s15940_s16 = smov [#allocation6]  }
  0x17   : > { %s405_s17 = sshll.u32 %s15940_s16, 4  ;;  %s15941_s25 = smov [#allocation9]   ;;  %s406_s17 = int_to_ptr.vmem [resolvable:$true] %s405_s17 }
  0x18   : > { %s19287_s30 = scalar_select %p16080_p10, 1, 0 }
  0x19   : > { %p15577_p11 = pneg %p16080_p10  ;;  %s433_s26 = sshll.u32 %s15941_s25, 4  ;;  %s16092_s26 = int_to_ptr.vmem [resolvable:$true] %s433_s26 }
  0x1a   : > { %s15812_s24 = scalar_lea.hbm %s19247_s5, 4608 }
  0x1b   : > { %p16088_p12 = pnand %p19264_p9, %p15577_p11  ;;  %p15813_p13 = scmp.ne.s32.totalorder %s19247_s5, %s15812_s24 }
  0x1c   : > { %p15819_p3 = scmp.lt.u32.totalorder %s15812_s24, %s19247_s5 }
  0x1d   : > { %p15814_p0 = pneg %p16088_p12 }
  0x1f   : > { %p15815_p1 = pnand %p15814_p0, %p15813_p13 }
  0x21   : > { %p15816_p2 = pneg %p15815_p1 }
  0x23   : > { %p15821_p4 = pnand %p15819_p3, %p15816_p2 }
  0x25   : > { %15824 = shalt.err (!%p15821_p4)
}
  0x26   : > { %s15825_s25 = scalar_lea.vmem %s406_s17, 4608  ;;  %p15833_p9 = scmp.lt.s32.totalorder %s406_s17, %s406_s17 }
  0x27   : > { %p15826_p7 = scmp.ne.s32.totalorder %s406_s17, %s15825_s25  ;;  %p15834_p6 = scmp.lt.s32.totalorder %s15825_s25, %s15825_s25 }
  0x29   : > { %p15828_p8 = pnand %p15826_p7, %p15814_p0  ;;  %p15835_p5 = por %p15834_p6, %p15833_p9 }
  0x2b   : > { %p15829_p11 = pneg %p15828_p8 }
  0x2d   : > { %p15836_p10 = pnand %p15835_p5, %p15829_p11 }
  0x2f   : > { %15839 = shalt.err (!%p15836_p10)
}
  0x30   : > { %s15942_s20 = smov 64   ;;  %s15943_s27 = smov 4  }
  0x31   : > { %15580 = dma.hbm_to_vmem [thread:$0]  (!%p16088_p12), %s19247_s5, 4608, %s406_s17, [#allocation7], %s15942_s20, %s15942_s20, %s15943_s27  }
  0x32   : > { %s15840_s16 = scalar_lea.hbm %s19253_s11, 6912 }
  0x33   : > { %p15841_p13 = scmp.ne.s32.totalorder %s19253_s11, %s15840_s16  ;;  %p15847_p9 = scmp.lt.u32.totalorder %s15840_s16, %s19253_s11 }
  0x35   : > { %p15843_p5 = pnand %p15841_p13, %p15814_p0 }
  0x37   : > { %p15844_p6 = pneg %p15843_p5 }
  0x39   : > { %p15849_p10 = pnand %p15847_p9, %p15844_p6 }
  0x3b   : > { %15852 = shalt.err (!%p15849_p10)
}
  0x3c   : > { %s15853_s17 = scalar_lea.vmem %s16092_s26, 6912  ;;  %p15861_p4 = scmp.lt.s32.totalorder %s16092_s26, %s16092_s26 }
  0x3d   : > { %p15854_p1 = scmp.ne.s32.totalorder %s16092_s26, %s15853_s17  ;;  %p15862_p7 = scmp.lt.s32.totalorder %s15853_s17, %s15853_s17 }
  0x3f   : > { %p15856_p2 = pnand %p15854_p1, %p15814_p0  ;;  %p15863_p8 = por %p15862_p7, %p15861_p4 }
  0x41   : > { %p15857_p3 = pneg %p15856_p2 }
  0x43   : > { %p15864_p11 = pnand %p15863_p8, %p15857_p3 }
  0x45   : > { %15867 = shalt.err (!%p15864_p11)
}
  0x46   : > { %15583 = dma.hbm_to_vmem [thread:$0]  (!%p16088_p12), %s19253_s11, 6912, %s16092_s26, [#allocation10], %s15942_s20, %s15942_s20, %s15943_s27  }
  0x47   : > { %p19289_p13 = scmp.ne.s32.totalorder %s19287_s30, 0 }
  0x49   : > { %466 = sbr.rel (%p19289_p13) target bundleno = 2321 (0x911), region = 80 }
  0x50   : > { %p19290_p5 = scmp.eq.s32.totalorder %s16052_s22, 0 }
  0x52   : > { %15913 = dma.done.wait (%p19290_p5), [#allocation7], 4608   ;;  %p19291_p0 = pmov %p19290_p5 }
  0x54   : > { %15915 = vsyncadd (%p19291_p0), [#allocation7], 4294962688  ;;  %p19292_p6 = pmov %p19291_p0 }
  0x55   : > { %p19293_p9 = pmov %p19291_p0 }
  0x56   : > { %15917 = dma.done.wait (%p19292_p6), [#allocation10], 6912  }
  0x57   : > { %15919 = vsyncadd (%p19293_p9), [#allocation10], 4294960384  ;;  %p518_p10 = scmp.lt.s32.totalorder %s16052_s22, 1  ;;  %vm644_vm0 = vcmask 31744   ;;  %v15944_v0 = vmov -inf   ;;  %vm693_vm1 = vcmask 1041408  }
  0x58   : > { %10880 = vst.msk [vmem:[#allocation2 + $0x128] sm:$0xff] %vm644_vm0, %v15944_v0  ;;  %10881 = vst.msk [vmem:[#allocation2 + $0x130] sm:$0xff] %vm644_vm0, %v15944_v0  ;;  %v556_v1 = vld [vmem:[%s19243_s1] sm:$0x3]  ;;  %v15652_v54 = vld [vmem:[#allocation6 + $0x28] sm:$0xff]   ;;  %vm890_vm2 = vcmask 523264  }
  0x59   : > { %10843 = vst.msk [vmem:[#allocation2] sm:$0xff] %vm644_vm0, %v15944_v0  ;;  %10844 = vst.msk [vmem:[#allocation2 + $0x8] sm:$0xff] %vm644_vm0, %v15944_v0  ;;  %s519_s28 = scalar_select %p518_p10, %s16052_s22, 1  ;;  %15561 = vmatprep.subr.msk.bf16.mxu1 %vm693_vm1, %v556_v1  ;;  %v695_v4 = vsel %vm693_vm1, %v556_v1, 0  ;;  %v923_v7 = vld [vmem:[%s19245_s3] sm:$0x3]  ;;  %15560 = vmatprep.subr.msk.bf16.mxu0 %vm693_vm1, %v556_v1 }
  0x5a   : > { %10845 = vst.msk [vmem:[#allocation2 + $0x10] sm:$0xff] %vm644_vm0, %v15944_v0  ;;  %10846 = vst.msk [vmem:[#allocation2 + $0x18] sm:$0xff] %vm644_vm0, %v15944_v0  ;;  %14791 = vmatpush3.bf16.msra.mxu1 %v695_v4  ;;  %13503 = vmatpush3.bf16.msra.mxu0 %v695_v4  ;;  %v932_v11 = vsel %vm693_vm1, %v923_v7, 0  ;;  %v16377_v30 = vld [vmem:[#allocation6 + $0x20] sm:$0xff]   ;;  %v15653_v55 = vld [vmem:[#allocation6 + $0x30] sm:$0xff]   ;;  %v15945_v57 = vmov 0.0  }
  0x5b   : > { %10847 = vst.msk [vmem:[#allocation2 + $0x20] sm:$0xff] %vm644_vm0, %v15944_v0  ;;  %10848 = vst.msk [vmem:[#allocation2 + $0x28] sm:$0xff] %vm644_vm0, %v15944_v0  ;;  %s12857_s30 = sshll.u32 %s519_s28, 7  ;;  %15562 = vmatprep.subr.msk.bf16.mxu1 %vm693_vm1, %v923_v7  ;;  %v16495_v56 = vld [vmem:[#allocation6 + $0x60] sm:$0xff]   ;;  %v15656_v58 = vld [vmem:[#allocation6 + $0x68] sm:$0xff]   ;;  %s515_s29 = sand.u32 1, %s15930_s19  }
  0x5c   : > { %10849 = vst.msk [vmem:[#allocation2 + $0x30] sm:$0xff] %vm644_vm0, %v15944_v0  ;;  %10850 = vst.msk [vmem:[#allocation2 + $0x38] sm:$0xff] %vm644_vm0, %v15944_v0  ;;  %s16302_s20 = scalar_lea.vmem %s19242_s0, %s12857_s30  ;;  %13690 = vmatprep.subr.bf16.mxu0 %v16495_v56  ;;  %v15654_v59 = vld [vmem:[#allocation6 + $0x38] sm:$0xff]   ;;  %v15657_v60 = vld [vmem:[#allocation6 + $0x70] sm:$0xff]   ;;  %s15565_s16 = smul.u32 768, %s515_s29  ;;  %vm4502_vm3 = vcmask 785408  }
  0x5d   : > { %10851 = vst.msk [vmem:[#allocation2 + $0x40] sm:$0xff] %vm644_vm0, %v15944_v0  ;;  %10852 = vst.msk [vmem:[#allocation2 + $0x48] sm:$0xff] %vm644_vm0, %v15944_v0  ;;  %v16308_v2 = vld [vmem:[%s16302_s20 + $0x40] sm:$0xff]   ;;  %v16311_v3 = vld [vmem:[%s16302_s20 + $0x48] sm:$0xff]   ;;  %s15946_s24 = smov 64   ;;  %vm4265_vm4 = vcmask 1048064  }
  0x5e   : > { %10853 = vst.msk [vmem:[#allocation2 + $0x50] sm:$0xff] %vm644_vm0, %v15944_v0  ;;  %10854 = vst.msk [vmem:[#allocation2 + $0x58] sm:$0xff] %vm644_vm0, %v15944_v0  ;;  %v10931_v5 = vunpack.c.l.bf16 %v16308_v2  ;;  %v10932_v6 = vunpack.c.h.bf16 %v16308_v2  ;;  %v16321_v8 = vld [vmem:[%s16302_s20 + $0x50] sm:$0xff]   ;;  %v10933_v9 = vunpack.c.l.bf16 %v16311_v3  ;;  %v10934_v10 = vunpack.c.h.bf16 %v16311_v3  ;;  %13520 = vmatprep.mubr.msk.bf16.mxu1 %vm644_vm0, %v16308_v2  ;;  %v16335_v14 = vld [vmem:[%s16302_s20 + $0x58] sm:$0xff]   ;;  %s16656_s12 = scalar_lea.vmem [#allocation11], %s15565_s16  ;;  %s15947_s21 = smov 96  }
  0x5f   : > { %10855 = vst.msk [vmem:[#allocation2 + $0x60] sm:$0xff] %vm644_vm0, %v15944_v0  ;;  %10856 = vst.msk [vmem:[#allocation2 + $0x68] sm:$0xff] %vm644_vm0, %v15944_v0  ;;  %v10935_v12 = vunpack.c.l.bf16 %v16321_v8  ;;  %v10936_v13 = vunpack.c.h.bf16 %v16321_v8  ;;  %v16338_v15 = vld [vmem:[%s16302_s20 + $0x60] sm:$0xff]   ;;  %v10937_v16 = vunpack.c.l.bf16 %v16335_v14  ;;  %v10938_v17 = vunpack.c.h.bf16 %v16335_v14  ;;  %v16346_v19 = vld [vmem:[%s16302_s20 + $0x68] sm:$0xff]   ;;  %13521 = vmatmul.mubr.msk.bf16.vlgmr.msra.gmra.mrb[0].mxu1 %vm644_vm0, %v16311_v3  ;;  %s15566_s17 = smul.u32 12288, %s16052_s22  ;;  %s12001_s15 = sshll.u32 %s16656_s12, 4  ;;  %s19189_s15 = int_to_ptr.vmem [resolvable:$true] %s12001_s15 }
  0x60   : > { %10857 = vst.msk [vmem:[#allocation2 + $0x70] sm:$0xff] %vm644_vm0, %v15944_v0  ;;  %10858 = vst.msk [vmem:[#allocation2 + $0x78] sm:$0xff] %vm644_vm0, %v15944_v0  ;;  %v10939_v18 = vunpack.c.l.bf16 %v16338_v15  ;;  %v16349_v20 = vld [vmem:[%s16302_s20 + $0x70] sm:$0xff]   ;;  %v16352_v21 = vld [vmem:[%s16302_s20] sm:$0xff]   ;;  %v10940_v22 = vunpack.c.h.bf16 %v16338_v15  ;;  %v10941_v23 = vunpack.c.l.bf16 %v16346_v19  ;;  %v10942_v24 = vunpack.c.h.bf16 %v16346_v19  ;;  %13537 = vmatpush3.bf16.msra.mxu1 %v932_v11  ;;  %13524 = vmatprep.mubr.msk.bf16.mxu1 %vm644_vm0, %v16321_v8  ;;  %s19308_s28 = sld [smem:[#allocation20_spill]]  ;;  %s19309_s23 = sld [smem:[#allocation29_spill]] }
  0x61   : > { %10859 = vst.msk [vmem:[#allocation2 + $0x80] sm:$0xff] %vm644_vm0, %v15944_v0  ;;  %10860 = vst.msk [vmem:[#allocation2 + $0x88] sm:$0xff] %vm644_vm0, %v15944_v0  ;;  %v16362_v25 = vld [vmem:[%s16302_s20 + $0x78] sm:$0xff]   ;;  %v16365_v26 = vld [vmem:[%s16302_s20 + $0x8] sm:$0xff]   ;;  %v10943_v28 = vunpack.c.l.bf16 %v16349_v20  ;;  %v10944_v29 = vunpack.c.h.bf16 %v16349_v20  ;;  %v10915_v33 = vunpack.c.l.bf16 %v16352_v21  ;;  %v10916_v36 = vunpack.c.h.bf16 %v16352_v21  ;;  %13570 = vmatprep.subr.bf16.mxu1 %v16377_v30  ;;  %13504 = vmatprep.mubr.msk.bf16.mxu0 %vm644_vm0, %v16352_v21  ;;  %s15868_s27 = scalar_lea.vmem %s19189_s15, 12288  ;;  %s15948_s18 = smov [#allocation11]  }
  0x62   : > { %10861 = vst.msk [vmem:[#allocation2 + $0x90] sm:$0xff] %vm644_vm0, %v15944_v0  ;;  %10862 = vst.msk [vmem:[#allocation2 + $0x98] sm:$0xff] %vm644_vm0, %v15944_v0  ;;  %v16368_v27 = vld [vmem:[%s16302_s20 + $0x10] sm:$0xff]   ;;  %v10945_v31 = vunpack.c.l.bf16 %v16362_v25  ;;  %v10946_v32 = vunpack.c.h.bf16 %v16362_v25  ;;  %v16386_v34 = vld [vmem:[%s16302_s20 + $0x18] sm:$0xff]   ;;  %v10917_v37 = vunpack.c.l.bf16 %v16365_v26  ;;  %v10918_v38 = vunpack.c.h.bf16 %v16365_v26  ;;  %13505 = vmatmul.mubr.msk.bf16.vlgmr.msra.gmra.mrb[0].mxu0 %vm644_vm0, %v16365_v26  ;;  %p15869_p12 = scmp.ne.s32.totalorder %s19189_s15, %s15868_s27 }
  0x63   : > { %10863 = vst.msk [vmem:[#allocation2 + $0xa0] sm:$0xff] %vm644_vm0, %v15944_v0  ;;  %10864 = vst.msk [vmem:[#allocation2 + $0xa8] sm:$0xff] %vm644_vm0, %v15944_v0  ;;  %v16389_v35 = vld [vmem:[%s16302_s20 + $0x20] sm:$0xff]   ;;  %v16397_v39 = vld [vmem:[%s16302_s20 + $0x28] sm:$0xff]   ;;  %v10919_v40 = vunpack.c.l.bf16 %v16368_v27  ;;  %v10920_v41 = vunpack.c.h.bf16 %v16368_v27  ;;  %v10921_v43 = vunpack.c.l.bf16 %v16386_v34  ;;  %v10922_v44 = vunpack.c.h.bf16 %v16386_v34  ;;  %13508 = vmatprep.mubr.msk.bf16.mxu0 %vm644_vm0, %v16368_v27  ;;  %13691 = vmatpush3.bf16.msra.mxu0 %v16495_v56 }
  0x64   : > { %10865 = vst.msk [vmem:[#allocation2 + $0xb0] sm:$0xff] %vm644_vm0, %v15944_v0  ;;  %10866 = vst.msk [vmem:[#allocation2 + $0xb8] sm:$0xff] %vm644_vm0, %v15944_v0  ;;  %v16406_v42 = vld [vmem:[%s16302_s20 + $0x30] sm:$0xff]   ;;  %v10923_v45 = vunpack.c.l.bf16 %v16389_v35  ;;  %v16417_v46 = vld [vmem:[%s16302_s20 + $0x38] sm:$0xff]   ;;  %v10924_v47 = vunpack.c.h.bf16 %v16389_v35  ;;  %v10925_v48 = vunpack.c.l.bf16 %v16397_v39  ;;  %v10926_v49 = vunpack.c.h.bf16 %v16397_v39  ;;  %13692 = vmatprep.subr.bf16.mxu0 %v15656_v58  ;;  %s19201_s20 = scalar_lea.sflag [#allocation8], %s515_s29 }
  0x65   : > { %10867 = vst.msk [vmem:[#allocation2 + $0xc0] sm:$0xff] %vm644_vm0, %v15944_v0  ;;  %10868 = vst.msk [vmem:[#allocation2 + $0xc8] sm:$0xff] %vm644_vm0, %v15944_v0  ;;  %v10927_v50 = vunpack.c.l.bf16 %v16406_v42  ;;  %v10928_v51 = vunpack.c.h.bf16 %v16406_v42  ;;  %v10929_v52 = vunpack.c.l.bf16 %v16417_v46  ;;  %v10930_v53 = vunpack.c.h.bf16 %v16417_v46  ;;  %v15658_v61 = vld [vmem:[#allocation6 + $0x78] sm:$0xff]   ;;  %v16644_v1 = vld [vmem:[#allocation6] sm:$0xff]  }
  0x66   : > { %10869 = vst.msk [vmem:[#allocation2 + $0xd0] sm:$0xff] %vm644_vm0, %v15944_v0  ;;  %10870 = vst.msk [vmem:[#allocation2 + $0xd8] sm:$0xff] %vm644_vm0, %v15944_v0  ;;  %v16647_v4 = vld [vmem:[#allocation6 + $0x80] sm:$0xff]   ;;  %vm11923_vm5 = vcmask 261120   ;;  %vm11921_vm6 = vcmask 1048320   ;;  %s19182_s26 = scalar_lea.hbm %s19309_s23, %s15566_s17  ;;  %p19310_p1 = scmp.ne.s32.totalorder %s19308_s28, 0 }
  0x67   : > { %10871 = vst.msk [vmem:[#allocation2 + $0xe0] sm:$0xff] %vm644_vm0, %v15944_v0  ;;  %10872 = vst.msk [vmem:[#allocation2 + $0xe8] sm:$0xff] %vm644_vm0, %v15944_v0  ;;  %13525 = vmatmul.mubr.msk.bf16.gmra.mrb[4].mxu1 %vm644_vm0, %v16335_v14  ;;  %13693 = vmatpush3.bf16.msra.mxu0 %v15656_v58 }
  0x68   : > { %10873 = vst.msk [vmem:[#allocation2 + $0xf0] sm:$0xff] %vm644_vm0, %v15944_v0  ;;  %10874 = vst.msk [vmem:[#allocation2 + $0xf8] sm:$0xff] %vm644_vm0, %v15944_v0  ;;  %13528 = vmatprep.mubr.msk.bf16.mxu1 %vm644_vm0, %v16338_v15  ;;  %13694 = vmatprep.subr.bf16.mxu0 %v15657_v60  ;;  %p15870_p2 = pnand %p15869_p12, %p19310_p1 }
  0x69   : > { %10875 = vst.msk [vmem:[#allocation2 + $0x100] sm:$0xff] %vm644_vm0, %v15944_v0  ;;  %10876 = vst.msk [vmem:[#allocation2 + $0x108] sm:$0xff] %vm644_vm0, %v15944_v0 }
  0x6a   : > { %10877 = vst.msk [vmem:[#allocation2 + $0x110] sm:$0xff] %vm644_vm0, %v15944_v0  ;;  %10878 = vst.msk [vmem:[#allocation2 + $0x118] sm:$0xff] %vm644_vm0, %v15944_v0  ;;  %13509 = vmatmul.mubr.msk.bf16.gmra.mrb[4].mxu0 %vm644_vm0, %v16386_v34  ;;  %p15871_p3 = pneg %p15870_p2 }
  0x6b   : > { %10879 = vst.msk [vmem:[#allocation2 + $0x120] sm:$0xff] %vm644_vm0, %v15944_v0  ;;  %10882 = vst.msk [vmem:[#allocation2 + $0x138] sm:$0xff] %vm644_vm0, %v15944_v0  ;;  %13512 = vmatprep.mubr.msk.bf16.mxu0 %vm644_vm0, %v16389_v35  ;;  %13695 = vmatpush3.bf16.msra.mxu0 %v15657_v60 }
  0x6c   : > { %10883 = vst.msk [vmem:[#allocation2 + $0x140] sm:$0xff] %vm644_vm0, %v15944_v0  ;;  %10884 = vst.msk [vmem:[#allocation2 + $0x148] sm:$0xff] %vm644_vm0, %v15944_v0  ;;  %13696 = vmatprep.subr.bf16.mxu0 %v15658_v61 }
  0x6d   : > { %10885 = vst.msk [vmem:[#allocation2 + $0x150] sm:$0xff] %vm644_vm0, %v15944_v0  ;;  %10886 = vst.msk [vmem:[#allocation2 + $0x158] sm:$0xff] %vm644_vm0, %v15944_v0 }
  0x6e   : > { %10887 = vst.msk [vmem:[#allocation2 + $0x160] sm:$0xff] %vm644_vm0, %v15944_v0  ;;  %10888 = vst.msk [vmem:[#allocation2 + $0x168] sm:$0xff] %vm644_vm0, %v15944_v0 }
  0x6f   : > { %10889 = vst.msk [vmem:[#allocation2 + $0x170] sm:$0xff] %vm644_vm0, %v15944_v0  ;;  %10890 = vst.msk [vmem:[#allocation2 + $0x178] sm:$0xff] %vm644_vm0, %v15944_v0  ;;  %13529 = vmatmul.mubr.msk.bf16.gmra.mrb[8].mxu1 %vm644_vm0, %v16346_v19  ;;  %13697 = vmatpush3.bf16.msra.mxu0 %v15658_v61 }
  0x70   : > { %10891 = vst.msk [vmem:[#allocation2 + $0x180] sm:$0xff] %vm644_vm0, %v15944_v0  ;;  %10892 = vst.msk [vmem:[#allocation2 + $0x188] sm:$0xff] %vm644_vm0, %v15944_v0  ;;  %13532 = vmatprep.mubr.msk.bf16.mxu1 %vm644_vm0, %v16349_v20  ;;  %13730 = vmatprep.subr.bf16.mxu0 %v16647_v4 }
  0x71   : > { %10893 = vst.msk [vmem:[#allocation2 + $0x190] sm:$0xff] %vm644_vm0, %v15944_v0  ;;  %10894 = vst.msk [vmem:[#allocation2 + $0x198] sm:$0xff] %vm644_vm0, %v15944_v0 }
  0x72   : > { %10895 = vst.msk [vmem:[#allocation2 + $0x1a0] sm:$0xff] %vm644_vm0, %v15944_v0  ;;  %10896 = vst.msk [vmem:[#allocation2 + $0x1a8] sm:$0xff] %vm644_vm0, %v15944_v0  ;;  %13513 = vmatmul.mubr.msk.bf16.gmra.mrb[8].mxu0 %vm644_vm0, %v16397_v39 }
  0x73   : > { %10897 = vst.msk [vmem:[#allocation2 + $0x1b0] sm:$0xff] %vm644_vm0, %v15944_v0  ;;  %10898 = vst.msk [vmem:[#allocation2 + $0x1b8] sm:$0xff] %vm644_vm0, %v15944_v0  ;;  %13516 = vmatprep.mubr.msk.bf16.mxu0 %vm644_vm0, %v16406_v42 }
  0x74   : > { %10899 = vst.msk [vmem:[#allocation2 + $0x1c0] sm:$0xff] %vm644_vm0, %v15944_v0  ;;  %10900 = vst.msk [vmem:[#allocation2 + $0x1c8] sm:$0xff] %vm644_vm0, %v15944_v0 }
  0x75   : > { %10901 = vst.msk [vmem:[#allocation2 + $0x1d0] sm:$0xff] %vm644_vm0, %v15944_v0  ;;  %10902 = vst.msk [vmem:[#allocation2 + $0x1d8] sm:$0xff] %vm644_vm0, %v15944_v0 }
  0x76   : > { %10903 = vst.msk [vmem:[#allocation2 + $0x1e0] sm:$0xff] %vm644_vm0, %v15944_v0  ;;  %10904 = vst.msk [vmem:[#allocation2 + $0x1e8] sm:$0xff] %vm644_vm0, %v15944_v0 }
  0x77   : > { %10905 = vst.msk [vmem:[#allocation2 + $0x1f0] sm:$0xff] %vm644_vm0, %v15944_v0  ;;  %10906 = vst.msk [vmem:[#allocation2 + $0x1f8] sm:$0xff] %vm644_vm0, %v15944_v0  ;;  %13533 = vmatmul.mubr.msk.bf16.gmra.mrb[12].mxu1 %vm644_vm0, %v16362_v25 }
  0x78   : > { %10907 = vst.msk [vmem:[#allocation2 + $0x200] sm:$0xff] %vm644_vm0, %v15944_v0  ;;  %10908 = vst.msk [vmem:[#allocation2 + $0x208] sm:$0xff] %vm644_vm0, %v15944_v0  ;;  %13538 = vmatprep.mubr.msk.bf16.mxu1 %vm644_vm0, %v16352_v21 }
  0x79   : > { %10909 = vst.msk [vmem:[#allocation2 + $0x210] sm:$0xff] %vm644_vm0, %v15944_v0  ;;  %10910 = vst.msk [vmem:[#allocation2 + $0x218] sm:$0xff] %vm644_vm0, %v15944_v0 }
  0x7a   : > { %10911 = vst.msk [vmem:[#allocation2 + $0x220] sm:$0xff] %vm644_vm0, %v15944_v0  ;;  %10912 = vst.msk [vmem:[#allocation2 + $0x228] sm:$0xff] %vm644_vm0, %v15944_v0  ;;  %13517 = vmatmul.mubr.msk.bf16.gmra.mrb[12].mxu0 %vm644_vm0, %v16417_v46 }
  0x7b   : > { %10913 = vst.msk [vmem:[#allocation2 + $0x230] sm:$0xff] %vm644_vm0, %v15944_v0  ;;  %10914 = vst.msk [vmem:[#allocation2 + $0x238] sm:$0xff] %vm644_vm0, %v15944_v0 }
  0x7c   : > { %10964 = vst.msk [vmem:[#allocation2 + $0x128] sm:$0xff] %vm644_vm0, %v10931_v5  ;;  %10965 = vst.msk [vmem:[#allocation2 + $0x130] sm:$0xff] %vm644_vm0, %v10932_v6  ;;  %v12095_v5 = vld [vmem:[%s19244_s2] ss:$0 sm:$0xff] }
  0x7d   : > { %10966 = vst.msk [vmem:[#allocation2 + $0x148] sm:$0xff] %vm644_vm0, %v10933_v9  ;;  %10967 = vst.msk [vmem:[#allocation2 + $0x150] sm:$0xff] %vm644_vm0, %v10934_v10 }
  0x7e   : > { %10968 = vst.msk [vmem:[#allocation2 + $0x168] sm:$0xff] %vm644_vm0, %v10935_v12  ;;  %10969 = vst.msk [vmem:[#allocation2 + $0x170] sm:$0xff] %vm644_vm0, %v10936_v13 }
  0x7f   : > { %10970 = vst.msk [vmem:[#allocation2 + $0x188] sm:$0xff] %vm644_vm0, %v10937_v16  ;;  %10971 = vst.msk [vmem:[#allocation2 + $0x190] sm:$0xff] %vm644_vm0, %v10938_v17  ;;  %13539 = vmatmul.mubr.msk.bf16.vlgmr.msra.gmra.mrb[16].mxu1 %vm644_vm0, %v16365_v26 }
  0x80   : > { %10972 = vst.msk [vmem:[#allocation2 + $0x1a8] sm:$0xff] %vm644_vm0, %v10939_v18  ;;  %10973 = vst.msk [vmem:[#allocation2 + $0x1b0] sm:$0xff] %vm644_vm0, %v10940_v22  ;;  %13542 = vmatprep.mubr.msk.bf16.mxu1 %vm644_vm0, %v16368_v27  ;;  %13571 = vmatpush3.bf16.msra.mxu1 %v16377_v30 }
  0x81   : > { %10974 = vst.msk [vmem:[#allocation2 + $0x1c8] sm:$0xff] %vm644_vm0, %v10941_v23  ;;  %10975 = vst.msk [vmem:[#allocation2 + $0x1d0] sm:$0xff] %vm644_vm0, %v10942_v24  ;;  %13572 = vmatprep.subr.bf16.mxu1 %v15652_v54 }
  0x82   : > { %10976 = vst.msk [vmem:[#allocation2 + $0x1e8] sm:$0xff] %vm644_vm0, %v10943_v28  ;;  %10977 = vst.msk [vmem:[#allocation2 + $0x1f0] sm:$0xff] %vm644_vm0, %v10944_v29 }
  0x83   : > { %10978 = vst.msk [vmem:[#allocation2 + $0x208] sm:$0xff] %vm644_vm0, %v10945_v31  ;;  %10979 = vst.msk [vmem:[#allocation2 + $0x210] sm:$0xff] %vm644_vm0, %v10946_v32 }
  0x84   : > { %10948 = vst.msk [vmem:[#allocation2 + $0x28] sm:$0xff] %vm644_vm0, %v10915_v33  ;;  %10949 = vst.msk [vmem:[#allocation2 + $0x30] sm:$0xff] %vm644_vm0, %v10916_v36  ;;  %13573 = vmatpush3.bf16.msra.mxu1 %v15652_v54 }
  0x85   : > { %10950 = vst.msk [vmem:[#allocation2 + $0x48] sm:$0xff] %vm644_vm0, %v10917_v37  ;;  %10951 = vst.msk [vmem:[#allocation2 + $0x50] sm:$0xff] %vm644_vm0, %v10918_v38  ;;  %13574 = vmatprep.subr.bf16.mxu1 %v15653_v55 }
  0x86   : > { %10952 = vst.msk [vmem:[#allocation2 + $0x68] sm:$0xff] %vm644_vm0, %v10919_v40  ;;  %10953 = vst.msk [vmem:[#allocation2 + $0x70] sm:$0xff] %vm644_vm0, %v10920_v41 }
  0x87   : > { %10954 = vst.msk [vmem:[#allocation2 + $0x88] sm:$0xff] %vm644_vm0, %v10921_v43  ;;  %10955 = vst.msk [vmem:[#allocation2 + $0x90] sm:$0xff] %vm644_vm0, %v10922_v44  ;;  %13543 = vmatmul.mubr.msk.bf16.gmra.mrb[20].mxu1 %vm644_vm0, %v16386_v34 }
  0x88   : > { %10956 = vst.msk [vmem:[#allocation2 + $0xa8] sm:$0xff] %vm644_vm0, %v10923_v45  ;;  %10957 = vst.msk [vmem:[#allocation2 + $0xb0] sm:$0xff] %vm644_vm0, %v10924_v47  ;;  %13546 = vmatprep.mubr.msk.bf16.mxu1 %vm644_vm0, %v16389_v35  ;;  %13575 = vmatpush3.bf16.msra.mxu1 %v15653_v55 }
  0x89   : > { %10958 = vst.msk [vmem:[#allocation2 + $0xc8] sm:$0xff] %vm644_vm0, %v10925_v48  ;;  %10959 = vst.msk [vmem:[#allocation2 + $0xd0] sm:$0xff] %vm644_vm0, %v10926_v49  ;;  %13576 = vmatprep.subr.bf16.mxu1 %v15654_v59 }
  0x8a   : > { %10960 = vst.msk [vmem:[#allocation2 + $0xe8] sm:$0xff] %vm644_vm0, %v10927_v50  ;;  %10961 = vst.msk [vmem:[#allocation2 + $0xf0] sm:$0xff] %vm644_vm0, %v10928_v51 }
  0x8b   : > { %10962 = vst.msk [vmem:[#allocation2 + $0x108] sm:$0xff] %vm644_vm0, %v10929_v52  ;;  %10963 = vst.msk [vmem:[#allocation2 + $0x110] sm:$0xff] %vm644_vm0, %v10930_v53 }
  0x8c   : > { %1136 = vst.msk [vmem:[#allocation3 + $0x48] sm:$0xff] %vm890_vm2, %v15945_v57  ;;  %1127 = vst.msk [vmem:[#allocation3] sm:$0xff] %vm890_vm2, %v15945_v57  ;;  %13577 = vmatpush3.bf16.msra.mxu1 %v15654_v59 }
  0x8d   : > { %1128 = vst.msk [vmem:[#allocation3 + $0x8] sm:$0xff] %vm890_vm2, %v15945_v57  ;;  %1129 = vst.msk [vmem:[#allocation3 + $0x10] sm:$0xff] %vm890_vm2, %v15945_v57  ;;  %13610 = vmatprep.subr.bf16.mxu1 %v16644_v1 }
  0x8e   : > { %1130 = vst.msk [vmem:[#allocation3 + $0x18] sm:$0xff] %vm890_vm2, %v15945_v57  ;;  %1131 = vst.msk [vmem:[#allocation3 + $0x20] sm:$0xff] %vm890_vm2, %v15945_v57 }
  0x8f   : > { %13547 = vmatmul.mubr.msk.bf16.gmra.mrb[24].mxu1 %vm644_vm0, %v16397_v39  ;;  %1132 = vst.msk [vmem:[#allocation3 + $0x28] sm:$0xff] %vm890_vm2, %v15945_v57  ;;  %1133 = vst.msk [vmem:[#allocation3 + $0x30] sm:$0xff] %vm890_vm2, %v15945_v57 }
  0x90   : > { %13550 = vmatprep.mubr.msk.bf16.mxu1 %vm644_vm0, %v16406_v42  ;;  %1134 = vst.msk [vmem:[#allocation3 + $0x38] sm:$0xff] %vm890_vm2, %v15945_v57  ;;  %1135 = vst.msk [vmem:[#allocation3 + $0x40] sm:$0xff] %vm890_vm2, %v15945_v57 }
  0x91   : > { %1137 = vst.msk [vmem:[#allocation3 + $0x50] sm:$0xff] %vm890_vm2, %v15945_v57  ;;  %1138 = vst.msk [vmem:[#allocation3 + $0x58] sm:$0xff] %vm890_vm2, %v15945_v57 }
  0x92   : > { %1139 = vst.msk [vmem:[#allocation3 + $0x60] sm:$0xff] %vm890_vm2, %v15945_v57  ;;  %1140 = vst.msk [vmem:[#allocation3 + $0x68] sm:$0xff] %vm890_vm2, %v15945_v57 }
  0x93   : > { %1141 = vst.msk [vmem:[#allocation3 + $0x70] sm:$0xff] %vm890_vm2, %v15945_v57  ;;  %1142 = vst.msk [vmem:[#allocation3 + $0x78] sm:$0xff] %vm890_vm2, %v15945_v57 }
  0x94   : > { %1143 = vst.msk [vmem:[#allocation3 + $0x80] sm:$0xff] %vm890_vm2, %v15945_v57  ;;  %1144 = vst.msk [vmem:[#allocation3 + $0x88] sm:$0xff] %vm890_vm2, %v15945_v57  ;;  %v1288_v62 = vld [vmem:[#allocation3 + $0x8] sm:$0xff]  ;;  %v1289_v63 = vld [vmem:[#allocation3 + $0x10] sm:$0xff] }
  0x95   : > { %1145 = vst.msk [vmem:[#allocation3 + $0x90] sm:$0xff] %vm890_vm2, %v15945_v57  ;;  %1146 = vst.msk [vmem:[#allocation3 + $0x98] sm:$0xff] %vm890_vm2, %v15945_v57  ;;  %v1320_v0 = vpack.c.bf16 %v1289_v63, %v1288_v62 }
  0x96   : > { %1147 = vst.msk [vmem:[#allocation3 + $0xa0] sm:$0xff] %vm890_vm2, %v15945_v57  ;;  %1148 = vst.msk [vmem:[#allocation3 + $0xa8] sm:$0xff] %vm890_vm2, %v15945_v57 }
  0x97   : > { %13551 = vmatmul.mubr.msk.bf16.gmra.mrb[28].mxu1 %vm644_vm0, %v16417_v46  ;;  %1149 = vst.msk [vmem:[#allocation3 + $0xb0] sm:$0xff] %vm890_vm2, %v15945_v57  ;;  %1150 = vst.msk [vmem:[#allocation3 + $0xb8] sm:$0xff] %vm890_vm2, %v15945_v57 }
  0x98   : > { %13554 = vmatprep.mubr.msk.bf16.mxu1 %vm644_vm0, %v16308_v2  ;;  %1151 = vst.msk [vmem:[#allocation3 + $0xc0] sm:$0xff] %vm890_vm2, %v15945_v57  ;;  %1152 = vst.msk [vmem:[#allocation3 + $0xc8] sm:$0xff] %vm890_vm2, %v15945_v57 }
  0x99   : > { %1153 = vst.msk [vmem:[#allocation3 + $0xd0] sm:$0xff] %vm890_vm2, %v15945_v57  ;;  %1154 = vst.msk [vmem:[#allocation3 + $0xd8] sm:$0xff] %vm890_vm2, %v15945_v57 }
  0x9a   : > { %1155 = vst.msk [vmem:[#allocation3 + $0xe0] sm:$0xff] %vm890_vm2, %v15945_v57  ;;  %1156 = vst.msk [vmem:[#allocation3 + $0xe8] sm:$0xff] %vm890_vm2, %v15945_v57 }
  0x9b   : > { %1157 = vst.msk [vmem:[#allocation3 + $0xf0] sm:$0xff] %vm890_vm2, %v15945_v57  ;;  %1158 = vst.msk [vmem:[#allocation3 + $0xf8] sm:$0xff] %vm890_vm2, %v15945_v57 }
  0x9c   : > { %1159 = vst.msk [vmem:[#allocation3 + $0x100] sm:$0xff] %vm890_vm2, %v15945_v57  ;;  %1160 = vst.msk [vmem:[#allocation3 + $0x108] sm:$0xff] %vm890_vm2, %v15945_v57 }
  0x9d   : > { %1161 = vst.msk [vmem:[#allocation3 + $0x110] sm:$0xff] %vm890_vm2, %v15945_v57  ;;  %1162 = vst.msk [vmem:[#allocation3 + $0x118] sm:$0xff] %vm890_vm2, %v15945_v57 }
  0x9e   : > { %1163 = vst.msk [vmem:[#allocation3 + $0x120] sm:$0xff] %vm890_vm2, %v15945_v57  ;;  %1164 = vst.msk [vmem:[#allocation3 + $0x128] sm:$0xff] %vm890_vm2, %v15945_v57 }
  0x9f   : > { %13555 = vmatmul.mubr.msk.bf16.gmra.mrb[32].mxu1 %vm644_vm0, %v16311_v3  ;;  %1165 = vst.msk [vmem:[#allocation3 + $0x130] sm:$0xff] %vm890_vm2, %v15945_v57  ;;  %1166 = vst.msk [vmem:[#allocation3 + $0x138] sm:$0xff] %vm890_vm2, %v15945_v57 }
  0xa0   : > { %13558 = vmatprep.mubr.msk.bf16.mxu1 %vm644_vm0, %v16321_v8  ;;  %1167 = vst.msk [vmem:[#allocation3 + $0x140] sm:$0xff] %vm890_vm2, %v15945_v57  ;;  %1168 = vst.msk [vmem:[#allocation3 + $0x148] sm:$0xff] %vm890_vm2, %v15945_v57 }
  0xa1   : > { %1169 = vst.msk [vmem:[#allocation3 + $0x150] sm:$0xff] %vm890_vm2, %v15945_v57  ;;  %1170 = vst.msk [vmem:[#allocation3 + $0x158] sm:$0xff] %vm890_vm2, %v15945_v57 }
  0xa2   : > { %1171 = vst.msk [vmem:[#allocation3 + $0x160] sm:$0xff] %vm890_vm2, %v15945_v57  ;;  %1172 = vst.msk [vmem:[#allocation3 + $0x168] sm:$0xff] %vm890_vm2, %v15945_v57 }
  0xa3   : > { %1173 = vst.msk [vmem:[#allocation3 + $0x170] sm:$0xff] %vm890_vm2, %v15945_v57  ;;  %1174 = vst.msk [vmem:[#allocation3 + $0x178] sm:$0xff] %vm890_vm2, %v15945_v57 }
  0xa4   : > { %1175 = vst.msk [vmem:[#allocation3 + $0x180] sm:$0xff] %vm890_vm2, %v15945_v57  ;;  %1176 = vst.msk [vmem:[#allocation3 + $0x188] sm:$0xff] %vm890_vm2, %v15945_v57 }
  0xa5   : > { %1177 = vst.msk [vmem:[#allocation3 + $0x190] sm:$0xff] %vm890_vm2, %v15945_v57  ;;  %1178 = vst.msk [vmem:[#allocation3 + $0x198] sm:$0xff] %vm890_vm2, %v15945_v57 }
  0xa6   : > { %1179 = vst.msk [vmem:[#allocation3 + $0x1a0] sm:$0xff] %vm890_vm2, %v15945_v57  ;;  %1180 = vst.msk [vmem:[#allocation3 + $0x1a8] sm:$0xff] %vm890_vm2, %v15945_v57 }
  0xa7   : > { %13559 = vmatmul.mubr.msk.bf16.gmra.mrb[36].mxu1 %vm644_vm0, %v16335_v14  ;;  %1181 = vst.msk [vmem:[#allocation3 + $0x1b0] sm:$0xff] %vm890_vm2, %v15945_v57  ;;  %1182 = vst.msk [vmem:[#allocation3 + $0x1b8] sm:$0xff] %vm890_vm2, %v15945_v57 }
  0xa8   : > { %13562 = vmatprep.mubr.msk.bf16.mxu1 %vm644_vm0, %v16338_v15  ;;  %1183 = vst.msk [vmem:[#allocation3 + $0x1c0] sm:$0xff] %vm890_vm2, %v15945_v57  ;;  %1184 = vst.msk [vmem:[#allocation3 + $0x1c8] sm:$0xff] %vm890_vm2, %v15945_v57 }
  0xa9   : > { %1185 = vst.msk [vmem:[#allocation3 + $0x1d0] sm:$0xff] %vm890_vm2, %v15945_v57  ;;  %1186 = vst.msk [vmem:[#allocation3 + $0x1d8] sm:$0xff] %vm890_vm2, %v15945_v57 }
  0xaa   : > { %1187 = vst.msk [vmem:[#allocation3 + $0x1e0] sm:$0xff] %vm890_vm2, %v15945_v57  ;;  %1188 = vst.msk [vmem:[#allocation3 + $0x1e8] sm:$0xff] %vm890_vm2, %v15945_v57 }
  0xab   : > { %1189 = vst.msk [vmem:[#allocation3 + $0x1f0] sm:$0xff] %vm890_vm2, %v15945_v57  ;;  %1190 = vst.msk [vmem:[#allocation3 + $0x1f8] sm:$0xff] %vm890_vm2, %v15945_v57 }
  0xac   : > { %1191 = vst.msk [vmem:[#allocation3 + $0x200] sm:$0xff] %vm890_vm2, %v15945_v57  ;;  %1192 = vst.msk [vmem:[#allocation3 + $0x208] sm:$0xff] %vm890_vm2, %v15945_v57 }
  0xad   : > { %1193 = vst.msk [vmem:[#allocation3 + $0x210] sm:$0xff] %vm890_vm2, %v15945_v57  ;;  %1194 = vst.msk [vmem:[#allocation3 + $0x218] sm:$0xff] %vm890_vm2, %v15945_v57 }
  0xae   : > { %1195 = vst.msk [vmem:[#allocation3 + $0x220] sm:$0xff] %vm890_vm2, %v15945_v57  ;;  %1196 = vst.msk [vmem:[#allocation3 + $0x228] sm:$0xff] %vm890_vm2, %v15945_v57 }
  0xaf   : > { %13563 = vmatmul.mubr.msk.bf16.gmra.mrb[40].mxu1 %vm644_vm0, %v16346_v19  ;;  %1197 = vst.msk [vmem:[#allocation3 + $0x230] sm:$0xff] %vm890_vm2, %v15945_v57  ;;  %1198 = vst.msk [vmem:[#allocation3 + $0x238] sm:$0xff] %vm890_vm2, %v15945_v57 }
  0xb0   : > { %13566 = vmatprep.mubr.msk.bf16.mxu1 %vm644_vm0, %v16349_v20  ;;  %4512 = vst.msk [vmem:[#allocation4 + $0x48] sm:$0xff] %vm4502_vm3, %v15945_v57  ;;  %4503 = vst.msk [vmem:[#allocation4] sm:$0xff] %vm4502_vm3, %v15945_v57 }
  0xb1   : > { %4504 = vst.msk [vmem:[#allocation4 + $0x8] sm:$0xff] %vm4502_vm3, %v15945_v57  ;;  %4505 = vst.msk [vmem:[#allocation4 + $0x10] sm:$0xff] %vm4502_vm3, %v15945_v57 }
  0xb2   : > { %4506 = vst.msk [vmem:[#allocation4 + $0x18] sm:$0xff] %vm4502_vm3, %v15945_v57  ;;  %4507 = vst.msk [vmem:[#allocation4 + $0x20] sm:$0xff] %vm4502_vm3, %v15945_v57 }
  0xb3   : > { %4508 = vst.msk [vmem:[#allocation4 + $0x28] sm:$0xff] %vm4502_vm3, %v15945_v57  ;;  %4509 = vst.msk [vmem:[#allocation4 + $0x30] sm:$0xff] %vm4502_vm3, %v15945_v57 }
  0xb4   : > { %4510 = vst.msk [vmem:[#allocation4 + $0x38] sm:$0xff] %vm4502_vm3, %v15945_v57  ;;  %4511 = vst.msk [vmem:[#allocation4 + $0x40] sm:$0xff] %vm4502_vm3, %v15945_v57 }
  0xb5   : > { %4513 = vst.msk [vmem:[#allocation4 + $0x50] sm:$0xff] %vm4502_vm3, %v15945_v57  ;;  %4514 = vst.msk [vmem:[#allocation4 + $0x58] sm:$0xff] %vm4502_vm3, %v15945_v57 }
  0xb6   : > { %4515 = vst.msk [vmem:[#allocation4 + $0x60] sm:$0xff] %vm4502_vm3, %v15945_v57  ;;  %4516 = vst.msk [vmem:[#allocation4 + $0x68] sm:$0xff] %vm4502_vm3, %v15945_v57 }
  0xb7   : > { %13567 = vmatmul.mubr.msk.bf16.gmra.mrb[44].mxu1 %vm644_vm0, %v16362_v25  ;;  %4517 = vst.msk [vmem:[#allocation4 + $0x70] sm:$0xff] %vm4502_vm3, %v15945_v57  ;;  %4518 = vst.msk [vmem:[#allocation4 + $0x78] sm:$0xff] %vm4502_vm3, %v15945_v57 }
  0xb8   : > { %13578 = vmatprep.mubr.msk.bf16.mxu1 %vm890_vm2, %v1320_v0  ;;  %4519 = vst.msk [vmem:[#allocation4 + $0x80] sm:$0xff] %vm4502_vm3, %v15945_v57  ;;  %4520 = vst.msk [vmem:[#allocation4 + $0x88] sm:$0xff] %vm4502_vm3, %v15945_v57 }
  0xb9   : > { %4521 = vst.msk [vmem:[#allocation4 + $0x90] sm:$0xff] %vm4502_vm3, %v15945_v57  ;;  %4522 = vst.msk [vmem:[#allocation4 + $0x98] sm:$0xff] %vm4502_vm3, %v15945_v57 }
  0xba   : > { %4523 = vst.msk [vmem:[#allocation4 + $0xa0] sm:$0xff] %vm4502_vm3, %v15945_v57  ;;  %4524 = vst.msk [vmem:[#allocation4 + $0xa8] sm:$0xff] %vm4502_vm3, %v15945_v57 }
  0xbb   : > { %4525 = vst.msk [vmem:[#allocation4 + $0xb0] sm:$0xff] %vm4502_vm3, %v15945_v57  ;;  %4526 = vst.msk [vmem:[#allocation4 + $0xb8] sm:$0xff] %vm4502_vm3, %v15945_v57 }
  0xbc   : > { %4527 = vst.msk [vmem:[#allocation4 + $0xc0] sm:$0xff] %vm4502_vm3, %v15945_v57  ;;  %4528 = vst.msk [vmem:[#allocation4 + $0xc8] sm:$0xff] %vm4502_vm3, %v15945_v57 }
  0xbd   : > { %4529 = vst.msk [vmem:[#allocation4 + $0xd0] sm:$0xff] %vm4502_vm3, %v15945_v57  ;;  %4530 = vst.msk [vmem:[#allocation4 + $0xd8] sm:$0xff] %vm4502_vm3, %v15945_v57 }
  0xbe   : > { %4531 = vst.msk [vmem:[#allocation4 + $0xe0] sm:$0xff] %vm4502_vm3, %v15945_v57  ;;  %4532 = vst.msk [vmem:[#allocation4 + $0xe8] sm:$0xff] %vm4502_vm3, %v15945_v57 }
  0xbf   : > { %4533 = vst.msk [vmem:[#allocation4 + $0xf0] sm:$0xff] %vm4502_vm3, %v15945_v57  ;;  %4534 = vst.msk [vmem:[#allocation4 + $0xf8] sm:$0xff] %vm4502_vm3, %v15945_v57 }
  0xc0   : > { %4535 = vst.msk [vmem:[#allocation4 + $0x100] sm:$0xff] %vm4502_vm3, %v15945_v57  ;;  %4536 = vst.msk [vmem:[#allocation4 + $0x108] sm:$0xff] %vm4502_vm3, %v15945_v57 }
  0xc1   : > { %4537 = vst.msk [vmem:[#allocation4 + $0x110] sm:$0xff] %vm4502_vm3, %v15945_v57  ;;  %4538 = vst.msk [vmem:[#allocation4 + $0x118] sm:$0xff] %vm4502_vm3, %v15945_v57 }
  0xc2   : > { %4539 = vst.msk [vmem:[#allocation4 + $0x120] sm:$0xff] %vm4502_vm3, %v15945_v57  ;;  %4540 = vst.msk [vmem:[#allocation4 + $0x128] sm:$0xff] %vm4502_vm3, %v15945_v57 }
  0xc3   : > { %4541 = vst.msk [vmem:[#allocation4 + $0x130] sm:$0xff] %vm4502_vm3, %v15945_v57  ;;  %4542 = vst.msk [vmem:[#allocation4 + $0x138] sm:$0xff] %vm4502_vm3, %v15945_v57 }
  0xc4   : > { %4543 = vst.msk [vmem:[#allocation4 + $0x140] sm:$0xff] %vm4502_vm3, %v15945_v57  ;;  %4544 = vst.msk [vmem:[#allocation4 + $0x148] sm:$0xff] %vm4502_vm3, %v15945_v57 }
  0xc5   : > { %4545 = vst.msk [vmem:[#allocation4 + $0x150] sm:$0xff] %vm4502_vm3, %v15945_v57  ;;  %4546 = vst.msk [vmem:[#allocation4 + $0x158] sm:$0xff] %vm4502_vm3, %v15945_v57 }
  0xc6   : > { %4547 = vst.msk [vmem:[#allocation4 + $0x160] sm:$0xff] %vm4502_vm3, %v15945_v57  ;;  %4548 = vst.msk [vmem:[#allocation4 + $0x168] sm:$0xff] %vm4502_vm3, %v15945_v57 }
  0xc7   : > { %4549 = vst.msk [vmem:[#allocation4 + $0x170] sm:$0xff] %vm4502_vm3, %v15945_v57  ;;  %4550 = vst.msk [vmem:[#allocation4 + $0x178] sm:$0xff] %vm4502_vm3, %v15945_v57 }
  0xc8   : > { %4551 = vst.msk [vmem:[#allocation4 + $0x180] sm:$0xff] %vm4502_vm3, %v15945_v57  ;;  %4552 = vst.msk [vmem:[#allocation4 + $0x188] sm:$0xff] %vm4502_vm3, %v15945_v57 }
  0xc9   : > { %4553 = vst.msk [vmem:[#allocation4 + $0x190] sm:$0xff] %vm4502_vm3, %v15945_v57  ;;  %4554 = vst.msk [vmem:[#allocation4 + $0x198] sm:$0xff] %vm4502_vm3, %v15945_v57 }
  0xca   : > { %4555 = vst.msk [vmem:[#allocation4 + $0x1a0] sm:$0xff] %vm4502_vm3, %v15945_v57  ;;  %4556 = vst.msk [vmem:[#allocation4 + $0x1a8] sm:$0xff] %vm4502_vm3, %v15945_v57 }
  0xcb   : > { %4557 = vst.msk [vmem:[#allocation4 + $0x1b0] sm:$0xff] %vm4502_vm3, %v15945_v57  ;;  %4558 = vst.msk [vmem:[#allocation4 + $0x1b8] sm:$0xff] %vm4502_vm3, %v15945_v57 }
  0xcc   : > { %4559 = vst.msk [vmem:[#allocation4 + $0x1c0] sm:$0xff] %vm4502_vm3, %v15945_v57  ;;  %4560 = vst.msk [vmem:[#allocation4 + $0x1c8] sm:$0xff] %vm4502_vm3, %v15945_v57 }
  0xcd   : > { %4561 = vst.msk [vmem:[#allocation4 + $0x1d0] sm:$0xff] %vm4502_vm3, %v15945_v57  ;;  %4562 = vst.msk [vmem:[#allocation4 + $0x1d8] sm:$0xff] %vm4502_vm3, %v15945_v57 }
  0xce   : > { %4563 = vst.msk [vmem:[#allocation4 + $0x1e0] sm:$0xff] %vm4502_vm3, %v15945_v57  ;;  %4564 = vst.msk [vmem:[#allocation4 + $0x1e8] sm:$0xff] %vm4502_vm3, %v15945_v57 }
  0xcf   : > { %4565 = vst.msk [vmem:[#allocation4 + $0x1f0] sm:$0xff] %vm4502_vm3, %v15945_v57  ;;  %4566 = vst.msk [vmem:[#allocation4 + $0x1f8] sm:$0xff] %vm4502_vm3, %v15945_v57 }
  0xd0   : > { %4567 = vst.msk [vmem:[#allocation4 + $0x200] sm:$0xff] %vm4502_vm3, %v15945_v57  ;;  %4568 = vst.msk [vmem:[#allocation4 + $0x208] sm:$0xff] %vm4502_vm3, %v15945_v57 }
  0xd1   : > { %4569 = vst.msk [vmem:[#allocation4 + $0x210] sm:$0xff] %vm4502_vm3, %v15945_v57  ;;  %4570 = vst.msk [vmem:[#allocation4 + $0x218] sm:$0xff] %vm4502_vm3, %v15945_v57 }
  0xd2   : > { %4571 = vst.msk [vmem:[#allocation4 + $0x220] sm:$0xff] %vm4502_vm3, %v15945_v57  ;;  %4572 = vst.msk [vmem:[#allocation4 + $0x228] sm:$0xff] %vm4502_vm3, %v15945_v57 }
  0xd3   : > { %4573 = vst.msk [vmem:[#allocation4 + $0x230] sm:$0xff] %vm4502_vm3, %v15945_v57  ;;  %4574 = vst.msk [vmem:[#allocation4 + $0x238] sm:$0xff] %vm4502_vm3, %v15945_v57 }
  0xd4   : > { %7657 = vst.msk [vmem:[#allocation5] sm:$0xff] %vm4502_vm3, %v15945_v57  ;;  %7658 = vst.msk [vmem:[#allocation5 + $0x8] sm:$0xff] %vm4502_vm3, %v15945_v57 }
  0xd5   : > { %7659 = vst.msk [vmem:[#allocation5 + $0x10] sm:$0xff] %vm4502_vm3, %v15945_v57  ;;  %7660 = vst.msk [vmem:[#allocation5 + $0x18] sm:$0xff] %vm4502_vm3, %v15945_v57 }
  0xd6   : > { %7661 = vst.msk [vmem:[#allocation5 + $0x20] sm:$0xff] %vm4502_vm3, %v15945_v57  ;;  %7662 = vst.msk [vmem:[#allocation5 + $0x28] sm:$0xff] %vm4502_vm3, %v15945_v57 }
  0xd7   : > { %7663 = vst.msk [vmem:[#allocation5 + $0x30] sm:$0xff] %vm4502_vm3, %v15945_v57  ;;  %7664 = vst.msk [vmem:[#allocation5 + $0x38] sm:$0xff] %vm4502_vm3, %v15945_v57 }
  0xd8   : > { %7665 = vst.msk [vmem:[#allocation5 + $0x40] sm:$0xff] %vm4502_vm3, %v15945_v57  ;;  %7666 = vst.msk [vmem:[#allocation5 + $0x48] sm:$0xff] %vm4502_vm3, %v15945_v57 }
  0xd9   : > { %7667 = vst.msk [vmem:[#allocation5 + $0x50] sm:$0xff] %vm4502_vm3, %v15945_v57  ;;  %7668 = vst.msk [vmem:[#allocation5 + $0x58] sm:$0xff] %vm4502_vm3, %v15945_v57 }
  0xda   : > { %7669 = vst.msk [vmem:[#allocation5 + $0x60] sm:$0xff] %vm4502_vm3, %v15945_v57  ;;  %7670 = vst.msk [vmem:[#allocation5 + $0x68] sm:$0xff] %vm4502_vm3, %v15945_v57 }
  0xdb   : > { %7671 = vst.msk [vmem:[#allocation5 + $0x70] sm:$0xff] %vm4502_vm3, %v15945_v57  ;;  %7672 = vst.msk [vmem:[#allocation5 + $0x78] sm:$0xff] %vm4502_vm3, %v15945_v57 }
  0xdc   : > { %7673 = vst.msk [vmem:[#allocation5 + $0x80] sm:$0xff] %vm4502_vm3, %v15945_v57  ;;  %7674 = vst.msk [vmem:[#allocation5 + $0x88] sm:$0xff] %vm4502_vm3, %v15945_v57 }
  0xdd   : > { %7675 = vst.msk [vmem:[#allocation5 + $0x90] sm:$0xff] %vm4502_vm3, %v15945_v57  ;;  %7676 = vst.msk [vmem:[#allocation5 + $0x98] sm:$0xff] %vm4502_vm3, %v15945_v57 }
  0xde   : > { %7677 = vst.msk [vmem:[#allocation5 + $0xa0] sm:$0xff] %vm4502_vm3, %v15945_v57  ;;  %7678 = vst.msk [vmem:[#allocation5 + $0xa8] sm:$0xff] %vm4502_vm3, %v15945_v57 }
  0xdf   : > { %7679 = vst.msk [vmem:[#allocation5 + $0xb0] sm:$0xff] %vm4502_vm3, %v15945_v57  ;;  %7680 = vst.msk [vmem:[#allocation5 + $0xb8] sm:$0xff] %vm4502_vm3, %v15945_v57 }
  0xe0   : > { %7681 = vst.msk [vmem:[#allocation5 + $0xc0] sm:$0xff] %vm4502_vm3, %v15945_v57  ;;  %7682 = vst.msk [vmem:[#allocation5 + $0xc8] sm:$0xff] %vm4502_vm3, %v15945_v57 }
  0xe1   : > { %7683 = vst.msk [vmem:[#allocation5 + $0xd0] sm:$0xff] %vm4502_vm3, %v15945_v57  ;;  %7684 = vst.msk [vmem:[#allocation5 + $0xd8] sm:$0xff] %vm4502_vm3, %v15945_v57 }
  0xe2   : > { %7685 = vst.msk [vmem:[#allocation5 + $0xe0] sm:$0xff] %vm4502_vm3, %v15945_v57  ;;  %7686 = vst.msk [vmem:[#allocation5 + $0xe8] sm:$0xff] %vm4502_vm3, %v15945_v57 }
  0xe3   : > { %7687 = vst.msk [vmem:[#allocation5 + $0xf0] sm:$0xff] %vm4502_vm3, %v15945_v57  ;;  %7688 = vst.msk [vmem:[#allocation5 + $0xf8] sm:$0xff] %vm4502_vm3, %v15945_v57 }
  0xe4   : > { %7689 = vst.msk [vmem:[#allocation5 + $0x100] sm:$0xff] %vm4502_vm3, %v15945_v57  ;;  %7690 = vst.msk [vmem:[#allocation5 + $0x108] sm:$0xff] %vm4502_vm3, %v15945_v57 }
  0xe5   : > { %7691 = vst.msk [vmem:[#allocation5 + $0x110] sm:$0xff] %vm4502_vm3, %v15945_v57  ;;  %7692 = vst.msk [vmem:[#allocation5 + $0x118] sm:$0xff] %vm4502_vm3, %v15945_v57 }
  0xe6   : > { %7693 = vst.msk [vmem:[#allocation5 + $0x120] sm:$0xff] %vm4502_vm3, %v15945_v57  ;;  %7694 = vst.msk [vmem:[#allocation5 + $0x128] sm:$0xff] %vm4502_vm3, %v15945_v57 }
  0xe7   : > { %7695 = vst.msk [vmem:[#allocation5 + $0x130] sm:$0xff] %vm4502_vm3, %v15945_v57  ;;  %7696 = vst.msk [vmem:[#allocation5 + $0x138] sm:$0xff] %vm4502_vm3, %v15945_v57 }
  0xe8   : > { %7697 = vst.msk [vmem:[#allocation5 + $0x140] sm:$0xff] %vm4502_vm3, %v15945_v57  ;;  %7698 = vst.msk [vmem:[#allocation5 + $0x148] sm:$0xff] %vm4502_vm3, %v15945_v57 }
  0xe9   : > { %7699 = vst.msk [vmem:[#allocation5 + $0x150] sm:$0xff] %vm4502_vm3, %v15945_v57  ;;  %7700 = vst.msk [vmem:[#allocation5 + $0x158] sm:$0xff] %vm4502_vm3, %v15945_v57 }
  0xea   : > { %7701 = vst.msk [vmem:[#allocation5 + $0x160] sm:$0xff] %vm4502_vm3, %v15945_v57  ;;  %7702 = vst.msk [vmem:[#allocation5 + $0x168] sm:$0xff] %vm4502_vm3, %v15945_v57 }
  0xeb   : > { %7703 = vst.msk [vmem:[#allocation5 + $0x170] sm:$0xff] %vm4502_vm3, %v15945_v57  ;;  %7704 = vst.msk [vmem:[#allocation5 + $0x178] sm:$0xff] %vm4502_vm3, %v15945_v57 }
  0xec   : > { %7705 = vst.msk [vmem:[#allocation5 + $0x180] sm:$0xff] %vm4502_vm3, %v15945_v57  ;;  %7706 = vst.msk [vmem:[#allocation5 + $0x188] sm:$0xff] %vm4502_vm3, %v15945_v57 }
  0xed   : > { %7707 = vst.msk [vmem:[#allocation5 + $0x190] sm:$0xff] %vm4502_vm3, %v15945_v57  ;;  %7708 = vst.msk [vmem:[#allocation5 + $0x198] sm:$0xff] %vm4502_vm3, %v15945_v57 }
  0xee   : > { %7709 = vst.msk [vmem:[#allocation5 + $0x1a0] sm:$0xff] %vm4502_vm3, %v15945_v57  ;;  %7710 = vst.msk [vmem:[#allocation5 + $0x1a8] sm:$0xff] %vm4502_vm3, %v15945_v57 }
  0xef   : > { %7711 = vst.msk [vmem:[#allocation5 + $0x1b0] sm:$0xff] %vm4502_vm3, %v15945_v57  ;;  %7712 = vst.msk [vmem:[#allocation5 + $0x1b8] sm:$0xff] %vm4502_vm3, %v15945_v57 }
  0xf0   : > { %7713 = vst.msk [vmem:[#allocation5 + $0x1c0] sm:$0xff] %vm4502_vm3, %v15945_v57  ;;  %7714 = vst.msk [vmem:[#allocation5 + $0x1c8] sm:$0xff] %vm4502_vm3, %v15945_v57 }
  0xf1   : > { %7715 = vst.msk [vmem:[#allocation5 + $0x1d0] sm:$0xff] %vm4502_vm3, %v15945_v57  ;;  %7716 = vst.msk [vmem:[#allocation5 + $0x1d8] sm:$0xff] %vm4502_vm3, %v15945_v57 }
  0xf2   : > { %7717 = vst.msk [vmem:[#allocation5 + $0x1e0] sm:$0xff] %vm4502_vm3, %v15945_v57  ;;  %7718 = vst.msk [vmem:[#allocation5 + $0x1e8] sm:$0xff] %vm4502_vm3, %v15945_v57 }
  0xf3   : > { %7719 = vst.msk [vmem:[#allocation5 + $0x1f0] sm:$0xff] %vm4502_vm3, %v15945_v57  ;;  %7720 = vst.msk [vmem:[#allocation5 + $0x1f8] sm:$0xff] %vm4502_vm3, %v15945_v57 }
  0xf4   : > { %7721 = vst.msk [vmem:[#allocation5 + $0x200] sm:$0xff] %vm4502_vm3, %v15945_v57  ;;  %7722 = vst.msk [vmem:[#allocation5 + $0x208] sm:$0xff] %vm4502_vm3, %v15945_v57 }
  0xf5   : > { %7723 = vst.msk [vmem:[#allocation5 + $0x210] sm:$0xff] %vm4502_vm3, %v15945_v57  ;;  %7724 = vst.msk [vmem:[#allocation5 + $0x218] sm:$0xff] %vm4502_vm3, %v15945_v57 }
  0xf6   : > { %7725 = vst.msk [vmem:[#allocation5 + $0x220] sm:$0xff] %vm4502_vm3, %v15945_v57  ;;  %7726 = vst.msk [vmem:[#allocation5 + $0x228] sm:$0xff] %vm4502_vm3, %v15945_v57 }
  0xf7   : > { %7727 = vst.msk [vmem:[#allocation5 + $0x230] sm:$0xff] %vm4502_vm3, %v15945_v57  ;;  %7728 = vst.msk [vmem:[#allocation5 + $0x238] sm:$0xff] %vm4502_vm3, %v15945_v57 }
 0x132   : > { %v13522_v6 = vpop.f32.mrb[0].mxu1 }
 0x133   : > { %v804_v7 = vadd.f32 %v13522_v6, %v12095_v5  ;;  %v795_v9 = vpop.f32.mrb[1].mxu1 }
 0x134   : > { %v796_v10 = vadd.f32 %v12095_v5, %v795_v9  ;;  %v13523_v11 = vpop.f32.mrb[2].mxu1 }
 0x135   : > { %v876_v12 = vmax.f32 %v804_v7, 0.0  ;;  %v807_v13 = vadd.f32 %v13523_v11, %v12095_v5  ;;  %v798_v16 = vpop.f32.mrb[3].mxu1  ;;  %v16689_v11 = vld [vmem:[%s19246_s4] ss:$0 sm:$0xff] }
 0x136   : > { %v874_v17 = vmax.f32 %v796_v10, 0.0  ;;  %v799_v18 = vadd.f32 %v12095_v5, %v798_v16 }
 0x137   : > { %909 = vst.msk [vmem:[%s16656_s12 + $0x1b0] sm:$0xff] %vm890_vm2, %v876_v12  ;;  %v877_v22 = vmax.f32 %v807_v13, 0.0 }
 0x138   : > { %907 = vst.msk [vmem:[%s16656_s12 + $0x180] sm:$0xff] %vm890_vm2, %v874_v17  ;;  %v875_v23 = vmax.f32 %v799_v18, 0.0 }
 0x139   : > { %910 = vst.msk [vmem:[%s16656_s12 + $0x1c8] sm:$0xff] %vm890_vm2, %v877_v22 }
 0x13a   : > { %908 = vst.msk [vmem:[%s16656_s12 + $0x198] sm:$0xff] %vm890_vm2, %v875_v23  ;;  %v13526_v24 = vpop.f32.mrb[4].mxu1 }
 0x13b   : > { %v820_v28 = vadd.f32 %v13526_v24, %v12095_v5  ;;  %v811_v29 = vpop.f32.mrb[5].mxu1 }
 0x13c   : > { %v812_v30 = vadd.f32 %v12095_v5, %v811_v29  ;;  %v13527_v31 = vpop.f32.mrb[6].mxu1 }
 0x13d   : > { %v880_v32 = vmax.f32 %v820_v28, 0.0  ;;  %v823_v33 = vadd.f32 %v13527_v31, %v12095_v5  ;;  %v814_v36 = vpop.f32.mrb[7].mxu1 }
 0x13e   : > { %v878_v37 = vmax.f32 %v812_v30, 0.0  ;;  %v815_v38 = vadd.f32 %v12095_v5, %v814_v36 }
 0x13f   : > { %913 = vst.msk [vmem:[%s16656_s12 + $0x210] sm:$0xff] %vm890_vm2, %v880_v32  ;;  %v881_v40 = vmax.f32 %v823_v33, 0.0 }
 0x140   : > { %911 = vst.msk [vmem:[%s16656_s12 + $0x1e0] sm:$0xff] %vm890_vm2, %v878_v37  ;;  %v879_v41 = vmax.f32 %v815_v38, 0.0 }
 0x141   : > { %914 = vst.msk [vmem:[%s16656_s12 + $0x228] sm:$0xff] %vm890_vm2, %v881_v40 }
 0x142   : > { %912 = vst.msk [vmem:[%s16656_s12 + $0x1f8] sm:$0xff] %vm890_vm2, %v879_v41  ;;  %v13530_v43 = vpop.f32.mrb[8].mxu1 }
 0x143   : > { %v836_v44 = vadd.f32 %v13530_v43, %v12095_v5  ;;  %v827_v45 = vpop.f32.mrb[9].mxu1 }
 0x144   : > { %v828_v47 = vadd.f32 %v12095_v5, %v827_v45  ;;  %v13531_v48 = vpop.f32.mrb[10].mxu1 }
 0x145   : > { %v884_v49 = vmax.f32 %v836_v44, 0.0  ;;  %v839_v50 = vadd.f32 %v13531_v48, %v12095_v5  ;;  %v830_v51 = vpop.f32.mrb[11].mxu1 }
 0x146   : > { %v882_v52 = vmax.f32 %v828_v47, 0.0  ;;  %v831_v53 = vadd.f32 %v12095_v5, %v830_v51 }
 0x147   : > { %917 = vst.msk [vmem:[%s16656_s12 + $0x270] sm:$0xff] %vm890_vm2, %v884_v49  ;;  %v885_v54 = vmax.f32 %v839_v50, 0.0 }
 0x148   : > { %915 = vst.msk [vmem:[%s16656_s12 + $0x240] sm:$0xff] %vm890_vm2, %v882_v52  ;;  %v883_v55 = vmax.f32 %v831_v53, 0.0 }
 0x149   : > { %918 = vst.msk [vmem:[%s16656_s12 + $0x288] sm:$0xff] %vm890_vm2, %v885_v54 }
 0x14a   : > { %916 = vst.msk [vmem:[%s16656_s12 + $0x258] sm:$0xff] %vm890_vm2, %v883_v55  ;;  %v13534_v56 = vpop.f32.mrb[12].mxu1 }
 0x14b   : > { %v852_v58 = vadd.f32 %v13534_v56, %v12095_v5  ;;  %v843_v59 = vpop.f32.mrb[13].mxu1 }
 0x14c   : > { %v844_v60 = vadd.f32 %v12095_v5, %v843_v59  ;;  %v13535_v61 = vpop.f32.mrb[14].mxu1  ;;  %v15660_v59 = vld [vmem:[#allocation6 + $0x8] sm:$0xff]  }
 0x14d   : > { %v888_v62 = vmax.f32 %v852_v58, 0.0  ;;  %v855_v63 = vadd.f32 %v13535_v61, %v12095_v5  ;;  %v846_v0 = vpop.f32.mrb[15].mxu1 }
 0x14e   : > { %v886_v6 = vmax.f32 %v844_v60, 0.0  ;;  %v847_v7 = vadd.f32 %v12095_v5, %v846_v0 }
 0x14f   : > { %921 = vst.msk [vmem:[%s16656_s12 + $0x2d0] sm:$0xff] %vm890_vm2, %v888_v62  ;;  %v889_v9 = vmax.f32 %v855_v63, 0.0 }
 0x150   : > { %919 = vst.msk [vmem:[%s16656_s12 + $0x2a0] sm:$0xff] %vm890_vm2, %v886_v6  ;;  %v887_v10 = vmax.f32 %v847_v7, 0.0 }
 0x151   : > { %922 = vst.msk [vmem:[%s16656_s12 + $0x2e8] sm:$0xff] %vm890_vm2, %v889_v9  ;;  %v15664_v9 = vld [vmem:[#allocation6 + $0x88] sm:$0xff]  }
 0x152   : > { %920 = vst.msk [vmem:[%s16656_s12 + $0x2b8] sm:$0xff] %vm890_vm2, %v887_v10  ;;  %v13540_v12 = vpop.f32.mrb[16].mxu1 }
 0x153   : > { %v977_v13 = vadd.f32 %v13540_v12, %v16689_v11  ;;  %v968_v16 = vpop.f32.mrb[17].mxu1 }
 0x154   : > { %v969_v5 = vadd.f32 %v16689_v11, %v968_v16  ;;  %v13541_v17 = vpop.f32.mrb[18].mxu1 }
 0x155   : > { %v1097_v18 = vmax.f32 %v977_v13, 0.0  ;;  %v980_v22 = vadd.f32 %v13541_v17, %v16689_v11  ;;  %v971_v23 = vpop.f32.mrb[19].mxu1  ;;  %v15661_v17 = vld [vmem:[#allocation6 + $0x10] sm:$0xff]  }
 0x156   : > { %v1095_v24 = vmax.f32 %v969_v5, 0.0  ;;  %v972_v28 = vadd.f32 %v16689_v11, %v971_v23 }
 0x157   : > { %1202 = vst.msk [vmem:[#allocation3 + $0x48] sm:$0xff] %vm890_vm2, %v1097_v18  ;;  %v1098_v29 = vmax.f32 %v980_v22, 0.0 }
 0x158   : > { %1200 = vst.msk [vmem:[#allocation3 + $0x28] sm:$0xff] %vm890_vm2, %v1095_v24  ;;  %v1096_v30 = vmax.f32 %v972_v28, 0.0 }
 0x159   : > { %1203 = vst.msk [vmem:[#allocation3 + $0x50] sm:$0xff] %vm890_vm2, %v1098_v29 }
 0x15a   : > { %1201 = vst.msk [vmem:[#allocation3 + $0x30] sm:$0xff] %vm890_vm2, %v1096_v30  ;;  %v13544_v31 = vpop.f32.mrb[20].mxu1 }
 0x15b   : > { %v993_v32 = vadd.f32 %v13544_v31, %v16689_v11  ;;  %v984_v33 = vpop.f32.mrb[21].mxu1 }
 0x15c   : > { %v985_v36 = vadd.f32 %v16689_v11, %v984_v33  ;;  %v13545_v37 = vpop.f32.mrb[22].mxu1 }
 0x15d   : > { %v1101_v38 = vmax.f32 %v993_v32, 0.0  ;;  %v996_v40 = vadd.f32 %v13545_v37, %v16689_v11  ;;  %v987_v41 = vpop.f32.mrb[23].mxu1 }
 0x15e   : > { %v1099_v43 = vmax.f32 %v985_v36, 0.0  ;;  %v988_v44 = vadd.f32 %v16689_v11, %v987_v41  ;;  %v1292_v58 = vld [vmem:[#allocation3 + $0x48] sm:$0xff]  ;;  %v15662_v36 = vld [vmem:[#allocation6 + $0x18] sm:$0xff]  }
 0x15f   : > { %1206 = vst.msk [vmem:[#allocation3 + $0x88] sm:$0xff] %vm890_vm2, %v1101_v38  ;;  %v1102_v45 = vmax.f32 %v996_v40, 0.0  ;;  %v1290_v48 = vld [vmem:[#allocation3 + $0x28] sm:$0xff] }
 0x160   : > { %1204 = vst.msk [vmem:[#allocation3 + $0x68] sm:$0xff] %vm890_vm2, %v1099_v43  ;;  %v1100_v47 = vmax.f32 %v988_v44, 0.0  ;;  %v2133_v49 = vld [vmem:[#allocation3 + $0x27] sm:$0xff]  ;;  %v1293_v50 = vld [vmem:[#allocation3 + $0x50] sm:$0xff] }
 0x161   : > { %1207 = vst.msk [vmem:[#allocation3 + $0x90] sm:$0xff] %vm890_vm2, %v1102_v45  ;;  %v1291_v51 = vld [vmem:[#allocation3 + $0x30] sm:$0xff]  ;;  %v16716_v62 = vpack.c.bf16 %v1293_v50, %v1292_v58  ;;  %v2135_v63 = vld [vmem:[#allocation3 + $0x47] sm:$0xff] }
 0x162   : > { %v2134_v52 = vld [vmem:[#allocation3 + $0x2f] sm:$0xff]  ;;  %1205 = vst.msk [vmem:[#allocation3 + $0x70] sm:$0xff] %vm890_vm2, %v1100_v47  ;;  %v13548_v54 = vpop.f32.mrb[24].mxu1  ;;  %v16711_v55 = vpack.c.bf16 %v1291_v51, %v1290_v48  ;;  %v15666_v51 = vld [vmem:[#allocation6 + $0x98] sm:$0xff]  }
 0x163   : > { %v2136_v53 = vld [vmem:[#allocation3 + $0x4f] sm:$0xff]  ;;  %v16713_v56 = vpack.c.bf16 %v2134_v52, %v2133_v49  ;;  %v1009_v60 = vadd.f32 %v13548_v54, %v16689_v11  ;;  %v1000_v61 = vpop.f32.mrb[25].mxu1  ;;  %v16757_v54 = vld [vmem:[#allocation6 + $0x40] sm:$0xff]  }
 0x164   : > { %v1001_v0 = vadd.f32 %v16689_v11, %v1000_v61  ;;  %v13549_v6 = vpop.f32.mrb[26].mxu1  ;;  %13579 = vmatmul.mubr.msk.bf16.vlgmr.msra.gmra.mrb[48].mxu1 %vm890_vm2, %v16711_v55  ;;  %v16723_v7 = vpack.c.bf16 %v2136_v53, %v2135_v63  ;;  %v15665_v43 = vld [vmem:[#allocation6 + $0x90] sm:$0xff]  }
 0x165   : > { %13698 = vmatprep.mubr.msk.bf16.mxu0 %vm890_vm2, %v16713_v56  ;;  %v1105_v10 = vmax.f32 %v1009_v60, 0.0  ;;  %v1012_v12 = vadd.f32 %v13549_v6, %v16689_v11  ;;  %v1003_v13 = vpop.f32.mrb[27].mxu1  ;;  %13582 = vmatprep.mubr.msk.bf16.mxu1 %vm890_vm2, %v16716_v62 }
 0x166   : > { %13611 = vmatpush3.bf16.msra.mxu1 %v16644_v1  ;;  %v1103_v16 = vmax.f32 %v1001_v0, 0.0  ;;  %v1004_v5 = vadd.f32 %v16689_v11, %v1003_v13  ;;  %13699 = vmatmul.mubr.msk.bf16.vlgmr.msra.gmra.mrb[16].mxu0 %vm890_vm2, %v16723_v7  ;;  %v2139_v41 = vld [vmem:[#allocation3 + $0x87] sm:$0xff] }
 0x167   : > { %13612 = vmatprep.subr.bf16.mxu1 %v15660_v59  ;;  %1210 = vst.msk [vmem:[#allocation3 + $0xc8] sm:$0xff] %vm890_vm2, %v1105_v10  ;;  %v1106_v18 = vmax.f32 %v1012_v12, 0.0  ;;  %13731 = vmatpush3.bf16.msra.mxu0 %v16647_v4  ;;  %v1294_v23 = vld [vmem:[#allocation3 + $0x68] sm:$0xff] }
 0x168   : > { %1208 = vst.msk [vmem:[#allocation3 + $0xa8] sm:$0xff] %vm890_vm2, %v1103_v16  ;;  %v1104_v22 = vmax.f32 %v1004_v5, 0.0  ;;  %v2137_v24 = vld [vmem:[#allocation3 + $0x67] sm:$0xff]  ;;  %v1297_v28 = vld [vmem:[#allocation3 + $0x90] sm:$0xff]  ;;  %13732 = vmatprep.subr.bf16.mxu0 %v15664_v9 }
 0x169   : > { %1211 = vst.msk [vmem:[#allocation3 + $0xd0] sm:$0xff] %vm890_vm2, %v1106_v18  ;;  %v1295_v1 = vld [vmem:[#allocation3 + $0x70] sm:$0xff]  ;;  %v1296_v4 = vld [vmem:[#allocation3 + $0x88] sm:$0xff]  ;;  %v16768_v5 = vld [vmem:[#allocation6 + $0xa0] sm:$0xff]  }
 0x16a   : > { %v2138_v29 = vld [vmem:[#allocation3 + $0x6f] sm:$0xff]  ;;  %13613 = vmatpush3.bf16.msra.mxu1 %v15660_v59  ;;  %1209 = vst.msk [vmem:[#allocation3 + $0xb0] sm:$0xff] %vm890_vm2, %v1104_v22  ;;  %v13552_v31 = vpop.f32.mrb[28].mxu1  ;;  %v16737_v32 = vpack.c.bf16 %v1295_v1, %v1294_v23  ;;  %v16742_v40 = vpack.c.bf16 %v1297_v28, %v1296_v4 }
 0x16b   : > { %v2140_v30 = vld [vmem:[#allocation3 + $0x8f] sm:$0xff]  ;;  %v16739_v33 = vpack.c.bf16 %v2138_v29, %v2137_v24  ;;  %13614 = vmatprep.subr.bf16.mxu1 %v15661_v17  ;;  %v1025_v37 = vadd.f32 %v13552_v31, %v16689_v11  ;;  %v1016_v38 = vpop.f32.mrb[29].mxu1  ;;  %13733 = vmatpush3.bf16.msra.mxu0 %v15664_v9 }
 0x16c   : > { %v1017_v44 = vadd.f32 %v16689_v11, %v1016_v38  ;;  %v13553_v45 = vpop.f32.mrb[30].mxu1  ;;  %13583 = vmatmul.mubr.msk.bf16.gmra.mrb[52].mxu1 %vm890_vm2, %v16737_v32  ;;  %v16749_v47 = vpack.c.bf16 %v2140_v30, %v2139_v41  ;;  %13734 = vmatprep.subr.bf16.mxu0 %v15665_v43 }
 0x16d   : > { %13702 = vmatprep.mubr.msk.bf16.mxu0 %vm890_vm2, %v16739_v33  ;;  %v1109_v48 = vmax.f32 %v1025_v37, 0.0  ;;  %v1028_v49 = vadd.f32 %v13553_v45, %v16689_v11  ;;  %v1019_v50 = vpop.f32.mrb[31].mxu1  ;;  %13586 = vmatprep.mubr.msk.bf16.mxu1 %vm890_vm2, %v16742_v40 }
 0x16e   : > { %13615 = vmatpush3.bf16.msra.mxu1 %v15661_v17  ;;  %v1107_v52 = vmax.f32 %v1017_v44, 0.0  ;;  %v1020_v53 = vadd.f32 %v16689_v11, %v1019_v50  ;;  %13703 = vmatmul.mubr.msk.bf16.gmra.mrb[20].mxu0 %vm890_vm2, %v16749_v47  ;;  %v1300_v16 = vld [vmem:[#allocation3 + $0xc8] sm:$0xff] }
 0x16f   : > { %13616 = vmatprep.subr.bf16.mxu1 %v15662_v36  ;;  %1214 = vst.msk [vmem:[#allocation3 + $0x108] sm:$0xff] %vm890_vm2, %v1109_v48  ;;  %v1110_v58 = vmax.f32 %v1028_v49, 0.0  ;;  %v1298_v60 = vld [vmem:[#allocation3 + $0xa8] sm:$0xff]  ;;  %13735 = vmatpush3.bf16.msra.mxu0 %v15665_v43 }
 0x170   : > { %1212 = vst.msk [vmem:[#allocation3 + $0xe8] sm:$0xff] %vm890_vm2, %v1107_v52  ;;  %v1108_v59 = vmax.f32 %v1020_v53, 0.0  ;;  %v2141_v61 = vld [vmem:[#allocation3 + $0xa7] sm:$0xff]  ;;  %v1301_v63 = vld [vmem:[#allocation3 + $0xd0] sm:$0xff]  ;;  %13736 = vmatprep.subr.bf16.mxu0 %v15666_v51 }
 0x171   : > { %1215 = vst.msk [vmem:[#allocation3 + $0x110] sm:$0xff] %vm890_vm2, %v1110_v58  ;;  %v1299_v0 = vld [vmem:[#allocation3 + $0xb0] sm:$0xff]  ;;  %v16771_v22 = vpack.c.bf16 %v1301_v63, %v1300_v16  ;;  %v2143_v23 = vld [vmem:[#allocation3 + $0xc7] sm:$0xff] }
 0x172   : > { %v2142_v6 = vld [vmem:[#allocation3 + $0xaf] sm:$0xff]  ;;  %13617 = vmatpush3.bf16.msra.mxu1 %v15662_v36  ;;  %1213 = vst.msk [vmem:[#allocation3 + $0xf0] sm:$0xff] %vm890_vm2, %v1108_v59  ;;  %v13556_v10 = vpop.f32.mrb[32].mxu1  ;;  %v16763_v12 = vpack.c.bf16 %v1299_v0, %v1298_v60 }
 0x173   : > { %v2144_v9 = vld [vmem:[#allocation3 + $0xcf] sm:$0xff]  ;;  %v16765_v13 = vpack.c.bf16 %v2142_v6, %v2141_v61  ;;  %13650 = vmatprep.subr.bf16.mxu1 %v16757_v54  ;;  %v1041_v17 = vadd.f32 %v13556_v10, %v16689_v11  ;;  %v1032_v18 = vpop.f32.mrb[33].mxu1  ;;  %13737 = vmatpush3.bf16.msra.mxu0 %v15666_v51 }
 0x174   : > { %v1033_v24 = vadd.f32 %v16689_v11, %v1032_v18  ;;  %v13557_v28 = vpop.f32.mrb[34].mxu1  ;;  %13587 = vmatmul.mubr.msk.bf16.gmra.mrb[56].mxu1 %vm890_vm2, %v16763_v12  ;;  %v16778_v1 = vpack.c.bf16 %v2144_v9, %v2143_v23  ;;  %13770 = vmatprep.subr.bf16.mxu0 %v16768_v5 }
 0x175   : > { %13706 = vmatprep.mubr.msk.bf16.mxu0 %vm890_vm2, %v16765_v13  ;;  %v1113_v29 = vmax.f32 %v1041_v17, 0.0  ;;  %v1044_v30 = vadd.f32 %v13557_v28, %v16689_v11  ;;  %v1035_v31 = vpop.f32.mrb[35].mxu1  ;;  %13590 = vmatprep.mubr.msk.bf16.mxu1 %vm890_vm2, %v16771_v22 }
 0x176   : > { %v1111_v4 = vmax.f32 %v1033_v24, 0.0  ;;  %v1036_v36 = vadd.f32 %v16689_v11, %v1035_v31  ;;  %13707 = vmatmul.mubr.msk.bf16.gmra.mrb[24].mxu0 %vm890_vm2, %v16778_v1  ;;  %v1304_v53 = vld [vmem:[#allocation3 + $0x108] sm:$0xff] }
 0x177   : > { %1218 = vst.msk [vmem:[#allocation3 + $0x148] sm:$0xff] %vm890_vm2, %v1113_v29  ;;  %v1114_v37 = vmax.f32 %v1044_v30, 0.0  ;;  %v1302_v41 = vld [vmem:[#allocation3 + $0xe8] sm:$0xff] }
 0x178   : > { %1216 = vst.msk [vmem:[#allocation3 + $0x128] sm:$0xff] %vm890_vm2, %v1111_v4  ;;  %v1112_v38 = vmax.f32 %v1036_v36, 0.0  ;;  %v2145_v43 = vld [vmem:[#allocation3 + $0xe7] sm:$0xff]  ;;  %v1305_v44 = vld [vmem:[#allocation3 + $0x110] sm:$0xff] }
 0x179   : > { %1219 = vst.msk [vmem:[#allocation3 + $0x150] sm:$0xff] %vm890_vm2, %v1114_v37  ;;  %v1303_v45 = vld [vmem:[#allocation3 + $0xf0] sm:$0xff]  ;;  %v16796_v60 = vpack.c.bf16 %v1305_v44, %v1304_v53  ;;  %v2147_v61 = vld [vmem:[#allocation3 + $0x107] sm:$0xff] }
 0x17a   : > { %v2146_v48 = vld [vmem:[#allocation3 + $0xef] sm:$0xff]  ;;  %1217 = vst.msk [vmem:[#allocation3 + $0x130] sm:$0xff] %vm890_vm2, %v1112_v38  ;;  %v13560_v50 = vpop.f32.mrb[36].mxu1  ;;  %v16791_v51 = vpack.c.bf16 %v1303_v45, %v1302_v41 }
 0x17b   : > { %v2148_v49 = vld [vmem:[#allocation3 + $0x10f] sm:$0xff]  ;;  %v16793_v52 = vpack.c.bf16 %v2146_v48, %v2145_v43  ;;  %v1057_v58 = vadd.f32 %v13560_v50, %v16689_v11  ;;  %v1048_v59 = vpop.f32.mrb[37].mxu1 }
 0x17c   : > { %v1049_v63 = vadd.f32 %v16689_v11, %v1048_v59  ;;  %v13561_v0 = vpop.f32.mrb[38].mxu1  ;;  %13591 = vmatmul.mubr.msk.bf16.gmra.mrb[60].mxu1 %vm890_vm2, %v16791_v51  ;;  %v16803_v6 = vpack.c.bf16 %v2148_v49, %v2147_v61 }
 0x17d   : > { %13710 = vmatprep.mubr.msk.bf16.mxu0 %vm890_vm2, %v16793_v52  ;;  %v1117_v9 = vmax.f32 %v1057_v58, 0.0  ;;  %v1060_v10 = vadd.f32 %v13561_v0, %v16689_v11  ;;  %v1051_v16 = vpop.f32.mrb[39].mxu1  ;;  %13594 = vmatprep.mubr.msk.bf16.mxu1 %vm890_vm2, %v16796_v60 }
 0x17e   : > { %v1115_v17 = vmax.f32 %v1049_v63, 0.0  ;;  %v1052_v18 = vadd.f32 %v16689_v11, %v1051_v16  ;;  %13711 = vmatmul.mubr.msk.bf16.gmra.mrb[28].mxu0 %vm890_vm2, %v16803_v6  ;;  %v1308_v43 = vld [vmem:[#allocation3 + $0x148] sm:$0xff] }
 0x17f   : > { %1222 = vst.msk [vmem:[#allocation3 + $0x188] sm:$0xff] %vm890_vm2, %v1117_v9  ;;  %v1118_v23 = vmax.f32 %v1060_v10, 0.0  ;;  %v1306_v28 = vld [vmem:[#allocation3 + $0x128] sm:$0xff] }
 0x180   : > { %1220 = vst.msk [vmem:[#allocation3 + $0x168] sm:$0xff] %vm890_vm2, %v1115_v17  ;;  %v1116_v24 = vmax.f32 %v1052_v18, 0.0  ;;  %v2149_v29 = vld [vmem:[#allocation3 + $0x127] sm:$0xff]  ;;  %v1309_v30 = vld [vmem:[#allocation3 + $0x150] sm:$0xff] }
 0x181   : > { %1223 = vst.msk [vmem:[#allocation3 + $0x190] sm:$0xff] %vm890_vm2, %v1118_v23  ;;  %v1307_v31 = vld [vmem:[#allocation3 + $0x130] sm:$0xff]  ;;  %v16820_v48 = vpack.c.bf16 %v1309_v30, %v1308_v43  ;;  %v2151_v49 = vld [vmem:[#allocation3 + $0x147] sm:$0xff] }
 0x182   : > { %v2150_v4 = vld [vmem:[#allocation3 + $0x12f] sm:$0xff]  ;;  %1221 = vst.msk [vmem:[#allocation3 + $0x170] sm:$0xff] %vm890_vm2, %v1116_v24  ;;  %v13564_v37 = vpop.f32.mrb[40].mxu1  ;;  %v16815_v38 = vpack.c.bf16 %v1307_v31, %v1306_v28 }
 0x183   : > { %v2152_v36 = vld [vmem:[#allocation3 + $0x14f] sm:$0xff]  ;;  %v16817_v41 = vpack.c.bf16 %v2150_v4, %v2149_v29  ;;  %v1073_v44 = vadd.f32 %v13564_v37, %v16689_v11  ;;  %v1064_v45 = vpop.f32.mrb[41].mxu1 }
 0x184   : > { %v1065_v50 = vadd.f32 %v16689_v11, %v1064_v45  ;;  %v13565_v53 = vpop.f32.mrb[42].mxu1  ;;  %13595 = vmatmul.mubr.msk.bf16.gmra.mrb[64].mxu1 %vm890_vm2, %v16815_v38  ;;  %v16827_v58 = vpack.c.bf16 %v2152_v36, %v2151_v49 }
 0x185   : > { %13714 = vmatprep.mubr.msk.bf16.mxu0 %vm890_vm2, %v16817_v41  ;;  %v1121_v59 = vmax.f32 %v1073_v44, 0.0  ;;  %v1076_v61 = vadd.f32 %v13565_v53, %v16689_v11  ;;  %v1067_v63 = vpop.f32.mrb[43].mxu1  ;;  %13598 = vmatprep.mubr.msk.bf16.mxu1 %vm890_vm2, %v16820_v48 }
 0x186   : > { %v1119_v0 = vmax.f32 %v1065_v50, 0.0  ;;  %v1068_v9 = vadd.f32 %v16689_v11, %v1067_v63  ;;  %13715 = vmatmul.mubr.msk.bf16.gmra.mrb[32].mxu0 %vm890_vm2, %v16827_v58  ;;  %v1312_v36 = vld [vmem:[#allocation3 + $0x188] sm:$0xff] }
 0x187   : > { %1226 = vst.msk [vmem:[#allocation3 + $0x1c8] sm:$0xff] %vm890_vm2, %v1121_v59  ;;  %v1122_v10 = vmax.f32 %v1076_v61, 0.0  ;;  %v1310_v17 = vld [vmem:[#allocation3 + $0x168] sm:$0xff] }
 0x188   : > { %1224 = vst.msk [vmem:[#allocation3 + $0x1a8] sm:$0xff] %vm890_vm2, %v1119_v0  ;;  %v1120_v16 = vmax.f32 %v1068_v9, 0.0  ;;  %v2153_v18 = vld [vmem:[#allocation3 + $0x167] sm:$0xff]  ;;  %v1313_v23 = vld [vmem:[#allocation3 + $0x190] sm:$0xff] }
 0x189   : > { %1227 = vst.msk [vmem:[#allocation3 + $0x1d0] sm:$0xff] %vm890_vm2, %v1122_v10  ;;  %v1311_v24 = vld [vmem:[#allocation3 + $0x170] sm:$0xff]  ;;  %v16844_v44 = vpack.c.bf16 %v1313_v23, %v1312_v36  ;;  %v2155_v45 = vld [vmem:[#allocation3 + $0x187] sm:$0xff] }
 0x18a   : > { %v2154_v28 = vld [vmem:[#allocation3 + $0x16f] sm:$0xff]  ;;  %1225 = vst.msk [vmem:[#allocation3 + $0x1b0] sm:$0xff] %vm890_vm2, %v1120_v16  ;;  %v13568_v30 = vpop.f32.mrb[44].mxu1  ;;  %v16839_v31 = vpack.c.bf16 %v1311_v24, %v1310_v17 }
 0x18b   : > { %v2156_v29 = vld [vmem:[#allocation3 + $0x18f] sm:$0xff]  ;;  %v16841_v4 = vpack.c.bf16 %v2154_v28, %v2153_v18  ;;  %v1089_v37 = vadd.f32 %v13568_v30, %v16689_v11  ;;  %v1080_v43 = vpop.f32.mrb[45].mxu1 }
 0x18c   : > { %v1081_v49 = vadd.f32 %v16689_v11, %v1080_v43  ;;  %v13569_v50 = vpop.f32.mrb[46].mxu1  ;;  %13599 = vmatmul.mubr.msk.bf16.gmra.mrb[68].mxu1 %vm890_vm2, %v16839_v31  ;;  %v16851_v53 = vpack.c.bf16 %v2156_v29, %v2155_v45 }
 0x18d   : > { %13718 = vmatprep.mubr.msk.bf16.mxu0 %vm890_vm2, %v16841_v4  ;;  %v1125_v59 = vmax.f32 %v1089_v37, 0.0  ;;  %v1092_v61 = vadd.f32 %v13569_v50, %v16689_v11  ;;  %v1083_v63 = vpop.f32.mrb[47].mxu1  ;;  %13602 = vmatprep.mubr.msk.bf16.mxu1 %vm890_vm2, %v16844_v44  ;;  %v1233_v50 = vld [vmem:[#allocation3 + $0xf] sm:$0xff] }
 0x18e   : > { %v1123_v0 = vmax.f32 %v1081_v49, 0.0  ;;  %v1084_v9 = vadd.f32 %v16689_v11, %v1083_v63  ;;  %13719 = vmatmul.mubr.msk.bf16.gmra.mrb[36].mxu0 %vm890_vm2, %v16851_v53  ;;  %v1316_v36 = vld [vmem:[#allocation3 + $0x1c8] sm:$0xff] }
 0x18f   : > { %1230 = vst.msk [vmem:[#allocation3 + $0x208] sm:$0xff] %vm890_vm2, %v1125_v59  ;;  %v1126_v10 = vmax.f32 %v1092_v61, 0.0  ;;  %v1314_v17 = vld [vmem:[#allocation3 + $0x1a8] sm:$0xff] }
 0x190   : > { %1228 = vst.msk [vmem:[#allocation3 + $0x1e8] sm:$0xff] %vm890_vm2, %v1123_v0  ;;  %v1124_v16 = vmax.f32 %v1084_v9, 0.0  ;;  %v2157_v18 = vld [vmem:[#allocation3 + $0x1a7] sm:$0xff]  ;;  %v1317_v23 = vld [vmem:[#allocation3 + $0x1d0] sm:$0xff] }
 0x191   : > { %1231 = vst.msk [vmem:[#allocation3 + $0x210] sm:$0xff] %vm890_vm2, %v1126_v10  ;;  %v1315_v24 = vld [vmem:[#allocation3 + $0x1b0] sm:$0xff]  ;;  %v16867_v37 = vpack.c.bf16 %v1317_v23, %v1316_v36  ;;  %v2159_v43 = vld [vmem:[#allocation3 + $0x1c7] sm:$0xff] }
 0x192   : > { %v2158_v28 = vld [vmem:[#allocation3 + $0x1af] sm:$0xff]  ;;  %1229 = vst.msk [vmem:[#allocation3 + $0x1f0] sm:$0xff] %vm890_vm2, %v1124_v16  ;;  %v16863_v11 = vpack.c.bf16 %v1315_v24, %v1314_v17  ;;  %v1232_v49 = vld [vmem:[#allocation3 + $0x7] sm:$0xff] }
 0x193   : > { %v2160_v29 = vld [vmem:[#allocation3 + $0x1cf] sm:$0xff]  ;;  %v16865_v30 = vpack.c.bf16 %v2158_v28, %v2157_v18  ;;  %v1264_v10 = vpack.c.bf16 %v1233_v50, %v1232_v49 }
 0x194   : > { %13603 = vmatmul.mubr.msk.bf16.gmra.mrb[72].mxu1 %vm890_vm2, %v16863_v11  ;;  %v16873_v45 = vpack.c.bf16 %v2160_v29, %v2159_v43  ;;  %v15668_v24 = vld [vmem:[#allocation6 + $0x48] sm:$0xff]   ;;  %v15669_v29 = vld [vmem:[#allocation6 + $0x50] sm:$0xff]  }
 0x195   : > { %13722 = vmatprep.mubr.msk.bf16.mxu0 %vm890_vm2, %v16865_v30  ;;  %13606 = vmatprep.mubr.msk.bf16.mxu1 %vm890_vm2, %v16867_v37  ;;  %v15672_v28 = vld [vmem:[#allocation6 + $0xa8] sm:$0xff]  }
 0x196   : > { %13723 = vmatmul.mubr.msk.bf16.gmra.mrb[40].mxu0 %vm890_vm2, %v16873_v45  ;;  %v2163_v18 = vld [vmem:[#allocation3 + $0x207] sm:$0xff] }
 0x197   : > { %v1318_v59 = vld [vmem:[#allocation3 + $0x1e8] sm:$0xff] }
 0x198   : > { %v2161_v61 = vld [vmem:[#allocation3 + $0x1e7] sm:$0xff]  ;;  %v2164_v9 = vld [vmem:[#allocation3 + $0x20f] sm:$0xff] }
 0x199   : > { %v1319_v63 = vld [vmem:[#allocation3 + $0x1f0] sm:$0xff]  ;;  %v16887_v23 = vpack.c.bf16 %v2164_v9, %v2163_v18  ;;  %v15676_v43 = vld [vmem:[#allocation6 + $0xc8] sm:$0xff]  }
 0x19a   : > { %v2162_v0 = vld [vmem:[#allocation3 + $0x1ef] sm:$0xff]  ;;  %v16879_v16 = vpack.c.bf16 %v1319_v63, %v1318_v59 }
 0x19b   : > { %v16881_v17 = vpack.c.bf16 %v2162_v0, %v2161_v61  ;;  %v1819_v50 = vld [vmem:[#allocation3 + $0x89] sm:$0xff]  ;;  %v1820_v59 = vld [vmem:[#allocation3 + $0x91] sm:$0xff] }
 0x19c   : > { %13607 = vmatmul.mubr.msk.bf16.gmra.mrb[76].mxu1 %vm890_vm2, %v16879_v16  ;;  %v15677_v61 = vld [vmem:[#allocation6 + $0xd0] sm:$0xff]   ;;  %v16976_v9 = vpack.c.bf16 %v1820_v59, %v1819_v50 }
 0x19d   : > { %13726 = vmatprep.mubr.msk.bf16.mxu0 %vm890_vm2, %v16881_v17  ;;  %13618 = vmatprep.mubr.msk.bf16.mxu1 %vm890_vm2, %v1264_v10  ;;  %v2785_v63 = vld [vmem:[#allocation3 + $0xa9] sm:$0xff]  ;;  %v2786_v0 = vld [vmem:[#allocation3 + $0xb1] sm:$0xff] }
 0x19e   : > { %13727 = vmatmul.mubr.msk.bf16.gmra.mrb[44].mxu0 %vm890_vm2, %v16887_v23  ;;  %v15678_v10 = vld [vmem:[#allocation6 + $0xd8] sm:$0xff]   ;;  %v16982_v18 = vpack.c.bf16 %v2786_v0, %v2785_v63  ;;  %v1839_v63 = vld [vmem:[#allocation3 + $0x1c9] sm:$0xff] }
 0x19f   : > { %13738 = vmatprep.mubr.msk.bf16.mxu0 %vm890_vm2, %v16711_v55  ;;  %v15673_v55 = vld [vmem:[#allocation6 + $0xb0] sm:$0xff]  }
 0x1a0   : > { %v2802_v50 = vld [vmem:[#allocation3 + $0x1b1] sm:$0xff] }
 0x1a1   : > { %v1840_v0 = vld [vmem:[#allocation3 + $0x1d1] sm:$0xff] }
 0x1a4   : > { %13619 = vmatmul.mubr.msk.bf16.vlgmr.msra.gmra.mrb[48].mxu1 %vm890_vm2, %v16713_v56  ;;  %v15670_v56 = vld [vmem:[#allocation6 + $0x58] sm:$0xff]  }
 0x1a5   : > { %13622 = vmatprep.mubr.msk.bf16.mxu1 %vm890_vm2, %v16723_v7  ;;  %13651 = vmatpush3.bf16.msra.mxu1 %v16757_v54  ;;  %v15674_v7 = vld [vmem:[#allocation6 + $0xb8] sm:$0xff]  }
 0x1a6   : > { %13739 = vmatmul.mubr.msk.bf16.vlgmr.msra.gmra.mrb[16].mxu0 %vm890_vm2, %v16716_v62  ;;  %13652 = vmatprep.subr.bf16.mxu1 %v15668_v24  ;;  %v4298_v62 = vld [vmem:[%s19249_s7] sm:$0x3] }
 0x1a7   : > { %13742 = vmatprep.mubr.msk.bf16.mxu0 %vm890_vm2, %v16737_v32  ;;  %13771 = vmatpush3.bf16.msra.mxu0 %v16768_v5  ;;  %v15675_v32 = vld [vmem:[#allocation6 + $0xc0] sm:$0xff]   ;;  %v2778_v5 = vld [vmem:[#allocation3 + $0x31] sm:$0xff] }
 0x1a8   : > { %13772 = vmatprep.subr.bf16.mxu0 %v15672_v28 }
 0x1a9   : > { %13653 = vmatpush3.bf16.msra.mxu1 %v15668_v24  ;;  %v1823_v24 = vld [vmem:[#allocation3 + $0xc9] sm:$0xff] }
 0x1aa   : > { %13654 = vmatprep.subr.bf16.mxu1 %v15669_v29 }
 0x1ab   : > { %13773 = vmatpush3.bf16.msra.mxu0 %v15672_v28  ;;  %v1824_v28 = vld [vmem:[#allocation3 + $0xd1] sm:$0xff] }
 0x1ac   : > { %13623 = vmatmul.mubr.msk.bf16.gmra.mrb[52].mxu1 %vm890_vm2, %v16739_v33  ;;  %13774 = vmatprep.subr.bf16.mxu0 %v15673_v55  ;;  %v1811_v33 = vld [vmem:[#allocation3 + $0x9] sm:$0xff] }
 0x1ad   : > { %13626 = vmatprep.mubr.msk.bf16.mxu1 %vm890_vm2, %v16749_v47  ;;  %13655 = vmatpush3.bf16.msra.mxu1 %v15669_v29  ;;  %v2486_v47 = vld [vmem:[#allocation3 + $0x210] sm:$0xff]  ;;  %v16988_v29 = vld [vmem:[#allocation6 + $0xe0] sm:$0xff]  }
 0x1ae   : > { %13743 = vmatmul.mubr.msk.bf16.gmra.mrb[20].mxu0 %vm890_vm2, %v16742_v40  ;;  %13656 = vmatprep.subr.bf16.mxu1 %v15670_v56  ;;  %v1812_v40 = vld [vmem:[#allocation3 + $0x11] sm:$0xff] }
 0x1af   : > { %13746 = vmatprep.mubr.msk.bf16.mxu0 %vm890_vm2, %v16763_v12  ;;  %13775 = vmatpush3.bf16.msra.mxu0 %v15673_v55  ;;  %v1843_v54 = vpack.c.bf16 %v1812_v40, %v1811_v33  ;;  %v2777_v12 = vld [vmem:[#allocation3 + $0x29] sm:$0xff]  ;;  %v1828_v33 = vld [vmem:[#allocation3 + $0x111] sm:$0xff] }
 0x1b0   : > { %13776 = vmatprep.subr.bf16.mxu0 %v15674_v7  ;;  %v2789_v55 = vld [vmem:[#allocation3 + $0xe9] sm:$0xff] }
 0x1b1   : > { %13657 = vmatpush3.bf16.msra.mxu1 %v15670_v56  ;;  %v2790_v56 = vld [vmem:[#allocation3 + $0xf1] sm:$0xff]  ;;  %v2793_v40 = vld [vmem:[#allocation3 + $0x129] sm:$0xff] }
 0x1b2   : > { %15563 = vmatprep.subr.msk.bf16.mxu1 %vm693_vm1, %v4298_v62 }
 0x1b3   : > { %13777 = vmatpush3.bf16.msra.mxu0 %v15674_v7  ;;  %v16990_v7 = vpack.c.bf16 %v1824_v28, %v1823_v24  ;;  %v2806_v24 = vld [vmem:[#allocation3 + $0x1f1] sm:$0xff]  ;;  %v17039_v28 = vpack.c.bf16 %v1840_v0, %v1839_v63 }
 0x1b4   : > { %13627 = vmatmul.mubr.msk.bf16.gmra.mrb[56].mxu1 %vm890_vm2, %v16765_v13  ;;  %13810 = vmatprep.subr.bf16.mxu0 %v15675_v32  ;;  %v3435_v63 = vld [vmem:[#allocation3 + $0x110] sm:$0xff] }
 0x1b5   : > { %13630 = vmatprep.mubr.msk.bf16.mxu1 %vm890_vm2, %v16778_v1  ;;  %v15691_v0 = vld [vmem:[%s19251_s9 + $0x50] sm:$0xff]  }
 0x1b6   : > { %13747 = vmatmul.mubr.msk.bf16.gmra.mrb[24].mxu0 %vm890_vm2, %v16771_v22  ;;  %v2485_v22 = vld [vmem:[#allocation3 + $0x208] sm:$0xff] }
 0x1b7   : > { %13750 = vmatprep.mubr.msk.bf16.mxu0 %vm890_vm2, %v16791_v51  ;;  %v16958_v51 = vpack.c.bf16 %v2486_v47, %v2485_v22  ;;  %v2794_v47 = vld [vmem:[#allocation3 + $0x131] sm:$0xff] }
 0x1b8   : > { %v1832_v22 = vld [vmem:[#allocation3 + $0x151] sm:$0xff] }
 0x1bc   : > { %13631 = vmatmul.mubr.msk.bf16.gmra.mrb[60].mxu1 %vm890_vm2, %v16793_v52 }
 0x1bd   : > { %13634 = vmatprep.mubr.msk.bf16.mxu1 %vm890_vm2, %v16803_v6 }
 0x1be   : > { %13751 = vmatmul.mubr.msk.bf16.gmra.mrb[28].mxu0 %vm890_vm2, %v16796_v60  ;;  %v2809_v60 = vpack.c.bf16 %v2778_v5, %v2777_v12  ;;  %v17009_v12 = vpack.c.bf16 %v2794_v47, %v2793_v40  ;;  %v1831_v5 = vld [vmem:[#allocation3 + $0x149] sm:$0xff] }
 0x1bf   : > { %13754 = vmatprep.mubr.msk.bf16.mxu0 %vm890_vm2, %v16815_v38  ;;  %v1815_v38 = vld [vmem:[#allocation3 + $0x49] sm:$0xff] }
 0x1c0   : > { %v3100_v47 = vld [vmem:[#allocation3 + $0x47] sm:$0xff] }
 0x1c4   : > { %13635 = vmatmul.mubr.msk.bf16.gmra.mrb[64].mxu1 %vm890_vm2, %v16817_v41 }
 0x1c5   : > { %13638 = vmatprep.mubr.msk.bf16.mxu1 %vm890_vm2, %v16827_v58 }
 0x1c6   : > { %13755 = vmatmul.mubr.msk.bf16.gmra.mrb[32].mxu0 %vm890_vm2, %v16820_v48  ;;  %v1816_v48 = vld [vmem:[#allocation3 + $0x51] sm:$0xff] }
 0x1c7   : > { %13758 = vmatprep.mubr.msk.bf16.mxu0 %vm890_vm2, %v16839_v31  ;;  %v4307_v31 = vsel %vm693_vm1, %v4298_v62, 0  ;;  %v16965_v36 = vpack.c.bf16 %v1816_v48, %v1815_v38  ;;  %v16997_v62 = vpack.c.bf16 %v2790_v56, %v2789_v55  ;;  %v2798_v38 = vld [vmem:[#allocation3 + $0x171] sm:$0xff]  ;;  %v17015_v48 = vpack.c.bf16 %v1832_v22, %v1831_v5  ;;  %v2807_v56 = vld [vmem:[#allocation3 + $0x209] sm:$0xff] }
 0x1c8   : > { %v3103_v22 = vld [vmem:[#allocation3 + $0x6f] sm:$0xff] }
 0x1cc   : > { %13639 = vmatmul.mubr.msk.bf16.gmra.mrb[68].mxu1 %vm890_vm2, %v16841_v4 }
 0x1cd   : > { %13642 = vmatprep.mubr.msk.bf16.mxu1 %vm890_vm2, %v16851_v53 }
 0x1ce   : > { %13759 = vmatmul.mubr.msk.bf16.gmra.mrb[36].mxu0 %vm890_vm2, %v16844_v44  ;;  %v2781_v44 = vld [vmem:[#allocation3 + $0x69] sm:$0xff] }
 0x1cf   : > { %13762 = vmatprep.mubr.msk.bf16.mxu0 %vm890_vm2, %v16863_v11  ;;  %v2782_v11 = vld [vmem:[#allocation3 + $0x71] sm:$0xff] }
 0x1d0   : > { %v16970_v49 = vpack.c.bf16 %v2782_v11, %v2781_v44  ;;  %v1835_v44 = vld [vmem:[#allocation3 + $0x189] sm:$0xff]  ;;  %v1836_v11 = vld [vmem:[#allocation3 + $0x191] sm:$0xff] }
 0x1d1   : > { %v17027_v59 = vpack.c.bf16 %v1836_v11, %v1835_v44  ;;  %v3104_v11 = vld [vmem:[#allocation3 + $0x87] sm:$0xff] }
 0x1d4   : > { %13643 = vmatmul.mubr.msk.bf16.gmra.mrb[72].mxu1 %vm890_vm2, %v16865_v30 }
 0x1d5   : > { %13646 = vmatprep.mubr.msk.bf16.mxu1 %vm890_vm2, %v16873_v45 }
 0x1d6   : > { %13763 = vmatmul.mubr.msk.bf16.gmra.mrb[40].mxu0 %vm890_vm2, %v16867_v37 }
 0x1d7   : > { %13766 = vmatprep.mubr.msk.bf16.mxu0 %vm890_vm2, %v16879_v16 }
 0x1dc   : > { %13647 = vmatmul.mubr.msk.bf16.gmra.mrb[76].mxu1 %vm890_vm2, %v16881_v17 }
 0x1dd   : > { %13658 = vmatprep.mubr.msk.bf16.mxu1 %vm890_vm2, %v1843_v54 }
 0x1de   : > { %13767 = vmatmul.mubr.msk.bf16.gmra.mrb[44].mxu0 %vm890_vm2, %v16958_v51 }
 0x1df   : > { %13778 = vmatprep.mubr.msk.bf16.mxu0 %vm890_vm2, %v2809_v60 }
 0x1e4   : > { %13659 = vmatmul.mubr.msk.bf16.vlgmr.msra.gmra.mrb[48].mxu1 %vm890_vm2, %v2809_v60  ;;  %v2797_v60 = vld [vmem:[#allocation3 + $0x169] sm:$0xff] }
 0x1e5   : > { %13662 = vmatprep.mubr.msk.bf16.mxu1 %vm890_vm2, %v16965_v36  ;;  %13931 = vmatpush3.bf16.msra.mxu1 %v4307_v31  ;;  %v17021_v31 = vpack.c.bf16 %v2798_v38, %v2797_v60  ;;  %v3105_v60 = vld [vmem:[#allocation3 + $0x8f] sm:$0xff]  ;;  %v3102_v38 = vld [vmem:[#allocation3 + $0x67] sm:$0xff] }
 0x1e6   : > { %13779 = vmatmul.mubr.msk.bf16.vlgmr.msra.gmra.mrb[16].mxu0 %vm890_vm2, %v16965_v36  ;;  %v3133_v44 = vpack.c.bf16 %v3103_v22, %v3102_v38 }
 0x1e7   : > { %13782 = vmatprep.mubr.msk.bf16.mxu0 %vm890_vm2, %v16970_v49  ;;  %13811 = vmatpush3.bf16.msra.mxu0 %v15675_v32  ;;  %v1827_v32 = vld [vmem:[#allocation3 + $0x109] sm:$0xff] }
 0x1e8   : > { %13812 = vmatprep.subr.bf16.mxu0 %v15676_v43  ;;  %v17003_v54 = vpack.c.bf16 %v1828_v33, %v1827_v32  ;;  %v2808_v32 = vld [vmem:[#allocation3 + $0x211] sm:$0xff] }
 0x1e9   : > { %v3101_v33 = vld [vmem:[#allocation3 + $0x4f] sm:$0xff]  ;;  %v17053_v40 = vpack.c.bf16 %v2808_v32, %v2807_v56 }
 0x1ea   : > { %v3132_v5 = vpack.c.bf16 %v3101_v33, %v3100_v47  ;;  %v3434_v56 = vld [vmem:[#allocation3 + $0x108] sm:$0xff]  ;;  %v17140_v33 = vld [vmem:[#allocation3 + $0x130] sm:$0xff] }
 0x1eb   : > { %13813 = vmatpush3.bf16.msra.mxu0 %v15676_v43  ;;  %v2801_v43 = vld [vmem:[#allocation3 + $0x1a9] sm:$0xff]  ;;  %v3460_v32 = vpack.c.bf16 %v3435_v63, %v3434_v56 }
 0x1ec   : > { %13663 = vmatmul.mubr.msk.bf16.gmra.mrb[52].mxu1 %vm890_vm2, %v16970_v49  ;;  %13814 = vmatprep.subr.bf16.mxu0 %v15677_v61  ;;  %v17142_v47 = vld [vmem:[#allocation3 + $0x150] sm:$0xff] }
 0x1ed   : > { %13666 = vmatprep.mubr.msk.bf16.mxu1 %vm890_vm2, %v16976_v9 }
 0x1ee   : > { %13783 = vmatmul.mubr.msk.bf16.gmra.mrb[20].mxu0 %vm890_vm2, %v16976_v9 }
 0x1ef   : > { %13786 = vmatprep.mubr.msk.bf16.mxu0 %vm890_vm2, %v16982_v18  ;;  %13815 = vmatpush3.bf16.msra.mxu0 %v15677_v61  ;;  %v17033_v61 = vpack.c.bf16 %v2802_v50, %v2801_v43  ;;  %v15680_v43 = vld [vmem:[#allocation6 + $0xe8] sm:$0xff]   ;;  %v3134_v50 = vpack.c.bf16 %v3105_v60, %v3104_v11  ;;  %v3443_v11 = vld [vmem:[#allocation3 + $0x190] sm:$0xff] }
 0x1f0   : > { %13816 = vmatprep.subr.bf16.mxu0 %v15678_v10  ;;  %v3438_v60 = vld [vmem:[#allocation3 + $0x148] sm:$0xff] }
 0x1f1   : > { %v3462_v38 = vpack.c.bf16 %v17142_v47, %v3438_v60 }
 0x1f3   : > { %13817 = vmatpush3.bf16.msra.mxu0 %v15678_v10  ;;  %v2805_v10 = vld [vmem:[#allocation3 + $0x1e9] sm:$0xff] }
 0x1f4   : > { %13667 = vmatmul.mubr.msk.bf16.gmra.mrb[56].mxu1 %vm890_vm2, %v16982_v18  ;;  %13850 = vmatprep.subr.bf16.mxu0 %v16988_v29  ;;  %v17045_v55 = vpack.c.bf16 %v2806_v24, %v2805_v10  ;;  %v3432_v10 = vld [vmem:[#allocation3 + $0xe8] sm:$0xff] }
 0x1f5   : > { %13670 = vmatprep.mubr.msk.bf16.mxu1 %vm890_vm2, %v16990_v7 }
 0x1f6   : > { %13787 = vmatmul.mubr.msk.bf16.gmra.mrb[24].mxu0 %vm890_vm2, %v16990_v7 }
 0x1f7   : > { %13790 = vmatprep.mubr.msk.bf16.mxu0 %vm890_vm2, %v16997_v62 }
 0x1fc   : > { %13671 = vmatmul.mubr.msk.bf16.gmra.mrb[60].mxu1 %vm890_vm2, %v16997_v62 }
 0x1fd   : > { %13674 = vmatprep.mubr.msk.bf16.mxu1 %vm890_vm2, %v17003_v54 }
 0x1fe   : > { %13791 = vmatmul.mubr.msk.bf16.gmra.mrb[28].mxu0 %vm890_vm2, %v17003_v54 }
 0x1ff   : > { %13794 = vmatprep.mubr.msk.bf16.mxu0 %vm890_vm2, %v17009_v12 }
 0x204   : > { %13675 = vmatmul.mubr.msk.bf16.gmra.mrb[64].mxu1 %vm890_vm2, %v17009_v12 }
 0x205   : > { %13678 = vmatprep.mubr.msk.bf16.mxu1 %vm890_vm2, %v17015_v48 }
 0x206   : > { %13795 = vmatmul.mubr.msk.bf16.gmra.mrb[32].mxu0 %vm890_vm2, %v17015_v48 }
 0x207   : > { %13798 = vmatprep.mubr.msk.bf16.mxu0 %vm890_vm2, %v17021_v31 }
 0x20c   : > { %13679 = vmatmul.mubr.msk.bf16.gmra.mrb[68].mxu1 %vm890_vm2, %v17021_v31 }
 0x20d   : > { %13682 = vmatprep.mubr.msk.bf16.mxu1 %vm890_vm2, %v17027_v59 }
 0x20e   : > { %13799 = vmatmul.mubr.msk.bf16.gmra.mrb[36].mxu0 %vm890_vm2, %v17027_v59 }
 0x20f   : > { %13802 = vmatprep.mubr.msk.bf16.mxu0 %vm890_vm2, %v17033_v61 }
 0x214   : > { %13683 = vmatmul.mubr.msk.bf16.gmra.mrb[72].mxu1 %vm890_vm2, %v17033_v61 }
 0x215   : > { %13686 = vmatprep.mubr.msk.bf16.mxu1 %vm890_vm2, %v17039_v28 }
 0x216   : > { %13803 = vmatmul.mubr.msk.bf16.gmra.mrb[40].mxu0 %vm890_vm2, %v17039_v28 }
 0x217   : > { %13806 = vmatprep.mubr.msk.bf16.mxu0 %vm890_vm2, %v17045_v55 }
 0x21c   : > { %13687 = vmatmul.mubr.msk.bf16.gmra.mrb[76].mxu1 %vm890_vm2, %v17045_v55 }
 0x21d   : > { %13932 = vmatprep.mubr.msk.bf16.mxu1 %vm644_vm0, %v16352_v21  ;;  %v15681_v21 = vld [vmem:[#allocation6 + $0xf0] sm:$0xff]  }
 0x21e   : > { %13807 = vmatmul.mubr.msk.bf16.gmra.mrb[44].mxu0 %vm890_vm2, %v17053_v40 }
 0x21f   : > { %13818 = vmatprep.mubr.msk.bf16.mxu0 %vm890_vm2, %v3132_v5  ;;  %v17144_v5 = vld [vmem:[#allocation3 + $0x128] sm:$0xff] }
 0x220   : > { %v3461_v22 = vpack.c.bf16 %v17140_v33, %v17144_v5 }
 0x224   : > { %13933 = vmatmul.mubr.msk.bf16.vlgmr.msra.gmra.mrb[80].mxu1 %vm644_vm0, %v16365_v26  ;;  %v15682_v26 = vld [vmem:[#allocation6 + $0xf8] sm:$0xff]  }
 0x225   : > { %13936 = vmatprep.mubr.msk.bf16.mxu1 %vm644_vm0, %v16368_v27  ;;  %v15683_v27 = vld [vmem:[#allocation6 + $0x100] sm:$0xff]  }
 0x226   : > { %13819 = vmatmul.mubr.msk.bf16.vlgmr.msra.gmra.mrb[16].mxu0 %vm890_vm2, %v3133_v44  ;;  %v3441_v44 = vld [vmem:[#allocation3 + $0x170] sm:$0xff] }
 0x227   : > { %13822 = vmatprep.mubr.msk.bf16.mxu0 %vm890_vm2, %v3134_v50  ;;  %13851 = vmatpush3.bf16.msra.mxu0 %v16988_v29  ;;  %v3433_v29 = vld [vmem:[#allocation3 + $0xf0] sm:$0xff] }
 0x228   : > { %13852 = vmatprep.subr.bf16.mxu0 %v15680_v43  ;;  %v3459_v24 = vpack.c.bf16 %v3433_v29, %v3432_v10 }
 0x22b   : > { %13853 = vmatpush3.bf16.msra.mxu0 %v15680_v43  ;;  %v3440_v43 = vld [vmem:[#allocation3 + $0x168] sm:$0xff] }
 0x22c   : > { %13937 = vmatmul.mubr.msk.bf16.gmra.mrb[84].mxu1 %vm644_vm0, %v16386_v34  ;;  %13854 = vmatprep.subr.bf16.mxu0 %v15681_v21  ;;  %v3423_v34 = vld [vmem:[#allocation3 + $0x50] sm:$0xff]  ;;  %v3463_v50 = vpack.c.bf16 %v3441_v44, %v3440_v43 }
 0x22d   : > { %13940 = vmatprep.mubr.msk.bf16.mxu1 %vm644_vm0, %v16389_v35  ;;  %v3422_v35 = vld [vmem:[#allocation3 + $0x48] sm:$0xff] }
 0x22e   : > { %13823 = vmatmul.mubr.msk.bf16.gmra.mrb[20].mxu0 %vm890_vm2, %v16765_v13 }
 0x22f   : > { %13826 = vmatprep.mubr.msk.bf16.mxu0 %vm890_vm2, %v16778_v1  ;;  %13855 = vmatpush3.bf16.msra.mxu0 %v15681_v21  ;;  %v3426_v1 = vld [vmem:[#allocation3 + $0x88] sm:$0xff] }
 0x230   : > { %13856 = vmatprep.subr.bf16.mxu0 %v15682_v26  ;;  %v3442_v21 = vld [vmem:[#allocation3 + $0x188] sm:$0xff] }
 0x231   : > { %v3464_v57 = vpack.c.bf16 %v3443_v11, %v3442_v21 }
 0x233   : > { %13857 = vmatpush3.bf16.msra.mxu0 %v15682_v26  ;;  %v15692_v26 = vld [vmem:[%s19251_s9 + $0x58] sm:$0xff]  }
 0x234   : > { %13941 = vmatmul.mubr.msk.bf16.gmra.mrb[88].mxu1 %vm644_vm0, %v16397_v39  ;;  %13890 = vmatprep.subr.bf16.mxu0 %v15683_v27  ;;  %v3425_v39 = vld [vmem:[#allocation3 + $0x70] sm:$0xff] }
 0x235   : > { %13944 = vmatprep.mubr.msk.bf16.mxu1 %vm644_vm0, %v16406_v42  ;;  %v3427_v42 = vld [vmem:[#allocation3 + $0x90] sm:$0xff] }
 0x236   : > { %13827 = vmatmul.mubr.msk.bf16.gmra.mrb[24].mxu0 %vm890_vm2, %v16793_v52  ;;  %v15684_v52 = vld [vmem:[#allocation6 + $0x108] sm:$0xff]  }
 0x237   : > { %13830 = vmatprep.mubr.msk.bf16.mxu0 %vm890_vm2, %v16803_v6  ;;  %v3456_v6 = vpack.c.bf16 %v3427_v42, %v3426_v1 }
 0x23c   : > { %13945 = vmatmul.mubr.msk.bf16.gmra.mrb[92].mxu1 %vm644_vm0, %v16417_v46  ;;  %v3424_v46 = vld [vmem:[#allocation3 + $0x68] sm:$0xff] }
 0x23d   : > { %13948 = vmatprep.mubr.msk.bf16.mxu1 %vm644_vm0, %v16308_v2  ;;  %v15687_v2 = vld [vmem:[%s19251_s9 + $0x30] sm:$0xff]   ;;  %v3455_v13 = vpack.c.bf16 %v3425_v39, %v3424_v46 }
 0x23e   : > { %13831 = vmatmul.mubr.msk.bf16.gmra.mrb[28].mxu0 %vm890_vm2, %v16817_v41  ;;  %13964 = vmatprep.subr.bf16.mxu1 %v15687_v2  ;;  %v3429_v41 = vld [vmem:[#allocation3 + $0xb0] sm:$0xff] }
 0x23f   : > { %13834 = vmatprep.mubr.msk.bf16.mxu0 %vm890_vm2, %v16827_v58  ;;  %13965 = vmatpush3.bf16.msra.mxu1 %v15687_v2  ;;  %v15690_v58 = vld [vmem:[%s19251_s9 + $0x48] sm:$0xff]  }
 0x240   : > { %v3444_v2 = vld [vmem:[#allocation3 + $0x1a8] sm:$0xff] }
 0x244   : > { %13949 = vmatmul.mubr.msk.bf16.gmra.mrb[96].mxu1 %vm644_vm0, %v16311_v3  ;;  %v15688_v3 = vld [vmem:[%s19251_s9 + $0x38] sm:$0xff]  }
 0x245   : > { %13952 = vmatprep.mubr.msk.bf16.mxu1 %vm644_vm0, %v16321_v8  ;;  %13966 = vmatprep.subr.bf16.mxu1 %v15688_v3  ;;  %v3130_v8 = vld [vmem:[#allocation3 + $0x227] sm:$0xff] }
 0x246   : > { %13835 = vmatmul.mubr.msk.bf16.gmra.mrb[32].mxu0 %vm890_vm2, %v16841_v4  ;;  %13967 = vmatpush3.bf16.msra.mxu1 %v15688_v3  ;;  %v3431_v4 = vld [vmem:[#allocation3 + $0xd0] sm:$0xff]  ;;  %v4668_v3 = vld [vmem:[#allocation4 + $0x8] sm:$0xff] }
 0x247   : > { %13838 = vmatprep.mubr.msk.bf16.mxu0 %vm890_vm2, %v16851_v53  ;;  %v3428_v53 = vld [vmem:[#allocation3 + $0xa8] sm:$0xff] }
 0x24c   : > { %13953 = vmatmul.mubr.msk.bf16.gmra.mrb[100].mxu1 %vm644_vm0, %v16335_v14  ;;  %v3131_v14 = vld [vmem:[#allocation3 + $0x22f] sm:$0xff] }
 0x24d   : > { %13956 = vmatprep.mubr.msk.bf16.mxu1 %vm644_vm0, %v16338_v15  ;;  %v3147_v15 = vpack.c.bf16 %v3131_v14, %v3130_v8  ;;  %v4669_v8 = vld [vmem:[#allocation4 + $0x10] sm:$0xff] }
 0x24e   : > { %13839 = vmatmul.mubr.msk.bf16.gmra.mrb[36].mxu0 %vm890_vm2, %v16865_v30  ;;  %v3457_v30 = vpack.c.bf16 %v3429_v41, %v3428_v53 }
 0x24f   : > { %13842 = vmatprep.mubr.msk.bf16.mxu0 %vm890_vm2, %v16873_v45  ;;  %v3430_v45 = vld [vmem:[#allocation3 + $0xc8] sm:$0xff] }
 0x254   : > { %13957 = vmatmul.mubr.msk.bf16.gmra.mrb[104].mxu1 %vm644_vm0, %v16346_v19  ;;  %v3454_v19 = vpack.c.bf16 %v3423_v34, %v3422_v35  ;;  %v17449_v34 = vld [vmem:[%s19251_s9] sm:$0xff]   ;;  %v3452_v35 = vld [vmem:[#allocation3 + $0x228] sm:$0xff] }
 0x255   : > { %13960 = vmatprep.mubr.msk.bf16.mxu1 %vm644_vm0, %v16349_v20  ;;  %v15689_v20 = vld [vmem:[%s19251_s9 + $0x40] sm:$0xff]  }
 0x256   : > { %13843 = vmatmul.mubr.msk.bf16.gmra.mrb[40].mxu0 %vm890_vm2, %v16881_v17  ;;  %13968 = vmatprep.subr.bf16.mxu1 %v15689_v20  ;;  %v15686_v17 = vld [vmem:[#allocation6 + $0x118] sm:$0xff]  }
 0x257   : > { %13846 = vmatprep.mubr.msk.bf16.mxu0 %vm890_vm2, %v16887_v23  ;;  %13969 = vmatpush3.bf16.msra.mxu1 %v15689_v20  ;;  %v3458_v23 = vpack.c.bf16 %v3431_v4, %v3430_v45  ;;  %v17541_v4 = vld [vmem:[%s19244_s2] ss:$0 sm:$0xff] }
 0x258   : > { %13970 = vmatprep.subr.bf16.mxu1 %v15690_v58 }
 0x25b   : > { %13971 = vmatpush3.bf16.msra.mxu1 %v15690_v58  ;;  %v13506_v58 = vpop.f32.mrb[0].mxu0 }
 0x25c   : > { %13961 = vmatmul.mubr.msk.bf16.gmra.mrb[108].mxu1 %vm644_vm0, %v16362_v25  ;;  %v15685_v25 = vld [vmem:[#allocation6 + $0x110] sm:$0xff]   ;;  %13972 = vmatprep.subr.bf16.mxu1 %v15691_v0  ;;  %v740_v53 = vadd.f32 %v17541_v4, %v13506_v58 }
 0x25e   : > { %13847 = vmatmul.mubr.msk.bf16.gmra.mrb[44].mxu0 %vm890_vm2, %v3147_v15  ;;  %v4700_v15 = vpack.c.bf16 %v4669_v8, %v4668_v3 }
 0x25f   : > { %13858 = vmatprep.mubr.msk.bf16.mxu0 %vm890_vm2, %v3454_v19  ;;  %13973 = vmatpush3.bf16.msra.mxu1 %v15691_v0  ;;  %v3453_v19 = vld [vmem:[#allocation3 + $0x230] sm:$0xff] }
 0x260   : > { %13974 = vmatprep.subr.bf16.mxu1 %v15692_v26  ;;  %13976 = vmatprep.mubr.msk.bf16.mxu1 %vm4502_vm3, %v4700_v15  ;;  %v3469_v20 = vpack.c.bf16 %v3453_v19, %v3452_v35 }
 0x263   : > { %13975 = vmatpush3.bf16.msra.mxu1 %v15692_v26 }
 0x264   : > { %14008 = vmatprep.subr.bf16.mxu1 %v17449_v34 }
 0x266   : > { %13859 = vmatmul.mubr.msk.bf16.vlgmr.msra.gmra.mrb[16].mxu0 %vm890_vm2, %v3455_v13  ;;  %v3775_v13 = vld [vmem:[#allocation3 + $0x231] sm:$0xff] }
 0x267   : > { %13862 = vmatprep.mubr.msk.bf16.mxu0 %vm890_vm2, %v3456_v6  ;;  %13891 = vmatpush3.bf16.msra.mxu0 %v15683_v27  ;;  %v3445_v27 = vld [vmem:[#allocation3 + $0x1b0] sm:$0xff] }
 0x268   : > { %13892 = vmatprep.subr.bf16.mxu0 %v15684_v52  ;;  %v3465_v14 = vpack.c.bf16 %v3445_v27, %v3444_v2 }
 0x26b   : > { %13893 = vmatpush3.bf16.msra.mxu0 %v15684_v52 }
 0x26c   : > { %13894 = vmatprep.subr.bf16.mxu0 %v15685_v25 }
 0x26e   : > { %13863 = vmatmul.mubr.msk.bf16.gmra.mrb[20].mxu0 %vm890_vm2, %v3457_v30  ;;  %v731_v30 = vpop.f32.mrb[1].mxu0 }
 0x26f   : > { %13866 = vmatprep.mubr.msk.bf16.mxu0 %vm890_vm2, %v3458_v23  ;;  %13895 = vmatpush3.bf16.msra.mxu0 %v15685_v25  ;;  %v732_v45 = vadd.f32 %v17541_v4, %v731_v30  ;;  %v13507_v10 = vpop.f32.mrb[2].mxu0 }
 0x270   : > { %13896 = vmatprep.subr.bf16.mxu0 %v15686_v17  ;;  %v743_v56 = vadd.f32 %v17541_v4, %v13507_v10 }
 0x271   : > { %v858_v23 = vmax.f32 %v732_v45, 0.0 }
 0x272   : > { %v861_v5 = vmax.f32 %v743_v56, 0.0 }
 0x273   : > { %13897 = vmatpush3.bf16.msra.mxu0 %v15686_v17  ;;  %v860_v17 = vmax.f32 %v740_v53, 0.0  ;;  %891 = vst.msk [vmem:[%s16656_s12] sm:$0xff] %vm890_vm2, %v858_v23 }
 0x274   : > { %894 = vst.msk [vmem:[%s16656_s12 + $0x48] sm:$0xff] %vm890_vm2, %v861_v5 }
 0x275   : > { %893 = vst.msk [vmem:[%s16656_s12 + $0x30] sm:$0xff] %vm890_vm2, %v860_v17 }
 0x276   : > { %13867 = vmatmul.mubr.msk.bf16.gmra.mrb[24].mxu0 %vm890_vm2, %v3459_v24 }
 0x277   : > { %13870 = vmatprep.mubr.msk.bf16.mxu0 %vm890_vm2, %v3460_v32  ;;  %v734_v32 = vpop.f32.mrb[3].mxu0 }
 0x278   : > { %v735_v33 = vadd.f32 %v17541_v4, %v734_v32  ;;  %v13510_v47 = vpop.f32.mrb[4].mxu0  ;;  %v17593_v32 = vld [vmem:[%s19250_s8] ss:$0 sm:$0xff] }
 0x279   : > { %v747_v60 = vpop.f32.mrb[5].mxu0 }
 0x27a   : > { %v748_v44 = vadd.f32 %v17541_v4, %v747_v60  ;;  %v13511_v11 = vpop.f32.mrb[6].mxu0 }
 0x27b   : > { %v750_v21 = vpop.f32.mrb[7].mxu0 }
 0x27c   : > { %v751_v27 = vadd.f32 %v17541_v4, %v750_v21  ;;  %v13514_v2 = vpop.f32.mrb[8].mxu0 }
 0x27d   : > { %v763_v15 = vpop.f32.mrb[9].mxu0 }
 0x27e   : > { %13871 = vmatmul.mubr.msk.bf16.gmra.mrb[28].mxu0 %vm890_vm2, %v3461_v22  ;;  %v756_v22 = vadd.f32 %v17541_v4, %v13510_v47  ;;  %v863_v19 = vmax.f32 %v751_v27, 0.0 }
 0x27f   : > { %13874 = vmatprep.mubr.msk.bf16.mxu0 %vm890_vm2, %v3462_v38  ;;  %v859_v38 = vmax.f32 %v735_v33, 0.0 }
 0x280   : > { %v864_v43 = vmax.f32 %v756_v22, 0.0  ;;  %896 = vst.msk [vmem:[%s16656_s12 + $0x78] sm:$0xff] %vm890_vm2, %v863_v19 }
 0x281   : > { %892 = vst.msk [vmem:[%s16656_s12 + $0x18] sm:$0xff] %vm890_vm2, %v859_v38 }
 0x282   : > { %897 = vst.msk [vmem:[%s16656_s12 + $0x90] sm:$0xff] %vm890_vm2, %v864_v43 }
 0x286   : > { %13875 = vmatmul.mubr.msk.bf16.gmra.mrb[32].mxu0 %vm890_vm2, %v3463_v50  ;;  %v759_v50 = vadd.f32 %v17541_v4, %v13511_v11 }
 0x287   : > { %13878 = vmatprep.mubr.msk.bf16.mxu0 %vm890_vm2, %v3464_v57  ;;  %v862_v57 = vmax.f32 %v748_v44, 0.0 }
 0x288   : > { %v865_v8 = vmax.f32 %v759_v50, 0.0 }
 0x289   : > { %895 = vst.msk [vmem:[%s16656_s12 + $0x60] sm:$0xff] %vm890_vm2, %v862_v57 }
 0x28a   : > { %898 = vst.msk [vmem:[%s16656_s12 + $0xa8] sm:$0xff] %vm890_vm2, %v865_v8 }
 0x28e   : > { %13879 = vmatmul.mubr.msk.bf16.gmra.mrb[36].mxu0 %vm890_vm2, %v3465_v14  ;;  %v772_v14 = vadd.f32 %v17541_v4, %v13514_v2 }
 0x28f   : > { %13882 = vmatprep.mubr.msk.bf16.mxu0 %vm890_vm2, %v16867_v37 }
 0x296   : > { %13883 = vmatmul.mubr.msk.bf16.gmra.mrb[40].mxu0 %vm890_vm2, %v16879_v16 }
 0x297   : > { %13886 = vmatprep.mubr.msk.bf16.mxu0 %vm890_vm2, %v16958_v51 }
 0x29e   : > { %13887 = vmatmul.mubr.msk.bf16.gmra.mrb[44].mxu0 %vm890_vm2, %v3469_v20  ;;  %v764_v20 = vadd.f32 %v17541_v4, %v763_v15 }
 0x29f   : > { %13898 = vmatprep.mubr.msk.bf16.mxu0 %vm890_vm2, %v16965_v36 }
 0x2a0   : > { %v866_v30 = vmax.f32 %v764_v20, 0.0 }
 0x2a2   : > { %899 = vst.msk [vmem:[%s16656_s12 + $0xc0] sm:$0xff] %vm890_vm2, %v866_v30 }
 0x2a6   : > { %13899 = vmatmul.mubr.msk.bf16.vlgmr.msra.gmra.mrb[16].mxu0 %vm890_vm2, %v16970_v49 }
 0x2a7   : > { %13902 = vmatprep.mubr.msk.bf16.mxu0 %vm890_vm2, %v16976_v9 }
 0x2ae   : > { %13903 = vmatmul.mubr.msk.bf16.gmra.mrb[20].mxu0 %vm890_vm2, %v16982_v18 }
 0x2af   : > { %13906 = vmatprep.mubr.msk.bf16.mxu0 %vm890_vm2, %v16990_v7 }
 0x2b6   : > { %13907 = vmatmul.mubr.msk.bf16.gmra.mrb[24].mxu0 %vm890_vm2, %v16997_v62 }
 0x2b7   : > { %13910 = vmatprep.mubr.msk.bf16.mxu0 %vm890_vm2, %v17003_v54  ;;  %v17473_v37 = vpop.f32.mrb[48].mxu1 }
 0x2b8   : > { %v17475_v16 = vpop.f32.mrb[49].mxu1 }
 0x2b9   : > { %v17477_v51 = vpop.f32.mrb[50].mxu1 }
 0x2ba   : > { %v17479_v36 = vpop.f32.mrb[51].mxu1 }
 0x2be   : > { %13911 = vmatmul.mubr.msk.bf16.gmra.mrb[28].mxu0 %vm890_vm2, %v17009_v12 }
 0x2bf   : > { %13914 = vmatprep.mubr.msk.bf16.mxu0 %vm890_vm2, %v17015_v48  ;;  %v17485_v49 = vpop.f32.mrb[52].mxu1 }
 0x2c0   : > { %v17487_v9 = vpop.f32.mrb[53].mxu1 }
 0x2c1   : > { %v17489_v18 = vpop.f32.mrb[54].mxu1 }
 0x2c2   : > { %v17491_v7 = vpop.f32.mrb[55].mxu1 }
 0x2c6   : > { %13915 = vmatmul.mubr.msk.bf16.gmra.mrb[32].mxu0 %vm890_vm2, %v17021_v31 }
 0x2c7   : > { %13918 = vmatprep.mubr.msk.bf16.mxu0 %vm890_vm2, %v17027_v59  ;;  %v17497_v62 = vpop.f32.mrb[56].mxu1 }
 0x2c8   : > { %v17499_v54 = vpop.f32.mrb[57].mxu1 }
 0x2c9   : > { %v17501_v12 = vpop.f32.mrb[58].mxu1 }
 0x2ca   : > { %v17503_v48 = vpop.f32.mrb[59].mxu1 }
 0x2ce   : > { %13919 = vmatmul.mubr.msk.bf16.gmra.mrb[36].mxu0 %vm890_vm2, %v17033_v61  ;;  %v3774_v61 = vld [vmem:[#allocation3 + $0x229] sm:$0xff] }
 0x2cf   : > { %13922 = vmatprep.mubr.msk.bf16.mxu0 %vm890_vm2, %v17039_v28  ;;  %v17509_v39 = vpop.f32.mrb[60].mxu1  ;;  %v3791_v6 = vpack.c.bf16 %v3775_v13, %v3774_v61  ;;  %v13515_v61 = vpop.f32.mrb[10].mxu0 }
 0x2d0   : > { %v17511_v31 = vpop.f32.mrb[61].mxu1  ;;  %v775_v58 = vadd.f32 %v17541_v4, %v13515_v61  ;;  %v766_v53 = vpop.f32.mrb[11].mxu0 }
 0x2d1   : > { %v17513_v42 = vpop.f32.mrb[62].mxu1  ;;  %v767_v45 = vadd.f32 %v17541_v4, %v766_v53  ;;  %v13518_v17 = vpop.f32.mrb[12].mxu0 }
 0x2d2   : > { %v17515_v59 = vpop.f32.mrb[63].mxu1  ;;  %v869_v23 = vmax.f32 %v775_v58, 0.0  ;;  %v788_v10 = vadd.f32 %v17541_v4, %v13518_v17  ;;  %v779_v56 = vpop.f32.mrb[13].mxu0 }
 0x2d3   : > { %v867_v33 = vmax.f32 %v767_v45, 0.0  ;;  %v780_v47 = vadd.f32 %v17541_v4, %v779_v56  ;;  %v13519_v5 = vpop.f32.mrb[14].mxu0 }
 0x2d4   : > { %902 = vst.msk [vmem:[%s16656_s12 + $0x108] sm:$0xff] %vm890_vm2, %v869_v23  ;;  %v872_v22 = vmax.f32 %v788_v10, 0.0  ;;  %v791_v60 = vadd.f32 %v17541_v4, %v13519_v5  ;;  %v782_v38 = vpop.f32.mrb[15].mxu0 }
 0x2d5   : > { %900 = vst.msk [vmem:[%s16656_s12 + $0xd8] sm:$0xff] %vm890_vm2, %v867_v33  ;;  %v870_v11 = vmax.f32 %v780_v47, 0.0  ;;  %v783_v43 = vadd.f32 %v17541_v4, %v782_v38 }
 0x2d6   : > { %13923 = vmatmul.mubr.msk.bf16.gmra.mrb[40].mxu0 %vm890_vm2, %v17045_v55  ;;  %905 = vst.msk [vmem:[%s16656_s12 + $0x150] sm:$0xff] %vm890_vm2, %v872_v22  ;;  %v873_v57 = vmax.f32 %v791_v60, 0.0 }
 0x2d7   : > { %13926 = vmatprep.mubr.msk.bf16.mxu0 %vm890_vm2, %v17053_v40  ;;  %v17521_v46 = vpop.f32.mrb[64].mxu1  ;;  %903 = vst.msk [vmem:[%s16656_s12 + $0x120] sm:$0xff] %vm890_vm2, %v870_v11  ;;  %v871_v8 = vmax.f32 %v783_v43, 0.0 }
 0x2d8   : > { %v17523_v1 = vpop.f32.mrb[65].mxu1  ;;  %906 = vst.msk [vmem:[%s16656_s12 + $0x168] sm:$0xff] %vm890_vm2, %v873_v57 }
 0x2d9   : > { %v17525_v28 = vpop.f32.mrb[66].mxu1  ;;  %904 = vst.msk [vmem:[%s16656_s12 + $0x138] sm:$0xff] %vm890_vm2, %v871_v8 }
 0x2da   : > { %v17527_v52 = vpop.f32.mrb[67].mxu1 }
 0x2de   : > { %13927 = vmatmul.mubr.msk.bf16.gmra.mrb[44].mxu0 %vm890_vm2, %v3791_v6  ;;  %v868_v6 = vmax.f32 %v772_v14, 0.0 }
 0x2df   : > { %v17530_v25 = vpop.f32.mrb[68].mxu1 }
 0x2e0   : > { %v17532_v55 = vpop.f32.mrb[69].mxu1  ;;  %901 = vst.msk [vmem:[%s16656_s12 + $0xf0] sm:$0xff] %vm890_vm2, %v868_v6 }
 0x2e1   : > { %v17534_v40 = vpop.f32.mrb[70].mxu1 }
 0x2e2   : > { %v17536_v41 = vpop.f32.mrb[71].mxu1 }
 0x2e7   : > { %v17545_v29 = vpop.f32.mrb[72].mxu1 }
 0x2e8   : > { %v17549_v63 = vpop.f32.mrb[73].mxu1 }
 0x2e9   : > { %v17553_v0 = vpop.f32.mrb[74].mxu1 }
 0x2ea   : > { %v17555_v24 = vpop.f32.mrb[75].mxu1 }
 0x2ef   : > { %v17564_v26 = vpop.f32.mrb[76].mxu1 }
 0x2f0   : > { %v17569_v3 = vpop.f32.mrb[77].mxu1 }
 0x2f1   : > { %v17574_v35 = vpop.f32.mrb[78].mxu1 }
 0x2f2   : > { %v17579_v13 = vpop.f32.mrb[79].mxu1 }
 0x2f7   : > { %v13934_v44 = vpop.f32.mrb[80].mxu1 }
 0x2f8   : > { %v4352_v50 = vadd.f32 %v13934_v44, %v17593_v32  ;;  %v4343_v21 = vpop.f32.mrb[81].mxu1 }
 0x2f9   : > { %v4344_v27 = vadd.f32 %v17593_v32, %v4343_v21  ;;  %v13935_v2 = vpop.f32.mrb[82].mxu1  ;;  %v15694_v21 = vld [vmem:[%s19251_s9 + $0x8] sm:$0xff]  }
 0x2fa   : > { %v4472_v14 = vmax.f32 %v4352_v50, 0.0  ;;  %v4355_v15 = vadd.f32 %v13935_v2, %v17593_v32  ;;  %v4346_v19 = vpop.f32.mrb[83].mxu1 }
 0x2fb   : > { %v4470_v20 = vmax.f32 %v4344_v27, 0.0  ;;  %v4347_v4 = vadd.f32 %v17593_v32, %v4346_v19 }
 0x2fc   : > { %4578 = vst.msk [vmem:[#allocation4 + $0x48] sm:$0xff] %vm4502_vm3, %v4472_v14  ;;  %v4473_v61 = vmax.f32 %v4355_v15, 0.0 }
 0x2fd   : > { %4576 = vst.msk [vmem:[#allocation4 + $0x28] sm:$0xff] %vm4502_vm3, %v4470_v20  ;;  %v4471_v6 = vmax.f32 %v4347_v4, 0.0 }
 0x2fe   : > { %4579 = vst.msk [vmem:[#allocation4 + $0x50] sm:$0xff] %vm4502_vm3, %v4473_v61 }
 0x2ff   : > { %4577 = vst.msk [vmem:[#allocation4 + $0x30] sm:$0xff] %vm4502_vm3, %v4471_v6  ;;  %v13938_v58 = vpop.f32.mrb[84].mxu1  ;;  %v15695_v6 = vld [vmem:[%s19251_s9 + $0x10] sm:$0xff]  }
 0x300   : > { %v4368_v53 = vadd.f32 %v13938_v58, %v17593_v32  ;;  %v4359_v30 = vpop.f32.mrb[85].mxu1 }
 0x301   : > { %v4360_v45 = vadd.f32 %v17593_v32, %v4359_v30  ;;  %v13939_v17 = vpop.f32.mrb[86].mxu1 }
 0x302   : > { %v4476_v23 = vmax.f32 %v4368_v53, 0.0  ;;  %v4371_v10 = vadd.f32 %v13939_v17, %v17593_v32  ;;  %v4362_v56 = vpop.f32.mrb[87].mxu1 }
 0x303   : > { %v4474_v33 = vmax.f32 %v4360_v45, 0.0  ;;  %v4363_v47 = vadd.f32 %v17593_v32, %v4362_v56  ;;  %v4672_v50 = vld [vmem:[#allocation4 + $0x48] sm:$0xff]  ;;  %v15696_v56 = vld [vmem:[%s19251_s9 + $0x18] sm:$0xff]  }
 0x304   : > { %4582 = vst.msk [vmem:[#allocation4 + $0x88] sm:$0xff] %vm4502_vm3, %v4476_v23  ;;  %v4477_v5 = vmax.f32 %v4371_v10, 0.0  ;;  %v4670_v38 = vld [vmem:[#allocation4 + $0x28] sm:$0xff] }
 0x305   : > { %4580 = vst.msk [vmem:[#allocation4 + $0x68] sm:$0xff] %vm4502_vm3, %v4474_v33  ;;  %v4475_v22 = vmax.f32 %v4363_v47, 0.0  ;;  %v4673_v60 = vld [vmem:[#allocation4 + $0x50] sm:$0xff] }
 0x306   : > { %4583 = vst.msk [vmem:[#allocation4 + $0x90] sm:$0xff] %vm4502_vm3, %v4477_v5  ;;  %v4671_v44 = vld [vmem:[#allocation4 + $0x30] sm:$0xff]  ;;  %v4702_v2 = vpack.c.bf16 %v4673_v60, %v4672_v50 }
 0x307   : > { %4581 = vst.msk [vmem:[#allocation4 + $0x70] sm:$0xff] %vm4502_vm3, %v4475_v22  ;;  %v13942_v11 = vpop.f32.mrb[88].mxu1  ;;  %v4701_v43 = vpack.c.bf16 %v4671_v44, %v4670_v38 }
 0x308   : > { %v4384_v57 = vadd.f32 %v13942_v11, %v17593_v32  ;;  %v4375_v27 = vpop.f32.mrb[89].mxu1 }
 0x309   : > { %v4376_v8 = vadd.f32 %v17593_v32, %v4375_v27  ;;  %v13943_v14 = vpop.f32.mrb[90].mxu1  ;;  %13977 = vmatmul.mubr.msk.bf16.vlgmr.msra.gmra.mrb[112].mxu1 %vm4502_vm3, %v4701_v43 }
 0x30a   : > { %v4480_v15 = vmax.f32 %v4384_v57, 0.0  ;;  %v4387_v19 = vadd.f32 %v13943_v14, %v17593_v32  ;;  %v4378_v20 = vpop.f32.mrb[91].mxu1  ;;  %13980 = vmatprep.mubr.msk.bf16.mxu1 %vm4502_vm3, %v4702_v2  ;;  %14009 = vmatpush3.bf16.msra.mxu1 %v17449_v34 }
 0x30b   : > { %v4478_v4 = vmax.f32 %v4376_v8, 0.0  ;;  %v4379_v61 = vadd.f32 %v17593_v32, %v4378_v20  ;;  %14010 = vmatprep.subr.bf16.mxu1 %v15694_v21  ;;  %v4676_v10 = vld [vmem:[#allocation4 + $0x88] sm:$0xff] }
 0x30c   : > { %4586 = vst.msk [vmem:[#allocation4 + $0xc8] sm:$0xff] %vm4502_vm3, %v4480_v15  ;;  %v4481_v58 = vmax.f32 %v4387_v19, 0.0  ;;  %v4674_v45 = vld [vmem:[#allocation4 + $0x68] sm:$0xff] }
 0x30d   : > { %4584 = vst.msk [vmem:[#allocation4 + $0xa8] sm:$0xff] %vm4502_vm3, %v4478_v4  ;;  %v4479_v53 = vmax.f32 %v4379_v61, 0.0  ;;  %v4677_v30 = vld [vmem:[#allocation4 + $0x90] sm:$0xff]  ;;  %v15698_v4 = vld [vmem:[%s19251_s9 + $0x28] sm:$0xff]  }
 0x30e   : > { %4587 = vst.msk [vmem:[#allocation4 + $0xd0] sm:$0xff] %vm4502_vm3, %v4481_v58  ;;  %v4675_v17 = vld [vmem:[#allocation4 + $0x70] sm:$0xff]  ;;  %14011 = vmatpush3.bf16.msra.mxu1 %v15694_v21  ;;  %v4704_v5 = vpack.c.bf16 %v4677_v30, %v4676_v10  ;;  %v15697_v21 = vld [vmem:[%s19251_s9 + $0x20] sm:$0xff]  }
 0x30f   : > { %4585 = vst.msk [vmem:[#allocation4 + $0xb0] sm:$0xff] %vm4502_vm3, %v4479_v53  ;;  %v13946_v34 = vpop.f32.mrb[92].mxu1  ;;  %v4703_v23 = vpack.c.bf16 %v4675_v17, %v4674_v45  ;;  %14012 = vmatprep.subr.bf16.mxu1 %v15695_v6 }
 0x310   : > { %v4400_v33 = vadd.f32 %v13946_v34, %v17593_v32  ;;  %v4391_v47 = vpop.f32.mrb[93].mxu1 }
 0x311   : > { %v4392_v22 = vadd.f32 %v17593_v32, %v4391_v47  ;;  %v13947_v60 = vpop.f32.mrb[94].mxu1  ;;  %13981 = vmatmul.mubr.msk.bf16.gmra.mrb[116].mxu1 %vm4502_vm3, %v4703_v23 }
 0x312   : > { %v4484_v38 = vmax.f32 %v4400_v33, 0.0  ;;  %v4403_v44 = vadd.f32 %v13947_v60, %v17593_v32  ;;  %v4394_v11 = vpop.f32.mrb[95].mxu1  ;;  %13984 = vmatprep.mubr.msk.bf16.mxu1 %vm4502_vm3, %v4704_v5  ;;  %14013 = vmatpush3.bf16.msra.mxu1 %v15695_v6 }
 0x313   : > { %v4482_v43 = vmax.f32 %v4392_v22, 0.0  ;;  %v4395_v50 = vadd.f32 %v17593_v32, %v4394_v11  ;;  %14014 = vmatprep.subr.bf16.mxu1 %v15696_v56  ;;  %v4680_v20 = vld [vmem:[#allocation4 + $0xc8] sm:$0xff] }
 0x314   : > { %4590 = vst.msk [vmem:[#allocation4 + $0x108] sm:$0xff] %vm4502_vm3, %v4484_v38  ;;  %v4485_v57 = vmax.f32 %v4403_v44, 0.0  ;;  %v4678_v8 = vld [vmem:[#allocation4 + $0xa8] sm:$0xff] }
 0x315   : > { %4588 = vst.msk [vmem:[#allocation4 + $0xe8] sm:$0xff] %vm4502_vm3, %v4482_v43  ;;  %v4483_v27 = vmax.f32 %v4395_v50, 0.0  ;;  %v4681_v2 = vld [vmem:[#allocation4 + $0xd0] sm:$0xff] }
 0x316   : > { %4591 = vst.msk [vmem:[#allocation4 + $0x110] sm:$0xff] %vm4502_vm3, %v4485_v57  ;;  %v4679_v14 = vld [vmem:[#allocation4 + $0xb0] sm:$0xff]  ;;  %14015 = vmatpush3.bf16.msra.mxu1 %v15696_v56  ;;  %v4706_v58 = vpack.c.bf16 %v4681_v2, %v4680_v20  ;;  %v17673_v56 = vld [vmem:[%s19251_s9 + $0x60] sm:$0xff]  }
 0x317   : > { %4589 = vst.msk [vmem:[#allocation4 + $0xf0] sm:$0xff] %vm4502_vm3, %v4483_v27  ;;  %v13950_v15 = vpop.f32.mrb[96].mxu1  ;;  %v4705_v19 = vpack.c.bf16 %v4679_v14, %v4678_v8  ;;  %14016 = vmatprep.subr.bf16.mxu1 %v15697_v21 }
 0x318   : > { %v4416_v61 = vadd.f32 %v13950_v15, %v17593_v32  ;;  %v4407_v6 = vpop.f32.mrb[97].mxu1 }
 0x319   : > { %v4408_v53 = vadd.f32 %v17593_v32, %v4407_v6  ;;  %v13951_v30 = vpop.f32.mrb[98].mxu1  ;;  %13985 = vmatmul.mubr.msk.bf16.gmra.mrb[120].mxu1 %vm4502_vm3, %v4705_v19 }
 0x31a   : > { %v4488_v45 = vmax.f32 %v4416_v61, 0.0  ;;  %v4419_v17 = vadd.f32 %v13951_v30, %v17593_v32  ;;  %v4410_v34 = vpop.f32.mrb[99].mxu1  ;;  %13988 = vmatprep.mubr.msk.bf16.mxu1 %vm4502_vm3, %v4706_v58  ;;  %14017 = vmatpush3.bf16.msra.mxu1 %v15697_v21 }
 0x31b   : > { %v4486_v23 = vmax.f32 %v4408_v53, 0.0  ;;  %v4411_v10 = vadd.f32 %v17593_v32, %v4410_v34  ;;  %14018 = vmatprep.subr.bf16.mxu1 %v15698_v4  ;;  %v4684_v11 = vld [vmem:[#allocation4 + $0x108] sm:$0xff] }
 0x31c   : > { %4594 = vst.msk [vmem:[#allocation4 + $0x148] sm:$0xff] %vm4502_vm3, %v4488_v45  ;;  %v4489_v33 = vmax.f32 %v4419_v17, 0.0  ;;  %v4682_v22 = vld [vmem:[#allocation4 + $0xe8] sm:$0xff] }
 0x31d   : > { %4592 = vst.msk [vmem:[#allocation4 + $0x128] sm:$0xff] %vm4502_vm3, %v4486_v23  ;;  %v4487_v47 = vmax.f32 %v4411_v10, 0.0  ;;  %v4685_v5 = vld [vmem:[#allocation4 + $0x110] sm:$0xff] }
 0x31e   : > { %4595 = vst.msk [vmem:[#allocation4 + $0x150] sm:$0xff] %vm4502_vm3, %v4489_v33  ;;  %v4683_v60 = vld [vmem:[#allocation4 + $0xf0] sm:$0xff]  ;;  %14019 = vmatpush3.bf16.msra.mxu1 %v15698_v4  ;;  %v4708_v21 = vpack.c.bf16 %v4685_v5, %v4684_v11 }
 0x31f   : > { %4593 = vst.msk [vmem:[#allocation4 + $0x130] sm:$0xff] %vm4502_vm3, %v4487_v47  ;;  %v13954_v38 = vpop.f32.mrb[100].mxu1  ;;  %v4707_v44 = vpack.c.bf16 %v4683_v60, %v4682_v22  ;;  %14052 = vmatprep.subr.bf16.mxu1 %v17673_v56 }
 0x320   : > { %v4432_v43 = vadd.f32 %v13954_v38, %v17593_v32  ;;  %v4423_v50 = vpop.f32.mrb[101].mxu1 }
 0x321   : > { %v4424_v57 = vadd.f32 %v17593_v32, %v4423_v50  ;;  %v13955_v27 = vpop.f32.mrb[102].mxu1  ;;  %13989 = vmatmul.mubr.msk.bf16.gmra.mrb[124].mxu1 %vm4502_vm3, %v4707_v44 }
 0x322   : > { %v4492_v2 = vmax.f32 %v4432_v43, 0.0  ;;  %v4435_v8 = vadd.f32 %v13955_v27, %v17593_v32  ;;  %v4426_v14 = vpop.f32.mrb[103].mxu1  ;;  %13992 = vmatprep.mubr.msk.bf16.mxu1 %vm4502_vm3, %v4708_v21 }
 0x323   : > { %v4490_v15 = vmax.f32 %v4424_v57, 0.0  ;;  %v4427_v19 = vadd.f32 %v17593_v32, %v4426_v14  ;;  %v4688_v45 = vld [vmem:[#allocation4 + $0x148] sm:$0xff] }
 0x324   : > { %4598 = vst.msk [vmem:[#allocation4 + $0x188] sm:$0xff] %vm4502_vm3, %v4492_v2  ;;  %v4493_v20 = vmax.f32 %v4435_v8, 0.0  ;;  %v4686_v6 = vld [vmem:[#allocation4 + $0x128] sm:$0xff] }
 0x325   : > { %4596 = vst.msk [vmem:[#allocation4 + $0x168] sm:$0xff] %vm4502_vm3, %v4490_v15  ;;  %v4491_v4 = vmax.f32 %v4427_v19, 0.0  ;;  %v4689_v61 = vld [vmem:[#allocation4 + $0x150] sm:$0xff] }
 0x326   : > { %4599 = vst.msk [vmem:[#allocation4 + $0x190] sm:$0xff] %vm4502_vm3, %v4493_v20  ;;  %v4687_v58 = vld [vmem:[#allocation4 + $0x130] sm:$0xff]  ;;  %v4710_v23 = vpack.c.bf16 %v4689_v61, %v4688_v45 }
 0x327   : > { %4597 = vst.msk [vmem:[#allocation4 + $0x170] sm:$0xff] %vm4502_vm3, %v4491_v4  ;;  %v13958_v53 = vpop.f32.mrb[104].mxu1  ;;  %v4709_v30 = vpack.c.bf16 %v4687_v58, %v4686_v6 }
 0x328   : > { %v4448_v17 = vadd.f32 %v13958_v53, %v17593_v32  ;;  %v4439_v34 = vpop.f32.mrb[105].mxu1 }
 0x329   : > { %v4440_v10 = vadd.f32 %v17593_v32, %v4439_v34  ;;  %v13959_v33 = vpop.f32.mrb[106].mxu1  ;;  %13993 = vmatmul.mubr.msk.bf16.gmra.mrb[128].mxu1 %vm4502_vm3, %v4709_v30 }
 0x32a   : > { %v4496_v47 = vmax.f32 %v4448_v17, 0.0  ;;  %v4451_v5 = vadd.f32 %v13959_v33, %v17593_v32  ;;  %v4442_v22 = vpop.f32.mrb[107].mxu1  ;;  %13996 = vmatprep.mubr.msk.bf16.mxu1 %vm4502_vm3, %v4710_v23 }
 0x32b   : > { %v4494_v60 = vmax.f32 %v4440_v10, 0.0  ;;  %v4443_v38 = vadd.f32 %v17593_v32, %v4442_v22  ;;  %v4692_v2 = vld [vmem:[#allocation4 + $0x188] sm:$0xff] }
 0x32c   : > { %4602 = vst.msk [vmem:[#allocation4 + $0x1c8] sm:$0xff] %vm4502_vm3, %v4496_v47  ;;  %v4497_v44 = vmax.f32 %v4451_v5, 0.0  ;;  %v4690_v50 = vld [vmem:[#allocation4 + $0x168] sm:$0xff] }
 0x32d   : > { %4600 = vst.msk [vmem:[#allocation4 + $0x1a8] sm:$0xff] %vm4502_vm3, %v4494_v60  ;;  %v4495_v11 = vmax.f32 %v4443_v38, 0.0  ;;  %v4693_v43 = vld [vmem:[#allocation4 + $0x190] sm:$0xff] }
 0x32e   : > { %4603 = vst.msk [vmem:[#allocation4 + $0x1d0] sm:$0xff] %vm4502_vm3, %v4497_v44  ;;  %v4691_v21 = vld [vmem:[#allocation4 + $0x170] sm:$0xff]  ;;  %v4712_v15 = vpack.c.bf16 %v4693_v43, %v4692_v2 }
 0x32f   : > { %4601 = vst.msk [vmem:[#allocation4 + $0x1b0] sm:$0xff] %vm4502_vm3, %v4495_v11  ;;  %v13962_v57 = vpop.f32.mrb[108].mxu1  ;;  %v4711_v27 = vpack.c.bf16 %v4691_v21, %v4690_v50  ;;  %v4609_v5 = vld [vmem:[#allocation4 + $0xf] sm:$0xff]  ;;  %v4610_v50 = vld [vmem:[#allocation4 + $0x27] sm:$0xff] }
 0x330   : > { %v4464_v8 = vadd.f32 %v13962_v57, %v17593_v32  ;;  %v4455_v14 = vpop.f32.mrb[109].mxu1  ;;  %v4611_v11 = vld [vmem:[#allocation4 + $0x2f] sm:$0xff]  ;;  %v4612_v57 = vld [vmem:[#allocation4 + $0x47] sm:$0xff] }
 0x331   : > { %v4456_v19 = vadd.f32 %v17593_v32, %v4455_v14  ;;  %v13963_v20 = vpop.f32.mrb[110].mxu1  ;;  %13997 = vmatmul.mubr.msk.bf16.gmra.mrb[132].mxu1 %vm4502_vm3, %v4711_v27  ;;  %v4613_v43 = vld [vmem:[#allocation4 + $0x4f] sm:$0xff]  ;;  %v17714_v21 = vpack.c.bf16 %v4611_v11, %v4610_v50  ;;  %v4626_v11 = vld [vmem:[#allocation4 + $0x127] sm:$0xff] }
 0x332   : > { %v4500_v4 = vmax.f32 %v4464_v8, 0.0  ;;  %v4467_v61 = vadd.f32 %v13963_v20, %v17593_v32  ;;  %v4458_v6 = vpop.f32.mrb[111].mxu1  ;;  %14000 = vmatprep.mubr.msk.bf16.mxu1 %vm4502_vm3, %v4712_v15  ;;  %v15700_v27 = vld [vmem:[%s19251_s9 + $0x68] sm:$0xff]   ;;  %v17719_v2 = vpack.c.bf16 %v4613_v43, %v4612_v57  ;;  %v15701_v8 = vld [vmem:[%s19251_s9 + $0x70] sm:$0xff]  }
 0x333   : > { %v4498_v58 = vmax.f32 %v4456_v19, 0.0  ;;  %v4459_v53 = vadd.f32 %v17593_v32, %v4458_v6  ;;  %v4696_v33 = vld [vmem:[#allocation4 + $0x1c8] sm:$0xff] }
 0x334   : > { %4606 = vst.msk [vmem:[#allocation4 + $0x208] sm:$0xff] %vm4502_vm3, %v4500_v4  ;;  %v4501_v30 = vmax.f32 %v4467_v61, 0.0  ;;  %v4694_v34 = vld [vmem:[#allocation4 + $0x1a8] sm:$0xff]  ;;  %v15702_v61 = vld [vmem:[%s19251_s9 + $0x78] sm:$0xff]  }
 0x335   : > { %4604 = vst.msk [vmem:[#allocation4 + $0x1e8] sm:$0xff] %vm4502_vm3, %v4498_v58  ;;  %v4499_v45 = vmax.f32 %v4459_v53, 0.0  ;;  %v4697_v17 = vld [vmem:[#allocation4 + $0x1d0] sm:$0xff]  ;;  %v4608_v32 = vld [vmem:[#allocation4 + $0x7] sm:$0xff] }
 0x336   : > { %4607 = vst.msk [vmem:[#allocation4 + $0x210] sm:$0xff] %vm4502_vm3, %v4501_v30  ;;  %v4695_v23 = vld [vmem:[#allocation4 + $0x1b0] sm:$0xff]  ;;  %v4714_v47 = vpack.c.bf16 %v4697_v17, %v4696_v33  ;;  %v4640_v38 = vpack.c.bf16 %v4609_v5, %v4608_v32  ;;  %v4614_v19 = vld [vmem:[#allocation4 + $0x67] sm:$0xff] }
 0x337   : > { %4605 = vst.msk [vmem:[#allocation4 + $0x1f0] sm:$0xff] %vm4502_vm3, %v4499_v45  ;;  %v4713_v10 = vpack.c.bf16 %v4695_v23, %v4694_v34  ;;  %v4615_v14 = vld [vmem:[#allocation4 + $0x6f] sm:$0xff]  ;;  %v4616_v4 = vld [vmem:[#allocation4 + $0x87] sm:$0xff] }
 0x338   : > { %v4617_v15 = vld [vmem:[#allocation4 + $0x8f] sm:$0xff]  ;;  %v17729_v20 = vpack.c.bf16 %v4615_v14, %v4614_v19  ;;  %v4618_v30 = vld [vmem:[#allocation4 + $0xa7] sm:$0xff] }
 0x339   : > { %14001 = vmatmul.mubr.msk.bf16.gmra.mrb[136].mxu1 %vm4502_vm3, %v4713_v10  ;;  %v17734_v6 = vpack.c.bf16 %v4617_v15, %v4616_v4  ;;  %v4619_v58 = vld [vmem:[#allocation4 + $0xaf] sm:$0xff]  ;;  %v4620_v17 = vld [vmem:[#allocation4 + $0xc7] sm:$0xff] }
 0x33a   : > { %14004 = vmatprep.mubr.msk.bf16.mxu1 %vm4502_vm3, %v4714_v47  ;;  %v4621_v53 = vld [vmem:[#allocation4 + $0xcf] sm:$0xff]  ;;  %v17743_v45 = vpack.c.bf16 %v4619_v58, %v4618_v30  ;;  %v4622_v32 = vld [vmem:[#allocation4 + $0xe7] sm:$0xff] }
 0x33b   : > { %v15704_v34 = vld [vmem:[%s19251_s9 + $0x88] sm:$0xff]   ;;  %v17748_v23 = vpack.c.bf16 %v4621_v53, %v4620_v17  ;;  %v17757_v10 = vld [vmem:[%s19251_s9 + $0x90] sm:$0xff]  }
 0x33c   : > { %v4698_v22 = vld [vmem:[#allocation4 + $0x1e8] sm:$0xff] }
 0x33d   : > { %v4623_v33 = vld [vmem:[#allocation4 + $0xef] sm:$0xff]  ;;  %v4628_v50 = vld [vmem:[#allocation4 + $0x147] sm:$0xff] }
 0x33e   : > { %v4699_v60 = vld [vmem:[#allocation4 + $0x1f0] sm:$0xff]  ;;  %v17759_v5 = vpack.c.bf16 %v4623_v33, %v4622_v32  ;;  %v4630_v14 = vld [vmem:[#allocation4 + $0x167] sm:$0xff]  ;;  %v17793_v33 = vld [vmem:[%s19248_s6] ss:$0 sm:$0xff] }
 0x33f   : > { %v4715_v44 = vpack.c.bf16 %v4699_v60, %v4698_v22  ;;  %v4625_v47 = vld [vmem:[#allocation4 + $0x10f] sm:$0xff]  ;;  %v4624_v22 = vld [vmem:[#allocation4 + $0x107] sm:$0xff] }
 0x340   : > { %v17762_v60 = vpack.c.bf16 %v4625_v47, %v4624_v22  ;;  %v4632_v19 = vld [vmem:[#allocation4 + $0x187] sm:$0xff] }
 0x341   : > { %14005 = vmatmul.mubr.msk.bf16.gmra.mrb[140].mxu1 %vm4502_vm3, %v4715_v44  ;;  %v4629_v44 = vld [vmem:[#allocation4 + $0x14f] sm:$0xff]  ;;  %v4634_v58 = vld [vmem:[#allocation4 + $0x1a7] sm:$0xff] }
 0x342   : > { %14020 = vmatprep.mubr.msk.bf16.mxu1 %vm4502_vm3, %v4640_v38  ;;  %v4627_v38 = vld [vmem:[#allocation4 + $0x12f] sm:$0xff]  ;;  %v17770_v57 = vpack.c.bf16 %v4629_v44, %v4628_v50  ;;  %v4636_v30 = vld [vmem:[#allocation4 + $0x1c7] sm:$0xff] }
 0x343   : > { %v17768_v43 = vpack.c.bf16 %v4627_v38, %v4626_v11  ;;  %v5219_v44 = vld [vmem:[#allocation4 + $0x9] sm:$0xff]  ;;  %v5220_v11 = vld [vmem:[#allocation4 + $0x11] sm:$0xff] }
 0x349   : > { %14021 = vmatmul.mubr.msk.bf16.vlgmr.msra.gmra.mrb[112].mxu1 %vm4502_vm3, %v17714_v21 }
 0x34a   : > { %14024 = vmatprep.mubr.msk.bf16.mxu1 %vm4502_vm3, %v17719_v2  ;;  %14053 = vmatpush3.bf16.msra.mxu1 %v17673_v56  ;;  %v15703_v56 = vld [vmem:[%s19251_s9 + $0x80] sm:$0xff]  }
 0x34b   : > { %14054 = vmatprep.subr.bf16.mxu1 %v15700_v27 }
 0x34e   : > { %14055 = vmatpush3.bf16.msra.mxu1 %v15700_v27  ;;  %v4631_v27 = vld [vmem:[#allocation4 + $0x16f] sm:$0xff] }
 0x34f   : > { %14056 = vmatprep.subr.bf16.mxu1 %v15701_v8  ;;  %v17776_v15 = vpack.c.bf16 %v4631_v27, %v4630_v14  ;;  %v4639_v14 = vld [vmem:[#allocation4 + $0x1ef] sm:$0xff] }
 0x351   : > { %14025 = vmatmul.mubr.msk.bf16.gmra.mrb[116].mxu1 %vm4502_vm3, %v17729_v20 }
 0x352   : > { %14028 = vmatprep.mubr.msk.bf16.mxu1 %vm4502_vm3, %v17734_v6  ;;  %14057 = vmatpush3.bf16.msra.mxu1 %v15701_v8  ;;  %v4633_v8 = vld [vmem:[#allocation4 + $0x18f] sm:$0xff] }
 0x353   : > { %14058 = vmatprep.subr.bf16.mxu1 %v15702_v61  ;;  %v17778_v4 = vpack.c.bf16 %v4633_v8, %v4632_v19 }
 0x356   : > { %14059 = vmatpush3.bf16.msra.mxu1 %v15702_v61  ;;  %v4635_v61 = vld [vmem:[#allocation4 + $0x1af] sm:$0xff] }
 0x357   : > { %14060 = vmatprep.subr.bf16.mxu1 %v15703_v56  ;;  %v17784_v53 = vpack.c.bf16 %v4635_v61, %v4634_v58  ;;  %v4638_v58 = vld [vmem:[#allocation4 + $0x1e7] sm:$0xff] }
 0x359   : > { %14029 = vmatmul.mubr.msk.bf16.gmra.mrb[120].mxu1 %vm4502_vm3, %v17743_v45 }
 0x35a   : > { %14032 = vmatprep.mubr.msk.bf16.mxu1 %vm4502_vm3, %v17748_v23  ;;  %14061 = vmatpush3.bf16.msra.mxu1 %v15703_v56  ;;  %v4637_v56 = vld [vmem:[#allocation4 + $0x1cf] sm:$0xff] }
 0x35b   : > { %14062 = vmatprep.subr.bf16.mxu1 %v15704_v34  ;;  %v17786_v17 = vpack.c.bf16 %v4637_v56, %v4636_v30  ;;  %v5251_v30 = vpack.c.bf16 %v5220_v11, %v5219_v44 }
 0x35e   : > { %14063 = vmatpush3.bf16.msra.mxu1 %v15704_v34 }
 0x35f   : > { %14096 = vmatprep.subr.bf16.mxu1 %v17757_v10 }
 0x361   : > { %14033 = vmatmul.mubr.msk.bf16.gmra.mrb[124].mxu1 %vm4502_vm3, %v17759_v5 }
 0x362   : > { %14036 = vmatprep.mubr.msk.bf16.mxu1 %vm4502_vm3, %v17762_v60 }
 0x369   : > { %14037 = vmatmul.mubr.msk.bf16.gmra.mrb[128].mxu1 %vm4502_vm3, %v17768_v43 }
 0x36a   : > { %14040 = vmatprep.mubr.msk.bf16.mxu1 %vm4502_vm3, %v17770_v57 }
 0x371   : > { %14041 = vmatmul.mubr.msk.bf16.gmra.mrb[132].mxu1 %vm4502_vm3, %v17776_v15 }
 0x372   : > { %14044 = vmatprep.mubr.msk.bf16.mxu1 %vm4502_vm3, %v17778_v4 }
 0x379   : > { %v13900_v34 = vpop.f32.mrb[16].mxu0  ;;  %14045 = vmatmul.mubr.msk.bf16.gmra.mrb[136].mxu1 %vm4502_vm3, %v17784_v53 }
 0x37a   : > { %v14792_v47 = vadd.f32 %v13900_v34, %v17473_v37  ;;  %v3907_v32 = vpop.f32.mrb[17].mxu0  ;;  %14048 = vmatprep.mubr.msk.bf16.mxu1 %vm4502_vm3, %v17786_v17 }
 0x37b   : > { %v14793_v22 = vadd.f32 %v3907_v32, %v17475_v16  ;;  %v13901_v38 = vpop.f32.mrb[18].mxu0  ;;  %v17805_v32 = vpack.c.bf16 %v4639_v14, %v4638_v58  ;;  %v5221_v14 = vld [vmem:[#allocation4 + $0x29] sm:$0xff] }
 0x37c   : > { %v14794_v50 = vadd.f32 %v13901_v38, %v17477_v51  ;;  %v3910_v27 = vpop.f32.mrb[19].mxu0  ;;  %v4075_v8 = vadd.f32 %v14792_v47, %v17793_v33 }
 0x37d   : > { %v14795_v19 = vadd.f32 %v3910_v27, %v17479_v36  ;;  %v4073_v61 = vadd.f32 %v14793_v22, %v17793_v33 }
 0x37e   : > { %v4076_v37 = vadd.f32 %v14794_v50, %v17793_v33  ;;  %v4107_v56 = vmax.f32 %v4075_v8, 0.0 }
 0x37f   : > { %v4074_v16 = vadd.f32 %v14795_v19, %v17793_v33  ;;  %v4105_v34 = vmax.f32 %v4073_v61, 0.0  ;;  %v5222_v19 = vld [vmem:[#allocation4 + $0x31] sm:$0xff] }
 0x380   : > { %4173 = vrot.lane.b32.xlu1 %v4107_v56, %s15946_s24  ;;  %v4108_v36 = vmax.f32 %v4076_v37, 0.0  ;;  %v5224_v37 = vld [vmem:[#allocation4 + $0x51] sm:$0xff] }
 0x381   : > { %4169 = vrot.lane.b32.xlu0 %v4105_v34, %s15946_s24  ;;  %v13904_v51 = vpop.f32.mrb[20].mxu0  ;;  %14049 = vmatmul.mubr.msk.bf16.gmra.mrb[140].mxu1 %vm4502_vm3, %v17805_v32  ;;  %v4106_v38 = vmax.f32 %v4074_v16, 0.0 }
 0x382   : > { %v14796_v47 = vadd.f32 %v13904_v51, %v17485_v49  ;;  %v3923_v22 = vpop.f32.mrb[21].mxu0  ;;  %14064 = vmatprep.mubr.msk.bf16.mxu1 %vm4502_vm3, %v5251_v30  ;;  %v5223_v49 = vld [vmem:[#allocation4 + $0x49] sm:$0xff]  ;;  %v17821_v30 = vpack.c.bf16 %v5222_v19, %v5221_v14  ;;  %v15707_v19 = vld [vmem:[%s19251_s9 + $0xa0] sm:$0xff]  }
 0x383   : > { %v14797_v44 = vadd.f32 %v3923_v22, %v17487_v9  ;;  %v13905_v11 = vpop.f32.mrb[22].mxu0  ;;  %v17824_v34 = vpack.c.bf16 %v5224_v37, %v5223_v49  ;;  %v5225_v14 = vld [vmem:[#allocation4 + $0x69] sm:$0xff]  ;;  %v5228_v49 = vld [vmem:[#allocation4 + $0x91] sm:$0xff] }
 0x384   : > { %v4079_v50 = vadd.f32 %v14796_v47, %v17793_v33  ;;  %v14798_v27 = vadd.f32 %v13905_v11, %v17489_v18  ;;  %4175 = vrot.lane.b32.xlu1 %v4108_v36, %s15946_s24  ;;  %v3926_v8 = vpop.f32.mrb[23].mxu0 }
 0x385   : > { %v14799_v61 = vadd.f32 %v3926_v8, %v17491_v7  ;;  %4171 = vrot.lane.b32.xlu0 %v4106_v38, %s15946_s24  ;;  %v4077_v9 = vadd.f32 %v14797_v44, %v17793_v33  ;;  %v15706_v7 = vld [vmem:[%s19251_s9 + $0x98] sm:$0xff]  }
 0x386   : > { %v4111_v56 = vmax.f32 %v4079_v50, 0.0  ;;  %v4080_v58 = vadd.f32 %v14798_v27, %v17793_v33 }
 0x387   : > { %v4078_v18 = vadd.f32 %v14799_v61, %v17793_v33  ;;  %v4109_v22 = vmax.f32 %v4077_v9, 0.0 }
 0x388   : > { %v4112_v16 = vmax.f32 %v4080_v58, 0.0 }
 0x389   : > { %4181 = vrot.lane.b32.xlu0 %v4111_v56, %s15946_s24  ;;  %v13908_v51 = vpop.f32.mrb[24].mxu0  ;;  %14065 = vmatmul.mubr.msk.bf16.vlgmr.msra.gmra.mrb[112].mxu1 %vm4502_vm3, %v17821_v30  ;;  %v4110_v11 = vmax.f32 %v4078_v18, 0.0 }
 0x38a   : > { %v14800_v36 = vadd.f32 %v13908_v51, %v17497_v62  ;;  %4183 = vrot.lane.b32.xlu1 %v4112_v16, %s15946_s24  ;;  %v3939_v47 = vpop.f32.mrb[25].mxu0  ;;  %14068 = vmatprep.mubr.msk.bf16.mxu1 %vm4502_vm3, %v17824_v34  ;;  %v5226_v62 = vld [vmem:[#allocation4 + $0x71] sm:$0xff] }
 0x38b   : > { %v14801_v38 = vadd.f32 %v3939_v47, %v17499_v54  ;;  %v13909_v44 = vpop.f32.mrb[26].mxu0  ;;  %14097 = vmatpush3.bf16.msra.mxu1 %v17757_v10  ;;  %v5227_v54 = vld [vmem:[#allocation4 + $0x89] sm:$0xff]  ;;  %v17848_v56 = vpack.c.bf16 %v5226_v62, %v5225_v14  ;;  %v5232_v62 = vld [vmem:[#allocation4 + $0xd1] sm:$0xff] }
 0x38c   : > { %v4083_v50 = vadd.f32 %v14800_v36, %v17793_v33  ;;  %v14802_v27 = vadd.f32 %v13909_v44, %v17501_v12  ;;  %v3942_v8 = vpop.f32.mrb[27].mxu0  ;;  %14098 = vmatprep.subr.bf16.mxu1 %v15706_v7  ;;  %v17851_v16 = vpack.c.bf16 %v5228_v49, %v5227_v54 }
 0x38d   : > { %v14803_v61 = vadd.f32 %v3942_v8, %v17503_v48  ;;  %4177 = vrot.lane.b32.xlu0 %v4109_v22, %s15946_s24  ;;  %v4081_v12 = vadd.f32 %v14801_v38, %v17793_v33  ;;  %v15708_v48 = vld [vmem:[%s19251_s9 + $0xa8] sm:$0xff]   ;;  %v5230_v8 = vld [vmem:[#allocation4 + $0xb1] sm:$0xff] }
 0x38e   : > { %v4115_v10 = vmax.f32 %v4083_v50, 0.0  ;;  %v4084_v37 = vadd.f32 %v14802_v27, %v17793_v33  ;;  %4179 = vrot.lane.b32.xlu1 %v4110_v11, %s15946_s24  ;;  %v5229_v27 = vld [vmem:[#allocation4 + $0xa9] sm:$0xff] }
 0x38f   : > { %14099 = vmatpush3.bf16.msra.mxu1 %v15706_v7  ;;  %v4082_v9 = vadd.f32 %v14803_v61, %v17793_v33  ;;  %v4113_v36 = vmax.f32 %v4081_v12, 0.0  ;;  %v17874_v54 = vpack.c.bf16 %v5230_v8, %v5229_v27 }
 0x390   : > { %v4116_v58 = vmax.f32 %v4084_v37, 0.0  ;;  %14100 = vmatprep.subr.bf16.mxu1 %v15707_v19 }
 0x391   : > { %4189 = vrot.lane.b32.xlu0 %v4115_v10, %s15946_s24  ;;  %v13912_v18 = vpop.f32.mrb[28].mxu0  ;;  %14069 = vmatmul.mubr.msk.bf16.gmra.mrb[116].mxu1 %vm4502_vm3, %v17848_v56  ;;  %v4114_v38 = vmax.f32 %v4082_v9, 0.0 }
 0x392   : > { %v14804_v51 = vadd.f32 %v13912_v18, %v17509_v39  ;;  %4191 = vrot.lane.b32.xlu1 %v4116_v58, %s15946_s24  ;;  %v3955_v7 = vpop.f32.mrb[29].mxu0  ;;  %14072 = vmatprep.mubr.msk.bf16.mxu1 %vm4502_vm3, %v17851_v16  ;;  %v15709_v39 = vld [vmem:[%s19251_s9 + $0xb0] sm:$0xff]  }
 0x393   : > { %v14805_v47 = vadd.f32 %v3955_v7, %v17511_v31  ;;  %v13913_v22 = vpop.f32.mrb[30].mxu0  ;;  %14101 = vmatpush3.bf16.msra.mxu1 %v15707_v19  ;;  %v5231_v31 = vld [vmem:[#allocation4 + $0xc9] sm:$0xff] }
 0x394   : > { %v4087_v44 = vadd.f32 %v14804_v51, %v17793_v33  ;;  %v14806_v11 = vadd.f32 %v13913_v22, %v17513_v42  ;;  %v3958_v50 = vpop.f32.mrb[31].mxu0  ;;  %14102 = vmatprep.subr.bf16.mxu1 %v15708_v48  ;;  %v17877_v37 = vpack.c.bf16 %v5232_v62, %v5231_v31 }
 0x395   : > { %v14807_v14 = vadd.f32 %v3958_v50, %v17515_v59  ;;  %4185 = vrot.lane.b32.xlu0 %v4113_v36, %s15946_s24  ;;  %v4085_v42 = vadd.f32 %v14805_v47, %v17793_v33  ;;  %v15710_v59 = vld [vmem:[%s19251_s9 + $0xb8] sm:$0xff]  }
 0x396   : > { %v4119_v19 = vmax.f32 %v4087_v44, 0.0  ;;  %v4088_v61 = vadd.f32 %v14806_v11, %v17793_v33  ;;  %4187 = vrot.lane.b32.xlu1 %v4114_v38, %s15946_s24  ;;  %v5233_v38 = vld [vmem:[#allocation4 + $0xe9] sm:$0xff]  ;;  %v5234_v44 = vld [vmem:[#allocation4 + $0xf1] sm:$0xff] }
 0x397   : > { %14103 = vmatpush3.bf16.msra.mxu1 %v15708_v48  ;;  %v4086_v10 = vadd.f32 %v14807_v14, %v17793_v33  ;;  %v4117_v48 = vmax.f32 %v4085_v42, 0.0  ;;  %v5236_v50 = vld [vmem:[#allocation4 + $0x111] sm:$0xff] }
 0x398   : > { %v4120_v49 = vmax.f32 %v4088_v61, 0.0  ;;  %14104 = vmatprep.subr.bf16.mxu1 %v15709_v39 }
 0x399   : > { %4197 = vrot.lane.b32.xlu0 %v4119_v19, %s15946_s24  ;;  %v13916_v12 = vpop.f32.mrb[32].mxu0  ;;  %14073 = vmatmul.mubr.msk.bf16.gmra.mrb[120].mxu1 %vm4502_vm3, %v17874_v54  ;;  %v4118_v7 = vmax.f32 %v4086_v10, 0.0 }
 0x39a   : > { %v14808_v58 = vadd.f32 %v13916_v12, %v17521_v46  ;;  %4199 = vrot.lane.b32.xlu1 %v4120_v49, %s15946_s24  ;;  %v3971_v9 = vpop.f32.mrb[33].mxu0  ;;  %14076 = vmatprep.mubr.msk.bf16.mxu1 %vm4502_vm3, %v17877_v37  ;;  %v17895_v46 = vld [vmem:[%s19251_s9 + $0xc0] sm:$0xff]  }
 0x39b   : > { %v14809_v18 = vadd.f32 %v3971_v9, %v17523_v1  ;;  %v13917_v51 = vpop.f32.mrb[34].mxu0  ;;  %14105 = vmatpush3.bf16.msra.mxu1 %v15709_v39  ;;  %v5235_v1 = vld [vmem:[#allocation4 + $0x109] sm:$0xff]  ;;  %v17902_v39 = vpack.c.bf16 %v5234_v44, %v5233_v38 }
 0x39c   : > { %v4091_v36 = vadd.f32 %v14808_v58, %v17793_v33  ;;  %v14810_v47 = vadd.f32 %v13917_v51, %v17525_v28  ;;  %v3974_v22 = vpop.f32.mrb[35].mxu0  ;;  %14106 = vmatprep.subr.bf16.mxu1 %v15710_v59  ;;  %v17905_v62 = vpack.c.bf16 %v5236_v50, %v5235_v1  ;;  %v5239_v51 = vld [vmem:[#allocation4 + $0x149] sm:$0xff] }
 0x39d   : > { %v14811_v11 = vadd.f32 %v3974_v22, %v17527_v52  ;;  %4193 = vrot.lane.b32.xlu0 %v4117_v48, %s15946_s24  ;;  %v4089_v28 = vadd.f32 %v14809_v18, %v17793_v33  ;;  %v5237_v48 = vld [vmem:[#allocation4 + $0x129] sm:$0xff]  ;;  %v5238_v18 = vld [vmem:[#allocation4 + $0x131] sm:$0xff] }
 0x39e   : > { %v4123_v27 = vmax.f32 %v4091_v36, 0.0  ;;  %v4092_v8 = vadd.f32 %v14810_v47, %v17793_v33  ;;  %4195 = vrot.lane.b32.xlu1 %v4118_v7, %s15946_s24  ;;  %v5240_v7 = vld [vmem:[#allocation4 + $0x151] sm:$0xff]  ;;  %v17923_v22 = vpack.c.bf16 %v5238_v18, %v5237_v48 }
 0x39f   : > { %14107 = vmatpush3.bf16.msra.mxu1 %v15710_v59  ;;  %v4090_v31 = vadd.f32 %v14811_v11, %v17793_v33  ;;  %v4121_v42 = vmax.f32 %v4089_v28, 0.0  ;;  %v17926_v44 = vpack.c.bf16 %v5240_v7, %v5239_v51 }
 0x3a0   : > { %v4124_v14 = vmax.f32 %v4092_v8, 0.0  ;;  %14140 = vmatprep.subr.bf16.mxu1 %v17895_v46 }
 0x3a1   : > { %4205 = vrot.lane.b32.xlu0 %v4123_v27, %s15946_s24  ;;  %v13920_v52 = vpop.f32.mrb[36].mxu0  ;;  %14077 = vmatmul.mubr.msk.bf16.gmra.mrb[124].mxu1 %vm4502_vm3, %v17902_v39  ;;  %v4122_v59 = vmax.f32 %v4090_v31, 0.0 }
 0x3a2   : > { %v14812_v19 = vadd.f32 %v13920_v52, %v17530_v25  ;;  %4207 = vrot.lane.b32.xlu1 %v4124_v14, %s15946_s24  ;;  %v3987_v61 = vpop.f32.mrb[37].mxu0  ;;  %14080 = vmatprep.mubr.msk.bf16.mxu1 %vm4502_vm3, %v17905_v62 }
 0x3a3   : > { %v14813_v49 = vadd.f32 %v3987_v61, %v17532_v55  ;;  %v13921_v10 = vpop.f32.mrb[38].mxu0  ;;  %v5242_v61 = vld [vmem:[#allocation4 + $0x171] sm:$0xff] }
 0x3a4   : > { %v4095_v12 = vadd.f32 %v14812_v19, %v17793_v33  ;;  %v14814_v58 = vadd.f32 %v13921_v10, %v17534_v40  ;;  %v3990_v9 = vpop.f32.mrb[39].mxu0  ;;  %v5241_v19 = vld [vmem:[#allocation4 + $0x169] sm:$0xff] }
 0x3a5   : > { %v14815_v25 = vadd.f32 %v3990_v9, %v17536_v41  ;;  %4201 = vrot.lane.b32.xlu0 %v4121_v42, %s15946_s24  ;;  %v4093_v55 = vadd.f32 %v14813_v49, %v17793_v33  ;;  %v5243_v42 = vld [vmem:[#allocation4 + $0x189] sm:$0xff]  ;;  %v5244_v49 = vld [vmem:[#allocation4 + $0x191] sm:$0xff] }
 0x3a6   : > { %v4127_v36 = vmax.f32 %v4095_v12, 0.0  ;;  %v4096_v47 = vadd.f32 %v14814_v58, %v17793_v33  ;;  %4203 = vrot.lane.b32.xlu1 %v4122_v59, %s15946_s24  ;;  %v17943_v12 = vpack.c.bf16 %v5242_v61, %v5241_v19  ;;  %v17946_v9 = vpack.c.bf16 %v5244_v49, %v5243_v42  ;;  %v5250_v19 = vld [vmem:[#allocation4 + $0x1f1] sm:$0xff]  ;;  %v15712_v61 = vld [vmem:[%s19251_s9 + $0xc8] sm:$0xff]  }
 0x3a7   : > { %v4094_v40 = vadd.f32 %v14815_v25, %v17793_v33  ;;  %v4125_v50 = vmax.f32 %v4093_v55, 0.0  ;;  %v5895_v49 = vld [vmem:[#allocation4 + $0x28] sm:$0xff] }
 0x3a8   : > { %v4128_v38 = vmax.f32 %v4096_v47, 0.0 }
 0x3a9   : > { %4213 = vrot.lane.b32.xlu0 %v4127_v36, %s15946_s24  ;;  %v13924_v41 = vpop.f32.mrb[40].mxu0  ;;  %14081 = vmatmul.mubr.msk.bf16.gmra.mrb[128].mxu1 %vm4502_vm3, %v17923_v22  ;;  %v4126_v28 = vmax.f32 %v4094_v40, 0.0  ;;  %v5245_v40 = vld [vmem:[#allocation4 + $0x1a9] sm:$0xff] }
 0x3aa   : > { %v14816_v11 = vadd.f32 %v13924_v41, %v17545_v29  ;;  %4215 = vrot.lane.b32.xlu1 %v4128_v38, %s15946_s24  ;;  %v4003_v1 = vpop.f32.mrb[41].mxu0  ;;  %14084 = vmatprep.mubr.msk.bf16.mxu1 %vm4502_vm3, %v17926_v44  ;;  %v5246_v41 = vld [vmem:[#allocation4 + $0x1b1] sm:$0xff] }
 0x3ab   : > { %v14817_v27 = vadd.f32 %v4003_v1, %v17549_v63  ;;  %v13925_v8 = vpop.f32.mrb[42].mxu0  ;;  %v5248_v1 = vld [vmem:[#allocation4 + $0x1d1] sm:$0xff] }
 0x3ac   : > { %v4099_v14 = vadd.f32 %v14816_v11, %v17793_v33  ;;  %v14818_v31 = vadd.f32 %v13925_v8, %v17553_v0  ;;  %v4006_v52 = vpop.f32.mrb[43].mxu0  ;;  %v5247_v11 = vld [vmem:[#allocation4 + $0x1c9] sm:$0xff]  ;;  %v17963_v8 = vpack.c.bf16 %v5246_v41, %v5245_v40 }
 0x3ad   : > { %v14819_v29 = vadd.f32 %v4006_v52, %v17555_v24  ;;  %4209 = vrot.lane.b32.xlu0 %v4125_v50, %s15946_s24  ;;  %v4097_v63 = vadd.f32 %v14817_v27, %v17793_v33  ;;  %v5249_v52 = vld [vmem:[#allocation4 + $0x1e9] sm:$0xff] }
 0x3ae   : > { %v4131_v10 = vmax.f32 %v4099_v14, 0.0  ;;  %v4100_v59 = vadd.f32 %v14818_v31, %v17793_v33  ;;  %4211 = vrot.lane.b32.xlu1 %v4126_v28, %s15946_s24  ;;  %v17966_v14 = vpack.c.bf16 %v5248_v1, %v5247_v11  ;;  %v5904_v40 = vld [vmem:[#allocation4 + $0xb0] sm:$0xff]  ;;  %v5901_v41 = vld [vmem:[#allocation4 + $0x88] sm:$0xff] }
 0x3af   : > { %v4098_v0 = vadd.f32 %v14819_v29, %v17793_v33  ;;  %v4129_v25 = vmax.f32 %v4097_v63, 0.0  ;;  %v15713_v29 = vld [vmem:[%s19251_s9 + $0xd0] sm:$0xff]   ;;  %v5903_v1 = vld [vmem:[#allocation4 + $0xa8] sm:$0xff] }
 0x3b0   : > { %v4132_v58 = vmax.f32 %v4100_v59, 0.0  ;;  %v5898_v63 = vld [vmem:[#allocation4 + $0x50] sm:$0xff] }
 0x3b1   : > { %4221 = vrot.lane.b32.xlu0 %v4131_v10, %s15946_s24  ;;  %v13928_v24 = vpop.f32.mrb[44].mxu0  ;;  %14085 = vmatmul.mubr.msk.bf16.gmra.mrb[132].mxu1 %vm4502_vm3, %v17943_v12  ;;  %v4130_v36 = vmax.f32 %v4098_v0, 0.0  ;;  %v5897_v0 = vld [vmem:[#allocation4 + $0x48] sm:$0xff] }
 0x3b2   : > { %v14820_v48 = vadd.f32 %v13928_v24, %v17564_v26  ;;  %4223 = vrot.lane.b32.xlu1 %v4132_v58, %s15946_s24  ;;  %v4019_v18 = vpop.f32.mrb[45].mxu0  ;;  %14088 = vmatprep.mubr.msk.bf16.mxu1 %vm4502_vm3, %v17946_v9  ;;  %v5900_v58 = vld [vmem:[#allocation4 + $0x70] sm:$0xff] }
 0x3b3   : > { %v14821_v51 = vadd.f32 %v4019_v18, %v17569_v3  ;;  %v13929_v7 = vpop.f32.mrb[46].mxu0  ;;  %v5899_v18 = vld [vmem:[#allocation4 + $0x68] sm:$0xff] }
 0x3b4   : > { %v4103_v47 = vadd.f32 %v14820_v48, %v17793_v33  ;;  %v14822_v55 = vadd.f32 %v13929_v7, %v17574_v35  ;;  %v4022_v38 = vpop.f32.mrb[47].mxu0  ;;  %v18054_v48 = vpack.c.bf16 %v5898_v63, %v5897_v0  ;;  %v18061_v7 = vpack.c.bf16 %v5900_v58, %v5899_v18  ;;  %v5913_v63 = vld [vmem:[#allocation4 + $0x148] sm:$0xff] }
 0x3b5   : > { %v14823_v26 = vadd.f32 %v4022_v38, %v17579_v13  ;;  %4217 = vrot.lane.b32.xlu0 %v4129_v25, %s15946_s24  ;;  %v4101_v3 = vadd.f32 %v14821_v51, %v17793_v33  ;;  %v15718_v25 = vld [vmem:[%s19251_s9 + $0xf8] sm:$0xff]   ;;  %v5902_v38 = vld [vmem:[#allocation4 + $0x90] sm:$0xff] }
 0x3b6   : > { %v4135_v50 = vmax.f32 %v4103_v47, 0.0  ;;  %v4104_v27 = vadd.f32 %v14822_v55, %v17793_v33  ;;  %4219 = vrot.lane.b32.xlu1 %v4130_v36, %s15946_s24  ;;  %v15719_v47 = vld [vmem:[%s19251_s9 + $0x100] sm:$0xff]   ;;  %v18076_v11 = vpack.c.bf16 %v5902_v38, %v5901_v41  ;;  %v5917_v38 = vld [vmem:[#allocation4 + $0x188] sm:$0xff] }
 0x3b7   : > { %v4102_v35 = vadd.f32 %v14823_v26, %v17793_v33  ;;  %v4133_v13 = vmax.f32 %v4101_v3, 0.0  ;;  %v17976_v33 = vpack.c.bf16 %v5250_v19, %v5249_v52  ;;  %v18083_v3 = vpack.c.bf16 %v5904_v40, %v5903_v1  ;;  %v5908_v52 = vld [vmem:[#allocation4 + $0xf0] sm:$0xff]  ;;  %v5905_v19 = vld [vmem:[#allocation4 + $0xc8] sm:$0xff] }
 0x3b8   : > { %v4136_v28 = vmax.f32 %v4104_v27, 0.0 }
 0x3b9   : > { %4229 = vrot.lane.b32.xlu0 %v4135_v50, %s15946_s24  ;;  %14089 = vmatmul.mubr.msk.bf16.gmra.mrb[136].mxu1 %vm4502_vm3, %v17963_v8  ;;  %v4134_v31 = vmax.f32 %v4102_v35, 0.0  ;;  %v15720_v50 = vld [vmem:[%s19251_s9 + $0x108] sm:$0xff]   ;;  %v15721_v35 = vld [vmem:[%s19251_s9 + $0x110] sm:$0xff]  }
 0x3ba   : > { %4231 = vrot.lane.b32.xlu1 %v4136_v28, %s15946_s24  ;;  %14092 = vmatprep.mubr.msk.bf16.mxu1 %vm4502_vm3, %v17966_v14 }
 0x3bd   : > { %4225 = vrot.lane.b32.xlu0 %v4133_v13, %s15946_s24 }
 0x3be   : > { %4227 = vrot.lane.b32.xlu1 %v4134_v31, %s15946_s24  ;;  %v5906_v31 = vld [vmem:[#allocation4 + $0xd0] sm:$0xff]  ;;  %s19307_s24 = sld [smem:[#allocation28_spill]] }
 0x3c1   : > { %14093 = vmatmul.mubr.msk.bf16.gmra.mrb[140].mxu1 %vm4502_vm3, %v17976_v33 }
 0x3c2   : > { %14108 = vmatprep.mubr.msk.bf16.mxu1 %vm4502_vm3, %v17714_v21  ;;  %v15714_v21 = vld [vmem:[%s19251_s9 + $0xd8] sm:$0xff]  }
 0x3c9   : > { %14109 = vmatmul.mubr.msk.bf16.vlgmr.msra.gmra.mrb[112].mxu1 %vm4502_vm3, %v17719_v2  ;;  %v15715_v2 = vld [vmem:[%s19251_s9 + $0xe0] sm:$0xff]  }
 0x3ca   : > { %14112 = vmatprep.mubr.msk.bf16.mxu1 %vm4502_vm3, %v17729_v20  ;;  %14141 = vmatpush3.bf16.msra.mxu1 %v17895_v46  ;;  %v15716_v20 = vld [vmem:[%s19251_s9 + $0xe8] sm:$0xff]  }
 0x3cb   : > { %14142 = vmatprep.subr.bf16.mxu1 %v15712_v61 }
 0x3ce   : > { %14143 = vmatpush3.bf16.msra.mxu1 %v15712_v61 }
 0x3cf   : > { %14144 = vmatprep.subr.bf16.mxu1 %v15713_v29 }
 0x3d1   : > { %14113 = vmatmul.mubr.msk.bf16.gmra.mrb[116].mxu1 %vm4502_vm3, %v17734_v6  ;;  %v15717_v6 = vld [vmem:[%s19251_s9 + $0xf0] sm:$0xff]  }
 0x3d2   : > { %14116 = vmatprep.mubr.msk.bf16.mxu1 %vm4502_vm3, %v17743_v45  ;;  %14145 = vmatpush3.bf16.msra.mxu1 %v15713_v29  ;;  %v18098_v29 = vpack.c.bf16 %v5906_v31, %v5905_v19  ;;  %v5923_v31 = vld [vmem:[#allocation4 + $0x1e8] sm:$0xff]  ;;  %v5926_v19 = vld [vmem:[#allocation4 + $0x210] sm:$0xff] }
 0x3d3   : > { %14146 = vmatprep.subr.bf16.mxu1 %v15714_v21 }
 0x3d6   : > { %14147 = vmatpush3.bf16.msra.mxu1 %v15714_v21  ;;  %v5907_v21 = vld [vmem:[#allocation4 + $0xe8] sm:$0xff] }
 0x3d7   : > { %14148 = vmatprep.subr.bf16.mxu1 %v15715_v2 }
 0x3d9   : > { %14117 = vmatmul.mubr.msk.bf16.gmra.mrb[120].mxu1 %vm4502_vm3, %v17748_v23 }
 0x3da   : > { %14120 = vmatprep.mubr.msk.bf16.mxu1 %vm4502_vm3, %v17759_v5  ;;  %14149 = vmatpush3.bf16.msra.mxu1 %v15715_v2  ;;  %v15722_v2 = vld [vmem:[%s19251_s9 + $0x118] sm:$0xff]  }
 0x3db   : > { %14150 = vmatprep.subr.bf16.mxu1 %v15716_v20 }
 0x3de   : > { %14151 = vmatpush3.bf16.msra.mxu1 %v15716_v20 }
 0x3df   : > { %14184 = vmatprep.subr.bf16.mxu1 %v15717_v6 }
 0x3e1   : > { %14121 = vmatmul.mubr.msk.bf16.gmra.mrb[124].mxu1 %vm4502_vm3, %v17762_v60 }
 0x3e2   : > { %14124 = vmatprep.mubr.msk.bf16.mxu1 %vm4502_vm3, %v17768_v43 }
 0x3e9   : > { %14125 = vmatmul.mubr.msk.bf16.gmra.mrb[128].mxu1 %vm4502_vm3, %v17770_v57 }
 0x3ea   : > { %14128 = vmatprep.mubr.msk.bf16.mxu1 %vm4502_vm3, %v17776_v15  ;;  %v5588_v15 = vld [vmem:[#allocation4 + $0x20f] sm:$0xff] }
 0x3f1   : > { %14129 = vmatmul.mubr.msk.bf16.gmra.mrb[132].mxu1 %vm4502_vm3, %v17778_v4  ;;  %v5896_v4 = vld [vmem:[#allocation4 + $0x30] sm:$0xff] }
 0x3f2   : > { %v4174_v45 = vpop.permute.xlu1 %4173  ;;  %14132 = vmatprep.mubr.msk.bf16.mxu1 %vm4502_vm3, %v17784_v53  ;;  %v5587_v53 = vld [vmem:[#allocation4 + $0x207] sm:$0xff] }
 0x3f3   : > { %4268 = vst.msk [vmem:[%s16656_s12 + $0x30] sm:$0xff] %vm4265_vm4, %v4174_v45  ;;  %v4170_v23 = vpop.permute.xlu0 %4169  ;;  %v18041_v42 = vpack.c.bf16 %v5588_v15, %v5587_v53  ;;  %v5911_v53 = vld [vmem:[#allocation4 + $0x128] sm:$0xff] }
 0x3f4   : > { %4266 = vst.msk [vmem:[%s16656_s12] sm:$0xff] %vm4265_vm4, %v4170_v23  ;;  %v18116_v23 = vld [vmem:[%s19251_s9 + $0x120] sm:$0xff]  }
 0x3f6   : > { %v4176_v5 = vpop.permute.xlu1 %4175 }
 0x3f7   : > { %4269 = vst.msk [vmem:[%s16656_s12 + $0x48] sm:$0xff] %vm4265_vm4, %v4176_v5  ;;  %v4172_v60 = vpop.permute.xlu0 %4171 }
 0x3f8   : > { %4267 = vst.msk [vmem:[%s16656_s12 + $0x18] sm:$0xff] %vm4265_vm4, %v4172_v60  ;;  %v5910_v60 = vld [vmem:[#allocation4 + $0x110] sm:$0xff] }
 0x3f9   : > { %14133 = vmatmul.mubr.msk.bf16.gmra.mrb[136].mxu1 %vm4502_vm3, %v17786_v17 }
 0x3fa   : > { %14136 = vmatprep.mubr.msk.bf16.mxu1 %vm4502_vm3, %v17805_v32  ;;  %v5927_v32 = vpack.c.bf16 %v5896_v4, %v5895_v49 }
 0x3fb   : > { %v4182_v43 = vpop.permute.xlu0 %4181 }
 0x3fc   : > { %4272 = vst.msk [vmem:[%s16656_s12 + $0x90] sm:$0xff] %vm4265_vm4, %v4182_v43  ;;  %v4184_v57 = vpop.permute.xlu1 %4183  ;;  %v5912_v43 = vld [vmem:[#allocation4 + $0x130] sm:$0xff] }
 0x3fd   : > { %4273 = vst.msk [vmem:[%s16656_s12 + $0xa8] sm:$0xff] %vm4265_vm4, %v4184_v57  ;;  %v5909_v57 = vld [vmem:[#allocation4 + $0x108] sm:$0xff]  ;;  %v18127_v49 = vpack.c.bf16 %v5912_v43, %v5911_v53 }
 0x3fe   : > { %v18122_v4 = vpack.c.bf16 %v5910_v60, %v5909_v57  ;;  %v6579_v60 = vld [vmem:[#allocation4 + $0xaf] sm:$0xff]  ;;  %v6578_v57 = vld [vmem:[#allocation4 + $0xa7] sm:$0xff] }
 0x3ff   : > { %v4178_v46 = vpop.permute.xlu0 %4177  ;;  %v6581_v43 = vld [vmem:[#allocation4 + $0xcf] sm:$0xff]  ;;  %v6580_v53 = vld [vmem:[#allocation4 + $0xc7] sm:$0xff] }
 0x400   : > { %4270 = vst.msk [vmem:[%s16656_s12 + $0x60] sm:$0xff] %vm4265_vm4, %v4178_v46  ;;  %v4180_v17 = vpop.permute.xlu1 %4179 }
 0x401   : > { %4271 = vst.msk [vmem:[%s16656_s12 + $0x78] sm:$0xff] %vm4265_vm4, %v4180_v17  ;;  %14137 = vmatmul.mubr.msk.bf16.gmra.mrb[140].mxu1 %vm4502_vm3, %v18041_v42 }
 0x402   : > { %14152 = vmatprep.mubr.msk.bf16.mxu1 %vm4502_vm3, %v5927_v32 }
 0x403   : > { %v4190_v10 = vpop.permute.xlu0 %4189 }
 0x404   : > { %4276 = vst.msk [vmem:[%s16656_s12 + $0xf0] sm:$0xff] %vm4265_vm4, %v4190_v10  ;;  %v4192_v59 = vpop.permute.xlu1 %4191  ;;  %v5914_v10 = vld [vmem:[#allocation4 + $0x150] sm:$0xff] }
 0x405   : > { %4277 = vst.msk [vmem:[%s16656_s12 + $0x108] sm:$0xff] %vm4265_vm4, %v4192_v59  ;;  %v5916_v59 = vld [vmem:[#allocation4 + $0x170] sm:$0xff]  ;;  %v18139_v0 = vpack.c.bf16 %v5914_v10, %v5913_v63  ;;  %v6582_v63 = vld [vmem:[#allocation4 + $0xe7] sm:$0xff] }
 0x406   : > { %v6583_v10 = vld [vmem:[#allocation4 + $0xef] sm:$0xff] }
 0x407   : > { %v4186_v24 = vpop.permute.xlu0 %4185 }
 0x408   : > { %4274 = vst.msk [vmem:[%s16656_s12 + $0xc0] sm:$0xff] %vm4265_vm4, %v4186_v24  ;;  %v4188_v51 = vpop.permute.xlu1 %4187  ;;  %v5915_v24 = vld [vmem:[#allocation4 + $0x168] sm:$0xff] }
 0x409   : > { %4275 = vst.msk [vmem:[%s16656_s12 + $0xd8] sm:$0xff] %vm4265_vm4, %v4188_v51  ;;  %14153 = vmatmul.mubr.msk.bf16.vlgmr.msra.gmra.mrb[112].mxu1 %vm4502_vm3, %v18054_v48 }
 0x40a   : > { %14156 = vmatprep.mubr.msk.bf16.mxu1 %vm4502_vm3, %v18061_v7  ;;  %14185 = vmatpush3.bf16.msra.mxu1 %v15717_v6  ;;  %v18105_v6 = vpack.c.bf16 %v5908_v52, %v5907_v21 }
 0x40b   : > { %v4198_v36 = vpop.permute.xlu0 %4197  ;;  %14186 = vmatprep.subr.bf16.mxu1 %v15718_v25 }
 0x40c   : > { %4280 = vst.msk [vmem:[%s16656_s12 + $0x150] sm:$0xff] %vm4265_vm4, %v4198_v36  ;;  %v4200_v55 = vpop.permute.xlu1 %4199 }
 0x40d   : > { %4281 = vst.msk [vmem:[%s16656_s12 + $0x168] sm:$0xff] %vm4265_vm4, %v4200_v55  ;;  %v5920_v55 = vld [vmem:[#allocation4 + $0x1b0] sm:$0xff] }
 0x40e   : > { %14187 = vmatpush3.bf16.msra.mxu1 %v15718_v25  ;;  %v18143_v25 = vpack.c.bf16 %v5916_v59, %v5915_v24  ;;  %v6585_v59 = vld [vmem:[#allocation4 + $0x10f] sm:$0xff]  ;;  %v6584_v24 = vld [vmem:[#allocation4 + $0x107] sm:$0xff] }
 0x40f   : > { %v4194_v26 = vpop.permute.xlu0 %4193  ;;  %14188 = vmatprep.subr.bf16.mxu1 %v15719_v47 }
 0x410   : > { %4278 = vst.msk [vmem:[%s16656_s12 + $0x120] sm:$0xff] %vm4265_vm4, %v4194_v26  ;;  %v4196_v27 = vpop.permute.xlu1 %4195  ;;  %v5919_v26 = vld [vmem:[#allocation4 + $0x1a8] sm:$0xff] }
 0x411   : > { %4279 = vst.msk [vmem:[%s16656_s12 + $0x138] sm:$0xff] %vm4265_vm4, %v4196_v27  ;;  %14157 = vmatmul.mubr.msk.bf16.gmra.mrb[116].mxu1 %vm4502_vm3, %v18076_v11  ;;  %v5922_v27 = vld [vmem:[#allocation4 + $0x1d0] sm:$0xff] }
 0x412   : > { %14160 = vmatprep.mubr.msk.bf16.mxu1 %vm4502_vm3, %v18083_v3  ;;  %14189 = vmatpush3.bf16.msra.mxu1 %v15719_v47  ;;  %v5918_v47 = vld [vmem:[#allocation4 + $0x190] sm:$0xff] }
 0x413   : > { %v4206_v28 = vpop.permute.xlu0 %4205  ;;  %14190 = vmatprep.subr.bf16.mxu1 %v15720_v50  ;;  %v18155_v41 = vpack.c.bf16 %v5918_v47, %v5917_v38  ;;  %v6587_v47 = vld [vmem:[#allocation4 + $0x12f] sm:$0xff]  ;;  %v6586_v38 = vld [vmem:[#allocation4 + $0x127] sm:$0xff] }
 0x414   : > { %4284 = vst.msk [vmem:[%s16656_s12 + $0x1b0] sm:$0xff] %vm4265_vm4, %v4206_v28  ;;  %v4208_v13 = vpop.permute.xlu1 %4207  ;;  %v5924_v28 = vld [vmem:[#allocation4 + $0x1f0] sm:$0xff] }
 0x415   : > { %4285 = vst.msk [vmem:[%s16656_s12 + $0x1c8] sm:$0xff] %vm4265_vm4, %v4208_v13  ;;  %v18169_v52 = vpack.c.bf16 %v5924_v28, %v5923_v31  ;;  %v6593_v28 = vld [vmem:[#allocation4 + $0x18f] sm:$0xff] }
 0x416   : > { %14191 = vmatpush3.bf16.msra.mxu1 %v15720_v50  ;;  %v18159_v50 = vpack.c.bf16 %v5920_v55, %v5919_v26  ;;  %v6589_v55 = vld [vmem:[#allocation4 + $0x14f] sm:$0xff]  ;;  %v6588_v26 = vld [vmem:[#allocation4 + $0x147] sm:$0xff] }
 0x417   : > { %v4202_v61 = vpop.permute.xlu0 %4201  ;;  %14192 = vmatprep.subr.bf16.mxu1 %v15721_v35 }
 0x418   : > { %4282 = vst.msk [vmem:[%s16656_s12 + $0x180] sm:$0xff] %vm4265_vm4, %v4202_v61  ;;  %v4204_v20 = vpop.permute.xlu1 %4203  ;;  %v5925_v61 = vld [vmem:[#allocation4 + $0x208] sm:$0xff] }
 0x419   : > { %4283 = vst.msk [vmem:[%s16656_s12 + $0x198] sm:$0xff] %vm4265_vm4, %v4204_v20  ;;  %14161 = vmatmul.mubr.msk.bf16.gmra.mrb[120].mxu1 %vm4502_vm3, %v18098_v29  ;;  %v18175_v21 = vpack.c.bf16 %v5926_v19, %v5925_v61  ;;  %v15725_v20 = vld [vmem:[%s19251_s9 + $0x130] sm:$0xff]   ;;  %v6592_v19 = vld [vmem:[#allocation4 + $0x187] sm:$0xff] }
 0x41a   : > { %14164 = vmatprep.mubr.msk.bf16.mxu1 %vm4502_vm3, %v18105_v6  ;;  %14193 = vmatpush3.bf16.msra.mxu1 %v15721_v35  ;;  %v5921_v35 = vld [vmem:[#allocation4 + $0x1c8] sm:$0xff]  ;;  %v6614_v61 = vpack.c.bf16 %v6593_v28, %v6592_v19  ;;  %v7273_v19 = vld [vmem:[#allocation4 + $0x1d1] sm:$0xff] }
 0x41b   : > { %v4214_v45 = vpop.permute.xlu0 %4213  ;;  %14194 = vmatprep.subr.bf16.mxu1 %v15722_v2  ;;  %v18167_v13 = vpack.c.bf16 %v5922_v27, %v5921_v35  ;;  %v6591_v27 = vld [vmem:[#allocation4 + $0x16f] sm:$0xff]  ;;  %v6590_v35 = vld [vmem:[#allocation4 + $0x167] sm:$0xff] }
 0x41c   : > { %4288 = vst.msk [vmem:[%s16656_s12 + $0x210] sm:$0xff] %vm4265_vm4, %v4214_v45  ;;  %v4216_v5 = vpop.permute.xlu1 %4215  ;;  %v6613_v31 = vpack.c.bf16 %v6591_v27, %v6590_v35  ;;  %v7270_v28 = vld [vmem:[#allocation4 + $0x1a9] sm:$0xff]  ;;  %v7271_v35 = vld [vmem:[#allocation4 + $0x1b1] sm:$0xff] }
 0x41d   : > { %4289 = vst.msk [vmem:[%s16656_s12 + $0x228] sm:$0xff] %vm4265_vm4, %v4216_v5  ;;  %v15731_v5 = vld [vmem:[%s19251_s9 + $0x160] sm:$0xff]  }
 0x41e   : > { %14195 = vmatpush3.bf16.msra.mxu1 %v15722_v2  ;;  %v15724_v2 = vld [vmem:[%s19251_s9 + $0x128] sm:$0xff]  }
 0x41f   : > { %v4210_v15 = vpop.permute.xlu0 %4209  ;;  %14228 = vmatprep.subr.bf16.mxu1 %v18116_v23 }
 0x420   : > { %4286 = vst.msk [vmem:[%s16656_s12 + $0x1e0] sm:$0xff] %vm4265_vm4, %v4210_v15  ;;  %v4212_v46 = vpop.permute.xlu1 %4211  ;;  %v6607_v15 = vpack.c.bf16 %v6579_v60, %v6578_v57  ;;  %v7257_v57 = vld [vmem:[#allocation4 + $0xd1] sm:$0xff] }
 0x421   : > { %4287 = vst.msk [vmem:[%s16656_s12 + $0x1f8] sm:$0xff] %vm4265_vm4, %v4212_v46  ;;  %14165 = vmatmul.mubr.msk.bf16.gmra.mrb[124].mxu1 %vm4502_vm3, %v18122_v4  ;;  %v15732_v46 = vld [vmem:[%s19251_s9 + $0x168] sm:$0xff]  }
 0x422   : > { %14168 = vmatprep.mubr.msk.bf16.mxu1 %vm4502_vm3, %v18127_v49 }
 0x423   : > { %v4222_v17 = vpop.permute.xlu0 %4221 }
 0x424   : > { %4292 = vst.msk [vmem:[%s16656_s12 + $0x270] sm:$0xff] %vm4265_vm4, %v4222_v17  ;;  %v4224_v32 = vpop.permute.xlu1 %4223  ;;  %v6608_v17 = vpack.c.bf16 %v6581_v43, %v6580_v53  ;;  %v7256_v43 = vld [vmem:[#allocation4 + $0xc9] sm:$0xff] }
 0x425   : > { %4293 = vst.msk [vmem:[%s16656_s12 + $0x288] sm:$0xff] %vm4265_vm4, %v4224_v32  ;;  %v15733_v32 = vld [vmem:[%s19251_s9 + $0x170] sm:$0xff]   ;;  %v7284_v53 = vpack.c.bf16 %v7257_v57, %v7256_v43 }
 0x427   : > { %v4218_v58 = vpop.permute.xlu0 %4217 }
 0x428   : > { %4290 = vst.msk [vmem:[%s16656_s12 + $0x240] sm:$0xff] %vm4265_vm4, %v4218_v58  ;;  %v4220_v18 = vpop.permute.xlu1 %4219  ;;  %v6609_v58 = vpack.c.bf16 %v6583_v10, %v6582_v63  ;;  %v7261_v10 = vld [vmem:[#allocation4 + $0x111] sm:$0xff] }
 0x429   : > { %4291 = vst.msk [vmem:[%s16656_s12 + $0x258] sm:$0xff] %vm4265_vm4, %v4220_v18  ;;  %14169 = vmatmul.mubr.msk.bf16.gmra.mrb[128].mxu1 %vm4502_vm3, %v18139_v0  ;;  %v15734_v18 = vld [vmem:[%s19251_s9 + $0x178] sm:$0xff]  }
 0x42a   : > { %14172 = vmatprep.mubr.msk.bf16.mxu1 %vm4502_vm3, %v18143_v25 }
 0x42b   : > { %v4230_v51 = vpop.permute.xlu0 %4229 }
 0x42c   : > { %4296 = vst.msk [vmem:[%s16656_s12 + $0x2d0] sm:$0xff] %vm4265_vm4, %v4230_v51  ;;  %v4232_v36 = vpop.permute.xlu1 %4231  ;;  %v6610_v51 = vpack.c.bf16 %v6585_v59, %v6584_v24  ;;  %v7263_v24 = vld [vmem:[#allocation4 + $0x131] sm:$0xff] }
 0x42d   : > { %4297 = vst.msk [vmem:[%s16656_s12 + $0x2e8] sm:$0xff] %vm4265_vm4, %v4232_v36  ;;  %v15735_v36 = vld [vmem:[%s19251_s9 + $0x180] sm:$0xff]  }
 0x42f   : > { %v4226_v40 = vpop.permute.xlu0 %4225 }
 0x430   : > { %4294 = vst.msk [vmem:[%s16656_s12 + $0x2a0] sm:$0xff] %vm4265_vm4, %v4226_v40  ;;  %v4228_v1 = vpop.permute.xlu1 %4227  ;;  %v6611_v40 = vpack.c.bf16 %v6587_v47, %v6586_v38  ;;  %v7267_v38 = vld [vmem:[#allocation4 + $0x171] sm:$0xff] }
 0x431   : > { %4295 = vst.msk [vmem:[%s16656_s12 + $0x2b8] sm:$0xff] %vm4265_vm4, %v4228_v1  ;;  %14173 = vmatmul.mubr.msk.bf16.gmra.mrb[132].mxu1 %vm4502_vm3, %v18155_v41  ;;  %v6612_v1 = vpack.c.bf16 %v6589_v55, %v6588_v26  ;;  %v7266_v55 = vld [vmem:[#allocation4 + $0x169] sm:$0xff]  ;;  %v7269_v26 = vld [vmem:[#allocation4 + $0x191] sm:$0xff] }
 0x432   : > { %14176 = vmatprep.mubr.msk.bf16.mxu1 %vm4502_vm3, %v18159_v50 }
 0x439   : > { %14177 = vmatmul.mubr.msk.bf16.gmra.mrb[136].mxu1 %vm4502_vm3, %v18167_v13 }
 0x43a   : > { %14180 = vmatprep.mubr.msk.bf16.mxu1 %vm4502_vm3, %v18169_v52 }
 0x441   : > { %14181 = vmatmul.mubr.msk.bf16.gmra.mrb[140].mxu1 %vm4502_vm3, %v18175_v21 }
 0x442   : > { %14196 = vmatprep.mubr.msk.bf16.mxu1 %vm4502_vm3, %v17821_v30  ;;  %v15726_v30 = vld [vmem:[%s19251_s9 + $0x138] sm:$0xff]  }
 0x449   : > { %14197 = vmatmul.mubr.msk.bf16.vlgmr.msra.gmra.mrb[112].mxu1 %vm4502_vm3, %v17824_v34  ;;  %v15727_v34 = vld [vmem:[%s19251_s9 + $0x140] sm:$0xff]  }
 0x44a   : > { %14200 = vmatprep.mubr.msk.bf16.mxu1 %vm4502_vm3, %v17848_v56  ;;  %14229 = vmatpush3.bf16.msra.mxu1 %v18116_v23  ;;  %v15728_v56 = vld [vmem:[%s19251_s9 + $0x148] sm:$0xff]  }
 0x44b   : > { %14230 = vmatprep.subr.bf16.mxu1 %v15724_v2 }
 0x44e   : > { %14231 = vmatpush3.bf16.msra.mxu1 %v15724_v2  ;;  %v6595_v2 = vld [vmem:[#allocation4 + $0x1af] sm:$0xff] }
 0x44f   : > { %14232 = vmatprep.subr.bf16.mxu1 %v15725_v20 }
 0x451   : > { %14201 = vmatmul.mubr.msk.bf16.gmra.mrb[116].mxu1 %vm4502_vm3, %v17851_v16  ;;  %v15729_v16 = vld [vmem:[%s19251_s9 + $0x150] sm:$0xff]  }
 0x452   : > { %14204 = vmatprep.mubr.msk.bf16.mxu1 %vm4502_vm3, %v17874_v54  ;;  %14233 = vmatpush3.bf16.msra.mxu1 %v15725_v20  ;;  %v6263_v54 = vld [vmem:[#allocation4 + $0x209] sm:$0xff] }
 0x453   : > { %14234 = vmatprep.subr.bf16.mxu1 %v15726_v30  ;;  %v6597_v20 = vld [vmem:[#allocation4 + $0x1cf] sm:$0xff] }
 0x456   : > { %14235 = vmatpush3.bf16.msra.mxu1 %v15726_v30  ;;  %v6594_v30 = vld [vmem:[#allocation4 + $0x1a7] sm:$0xff] }
 0x457   : > { %14236 = vmatprep.subr.bf16.mxu1 %v15727_v34 }
 0x459   : > { %14205 = vmatmul.mubr.msk.bf16.gmra.mrb[120].mxu1 %vm4502_vm3, %v17877_v37  ;;  %v6264_v37 = vld [vmem:[#allocation4 + $0x211] sm:$0xff] }
 0x45a   : > { %14208 = vmatprep.mubr.msk.bf16.mxu1 %vm4502_vm3, %v17902_v39  ;;  %14237 = vmatpush3.bf16.msra.mxu1 %v15727_v34  ;;  %v6573_v39 = vld [vmem:[#allocation4 + $0x4f] sm:$0xff]  ;;  %v6615_v34 = vpack.c.bf16 %v6595_v2, %v6594_v30 }
 0x45b   : > { %14238 = vmatprep.subr.bf16.mxu1 %v15728_v56  ;;  %v7275_v30 = vld [vmem:[#allocation4 + $0x1f1] sm:$0xff] }
 0x45e   : > { %14239 = vmatpush3.bf16.msra.mxu1 %v15728_v56  ;;  %v6596_v56 = vld [vmem:[#allocation4 + $0x1c7] sm:$0xff] }
 0x45f   : > { %14272 = vmatprep.subr.bf16.mxu1 %v15729_v16 }
 0x461   : > { %14209 = vmatmul.mubr.msk.bf16.gmra.mrb[124].mxu1 %vm4502_vm3, %v17905_v62  ;;  %v18228_v62 = vpack.c.bf16 %v6264_v37, %v6263_v54  ;;  %v6599_v54 = vld [vmem:[#allocation4 + $0x1ef] sm:$0xff]  ;;  %v6598_v37 = vld [vmem:[#allocation4 + $0x1e7] sm:$0xff] }
 0x462   : > { %14212 = vmatprep.mubr.msk.bf16.mxu1 %vm4502_vm3, %v17923_v22  ;;  %v6572_v22 = vld [vmem:[#allocation4 + $0x47] sm:$0xff] }
 0x469   : > { %14213 = vmatmul.mubr.msk.bf16.gmra.mrb[128].mxu1 %vm4502_vm3, %v17926_v44  ;;  %v6604_v44 = vpack.c.bf16 %v6573_v39, %v6572_v22  ;;  %v6617_v39 = vpack.c.bf16 %v6599_v54, %v6598_v37  ;;  %v6602_v22 = vld [vmem:[#allocation4 + $0x227] sm:$0xff]  ;;  %v15746_v37 = vld [vmem:[#allocation9 + $0x58] sm:$0xff]  }
 0x46a   : > { %14216 = vmatprep.mubr.msk.bf16.mxu1 %vm4502_vm3, %v17943_v12  ;;  %v6575_v12 = vld [vmem:[#allocation4 + $0x6f] sm:$0xff] }
 0x471   : > { %14217 = vmatmul.mubr.msk.bf16.gmra.mrb[132].mxu1 %vm4502_vm3, %v17946_v9  ;;  %v6577_v9 = vld [vmem:[#allocation4 + $0x8f] sm:$0xff] }
 0x472   : > { %14220 = vmatprep.mubr.msk.bf16.mxu1 %vm4502_vm3, %v17963_v8  ;;  %v6574_v8 = vld [vmem:[#allocation4 + $0x67] sm:$0xff] }
 0x473   : > { %v6605_v45 = vpack.c.bf16 %v6575_v12, %v6574_v8  ;;  %v15742_v8 = vld [vmem:[#allocation9 + $0x38] sm:$0xff]  }
 0x479   : > { %14221 = vmatmul.mubr.msk.bf16.gmra.mrb[136].mxu1 %vm4502_vm3, %v17966_v14  ;;  %v6576_v14 = vld [vmem:[#allocation4 + $0x87] sm:$0xff] }
 0x47a   : > { %14224 = vmatprep.mubr.msk.bf16.mxu1 %vm4502_vm3, %v17976_v33  ;;  %v15730_v33 = vld [vmem:[%s19251_s9 + $0x158] sm:$0xff]   ;;  %v6606_v23 = vpack.c.bf16 %v6577_v9, %v6576_v14  ;;  %v15741_v9 = vld [vmem:[#allocation9 + $0x30] sm:$0xff]   ;;  %v15736_v14 = vld [vmem:[%s19251_s9 + $0x188] sm:$0xff]  }
 0x47b   : > { %14360 = vmatprep.subr.bf16.mxu0 %v15741_v9 }
 0x47c   : > { %14361 = vmatpush3.bf16.msra.mxu0 %v15741_v9  ;;  %v18334_v9 = vld [vmem:[%s19252_s10] ss:$0 sm:$0xff] }
 0x47d   : > { %14362 = vmatprep.subr.bf16.mxu0 %v15742_v8 }
 0x480   : > { %14363 = vmatpush3.bf16.msra.mxu0 %v15742_v8 }
 0x481   : > { %14225 = vmatmul.mubr.msk.bf16.gmra.mrb[140].mxu1 %vm4502_vm3, %v18228_v62 }
 0x482   : > { %14240 = vmatprep.mubr.msk.bf16.mxu1 %vm4502_vm3, %v6604_v44  ;;  %v6603_v44 = vld [vmem:[#allocation4 + $0x22f] sm:$0xff] }
 0x483   : > { %v6619_v12 = vpack.c.bf16 %v6603_v44, %v6602_v22  ;;  %v7823_v22 = vld [vmem:[#allocation5 + $0x10] sm:$0xff] }
 0x489   : > { %14241 = vmatmul.mubr.msk.bf16.vlgmr.msra.gmra.mrb[112].mxu1 %vm4502_vm3, %v6605_v45  ;;  %v15743_v45 = vld [vmem:[#allocation9 + $0x40] sm:$0xff]  }
 0x48a   : > { %14244 = vmatprep.mubr.msk.bf16.mxu1 %vm4502_vm3, %v6606_v23  ;;  %14273 = vmatpush3.bf16.msra.mxu1 %v15729_v16  ;;  %v6616_v16 = vpack.c.bf16 %v6597_v20, %v6596_v56  ;;  %v15740_v23 = vld [vmem:[%s19251_s9 + $0x1a8] sm:$0xff]  }
 0x48b   : > { %14274 = vmatprep.subr.bf16.mxu1 %v15730_v33  ;;  %14364 = vmatprep.subr.bf16.mxu0 %v15743_v45  ;;  %v7274_v20 = vld [vmem:[#allocation4 + $0x1e9] sm:$0xff] }
 0x48c   : > { %14365 = vmatpush3.bf16.msra.mxu0 %v15743_v45  ;;  %v7278_v56 = vld [vmem:[#allocation4 + $0x229] sm:$0xff] }
 0x48e   : > { %14275 = vmatpush3.bf16.msra.mxu1 %v15730_v33  ;;  %v15745_v33 = vld [vmem:[#allocation9 + $0x50] sm:$0xff]  }
 0x48f   : > { %14276 = vmatprep.subr.bf16.mxu1 %v15731_v5 }
 0x491   : > { %14245 = vmatmul.mubr.msk.bf16.gmra.mrb[116].mxu1 %vm4502_vm3, %v6607_v15 }
 0x492   : > { %14248 = vmatprep.mubr.msk.bf16.mxu1 %vm4502_vm3, %v6608_v17  ;;  %14277 = vmatpush3.bf16.msra.mxu1 %v15731_v5  ;;  %v7259_v17 = vld [vmem:[#allocation4 + $0xf1] sm:$0xff] }
 0x493   : > { %14278 = vmatprep.subr.bf16.mxu1 %v15732_v46 }
 0x496   : > { %14279 = vmatpush3.bf16.msra.mxu1 %v15732_v46  ;;  %v7258_v46 = vld [vmem:[#allocation4 + $0xe9] sm:$0xff] }
 0x497   : > { %14280 = vmatprep.subr.bf16.mxu1 %v15733_v32  ;;  %v7285_v59 = vpack.c.bf16 %v7259_v17, %v7258_v46 }
 0x499   : > { %14249 = vmatmul.mubr.msk.bf16.gmra.mrb[120].mxu1 %vm4502_vm3, %v6609_v58  ;;  %v7262_v58 = vld [vmem:[#allocation4 + $0x129] sm:$0xff] }
 0x49a   : > { %14252 = vmatprep.mubr.msk.bf16.mxu1 %vm4502_vm3, %v6610_v51  ;;  %14281 = vmatpush3.bf16.msra.mxu1 %v15733_v32  ;;  %v7260_v32 = vld [vmem:[#allocation4 + $0x109] sm:$0xff]  ;;  %v7265_v51 = vld [vmem:[#allocation4 + $0x151] sm:$0xff] }
 0x49b   : > { %14282 = vmatprep.subr.bf16.mxu1 %v15734_v18  ;;  %v7286_v63 = vpack.c.bf16 %v7261_v10, %v7260_v32  ;;  %v15748_v32 = vld [vmem:[#allocation9 + $0x8] sm:$0xff]  }
 0x49e   : > { %14283 = vmatpush3.bf16.msra.mxu1 %v15734_v18  ;;  %v7264_v18 = vld [vmem:[#allocation4 + $0x149] sm:$0xff] }
 0x49f   : > { %14316 = vmatprep.subr.bf16.mxu1 %v15735_v36  ;;  %v7288_v47 = vpack.c.bf16 %v7265_v51, %v7264_v18 }
 0x4a1   : > { %14253 = vmatmul.mubr.msk.bf16.gmra.mrb[124].mxu1 %vm4502_vm3, %v6611_v40  ;;  %v7268_v40 = vld [vmem:[#allocation4 + $0x189] sm:$0xff] }
 0x4a2   : > { %14256 = vmatprep.mubr.msk.bf16.mxu1 %vm4502_vm3, %v6612_v1  ;;  %v7289_v1 = vpack.c.bf16 %v7267_v38, %v7266_v55  ;;  %v7290_v27 = vpack.c.bf16 %v7269_v26, %v7268_v40  ;;  %v15749_v38 = vld [vmem:[#allocation9 + $0x10] sm:$0xff]  }
 0x4a9   : > { %14257 = vmatmul.mubr.msk.bf16.gmra.mrb[128].mxu1 %vm4502_vm3, %v6613_v31  ;;  %v7272_v31 = vld [vmem:[#allocation4 + $0x1c9] sm:$0xff] }
 0x4aa   : > { %14260 = vmatprep.mubr.msk.bf16.mxu1 %vm4502_vm3, %v6614_v61  ;;  %v7291_v61 = vpack.c.bf16 %v7271_v35, %v7270_v28  ;;  %v7292_v2 = vpack.c.bf16 %v7273_v19, %v7272_v31 }
 0x4b1   : > { %14261 = vmatmul.mubr.msk.bf16.gmra.mrb[132].mxu1 %vm4502_vm3, %v6615_v34  ;;  %v7293_v34 = vpack.c.bf16 %v7275_v30, %v7274_v20 }
 0x4b2   : > { %14264 = vmatprep.mubr.msk.bf16.mxu1 %vm4502_vm3, %v6616_v16  ;;  %v7279_v16 = vld [vmem:[#allocation4 + $0x231] sm:$0xff] }
 0x4b3   : > { %v7295_v54 = vpack.c.bf16 %v7279_v16, %v7278_v56 }
 0x4b9   : > { %14265 = vmatmul.mubr.msk.bf16.gmra.mrb[136].mxu1 %vm4502_vm3, %v6617_v39  ;;  %v7822_v39 = vld [vmem:[#allocation5 + $0x8] sm:$0xff] }
 0x4ba   : > { %14268 = vmatprep.mubr.msk.bf16.mxu1 %vm4502_vm3, %v18041_v42  ;;  %v15744_v42 = vld [vmem:[#allocation9 + $0x48] sm:$0xff]   ;;  %v7854_v44 = vpack.c.bf16 %v7823_v22, %v7822_v39 }
 0x4bb   : > { %14366 = vmatprep.subr.bf16.mxu0 %v15744_v42 }
 0x4bc   : > { %14367 = vmatpush3.bf16.msra.mxu0 %v15744_v42  ;;  %14372 = vmatprep.mubr.msk.bf16.mxu0 %vm4502_vm3, %v7854_v44  ;;  %v15751_v44 = vld [vmem:[#allocation9 + $0x20] sm:$0xff]  }
 0x4bd   : > { %14368 = vmatprep.subr.bf16.mxu0 %v15745_v33 }
 0x4c0   : > { %14369 = vmatpush3.bf16.msra.mxu0 %v15745_v33 }
 0x4c1   : > { %14269 = vmatmul.mubr.msk.bf16.gmra.mrb[140].mxu1 %vm4502_vm3, %v6619_v12  ;;  %14370 = vmatprep.subr.bf16.mxu0 %v15746_v37  ;;  %v15747_v12 = vld [vmem:[#allocation9] sm:$0xff]  }
 0x4c2   : > { %14284 = vmatprep.mubr.msk.bf16.mxu1 %vm4502_vm3, %v18054_v48  ;;  %v15737_v48 = vld [vmem:[%s19251_s9 + $0x190] sm:$0xff]  }
 0x4c4   : > { %14371 = vmatpush3.bf16.msra.mxu0 %v15746_v37 }
 0x4c5   : > { %14404 = vmatprep.subr.bf16.mxu0 %v15747_v12 }
 0x4c9   : > { %14285 = vmatmul.mubr.msk.bf16.vlgmr.msra.gmra.mrb[112].mxu1 %vm4502_vm3, %v18061_v7  ;;  %v15738_v7 = vld [vmem:[%s19251_s9 + $0x198] sm:$0xff]  }
 0x4ca   : > { %14288 = vmatprep.mubr.msk.bf16.mxu1 %vm4502_vm3, %v18076_v11  ;;  %14317 = vmatpush3.bf16.msra.mxu1 %v15735_v36  ;;  %v15739_v11 = vld [vmem:[%s19251_s9 + $0x1a0] sm:$0xff]   ;;  %v7287_v36 = vpack.c.bf16 %v7263_v24, %v7262_v58 }
 0x4cb   : > { %14318 = vmatprep.subr.bf16.mxu1 %v15736_v14 }
 0x4ce   : > { %14319 = vmatpush3.bf16.msra.mxu1 %v15736_v14 }
 0x4cf   : > { %14320 = vmatprep.subr.bf16.mxu1 %v15737_v48 }
 0x4d1   : > { %14289 = vmatmul.mubr.msk.bf16.gmra.mrb[116].mxu1 %vm4502_vm3, %v18083_v3  ;;  %v6940_v3 = vld [vmem:[#allocation4 + $0x228] sm:$0xff] }
 0x4d2   : > { %14292 = vmatprep.mubr.msk.bf16.mxu1 %vm4502_vm3, %v18098_v29  ;;  %14321 = vmatpush3.bf16.msra.mxu1 %v15737_v48  ;;  %v6941_v29 = vld [vmem:[#allocation4 + $0x230] sm:$0xff] }
 0x4d3   : > { %14322 = vmatprep.subr.bf16.mxu1 %v15738_v7 }
 0x4d6   : > { %14323 = vmatpush3.bf16.msra.mxu1 %v15738_v7 }
 0x4d7   : > { %14324 = vmatprep.subr.bf16.mxu1 %v15739_v11 }
 0x4d9   : > { %14293 = vmatmul.mubr.msk.bf16.gmra.mrb[120].mxu1 %vm4502_vm3, %v18105_v6  ;;  %v6957_v6 = vpack.c.bf16 %v6941_v29, %v6940_v3 }
 0x4da   : > { %14296 = vmatprep.mubr.msk.bf16.mxu1 %vm4502_vm3, %v18122_v4  ;;  %14325 = vmatpush3.bf16.msra.mxu1 %v15739_v11  ;;  %v7248_v4 = vld [vmem:[#allocation4 + $0x49] sm:$0xff] }
 0x4db   : > { %14326 = vmatprep.subr.bf16.mxu1 %v15740_v23 }
 0x4de   : > { %14327 = vmatpush3.bf16.msra.mxu1 %v15740_v23 }
 0x4e1   : > { %14297 = vmatmul.mubr.msk.bf16.gmra.mrb[124].mxu1 %vm4502_vm3, %v18127_v49  ;;  %v7249_v49 = vld [vmem:[#allocation4 + $0x51] sm:$0xff] }
 0x4e2   : > { %14300 = vmatprep.mubr.msk.bf16.mxu1 %vm4502_vm3, %v18139_v0  ;;  %v7280_v0 = vpack.c.bf16 %v7249_v49, %v7248_v4 }
 0x4e9   : > { %14301 = vmatmul.mubr.msk.bf16.gmra.mrb[128].mxu1 %vm4502_vm3, %v18143_v25  ;;  %v7250_v25 = vld [vmem:[#allocation4 + $0x69] sm:$0xff] }
 0x4ea   : > { %14304 = vmatprep.mubr.msk.bf16.mxu1 %vm4502_vm3, %v18155_v41  ;;  %v7251_v41 = vld [vmem:[#allocation4 + $0x71] sm:$0xff] }
 0x4eb   : > { %v7281_v5 = vpack.c.bf16 %v7251_v41, %v7250_v25 }
 0x4f1   : > { %14305 = vmatmul.mubr.msk.bf16.gmra.mrb[132].mxu1 %vm4502_vm3, %v18159_v50  ;;  %v7252_v50 = vld [vmem:[#allocation4 + $0x89] sm:$0xff] }
 0x4f2   : > { %14308 = vmatprep.mubr.msk.bf16.mxu1 %vm4502_vm3, %v18167_v13  ;;  %v7253_v13 = vld [vmem:[#allocation4 + $0x91] sm:$0xff] }
 0x4f3   : > { %v7282_v60 = vpack.c.bf16 %v7253_v13, %v7252_v50 }
 0x4f9   : > { %14309 = vmatmul.mubr.msk.bf16.gmra.mrb[136].mxu1 %vm4502_vm3, %v18169_v52  ;;  %v7254_v52 = vld [vmem:[#allocation4 + $0xa9] sm:$0xff] }
 0x4fa   : > { %14312 = vmatprep.mubr.msk.bf16.mxu1 %vm4502_vm3, %v18175_v21  ;;  %v7255_v21 = vld [vmem:[#allocation4 + $0xb1] sm:$0xff] }
 0x4fb   : > { %v7283_v15 = vpack.c.bf16 %v7255_v21, %v7254_v52 }
 0x501   : > { %14313 = vmatmul.mubr.msk.bf16.gmra.mrb[140].mxu1 %vm4502_vm3, %v6957_v6 }
 0x502   : > { %14328 = vmatprep.mubr.msk.bf16.mxu1 %vm4502_vm3, %v7280_v0 }
 0x509   : > { %14329 = vmatmul.mubr.msk.bf16.vlgmr.msra.gmra.mrb[112].mxu1 %vm4502_vm3, %v7281_v5 }
 0x50a   : > { %14332 = vmatprep.mubr.msk.bf16.mxu1 %vm4502_vm3, %v7282_v60 }
 0x511   : > { %14333 = vmatmul.mubr.msk.bf16.gmra.mrb[116].mxu1 %vm4502_vm3, %v7283_v15 }
 0x512   : > { %14336 = vmatprep.mubr.msk.bf16.mxu1 %vm4502_vm3, %v7284_v53 }
 0x519   : > { %14337 = vmatmul.mubr.msk.bf16.gmra.mrb[120].mxu1 %vm4502_vm3, %v7285_v59 }
 0x51a   : > { %14340 = vmatprep.mubr.msk.bf16.mxu1 %vm4502_vm3, %v7286_v63 }
 0x521   : > { %14341 = vmatmul.mubr.msk.bf16.gmra.mrb[124].mxu1 %vm4502_vm3, %v7287_v36 }
 0x522   : > { %14344 = vmatprep.mubr.msk.bf16.mxu1 %vm4502_vm3, %v7288_v47 }
 0x529   : > { %14345 = vmatmul.mubr.msk.bf16.gmra.mrb[128].mxu1 %vm4502_vm3, %v7289_v1 }
 0x52a   : > { %14348 = vmatprep.mubr.msk.bf16.mxu1 %vm4502_vm3, %v7290_v27 }
 0x531   : > { %14349 = vmatmul.mubr.msk.bf16.gmra.mrb[132].mxu1 %vm4502_vm3, %v7291_v61  ;;  %v15750_v61 = vld [vmem:[#allocation9 + $0x18] sm:$0xff]  }
 0x532   : > { %14352 = vmatprep.mubr.msk.bf16.mxu1 %vm4502_vm3, %v7292_v2 }
 0x539   : > { %14353 = vmatmul.mubr.msk.bf16.gmra.mrb[136].mxu1 %vm4502_vm3, %v7293_v34 }
 0x53a   : > { %14356 = vmatprep.mubr.msk.bf16.mxu1 %vm4502_vm3, %v18228_v62 }
 0x541   : > { %14357 = vmatmul.mubr.msk.bf16.gmra.mrb[140].mxu1 %vm4502_vm3, %v7295_v54 }
 0x5dc   : > { %v14330_v62 = vpop.f32.mrb[112].mxu1 }
 0x5dd   : > { %v7595_v8 = vadd.f32 %v14330_v62, %v18334_v9  ;;  %v7427_v45 = vpop.f32.mrb[113].mxu1 }
 0x5de   : > { %v7593_v14 = vadd.f32 %v18334_v9, %v7427_v45  ;;  %v14331_v42 = vpop.f32.mrb[114].mxu1 }
 0x5df   : > { %v7627_v48 = vmax.f32 %v7595_v8, 0.0  ;;  %v7596_v33 = vadd.f32 %v14331_v42, %v18334_v9  ;;  %v7430_v7 = vpop.f32.mrb[115].mxu1 }
 0x5e0   : > { %v7625_v11 = vmax.f32 %v7593_v14, 0.0  ;;  %v7594_v23 = vadd.f32 %v18334_v9, %v7430_v7  ;;  %v15752_v7 = vld [vmem:[#allocation9 + $0x28] sm:$0xff]  }
 0x5e1   : > { %7732 = vst.msk [vmem:[#allocation5 + $0x48] sm:$0xff] %vm4502_vm3, %v7627_v48  ;;  %v7628_v3 = vmax.f32 %v7596_v33, 0.0 }
 0x5e2   : > { %7730 = vst.msk [vmem:[#allocation5 + $0x28] sm:$0xff] %vm4502_vm3, %v7625_v11  ;;  %v7626_v29 = vmax.f32 %v7594_v23, 0.0 }
 0x5e3   : > { %7733 = vst.msk [vmem:[#allocation5 + $0x50] sm:$0xff] %vm4502_vm3, %v7628_v3 }
 0x5e4   : > { %7731 = vst.msk [vmem:[#allocation5 + $0x30] sm:$0xff] %vm4502_vm3, %v7626_v29  ;;  %v14334_v6 = vpop.f32.mrb[116].mxu1 }
 0x5e5   : > { %v7599_v4 = vadd.f32 %v14334_v6, %v18334_v9  ;;  %v7443_v49 = vpop.f32.mrb[117].mxu1 }
 0x5e6   : > { %v7597_v0 = vadd.f32 %v18334_v9, %v7443_v49  ;;  %v14335_v25 = vpop.f32.mrb[118].mxu1 }
 0x5e7   : > { %v7631_v41 = vmax.f32 %v7599_v4, 0.0  ;;  %v7600_v50 = vadd.f32 %v14335_v25, %v18334_v9  ;;  %v7446_v13 = vpop.f32.mrb[119].mxu1 }
 0x5e8   : > { %v7629_v5 = vmax.f32 %v7597_v0, 0.0  ;;  %v7598_v60 = vadd.f32 %v18334_v9, %v7446_v13  ;;  %v7826_v17 = vld [vmem:[#allocation5 + $0x48] sm:$0xff] }
 0x5e9   : > { %7736 = vst.msk [vmem:[#allocation5 + $0x88] sm:$0xff] %vm4502_vm3, %v7631_v41  ;;  %v7632_v52 = vmax.f32 %v7600_v50, 0.0  ;;  %v7824_v57 = vld [vmem:[#allocation5 + $0x28] sm:$0xff]  ;;  %v18396_v50 = vld [vmem:[#allocation9 + $0x60] sm:$0xff]  }
 0x5ea   : > { %7734 = vst.msk [vmem:[#allocation5 + $0x68] sm:$0xff] %vm4502_vm3, %v7629_v5  ;;  %v7630_v21 = vmax.f32 %v7598_v60, 0.0  ;;  %v7827_v43 = vld [vmem:[#allocation5 + $0x50] sm:$0xff] }
 0x5eb   : > { %7737 = vst.msk [vmem:[#allocation5 + $0x90] sm:$0xff] %vm4502_vm3, %v7632_v52  ;;  %v7825_v15 = vld [vmem:[#allocation5 + $0x30] sm:$0xff]  ;;  %v18355_v63 = vpack.c.bf16 %v7827_v43, %v7826_v17 }
 0x5ec   : > { %7735 = vst.msk [vmem:[#allocation5 + $0x70] sm:$0xff] %vm4502_vm3, %v7630_v21  ;;  %v14338_v53 = vpop.f32.mrb[120].mxu1  ;;  %v18352_v46 = vpack.c.bf16 %v7825_v15, %v7824_v57 }
 0x5ed   : > { %v7603_v10 = vadd.f32 %v14338_v53, %v18334_v9  ;;  %v7459_v59 = vpop.f32.mrb[121].mxu1 }
 0x5ee   : > { %v7601_v58 = vadd.f32 %v18334_v9, %v7459_v59  ;;  %v14339_v24 = vpop.f32.mrb[122].mxu1  ;;  %14373 = vmatmul.mubr.msk.bf16.vlgmr.msra.gmra.mrb[48].mxu0 %vm4502_vm3, %v18352_v46 }
 0x5ef   : > { %v7635_v18 = vmax.f32 %v7603_v10, 0.0  ;;  %v7604_v51 = vadd.f32 %v14339_v24, %v18334_v9  ;;  %v7462_v36 = vpop.f32.mrb[123].mxu1  ;;  %14376 = vmatprep.mubr.msk.bf16.mxu0 %vm4502_vm3, %v18355_v63  ;;  %14405 = vmatpush3.bf16.msra.mxu0 %v15747_v12 }
 0x5f0   : > { %v7633_v47 = vmax.f32 %v7601_v58, 0.0  ;;  %v7602_v55 = vadd.f32 %v18334_v9, %v7462_v36  ;;  %14406 = vmatprep.subr.bf16.mxu0 %v15748_v32  ;;  %v7830_v19 = vld [vmem:[#allocation5 + $0x88] sm:$0xff] }
 0x5f1   : > { %7740 = vst.msk [vmem:[#allocation5 + $0xc8] sm:$0xff] %vm4502_vm3, %v7635_v18  ;;  %v7636_v40 = vmax.f32 %v7604_v51, 0.0  ;;  %v7828_v27 = vld [vmem:[#allocation5 + $0x68] sm:$0xff] }
 0x5f2   : > { %7738 = vst.msk [vmem:[#allocation5 + $0xa8] sm:$0xff] %vm4502_vm3, %v7633_v47  ;;  %v7634_v26 = vmax.f32 %v7602_v55, 0.0  ;;  %v7831_v1 = vld [vmem:[#allocation5 + $0x90] sm:$0xff] }
 0x5f3   : > { %7741 = vst.msk [vmem:[#allocation5 + $0xd0] sm:$0xff] %vm4502_vm3, %v7636_v40  ;;  %v7829_v28 = vld [vmem:[#allocation5 + $0x70] sm:$0xff]  ;;  %14407 = vmatpush3.bf16.msra.mxu0 %v15748_v32  ;;  %v18371_v30 = vpack.c.bf16 %v7831_v1, %v7830_v19 }
 0x5f4   : > { %7739 = vst.msk [vmem:[#allocation5 + $0xb0] sm:$0xff] %vm4502_vm3, %v7634_v26  ;;  %v14342_v35 = vpop.f32.mrb[124].mxu1  ;;  %v18368_v31 = vpack.c.bf16 %v7829_v28, %v7828_v27  ;;  %14408 = vmatprep.subr.bf16.mxu0 %v15749_v38 }
 0x5f5   : > { %v7607_v2 = vadd.f32 %v14342_v35, %v18334_v9  ;;  %v7475_v20 = vpop.f32.mrb[125].mxu1 }
 0x5f6   : > { %v7605_v34 = vadd.f32 %v18334_v9, %v7475_v20  ;;  %v14343_v56 = vpop.f32.mrb[126].mxu1  ;;  %14377 = vmatmul.mubr.msk.bf16.gmra.mrb[52].mxu0 %vm4502_vm3, %v18368_v31 }
 0x5f7   : > { %v7639_v16 = vmax.f32 %v7607_v2, 0.0  ;;  %v7608_v54 = vadd.f32 %v14343_v56, %v18334_v9  ;;  %v7478_v37 = vpop.f32.mrb[127].mxu1  ;;  %14380 = vmatprep.mubr.msk.bf16.mxu0 %vm4502_vm3, %v18371_v30  ;;  %14409 = vmatpush3.bf16.msra.mxu0 %v15749_v38 }
 0x5f8   : > { %v7637_v39 = vmax.f32 %v7605_v34, 0.0  ;;  %v7606_v22 = vadd.f32 %v18334_v9, %v7478_v37  ;;  %14410 = vmatprep.subr.bf16.mxu0 %v15750_v61  ;;  %v7834_v33 = vld [vmem:[#allocation5 + $0xc8] sm:$0xff] }
 0x5f9   : > { %7744 = vst.msk [vmem:[#allocation5 + $0x108] sm:$0xff] %vm4502_vm3, %v7639_v16  ;;  %v7640_v12 = vmax.f32 %v7608_v54, 0.0  ;;  %v7832_v45 = vld [vmem:[#allocation5 + $0xa8] sm:$0xff] }
 0x5fa   : > { %7742 = vst.msk [vmem:[#allocation5 + $0xe8] sm:$0xff] %vm4502_vm3, %v7637_v39  ;;  %v7638_v62 = vmax.f32 %v7606_v22, 0.0  ;;  %v7835_v8 = vld [vmem:[#allocation5 + $0xd0] sm:$0xff] }
 0x5fb   : > { %7745 = vst.msk [vmem:[#allocation5 + $0x110] sm:$0xff] %vm4502_vm3, %v7640_v12  ;;  %v7833_v14 = vld [vmem:[#allocation5 + $0xb0] sm:$0xff]  ;;  %14411 = vmatpush3.bf16.msra.mxu0 %v15750_v61  ;;  %v18387_v3 = vpack.c.bf16 %v7835_v8, %v7834_v33 }
 0x5fc   : > { %7743 = vst.msk [vmem:[#allocation5 + $0xf0] sm:$0xff] %vm4502_vm3, %v7638_v62  ;;  %v14346_v42 = vpop.f32.mrb[128].mxu1  ;;  %v18384_v48 = vpack.c.bf16 %v7833_v14, %v7832_v45  ;;  %14412 = vmatprep.subr.bf16.mxu0 %v15751_v44 }
 0x5fd   : > { %v7611_v11 = vadd.f32 %v14346_v42, %v18334_v9  ;;  %v7491_v23 = vpop.f32.mrb[129].mxu1 }
 0x5fe   : > { %v7609_v29 = vadd.f32 %v18334_v9, %v7491_v23  ;;  %v14347_v6 = vpop.f32.mrb[130].mxu1  ;;  %14381 = vmatmul.mubr.msk.bf16.gmra.mrb[56].mxu0 %vm4502_vm3, %v18384_v48 }
 0x5ff   : > { %v7643_v4 = vmax.f32 %v7611_v11, 0.0  ;;  %v7612_v49 = vadd.f32 %v14347_v6, %v18334_v9  ;;  %v7494_v0 = vpop.f32.mrb[131].mxu1  ;;  %14384 = vmatprep.mubr.msk.bf16.mxu0 %vm4502_vm3, %v18387_v3  ;;  %14413 = vmatpush3.bf16.msra.mxu0 %v15751_v44 }
 0x600   : > { %v7641_v25 = vmax.f32 %v7609_v29, 0.0  ;;  %v7610_v41 = vadd.f32 %v18334_v9, %v7494_v0  ;;  %14414 = vmatprep.subr.bf16.mxu0 %v15752_v7  ;;  %v7838_v15 = vld [vmem:[#allocation5 + $0x108] sm:$0xff] }
 0x601   : > { %7748 = vst.msk [vmem:[#allocation5 + $0x148] sm:$0xff] %vm4502_vm3, %v7643_v4  ;;  %v7644_v13 = vmax.f32 %v7612_v49, 0.0  ;;  %v7836_v52 = vld [vmem:[#allocation5 + $0xe8] sm:$0xff] }
 0x602   : > { %7746 = vst.msk [vmem:[#allocation5 + $0x128] sm:$0xff] %vm4502_vm3, %v7641_v25  ;;  %v7642_v5 = vmax.f32 %v7610_v41, 0.0  ;;  %v7839_v60 = vld [vmem:[#allocation5 + $0x110] sm:$0xff] }
 0x603   : > { %7749 = vst.msk [vmem:[#allocation5 + $0x150] sm:$0xff] %vm4502_vm3, %v7644_v13  ;;  %v7837_v21 = vld [vmem:[#allocation5 + $0xf0] sm:$0xff]  ;;  %14415 = vmatpush3.bf16.msra.mxu0 %v15752_v7  ;;  %v18406_v32 = vpack.c.bf16 %v7839_v60, %v7838_v15 }
 0x604   : > { %7747 = vst.msk [vmem:[#allocation5 + $0x130] sm:$0xff] %vm4502_vm3, %v7642_v5  ;;  %v14350_v43 = vpop.f32.mrb[132].mxu1  ;;  %v18402_v57 = vpack.c.bf16 %v7837_v21, %v7836_v52  ;;  %14448 = vmatprep.subr.bf16.mxu0 %v18396_v50  ;;  %v7763_v15 = vld [vmem:[#allocation5 + $0xf] sm:$0xff] }
 0x605   : > { %v7615_v53 = vadd.f32 %v14350_v43, %v18334_v9  ;;  %v7507_v17 = vpop.f32.mrb[133].mxu1 }
 0x606   : > { %v7613_v10 = vadd.f32 %v18334_v9, %v7507_v17  ;;  %v14351_v59 = vpop.f32.mrb[134].mxu1  ;;  %14385 = vmatmul.mubr.msk.bf16.gmra.mrb[60].mxu0 %vm4502_vm3, %v18402_v57 }
 0x607   : > { %v7647_v58 = vmax.f32 %v7615_v53, 0.0  ;;  %v7616_v24 = vadd.f32 %v14351_v59, %v18334_v9  ;;  %v7510_v18 = vpop.f32.mrb[135].mxu1  ;;  %14388 = vmatprep.mubr.msk.bf16.mxu0 %vm4502_vm3, %v18406_v32 }
 0x608   : > { %v7645_v51 = vmax.f32 %v7613_v10, 0.0  ;;  %v7614_v36 = vadd.f32 %v18334_v9, %v7510_v18  ;;  %v7842_v28 = vld [vmem:[#allocation5 + $0x148] sm:$0xff] }
 0x609   : > { %7752 = vst.msk [vmem:[#allocation5 + $0x188] sm:$0xff] %vm4502_vm3, %v7647_v58  ;;  %v7648_v47 = vmax.f32 %v7616_v24, 0.0  ;;  %v7840_v40 = vld [vmem:[#allocation5 + $0x128] sm:$0xff] }
 0x60a   : > { %7750 = vst.msk [vmem:[#allocation5 + $0x168] sm:$0xff] %vm4502_vm3, %v7645_v51  ;;  %v7646_v55 = vmax.f32 %v7614_v36, 0.0  ;;  %v7843_v38 = vld [vmem:[#allocation5 + $0x150] sm:$0xff]  ;;  %v7764_v18 = vld [vmem:[#allocation5 + $0x27] sm:$0xff] }
 0x60b   : > { %7753 = vst.msk [vmem:[#allocation5 + $0x190] sm:$0xff] %vm4502_vm3, %v7648_v47  ;;  %v7841_v26 = vld [vmem:[#allocation5 + $0x130] sm:$0xff]  ;;  %v18422_v61 = vpack.c.bf16 %v7843_v38, %v7842_v28  ;;  %v7766_v36 = vld [vmem:[#allocation5 + $0x47] sm:$0xff] }
 0x60c   : > { %7751 = vst.msk [vmem:[#allocation5 + $0x170] sm:$0xff] %vm4502_vm3, %v7646_v55  ;;  %v14354_v1 = vpop.f32.mrb[136].mxu1  ;;  %v18419_v27 = vpack.c.bf16 %v7841_v26, %v7840_v40  ;;  %v7765_v58 = vld [vmem:[#allocation5 + $0x2f] sm:$0xff] }
 0x60d   : > { %v7619_v35 = vadd.f32 %v14354_v1, %v18334_v9  ;;  %v7523_v19 = vpop.f32.mrb[137].mxu1  ;;  %v7767_v24 = vld [vmem:[#allocation5 + $0x4f] sm:$0xff]  ;;  %v18464_v51 = vpack.c.bf16 %v7765_v58, %v7764_v18  ;;  %v7768_v1 = vld [vmem:[#allocation5 + $0x67] sm:$0xff] }
 0x60e   : > { %v7617_v2 = vadd.f32 %v18334_v9, %v7523_v19  ;;  %v14355_v20 = vpop.f32.mrb[138].mxu1  ;;  %14389 = vmatmul.mubr.msk.bf16.gmra.mrb[64].mxu0 %vm4502_vm3, %v18419_v27  ;;  %v15754_v47 = vld [vmem:[#allocation9 + $0x68] sm:$0xff]   ;;  %v18466_v55 = vpack.c.bf16 %v7767_v24, %v7766_v36  ;;  %v15755_v38 = vld [vmem:[#allocation9 + $0x70] sm:$0xff]   ;;  %v15756_v19 = vld [vmem:[#allocation9 + $0x78] sm:$0xff]  }
 0x60f   : > { %v7651_v34 = vmax.f32 %v7619_v35, 0.0  ;;  %v7620_v56 = vadd.f32 %v14355_v20, %v18334_v9  ;;  %v7526_v16 = vpop.f32.mrb[139].mxu1  ;;  %14392 = vmatprep.mubr.msk.bf16.mxu0 %vm4502_vm3, %v18422_v61  ;;  %v7769_v40 = vld [vmem:[#allocation5 + $0x6f] sm:$0xff]  ;;  %v7770_v35 = vld [vmem:[#allocation5 + $0x87] sm:$0xff] }
 0x610   : > { %v7649_v54 = vmax.f32 %v7617_v2, 0.0  ;;  %v7618_v37 = vadd.f32 %v18334_v9, %v7526_v16  ;;  %v7846_v14 = vld [vmem:[#allocation5 + $0x188] sm:$0xff]  ;;  %19294 = vst [vmem:[#allocation22_spill] sm:$0xff] %v18466_v55  ;;  %v18473_v28 = vpack.c.bf16 %v7769_v40, %v7768_v1  ;;  %v8374_v58 = vld [vmem:[#allocation5 + $0x11] sm:$0xff] }
 0x611   : > { %7756 = vst.msk [vmem:[#allocation5 + $0x1c8] sm:$0xff] %vm4502_vm3, %v7651_v34  ;;  %v7652_v39 = vmax.f32 %v7620_v56, 0.0  ;;  %v7844_v12 = vld [vmem:[#allocation5 + $0x168] sm:$0xff]  ;;  %v8376_v40 = vld [vmem:[#allocation5 + $0x31] sm:$0xff] }
 0x612   : > { %7754 = vst.msk [vmem:[#allocation5 + $0x1a8] sm:$0xff] %vm4502_vm3, %v7649_v54  ;;  %v7650_v22 = vmax.f32 %v7618_v37, 0.0  ;;  %v7847_v44 = vld [vmem:[#allocation5 + $0x190] sm:$0xff]  ;;  %19295 = vst [vmem:[#allocation23_spill] sm:$0xff] %v18473_v28  ;;  %v7772_v56 = vld [vmem:[#allocation5 + $0xa7] sm:$0xff] }
 0x613   : > { %7757 = vst.msk [vmem:[#allocation5 + $0x1d0] sm:$0xff] %vm4502_vm3, %v7652_v39  ;;  %v7845_v62 = vld [vmem:[#allocation5 + $0x170] sm:$0xff]  ;;  %v18438_v7 = vpack.c.bf16 %v7847_v44, %v7846_v14  ;;  %v7774_v54 = vld [vmem:[#allocation5 + $0xc7] sm:$0xff] }
 0x614   : > { %7755 = vst.msk [vmem:[#allocation5 + $0x1b0] sm:$0xff] %vm4502_vm3, %v7650_v22  ;;  %v14358_v8 = vpop.f32.mrb[140].mxu1  ;;  %v18435_v45 = vpack.c.bf16 %v7845_v62, %v7844_v12  ;;  %v7771_v26 = vld [vmem:[#allocation5 + $0x8f] sm:$0xff]  ;;  %v7776_v62 = vld [vmem:[#allocation5 + $0xe7] sm:$0xff] }
 0x615   : > { %v7623_v42 = vadd.f32 %v14358_v8, %v18334_v9  ;;  %v7539_v33 = vpop.f32.mrb[141].mxu1  ;;  %v18475_v2 = vpack.c.bf16 %v7771_v26, %v7770_v35  ;;  %v7773_v20 = vld [vmem:[#allocation5 + $0xaf] sm:$0xff]  ;;  %v7778_v14 = vld [vmem:[#allocation5 + $0x107] sm:$0xff] }
 0x616   : > { %v7621_v11 = vadd.f32 %v18334_v9, %v7539_v33  ;;  %v14359_v23 = vpop.f32.mrb[142].mxu1  ;;  %14393 = vmatmul.mubr.msk.bf16.gmra.mrb[68].mxu0 %vm4502_vm3, %v18435_v45  ;;  %v7775_v34 = vld [vmem:[#allocation5 + $0xcf] sm:$0xff]  ;;  %v18481_v16 = vpack.c.bf16 %v7773_v20, %v7772_v56  ;;  %v15761_v20 = vld [vmem:[#allocation9 + $0xa0] sm:$0xff]  }
 0x617   : > { %v7655_v29 = vmax.f32 %v7623_v42, 0.0  ;;  %v7624_v6 = vadd.f32 %v14359_v23, %v18334_v9  ;;  %v7542_v4 = vpop.f32.mrb[143].mxu1  ;;  %14396 = vmatprep.mubr.msk.bf16.mxu0 %vm4502_vm3, %v18438_v7  ;;  %19296 = vst [vmem:[#allocation24_spill] sm:$0xff] %v18475_v2  ;;  %v15758_v37 = vld [vmem:[#allocation9 + $0x88] sm:$0xff]   ;;  %v18483_v39 = vpack.c.bf16 %v7775_v34, %v7774_v54  ;;  %v15759_v22 = vld [vmem:[#allocation9 + $0x90] sm:$0xff]  }
 0x618   : > { %v7653_v49 = vmax.f32 %v7621_v11, 0.0  ;;  %v7622_v0 = vadd.f32 %v18334_v9, %v7542_v4  ;;  %v7850_v21 = vld [vmem:[#allocation5 + $0x1c8] sm:$0xff]  ;;  %v8378_v1 = vld [vmem:[#allocation5 + $0x51] sm:$0xff] }
 0x619   : > { %7760 = vst.msk [vmem:[#allocation5 + $0x208] sm:$0xff] %vm4502_vm3, %v7655_v29  ;;  %v7656_v25 = vmax.f32 %v7624_v6, 0.0  ;;  %v7848_v5 = vld [vmem:[#allocation5 + $0x1a8] sm:$0xff]  ;;  %v8380_v56 = vld [vmem:[#allocation5 + $0x71] sm:$0xff] }
 0x61a   : > { %7758 = vst.msk [vmem:[#allocation5 + $0x1e8] sm:$0xff] %vm4502_vm3, %v7653_v49  ;;  %v7654_v41 = vmax.f32 %v7622_v0, 0.0  ;;  %v7851_v13 = vld [vmem:[#allocation5 + $0x1d0] sm:$0xff]  ;;  %v7762_v9 = vld [vmem:[#allocation5 + $0x7] sm:$0xff] }
 0x61b   : > { %7761 = vst.msk [vmem:[#allocation5 + $0x210] sm:$0xff] %vm4502_vm3, %v7656_v25  ;;  %v7849_v60 = vld [vmem:[#allocation5 + $0x1b0] sm:$0xff]  ;;  %v18453_v43 = vpack.c.bf16 %v7851_v13, %v7850_v21  ;;  %v7794_v10 = vpack.c.bf16 %v7763_v15, %v7762_v9  ;;  %v7780_v23 = vld [vmem:[#allocation5 + $0x127] sm:$0xff] }
 0x61c   : > { %7759 = vst.msk [vmem:[#allocation5 + $0x1f0] sm:$0xff] %vm4502_vm3, %v7654_v41  ;;  %v18451_v52 = vpack.c.bf16 %v7849_v60, %v7848_v5  ;;  %v7777_v44 = vld [vmem:[#allocation5 + $0xef] sm:$0xff]  ;;  %v7782_v6 = vld [vmem:[#allocation5 + $0x147] sm:$0xff] }
 0x61d   : > { %v7779_v12 = vld [vmem:[#allocation5 + $0x10f] sm:$0xff]  ;;  %v18489_v8 = vpack.c.bf16 %v7777_v44, %v7776_v62  ;;  %v7784_v25 = vld [vmem:[#allocation5 + $0x167] sm:$0xff] }
 0x61e   : > { %14397 = vmatmul.mubr.msk.bf16.gmra.mrb[72].mxu0 %vm4502_vm3, %v18451_v52  ;;  %v18491_v42 = vpack.c.bf16 %v7779_v12, %v7778_v14  ;;  %v7781_v33 = vld [vmem:[#allocation5 + $0x12f] sm:$0xff]  ;;  %v7786_v13 = vld [vmem:[#allocation5 + $0x187] sm:$0xff] }
 0x61f   : > { %14400 = vmatprep.mubr.msk.bf16.mxu0 %vm4502_vm3, %v18453_v43  ;;  %v7783_v11 = vld [vmem:[#allocation5 + $0x14f] sm:$0xff]  ;;  %v18497_v29 = vpack.c.bf16 %v7781_v33, %v7780_v23  ;;  %v7788_v9 = vld [vmem:[#allocation5 + $0x1a7] sm:$0xff] }
 0x620   : > { %v18499_v4 = vpack.c.bf16 %v7783_v11, %v7782_v6  ;;  %v7785_v49 = vld [vmem:[#allocation5 + $0x16f] sm:$0xff] }
 0x621   : > { %v7852_v53 = vld [vmem:[#allocation5 + $0x1e8] sm:$0xff]  ;;  %v18505_v41 = vpack.c.bf16 %v7785_v49, %v7784_v25  ;;  %v8384_v33 = vld [vmem:[#allocation5 + $0xb1] sm:$0xff]  ;;  %v15765_v25 = vld [vmem:[#allocation9 + $0xc0] sm:$0xff]  }
 0x622   : > { %v7787_v0 = vld [vmem:[#allocation5 + $0x18f] sm:$0xff]  ;;  %v7792_v18 = vld [vmem:[#allocation5 + $0x1e7] sm:$0xff]  ;;  %v15764_v49 = vld [vmem:[#allocation9 + $0xb8] sm:$0xff]  }
 0x623   : > { %v7853_v17 = vld [vmem:[#allocation5 + $0x1f0] sm:$0xff]  ;;  %v18507_v5 = vpack.c.bf16 %v7787_v0, %v7786_v13  ;;  %v15762_v12 = vld [vmem:[#allocation9 + $0xa8] sm:$0xff]  }
 0x624   : > { %v18459_v59 = vpack.c.bf16 %v7853_v17, %v7852_v53  ;;  %v7789_v60 = vld [vmem:[#allocation5 + $0x1af] sm:$0xff]  ;;  %v7790_v53 = vld [vmem:[#allocation5 + $0x1c7] sm:$0xff] }
 0x625   : > { %v7791_v21 = vld [vmem:[#allocation5 + $0x1cf] sm:$0xff]  ;;  %v18513_v15 = vpack.c.bf16 %v7789_v60, %v7788_v9 }
 0x626   : > { %14401 = vmatmul.mubr.msk.bf16.gmra.mrb[76].mxu0 %vm4502_vm3, %v18459_v59  ;;  %v18515_v17 = vpack.c.bf16 %v7791_v21, %v7790_v53  ;;  %v7793_v24 = vld [vmem:[#allocation5 + $0x1ef] sm:$0xff] }
 0x627   : > { %14416 = vmatprep.mubr.msk.bf16.mxu0 %vm4502_vm3, %v7794_v10  ;;  %v8373_v10 = vld [vmem:[#allocation5 + $0x9] sm:$0xff]  ;;  %v8386_v23 = vld [vmem:[#allocation5 + $0xd1] sm:$0xff] }
 0x628   : > { %v8405_v36 = vpack.c.bf16 %v8374_v58, %v8373_v10  ;;  %v8377_v26 = vld [vmem:[#allocation5 + $0x49] sm:$0xff]  ;;  %v8388_v60 = vld [vmem:[#allocation5 + $0xf1] sm:$0xff] }
 0x629   : > { %v8379_v34 = vld [vmem:[#allocation5 + $0x69] sm:$0xff]  ;;  %v8390_v9 = vld [vmem:[#allocation5 + $0x111] sm:$0xff] }
 0x62a   : > { %v8381_v54 = vld [vmem:[#allocation5 + $0x89] sm:$0xff]  ;;  %v18534_v44 = vpack.c.bf16 %v8380_v56, %v8379_v34 }
 0x62b   : > { %v8383_v14 = vld [vmem:[#allocation5 + $0xa9] sm:$0xff] }
 0x62c   : > { %v8385_v11 = vld [vmem:[#allocation5 + $0xc9] sm:$0xff]  ;;  %v18542_v6 = vpack.c.bf16 %v8384_v33, %v8383_v14 }
 0x62d   : > { %v18544_v0 = vpack.c.bf16 %v8386_v23, %v8385_v11  ;;  %v8387_v13 = vld [vmem:[#allocation5 + $0xe9] sm:$0xff]  ;;  %v8404_v23 = vld [vmem:[#allocation5 + $0x1f1] sm:$0xff] }
 0x62e   : > { %14417 = vmatmul.mubr.msk.bf16.vlgmr.msra.gmra.mrb[48].mxu0 %vm4502_vm3, %v18464_v51  ;;  %v8389_v21 = vld [vmem:[#allocation5 + $0x109] sm:$0xff]  ;;  %v18550_v53 = vpack.c.bf16 %v8388_v60, %v8387_v13 }
 0x62f   : > { %14420 = vmatprep.mubr.msk.bf16.mxu0 %vm4502_vm3, %v18466_v55  ;;  %14449 = vmatpush3.bf16.msra.mxu0 %v18396_v50  ;;  %v15757_v50 = vld [vmem:[#allocation9 + $0x80] sm:$0xff]   ;;  %v18552_v10 = vpack.c.bf16 %v8390_v9, %v8389_v21  ;;  %v8391_v58 = vld [vmem:[#allocation5 + $0x129] sm:$0xff]  ;;  %v15768_v21 = vld [vmem:[#allocation9 + $0xd8] sm:$0xff]  }
 0x630   : > { %14450 = vmatprep.subr.bf16.mxu0 %v15754_v47  ;;  %v8403_v11 = vld [vmem:[#allocation5 + $0x1e9] sm:$0xff]  ;;  %v15769_v9 = vld [vmem:[#allocation9 + $0xe0] sm:$0xff]  }
 0x631   : > { %v15766_v13 = vld [vmem:[#allocation9 + $0xc8] sm:$0xff]   ;;  %v15767_v60 = vld [vmem:[#allocation9 + $0xd0] sm:$0xff]  }
 0x633   : > { %14451 = vmatpush3.bf16.msra.mxu0 %v15754_v47  ;;  %v18521_v47 = vpack.c.bf16 %v7793_v24, %v7792_v18  ;;  %v8392_v24 = vld [vmem:[#allocation5 + $0x131] sm:$0xff]  ;;  %v8393_v18 = vld [vmem:[#allocation5 + $0x149] sm:$0xff] }
 0x634   : > { %14452 = vmatprep.subr.bf16.mxu0 %v15755_v38 }
 0x636   : > { %14421 = vmatmul.mubr.msk.bf16.gmra.mrb[52].mxu0 %vm4502_vm3, %v18473_v28 }
 0x637   : > { %14424 = vmatprep.mubr.msk.bf16.mxu0 %vm4502_vm3, %v18475_v2  ;;  %14453 = vmatpush3.bf16.msra.mxu0 %v15755_v38  ;;  %v8375_v38 = vld [vmem:[#allocation5 + $0x29] sm:$0xff] }
 0x638   : > { %14454 = vmatprep.subr.bf16.mxu0 %v15756_v19  ;;  %v18526_v35 = vpack.c.bf16 %v8376_v40, %v8375_v38  ;;  %v18558_v38 = vpack.c.bf16 %v8392_v24, %v8391_v58  ;;  %v15770_v58 = vld [vmem:[#allocation9 + $0xe8] sm:$0xff]   ;;  %v11013_v24 = vld [vmem:[#allocation2 + $0x10] sm:$0xff] }
 0x63b   : > { %14455 = vmatpush3.bf16.msra.mxu0 %v15756_v19  ;;  %v15760_v19 = vld [vmem:[#allocation9 + $0x98] sm:$0xff]  }
 0x63c   : > { %14456 = vmatprep.subr.bf16.mxu0 %v15757_v50 }
 0x63e   : > { %14425 = vmatmul.mubr.msk.bf16.gmra.mrb[56].mxu0 %vm4502_vm3, %v18481_v16 }
 0x63f   : > { %14428 = vmatprep.mubr.msk.bf16.mxu0 %vm4502_vm3, %v18483_v39  ;;  %14457 = vmatpush3.bf16.msra.mxu0 %v15757_v50  ;;  %v18528_v50 = vpack.c.bf16 %v8378_v1, %v8377_v26  ;;  %v8395_v26 = vld [vmem:[#allocation5 + $0x169] sm:$0xff]  ;;  %v8396_v1 = vld [vmem:[#allocation5 + $0x171] sm:$0xff] }
 0x640   : > { %14458 = vmatprep.subr.bf16.mxu0 %v15758_v37  ;;  %v18566_v34 = vpack.c.bf16 %v8396_v1, %v8395_v26  ;;  %v11076_v26 = vld [vmem:[#allocation2 + $0x9] sm:$0xff]  ;;  %v11077_v1 = vld [vmem:[#allocation2 + $0x11] sm:$0xff] }
 0x643   : > { %14459 = vmatpush3.bf16.msra.mxu0 %v15758_v37  ;;  %v8382_v37 = vld [vmem:[#allocation5 + $0x91] sm:$0xff] }
 0x644   : > { %14492 = vmatprep.subr.bf16.mxu0 %v15759_v22  ;;  %v18536_v62 = vpack.c.bf16 %v8382_v37, %v8381_v54  ;;  %v8399_v54 = vld [vmem:[#allocation5 + $0x1a9] sm:$0xff]  ;;  %v8400_v37 = vld [vmem:[#allocation5 + $0x1b1] sm:$0xff] }
 0x645   : > { %v18574_v14 = vpack.c.bf16 %v8400_v37, %v8399_v54  ;;  %v11268_v54 = vld [vmem:[#allocation2 + $0x29] sm:$0xff] }
 0x646   : > { %14429 = vmatmul.mubr.msk.bf16.gmra.mrb[60].mxu0 %vm4502_vm3, %v18489_v8 }
 0x647   : > { %14432 = vmatprep.mubr.msk.bf16.mxu0 %vm4502_vm3, %v18491_v42  ;;  %19297 = vst [vmem:[#allocation25_spill] sm:$0xff] %v18574_v14 }
 0x64e   : > { %14433 = vmatmul.mubr.msk.bf16.gmra.mrb[64].mxu0 %vm4502_vm3, %v18497_v29 }
 0x64f   : > { %14436 = vmatprep.mubr.msk.bf16.mxu0 %vm4502_vm3, %v18499_v4 }
 0x656   : > { %14437 = vmatmul.mubr.msk.bf16.gmra.mrb[68].mxu0 %vm4502_vm3, %v18505_v41 }
 0x657   : > { %14440 = vmatprep.mubr.msk.bf16.mxu0 %vm4502_vm3, %v18507_v5 }
 0x65e   : > { %14441 = vmatmul.mubr.msk.bf16.gmra.mrb[72].mxu0 %vm4502_vm3, %v18513_v15 }
 0x65f   : > { %14444 = vmatprep.mubr.msk.bf16.mxu0 %vm4502_vm3, %v18515_v17 }
 0x666   : > { %14445 = vmatmul.mubr.msk.bf16.gmra.mrb[76].mxu0 %vm4502_vm3, %v18521_v47 }
 0x667   : > { %14460 = vmatprep.mubr.msk.bf16.mxu0 %vm4502_vm3, %v8405_v36  ;;  %v8394_v36 = vld [vmem:[#allocation5 + $0x151] sm:$0xff] }
 0x668   : > { %v18560_v40 = vpack.c.bf16 %v8394_v36, %v8393_v18  ;;  %v11140_v18 = vld [vmem:[#allocation2 + $0x27] sm:$0xff]  ;;  %v11141_v36 = vld [vmem:[#allocation2 + $0x2f] sm:$0xff] }
 0x66e   : > { %14461 = vmatmul.mubr.msk.bf16.vlgmr.msra.gmra.mrb[48].mxu0 %vm4502_vm3, %v18526_v35 }
 0x66f   : > { %14464 = vmatprep.mubr.msk.bf16.mxu0 %vm4502_vm3, %v18528_v50  ;;  %14493 = vmatpush3.bf16.msra.mxu0 %v15759_v22  ;;  %v15763_v22 = vld [vmem:[#allocation9 + $0xb0] sm:$0xff]  }
 0x670   : > { %14494 = vmatprep.subr.bf16.mxu0 %v15760_v19 }
 0x673   : > { %14495 = vmatpush3.bf16.msra.mxu0 %v15760_v19  ;;  %v8397_v19 = vld [vmem:[#allocation5 + $0x189] sm:$0xff] }
 0x674   : > { %14496 = vmatprep.subr.bf16.mxu0 %v15761_v20 }
 0x676   : > { %14465 = vmatmul.mubr.msk.bf16.gmra.mrb[52].mxu0 %vm4502_vm3, %v18534_v44 }
 0x677   : > { %14468 = vmatprep.mubr.msk.bf16.mxu0 %vm4502_vm3, %v18536_v62  ;;  %14497 = vmatpush3.bf16.msra.mxu0 %v15761_v20  ;;  %v8398_v20 = vld [vmem:[#allocation5 + $0x191] sm:$0xff] }
 0x678   : > { %14498 = vmatprep.subr.bf16.mxu0 %v15762_v12  ;;  %v18568_v56 = vpack.c.bf16 %v8398_v20, %v8397_v19  ;;  %v11205_v20 = vld [vmem:[#allocation2 + $0x30] sm:$0xff] }
 0x67b   : > { %14499 = vmatpush3.bf16.msra.mxu0 %v15762_v12  ;;  %v8401_v12 = vld [vmem:[#allocation5 + $0x1c9] sm:$0xff] }
 0x67c   : > { %14500 = vmatprep.subr.bf16.mxu0 %v15763_v22 }
 0x67e   : > { %14469 = vmatmul.mubr.msk.bf16.gmra.mrb[56].mxu0 %vm4502_vm3, %v18542_v6 }
 0x67f   : > { %14472 = vmatprep.mubr.msk.bf16.mxu0 %vm4502_vm3, %v18544_v0  ;;  %14501 = vmatpush3.bf16.msra.mxu0 %v15763_v22  ;;  %v8402_v22 = vld [vmem:[#allocation5 + $0x1d1] sm:$0xff] }
 0x680   : > { %14502 = vmatprep.subr.bf16.mxu0 %v15764_v49  ;;  %v18576_v33 = vpack.c.bf16 %v8402_v22, %v8401_v12  ;;  %v11269_v12 = vld [vmem:[#allocation2 + $0x31] sm:$0xff]  ;;  %v11333_v22 = vld [vmem:[#allocation2 + $0x47] sm:$0xff] }
 0x682   : > { %19298 = vst [vmem:[#allocation26_spill] sm:$0xff] %v18576_v33 }
 0x683   : > { %14503 = vmatpush3.bf16.msra.mxu0 %v15764_v49  ;;  %v18582_v49 = vpack.c.bf16 %v8404_v23, %v8403_v11  ;;  %v11047_v11 = vmax.f32 %v11141_v36, %v11205_v20  ;;  %v15773_v23 = vld [vmem:[#allocation9 + $0x100] sm:$0xff]  }
 0x684   : > { %14536 = vmatprep.subr.bf16.mxu0 %v15765_v25 }
 0x685   : > { %19299 = vst [vmem:[#allocation27_spill] sm:$0xff] %v18582_v49 }
 0x686   : > { %14473 = vmatmul.mubr.msk.bf16.gmra.mrb[60].mxu0 %vm4502_vm3, %v18550_v53 }
 0x687   : > { %14476 = vmatprep.mubr.msk.bf16.mxu0 %vm4502_vm3, %v18552_v10 }
 0x68e   : > { %14477 = vmatmul.mubr.msk.bf16.gmra.mrb[64].mxu0 %vm4502_vm3, %v18558_v38 }
 0x68f   : > { %14480 = vmatprep.mubr.msk.bf16.mxu0 %vm4502_vm3, %v18560_v40 }
 0x696   : > { %14481 = vmatmul.mubr.msk.bf16.gmra.mrb[68].mxu0 %vm4502_vm3, %v18566_v34 }
 0x697   : > { %14484 = vmatprep.mubr.msk.bf16.mxu0 %vm4502_vm3, %v18568_v56 }
 0x69e   : > { %14485 = vmatmul.mubr.msk.bf16.gmra.mrb[72].mxu0 %vm4502_vm3, %v18574_v14 }
 0x69f   : > { %14488 = vmatprep.mubr.msk.bf16.mxu0 %vm4502_vm3, %v18576_v33 }
 0x6a6   : > { %14489 = vmatmul.mubr.msk.bf16.gmra.mrb[76].mxu0 %vm4502_vm3, %v18582_v49 }
 0x6a7   : > { %14504 = vmatprep.mubr.msk.bf16.mxu0 %vm4502_vm3, %v18464_v51  ;;  %v11541_v51 = vld [vmem:[%s19255_s13] sm:$0x3] }
 0x6a8   : > { %15564 = vmatprep.subr.msk.bf16.mxu1 %vm693_vm1, %v11541_v51 }
 0x6ae   : > { %14505 = vmatmul.mubr.msk.bf16.vlgmr.msra.gmra.mrb[48].mxu0 %vm4502_vm3, %v18466_v55 }
 0x6af   : > { %14508 = vmatprep.mubr.msk.bf16.mxu0 %vm4502_vm3, %v18473_v28  ;;  %14537 = vmatpush3.bf16.msra.mxu0 %v15765_v25  ;;  %v11598_v25 = vsel %vm693_vm1, %v11541_v51, 0 }
 0x6b0   : > { %14538 = vmatprep.subr.bf16.mxu0 %v15766_v13  ;;  %14757 = vmatpush3.bf16.msra.mxu1 %v11598_v25  ;;  %v11397_v25 = vld [vmem:[#allocation2 + $0x48] sm:$0xff] }
 0x6b3   : > { %14539 = vmatpush3.bf16.msra.mxu0 %v15766_v13  ;;  %v18628_v13 = vld [vmem:[#allocation5 + $0x208] sm:$0xff] }
 0x6b4   : > { %14540 = vmatprep.subr.bf16.mxu0 %v15767_v60 }
 0x6b6   : > { %14509 = vmatmul.mubr.msk.bf16.gmra.mrb[52].mxu0 %vm4502_vm3, %v18475_v2 }
 0x6b7   : > { %14512 = vmatprep.mubr.msk.bf16.mxu0 %vm4502_vm3, %v18481_v16  ;;  %14541 = vmatpush3.bf16.msra.mxu0 %v15767_v60  ;;  %v15771_v16 = vld [vmem:[#allocation9 + $0xf0] sm:$0xff]  }
 0x6b8   : > { %14542 = vmatprep.subr.bf16.mxu0 %v15768_v21  ;;  %v18630_v60 = vld [vmem:[#allocation5 + $0x210] sm:$0xff] }
 0x6bb   : > { %14543 = vmatpush3.bf16.msra.mxu0 %v15768_v21 }
 0x6bc   : > { %14544 = vmatprep.subr.bf16.mxu0 %v15769_v9 }
 0x6be   : > { %14513 = vmatmul.mubr.msk.bf16.gmra.mrb[56].mxu0 %vm4502_vm3, %v18483_v39  ;;  %v8742_v39 = vld [vmem:[#allocation5 + $0x20f] sm:$0xff] }
 0x6bf   : > { %14516 = vmatprep.mubr.msk.bf16.mxu0 %vm4502_vm3, %v18489_v8  ;;  %14545 = vmatpush3.bf16.msra.mxu0 %v15769_v9  ;;  %v8741_v8 = vld [vmem:[#allocation5 + $0x207] sm:$0xff] }
 0x6c0   : > { %14546 = vmatprep.subr.bf16.mxu0 %v15770_v58 }
 0x6c3   : > { %14547 = vmatpush3.bf16.msra.mxu0 %v15770_v58  ;;  %v11398_v58 = vld [vmem:[#allocation2 + $0x50] sm:$0xff] }
 0x6c4   : > { %14580 = vmatprep.subr.bf16.mxu0 %v15771_v16 }
 0x6c6   : > { %14517 = vmatmul.mubr.msk.bf16.gmra.mrb[60].mxu0 %vm4502_vm3, %v18491_v42  ;;  %v8758_v42 = vpack.c.bf16 %v8742_v39, %v8741_v8  ;;  %v11111_v39 = vmax.f32 %v11047_v11, %v11269_v12  ;;  %v11335_v8 = vld [vmem:[#allocation2 + $0x67] sm:$0xff] }
 0x6c7   : > { %14520 = vmatprep.mubr.msk.bf16.mxu0 %vm4502_vm3, %v18497_v29  ;;  %v15772_v29 = vld [vmem:[#allocation9 + $0xf8] sm:$0xff]  }
 0x6ce   : > { %14521 = vmatmul.mubr.msk.bf16.gmra.mrb[64].mxu0 %vm4502_vm3, %v18499_v4  ;;  %v10980_v4 = vld [vmem:[#allocation2 + $0x7] sm:$0xff] }
 0x6cf   : > { %14524 = vmatprep.mubr.msk.bf16.mxu0 %vm4502_vm3, %v18505_v41  ;;  %v10981_v41 = vld [vmem:[#allocation2 + $0xf] sm:$0xff] }
 0x6d6   : > { %14525 = vmatmul.mubr.msk.bf16.gmra.mrb[68].mxu0 %vm4502_vm3, %v18507_v5  ;;  %v11012_v5 = vld [vmem:[#allocation2 + $0x8] sm:$0xff] }
 0x6d7   : > { %14528 = vmatprep.mubr.msk.bf16.mxu0 %vm4502_vm3, %v18513_v15  ;;  %v11044_v15 = vmax.f32 %v10980_v4, %v11012_v5  ;;  %v11399_v4 = vld [vmem:[#allocation2 + $0x68] sm:$0xff] }
 0x6d9   : > { %v11108_v19 = vmax.f32 %v11044_v15, %v11076_v26  ;;  %v11461_v15 = vld [vmem:[#allocation2 + $0x49] sm:$0xff] }
 0x6da   : > { %v15774_v26 = vld [vmem:[#allocation9 + $0x108] sm:$0xff]  }
 0x6db   : > { %v11172_v21 = vmax.f32 %v11108_v19, %v11140_v18  ;;  %v11463_v19 = vld [vmem:[#allocation2 + $0x69] sm:$0xff] }
 0x6de   : > { %14529 = vmatmul.mubr.msk.bf16.gmra.mrb[72].mxu0 %vm4502_vm3, %v18515_v17  ;;  %v11045_v17 = vmax.f32 %v10981_v41, %v11013_v24  ;;  %v11400_v41 = vld [vmem:[#allocation2 + $0x70] sm:$0xff] }
 0x6df   : > { %14532 = vmatprep.mubr.msk.bf16.mxu0 %vm4502_vm3, %v18521_v47  ;;  %v11204_v47 = vld [vmem:[#allocation2 + $0x28] sm:$0xff] }
 0x6e0   : > { %v11046_v37 = vmax.f32 %v11140_v18, %v11204_v47 }
 0x6e2   : > { %v11110_v51 = vmax.f32 %v11046_v37, %v11268_v54  ;;  %v11048_v37 = vmax.f32 %v11333_v22, %v11397_v25 }
 0x6e6   : > { %14533 = vmatmul.mubr.msk.bf16.gmra.mrb[76].mxu0 %vm4502_vm3, %v8758_v42  ;;  %v11336_v42 = vld [vmem:[#allocation2 + $0x6f] sm:$0xff] }
 0x6e7   : > { %14548 = vmatprep.mubr.msk.bf16.mxu0 %vm4502_vm3, %v18352_v46  ;;  %v11109_v46 = vmax.f32 %v11045_v17, %v11077_v1  ;;  %v11462_v17 = vld [vmem:[#allocation2 + $0x51] sm:$0xff] }
 0x6e9   : > { %v11173_v9 = vmax.f32 %v11109_v46, %v11141_v36 }
 0x6eb   : > { %v11237_v24 = vmax.f32 %v11173_v9, %v11205_v20  ;;  %v11464_v20 = vld [vmem:[#allocation2 + $0x71] sm:$0xff]  ;;  %v11112_v9 = vmax.f32 %v11048_v37, %v11461_v15 }
 0x6ed   : > { %v11176_v28 = vmax.f32 %v11112_v9, %v11335_v8 }
 0x6ee   : > { %14549 = vmatmul.mubr.msk.bf16.vlgmr.msra.gmra.mrb[48].mxu0 %vm4502_vm3, %v18355_v63  ;;  %v11334_v63 = vld [vmem:[#allocation2 + $0x4f] sm:$0xff] }
 0x6ef   : > { %14552 = vmatprep.mubr.msk.bf16.mxu0 %vm4502_vm3, %v18368_v31  ;;  %14581 = vmatpush3.bf16.msra.mxu0 %v15771_v16  ;;  %v11236_v31 = vmax.f32 %v11172_v21, %v11204_v47  ;;  %v11174_v16 = vmax.f32 %v11110_v51, %v11333_v22  ;;  %v11175_v18 = vmax.f32 %v11111_v39, %v11334_v63 }
 0x6f0   : > { %14582 = vmatprep.subr.bf16.mxu0 %v15772_v29  ;;  %v11049_v46 = vmax.f32 %v11334_v63, %v11398_v58  ;;  %v11301_v47 = vmax.f32 %v11237_v24, %v11269_v12  ;;  %v11050_v21 = vmax.f32 %v11335_v8, %v11399_v4  ;;  %v11051_v51 = vmax.f32 %v11336_v42, %v11400_v41  ;;  %v15775_v12 = vld [vmem:[#allocation9 + $0x110] sm:$0xff]  }
 0x6f1   : > { %v11300_v36 = vmax.f32 %v11236_v31, %v11268_v54  ;;  %v11238_v1 = vmax.f32 %v11174_v16, %v11397_v25  ;;  %v11239_v11 = vmax.f32 %v11175_v18, %v11398_v58  ;;  %v11337_v31 = vld [vmem:[#allocation2 + $0x87] sm:$0xff] }
 0x6f2   : > { %v11113_v2 = vmax.f32 %v11049_v46, %v11462_v17  ;;  %v11366_v54 = vmax.f32 %v11301_v47, %v11334_v63  ;;  %v11114_v16 = vmax.f32 %v11050_v21, %v11463_v19  ;;  %v11115_v37 = vmax.f32 %v11051_v51, %v11464_v20  ;;  %v11402_v63 = vld [vmem:[#allocation2 + $0x90] sm:$0xff] }
 0x6f3   : > { %14583 = vmatpush3.bf16.msra.mxu0 %v15772_v29  ;;  %v11365_v29 = vmax.f32 %v11300_v36, %v11333_v22  ;;  %v11302_v5 = vmax.f32 %v11238_v1, %v11461_v15  ;;  %v11303_v39 = vmax.f32 %v11239_v11, %v11462_v17  ;;  %v11401_v22 = vld [vmem:[#allocation2 + $0x88] sm:$0xff] }
 0x6f4   : > { %14584 = vmatprep.subr.bf16.mxu0 %v15773_v23  ;;  %v11177_v55 = vmax.f32 %v11113_v2, %v11336_v42  ;;  %v11430_v36 = vmax.f32 %v11366_v54, %v11398_v58  ;;  %v11178_v46 = vmax.f32 %v11114_v16, %v11337_v31  ;;  %v11465_v47 = vld [vmem:[#allocation2 + $0x89] sm:$0xff]  ;;  %v11466_v58 = vld [vmem:[#allocation2 + $0x91] sm:$0xff] }
 0x6f5   : > { %v11429_v24 = vmax.f32 %v11365_v29, %v11397_v25  ;;  %v11367_v18 = vmax.f32 %v11302_v5, %v11335_v8  ;;  %v11368_v1 = vmax.f32 %v11303_v39, %v11336_v42  ;;  %v15776_v8 = vld [vmem:[#allocation9 + $0x118] sm:$0xff]   ;;  %v11052_v42 = vmax.f32 %v11337_v31, %v11401_v22  ;;  %v11340_v39 = vld [vmem:[#allocation2 + $0xaf] sm:$0xff] }
 0x6f6   : > { %14553 = vmatmul.mubr.msk.bf16.gmra.mrb[52].mxu0 %vm4502_vm3, %v18371_v30  ;;  %v11338_v30 = vld [vmem:[#allocation2 + $0x8f] sm:$0xff]  ;;  %v11494_v11 = vmax.f32 %v11430_v36, %v11462_v17  ;;  %v11242_v25 = vmax.f32 %v11178_v46, %v11401_v22 }
 0x6f7   : > { %14556 = vmatprep.mubr.msk.bf16.mxu0 %vm4502_vm3, %v18384_v48  ;;  %14585 = vmatpush3.bf16.msra.mxu0 %v15773_v23  ;;  %v11493_v49 = vmax.f32 %v11429_v24, %v11461_v15  ;;  %v11431_v33 = vmax.f32 %v11367_v18, %v11399_v4  ;;  %v11240_v48 = vmax.f32 %v11176_v28, %v11399_v4  ;;  %v11339_v4 = vld [vmem:[#allocation2 + $0xa7] sm:$0xff] }
 0x6f8   : > { %14586 = vmatprep.subr.bf16.mxu0 %v15774_v26  ;;  %v11241_v23 = vmax.f32 %v11177_v55, %v11400_v41  ;;  %v11432_v21 = vmax.f32 %v11368_v1, %v11400_v41  ;;  %v11179_v14 = vmax.f32 %v11115_v37, %v11338_v30  ;;  %v11306_v54 = vmax.f32 %v11242_v25, %v11465_v47  ;;  %v11403_v41 = vld [vmem:[#allocation2 + $0xa8] sm:$0xff] }
 0x6f9   : > { %v11495_v2 = vmax.f32 %v11431_v33, %v11463_v19  ;;  %v11304_v5 = vmax.f32 %v11240_v48, %v11463_v19  ;;  %v11525_v51 = vpack.c.bf16 %v11494_v11, %v11493_v49  ;;  %v11053_v17 = vmax.f32 %v11338_v30, %v11402_v63  ;;  %v11467_v16 = vld [vmem:[#allocation2 + $0xa9] sm:$0xff] }
 0x6fa   : > { %v11305_v29 = vmax.f32 %v11241_v23, %v11464_v20  ;;  %v11496_v9 = vmax.f32 %v11432_v21, %v11464_v20  ;;  %v11243_v15 = vmax.f32 %v11179_v14, %v11402_v63  ;;  %v11371_v49 = vmax.f32 %v11306_v54, %v11339_v4  ;;  %v11404_v20 = vld [vmem:[#allocation2 + $0xb0] sm:$0xff]  ;;  %v18642_v14 = vld [vmem:[#allocation9 + $0x120] sm:$0xff]   ;;  %v11405_v36 = vld [vmem:[#allocation2 + $0xc8] sm:$0xff] }
 0x6fb   : > { %14587 = vmatpush3.bf16.msra.mxu0 %v15774_v26  ;;  %v11369_v55 = vmax.f32 %v11304_v5, %v11337_v31  ;;  %v11116_v26 = vmax.f32 %v11052_v42, %v11465_v47  ;;  %14758 = vmatprep.mubr.msk.bf16.mxu1 %vm644_vm0, %v11525_v51  ;;  %v11117_v24 = vmax.f32 %v11053_v17, %v11466_v58  ;;  %v11341_v23 = vld [vmem:[#allocation2 + $0xc7] sm:$0xff]  ;;  %v11406_v11 = vld [vmem:[#allocation2 + $0xd0] sm:$0xff] }
 0x6fc   : > { %14588 = vmatprep.subr.bf16.mxu0 %v15775_v12  ;;  %v11370_v28 = vmax.f32 %v11305_v29, %v11338_v30  ;;  %v11526_v33 = vpack.c.bf16 %v11496_v9, %v11495_v2  ;;  %v11307_v19 = vmax.f32 %v11243_v15, %v11466_v58  ;;  %v11435_v30 = vmax.f32 %v11371_v49, %v11403_v41  ;;  %v11342_v2 = vld [vmem:[#allocation2 + $0xcf] sm:$0xff] }
 0x6fd   : > { %v11054_v1 = vmax.f32 %v11339_v4, %v11403_v41  ;;  %v11181_v48 = vmax.f32 %v11117_v24, %v11340_v39  ;;  %v11055_v21 = vmax.f32 %v11340_v39, %v11404_v20  ;;  %v11469_v5 = vld [vmem:[#allocation2 + $0xc9] sm:$0xff]  ;;  %v11470_v9 = vld [vmem:[#allocation2 + $0xd1] sm:$0xff]  ;;  %v11056_v54 = vmax.f32 %v11341_v23, %v11405_v36 }
 0x6fe   : > { %14557 = vmatmul.mubr.msk.bf16.gmra.mrb[56].mxu0 %vm4502_vm3, %v18387_v3  ;;  %v11433_v3 = vmax.f32 %v11369_v55, %v11401_v22  ;;  %v11434_v31 = vmax.f32 %v11370_v28, %v11402_v63  ;;  %14759 = vmatmul.mubr.msk.bf16.vlgmr.msra.gmra.mrb[144].mxu1 %vm644_vm0, %v11526_v33  ;;  %v11372_v18 = vmax.f32 %v11307_v19, %v11340_v39  ;;  %v11343_v28 = vld [vmem:[#allocation2 + $0xe7] sm:$0xff]  ;;  %v11408_v33 = vld [vmem:[#allocation2 + $0xf0] sm:$0xff] }
 0x6ff   : > { %14560 = vmatprep.mubr.msk.bf16.mxu0 %vm4502_vm3, %v18402_v57  ;;  %14589 = vmatpush3.bf16.msra.mxu0 %v15775_v12  ;;  %v11468_v57 = vld [vmem:[#allocation2 + $0xb1] sm:$0xff]  ;;  %v11180_v12 = vmax.f32 %v11116_v26, %v11339_v4  ;;  %v11499_v22 = vmax.f32 %v11435_v30, %v11467_v16  ;;  %v11118_v29 = vmax.f32 %v11054_v1, %v11467_v16  ;;  %v11407_v4 = vld [vmem:[#allocation2 + $0xe8] sm:$0xff] }
 0x700   : > { %14590 = vmatprep.subr.bf16.mxu0 %v15776_v8  ;;  %v11497_v37 = vmax.f32 %v11433_v3, %v11465_v47  ;;  %v11498_v46 = vmax.f32 %v11434_v31, %v11466_v58  ;;  %v11436_v25 = vmax.f32 %v11372_v18, %v11404_v20  ;;  %v11245_v51 = vmax.f32 %v11181_v48, %v11404_v20  ;;  %v11344_v26 = vld [vmem:[#allocation2 + $0xef] sm:$0xff] }
 0x701   : > { %v11244_v63 = vmax.f32 %v11180_v12, %v11403_v41  ;;  %v11119_v15 = vmax.f32 %v11055_v21, %v11468_v57  ;;  %v11182_v55 = vmax.f32 %v11118_v29, %v11341_v23  ;;  %v11057_v17 = vmax.f32 %v11342_v2, %v11406_v11  ;;  %v11471_v3 = vld [vmem:[#allocation2 + $0xe9] sm:$0xff]  ;;  %v11472_v18 = vld [vmem:[#allocation2 + $0xf1] sm:$0xff] }
 0x702   : > { %v11527_v42 = vpack.c.bf16 %v11498_v46, %v11497_v37  ;;  %v11500_v47 = vmax.f32 %v11436_v25, %v11468_v57  ;;  %v11120_v19 = vmax.f32 %v11056_v54, %v11469_v5  ;;  %v11345_v37 = vld [vmem:[#allocation2 + $0x107] sm:$0xff]  ;;  %v11059_v46 = vmax.f32 %v11344_v26, %v11408_v33  ;;  %v11346_v25 = vld [vmem:[#allocation2 + $0x10f] sm:$0xff] }
 0x703   : > { %14591 = vmatpush3.bf16.msra.mxu0 %v15776_v8  ;;  %v11308_v58 = vmax.f32 %v11244_v63, %v11467_v16  ;;  %v11309_v8 = vmax.f32 %v11245_v51, %v11468_v57  ;;  %v11183_v41 = vmax.f32 %v11119_v15, %v11342_v2  ;;  %v11246_v20 = vmax.f32 %v11182_v55, %v11405_v36 }
 0x704   : > { %14624 = vmatprep.subr.bf16.mxu0 %v18642_v14  ;;  %14762 = vmatprep.mubr.msk.bf16.mxu1 %vm644_vm0, %v11527_v42  ;;  %v11528_v39 = vpack.c.bf16 %v11500_v47, %v11499_v22  ;;  %v11121_v31 = vmax.f32 %v11057_v17, %v11470_v9  ;;  %v11184_v30 = vmax.f32 %v11120_v19, %v11343_v28  ;;  %v11410_v47 = vld [vmem:[#allocation2 + $0x110] sm:$0xff] }
 0x705   : > { %v11373_v49 = vmax.f32 %v11308_v58, %v11341_v23  ;;  %v11374_v16 = vmax.f32 %v11309_v8, %v11342_v2  ;;  %v11247_v24 = vmax.f32 %v11183_v41, %v11406_v11  ;;  %v11310_v12 = vmax.f32 %v11246_v20, %v11469_v5  ;;  %v11409_v23 = vld [vmem:[#allocation2 + $0x108] sm:$0xff] }
 0x706   : > { %14561 = vmatmul.mubr.msk.bf16.gmra.mrb[60].mxu0 %vm4502_vm3, %v18406_v32  ;;  %v11058_v32 = vmax.f32 %v11343_v28, %v11407_v4  ;;  %14763 = vmatmul.mubr.msk.bf16.gmra.mrb[148].mxu1 %vm644_vm0, %v11528_v39  ;;  %v11185_v1 = vmax.f32 %v11121_v31, %v11344_v26  ;;  %v11123_v42 = vmax.f32 %v11059_v46, %v11472_v18  ;;  %v11473_v17 = vld [vmem:[#allocation2 + $0x109] sm:$0xff] }
 0x707   : > { %14564 = vmatprep.mubr.msk.bf16.mxu0 %vm4502_vm3, %v18419_v27  ;;  %v11437_v57 = vmax.f32 %v11373_v49, %v11405_v36  ;;  %v11438_v48 = vmax.f32 %v11374_v16, %v11406_v11  ;;  %v11311_v21 = vmax.f32 %v11247_v24, %v11470_v9  ;;  %v11248_v27 = vmax.f32 %v11184_v30, %v11407_v4  ;;  %v11347_v49 = vld [vmem:[#allocation2 + $0x127] sm:$0xff] }
 0x708   : > { %v11122_v22 = vmax.f32 %v11058_v32, %v11471_v3  ;;  %v11375_v29 = vmax.f32 %v11310_v12, %v11343_v28  ;;  %v11249_v2 = vmax.f32 %v11185_v1, %v11408_v33  ;;  %v11187_v8 = vmax.f32 %v11123_v42, %v11346_v25  ;;  %v11411_v20 = vld [vmem:[#allocation2 + $0x128] sm:$0xff]  ;;  %v11412_v32 = vld [vmem:[#allocation2 + $0x130] sm:$0xff] }
 0x709   : > { %v11501_v63 = vmax.f32 %v11437_v57, %v11469_v5  ;;  %v11502_v51 = vmax.f32 %v11438_v48, %v11470_v9  ;;  %v11376_v15 = vmax.f32 %v11311_v21, %v11344_v26  ;;  %v11312_v54 = vmax.f32 %v11248_v27, %v11471_v3  ;;  %v11474_v5 = vld [vmem:[#allocation2 + $0x111] sm:$0xff]  ;;  %v11475_v1 = vld [vmem:[#allocation2 + $0x129] sm:$0xff] }
 0x70a   : > { %v11186_v58 = vmax.f32 %v11122_v22, %v11345_v37  ;;  %v11439_v36 = vmax.f32 %v11375_v29, %v11407_v4  ;;  %v11313_v55 = vmax.f32 %v11249_v2, %v11472_v18  ;;  %v11060_v41 = vmax.f32 %v11345_v37, %v11409_v23  ;;  %v11413_v46 = vld [vmem:[#allocation2 + $0x148] sm:$0xff]  ;;  %v11476_v27 = vld [vmem:[#allocation2 + $0x131] sm:$0xff] }
 0x70b   : > { %v11529_v11 = vpack.c.bf16 %v11502_v51, %v11501_v63  ;;  %v11440_v19 = vmax.f32 %v11376_v15, %v11408_v33  ;;  %v11377_v39 = vmax.f32 %v11312_v54, %v11345_v37  ;;  %v11251_v4 = vmax.f32 %v11187_v8, %v11410_v47  ;;  %v11350_v15 = vld [vmem:[#allocation2 + $0x14f] sm:$0xff] }
 0x70c   : > { %v11250_v28 = vmax.f32 %v11186_v58, %v11409_v23  ;;  %v11503_v9 = vmax.f32 %v11439_v36, %v11471_v3  ;;  %v11378_v26 = vmax.f32 %v11313_v55, %v11346_v25  ;;  %v11061_v31 = vmax.f32 %v11346_v25, %v11410_v47  ;;  %v11478_v8 = vld [vmem:[#allocation2 + $0x151] sm:$0xff] }
 0x70d   : > { %14766 = vmatprep.mubr.msk.bf16.mxu1 %vm644_vm0, %v11529_v11  ;;  %v11504_v16 = vmax.f32 %v11440_v19, %v11472_v18  ;;  %v11441_v24 = vmax.f32 %v11377_v39, %v11409_v23  ;;  %v11124_v33 = vmax.f32 %v11060_v41, %v11473_v17  ;;  %v11315_v12 = vmax.f32 %v11251_v4, %v11474_v5  ;;  %v11349_v18 = vld [vmem:[#allocation2 + $0x147] sm:$0xff]  ;;  %v11414_v23 = vld [vmem:[#allocation2 + $0x150] sm:$0xff] }
 0x70e   : > { %14565 = vmatmul.mubr.msk.bf16.gmra.mrb[64].mxu0 %vm4502_vm3, %v18422_v61  ;;  %v11314_v30 = vmax.f32 %v11250_v28, %v11473_v17  ;;  %v11348_v61 = vld [vmem:[#allocation2 + $0x12f] sm:$0xff]  ;;  %v11442_v57 = vmax.f32 %v11378_v26, %v11410_v47  ;;  %v11125_v37 = vmax.f32 %v11061_v31, %v11474_v5  ;;  %v11062_v48 = vmax.f32 %v11347_v49, %v11411_v20 }
 0x70f   : > { %14568 = vmatprep.mubr.msk.bf16.mxu0 %vm4502_vm3, %v18435_v45  ;;  %v11530_v21 = vpack.c.bf16 %v11504_v16, %v11503_v9  ;;  %v11505_v45 = vmax.f32 %v11441_v24, %v11473_v17  ;;  %v11188_v22 = vmax.f32 %v11124_v33, %v11347_v49  ;;  %v11380_v63 = vmax.f32 %v11315_v12, %v11348_v61  ;;  %v11477_v17 = vld [vmem:[#allocation2 + $0x149] sm:$0xff] }
 0x710   : > { %v11379_v3 = vmax.f32 %v11314_v30, %v11347_v49  ;;  %v11506_v25 = vmax.f32 %v11442_v57, %v11474_v5  ;;  %v11189_v29 = vmax.f32 %v11125_v37, %v11348_v61  ;;  %v11063_v2 = vmax.f32 %v11348_v61, %v11412_v32  ;;  %v11351_v5 = vld [vmem:[#allocation2 + $0x167] sm:$0xff]  ;;  %v11352_v16 = vld [vmem:[#allocation2 + $0x16f] sm:$0xff] }
 0x711   : > { %14767 = vmatmul.mubr.msk.bf16.gmra.mrb[152].mxu1 %vm644_vm0, %v11530_v21  ;;  %v11252_v51 = vmax.f32 %v11188_v22, %v11411_v20  ;;  %v11126_v54 = vmax.f32 %v11062_v48, %v11475_v1  ;;  %v11064_v47 = vmax.f32 %v11349_v18, %v11413_v46  ;;  %v11444_v36 = vmax.f32 %v11380_v63, %v11412_v32  ;;  %v11415_v28 = vld [vmem:[#allocation2 + $0x168] sm:$0xff]  ;;  %v11416_v24 = vld [vmem:[#allocation2 + $0x170] sm:$0xff] }
 0x712   : > { %v11443_v42 = vmax.f32 %v11379_v3, %v11411_v20  ;;  %v11531_v58 = vpack.c.bf16 %v11506_v25, %v11505_v45  ;;  %v11253_v55 = vmax.f32 %v11189_v29, %v11412_v32  ;;  %v11127_v41 = vmax.f32 %v11063_v2, %v11476_v27  ;;  %v11479_v30 = vld [vmem:[#allocation2 + $0x169] sm:$0xff]  ;;  %v11480_v48 = vld [vmem:[#allocation2 + $0x171] sm:$0xff] }
 0x713   : > { %v11316_v19 = vmax.f32 %v11252_v51, %v11475_v1  ;;  %v11190_v39 = vmax.f32 %v11126_v54, %v11349_v18  ;;  %v11065_v49 = vmax.f32 %v11350_v15, %v11414_v23  ;;  %v11508_v20 = vmax.f32 %v11444_v36, %v11476_v27  ;;  %v11353_v45 = vld [vmem:[#allocation2 + $0x187] sm:$0xff]  ;;  %v11354_v51 = vld [vmem:[#allocation2 + $0x18f] sm:$0xff] }
 0x714   : > { %v11507_v11 = vmax.f32 %v11443_v42, %v11475_v1  ;;  %14770 = vmatprep.mubr.msk.bf16.mxu1 %vm644_vm0, %v11531_v58  ;;  %v11317_v9 = vmax.f32 %v11253_v55, %v11476_v27  ;;  %v11191_v26 = vmax.f32 %v11127_v41, %v11350_v15  ;;  %v11066_v12 = vmax.f32 %v11351_v5, %v11415_v28  ;;  %v11417_v22 = vld [vmem:[#allocation2 + $0x188] sm:$0xff] }
 0x715   : > { %v11381_v4 = vmax.f32 %v11316_v19, %v11349_v18  ;;  %v11254_v31 = vmax.f32 %v11190_v39, %v11413_v46  ;;  %v11129_v61 = vmax.f32 %v11065_v49, %v11478_v8  ;;  %v11067_v25 = vmax.f32 %v11352_v16, %v11416_v24  ;;  %v11481_v41 = vld [vmem:[#allocation2 + $0x189] sm:$0xff]  ;;  %v11482_v39 = vld [vmem:[#allocation2 + $0x191] sm:$0xff] }
 0x716   : > { %14569 = vmatmul.mubr.msk.bf16.gmra.mrb[68].mxu0 %vm4502_vm3, %v18438_v7  ;;  %v11128_v7 = vmax.f32 %v11064_v47, %v11477_v17  ;;  %v11532_v32 = vpack.c.bf16 %v11508_v20, %v11507_v11  ;;  %v11382_v33 = vmax.f32 %v11317_v9, %v11350_v15  ;;  %v11255_v57 = vmax.f32 %v11191_v26, %v11414_v23  ;;  %v11355_v49 = vld [vmem:[#allocation2 + $0x1a7] sm:$0xff] }
 0x717   : > { %14572 = vmatprep.mubr.msk.bf16.mxu0 %vm4502_vm3, %v18451_v52  ;;  %v11445_v1 = vmax.f32 %v11381_v4, %v11413_v46  ;;  %v11318_v37 = vmax.f32 %v11254_v31, %v11477_v17  ;;  %v11193_v21 = vmax.f32 %v11129_v61, %v11352_v16  ;;  %v11130_v63 = vmax.f32 %v11066_v12, %v11479_v30  ;;  %v11418_v46 = vld [vmem:[#allocation2 + $0x190] sm:$0xff]  ;;  %v11419_v20 = vld [vmem:[#allocation2 + $0x1a8] sm:$0xff] }
 0x718   : > { %v11192_v52 = vmax.f32 %v11128_v7, %v11351_v5  ;;  %v11446_v3 = vmax.f32 %v11382_v33, %v11414_v23  ;;  %v11319_v27 = vmax.f32 %v11255_v57, %v11478_v8  ;;  %v11131_v47 = vmax.f32 %v11067_v25, %v11480_v48  ;;  %v11356_v7 = vld [vmem:[#allocation2 + $0x1af] sm:$0xff]  ;;  %v11357_v25 = vld [vmem:[#allocation2 + $0x1c7] sm:$0xff] }
 0x719   : > { %14771 = vmatmul.mubr.msk.bf16.gmra.mrb[156].mxu1 %vm644_vm0, %v11532_v32  ;;  %v11509_v29 = vmax.f32 %v11445_v1, %v11477_v17  ;;  %v11383_v18 = vmax.f32 %v11318_v37, %v11351_v5  ;;  %v11257_v42 = vmax.f32 %v11193_v21, %v11416_v24  ;;  %v11194_v58 = vmax.f32 %v11130_v63, %v11353_v45  ;;  %v11420_v61 = vld [vmem:[#allocation2 + $0x1b0] sm:$0xff] }
 0x71a   : > { %v11256_v2 = vmax.f32 %v11192_v52, %v11415_v28  ;;  %v11510_v15 = vmax.f32 %v11446_v3, %v11478_v8  ;;  %v11384_v54 = vmax.f32 %v11319_v27, %v11352_v16  ;;  %v11068_v11 = vmax.f32 %v11353_v45, %v11417_v22 }
 0x71b   : > { %v11447_v23 = vmax.f32 %v11383_v18, %v11415_v28  ;;  %v11321_v55 = vmax.f32 %v11257_v42, %v11480_v48  ;;  %v11195_v5 = vmax.f32 %v11131_v47, %v11354_v51  ;;  %v11258_v8 = vmax.f32 %v11194_v58, %v11417_v22  ;;  %v11422_v42 = vld [vmem:[#allocation2 + $0x1d0] sm:$0xff]  ;;  %v11359_v58 = vld [vmem:[#allocation2 + $0x1e7] sm:$0xff] }
 0x71c   : > { %v11320_v36 = vmax.f32 %v11256_v2, %v11479_v30  ;;  %v11533_v17 = vpack.c.bf16 %v11510_v15, %v11509_v29  ;;  %v11448_v19 = vmax.f32 %v11384_v54, %v11416_v24  ;;  %v11069_v31 = vmax.f32 %v11354_v51, %v11418_v46  ;;  %v11483_v24 = vld [vmem:[#allocation2 + $0x1a9] sm:$0xff] }
 0x71d   : > { %v11511_v9 = vmax.f32 %v11447_v23, %v11479_v30  ;;  %v11386_v4 = vmax.f32 %v11321_v55, %v11354_v51  ;;  %v11259_v28 = vmax.f32 %v11195_v5, %v11418_v46  ;;  %v11322_v16 = vmax.f32 %v11258_v8, %v11481_v41  ;;  %v11484_v30 = vld [vmem:[#allocation2 + $0x1b1] sm:$0xff]  ;;  %v11421_v2 = vld [vmem:[#allocation2 + $0x1c8] sm:$0xff] }
 0x71e   : > { %14573 = vmatmul.mubr.msk.bf16.gmra.mrb[72].mxu0 %vm4502_vm3, %v18453_v43  ;;  %v11385_v26 = vmax.f32 %v11320_v36, %v11353_v45  ;;  %14774 = vmatprep.mubr.msk.bf16.mxu1 %vm644_vm0, %v11533_v17  ;;  %v11512_v43 = vmax.f32 %v11448_v19, %v11480_v48  ;;  %v11132_v32 = vmax.f32 %v11068_v11, %v11481_v41  ;;  %v11423_v23 = vld [vmem:[#allocation2 + $0x1e8] sm:$0xff]  ;;  %v11486_v17 = vld [vmem:[#allocation2 + $0x1d1] sm:$0xff] }
 0x71f   : > { %14576 = vmatprep.mubr.msk.bf16.mxu0 %vm4502_vm3, %v18459_v59  ;;  %v11450_v33 = vmax.f32 %v11386_v4, %v11418_v46  ;;  %v11133_v57 = vmax.f32 %v11069_v31, %v11482_v39  ;;  %v11070_v12 = vmax.f32 %v11355_v49, %v11419_v20  ;;  %v11323_v37 = vmax.f32 %v11259_v28, %v11482_v39  ;;  %v11485_v11 = vld [vmem:[#allocation2 + $0x1c9] sm:$0xff]  ;;  %v11488_v28 = vld [vmem:[#allocation2 + $0x1f1] sm:$0xff] }
 0x720   : > { %v11449_v59 = vmax.f32 %v11385_v26, %v11417_v22  ;;  %v11534_v1 = vpack.c.bf16 %v11512_v43, %v11511_v9  ;;  %v11387_v52 = vmax.f32 %v11322_v16, %v11355_v49  ;;  %v11196_v21 = vmax.f32 %v11132_v32, %v11355_v49  ;;  %v11358_v22 = vld [vmem:[#allocation2 + $0x1cf] sm:$0xff] }
 0x721   : > { %v11514_v3 = vmax.f32 %v11450_v33, %v11482_v39  ;;  %v11197_v27 = vmax.f32 %v11133_v57, %v11356_v7  ;;  %v11071_v48 = vmax.f32 %v11356_v7, %v11420_v61  ;;  %v11388_v63 = vmax.f32 %v11323_v37, %v11356_v7  ;;  %v11424_v5 = vld [vmem:[#allocation2 + $0x1f0] sm:$0xff] }
 0x722   : > { %v11513_v45 = vmax.f32 %v11449_v59, %v11481_v41  ;;  %14775 = vmatmul.mubr.msk.bf16.gmra.mrb[160].mxu1 %vm644_vm0, %v11534_v1  ;;  %v11451_v29 = vmax.f32 %v11387_v52, %v11419_v20  ;;  %v11260_v18 = vmax.f32 %v11196_v21, %v11419_v20  ;;  %v11134_v51 = vmax.f32 %v11070_v12, %v11483_v24  ;;  %v11487_v43 = vld [vmem:[#allocation2 + $0x1e9] sm:$0xff] }
 0x723   : > { %v19300_v15 = vpack.c.bf16 %v18630_v60, %v18628_v13  ;;  %v11261_v46 = vmax.f32 %v11197_v27, %v11420_v61  ;;  %v11135_v47 = vmax.f32 %v11071_v48, %v11484_v30  ;;  %v11452_v36 = vmax.f32 %v11388_v63, %v11420_v61  ;;  %v11360_v60 = vld [vmem:[#allocation2 + $0x1ef] sm:$0xff]  ;;  %v11361_v52 = vld [vmem:[#allocation2 + $0x207] sm:$0xff] }
 0x724   : > { %v11535_v54 = vpack.c.bf16 %v11514_v3, %v11513_v45  ;;  %v11515_v55 = vmax.f32 %v11451_v29, %v11483_v24  ;;  %v11324_v41 = vmax.f32 %v11260_v18, %v11483_v24  ;;  %v11198_v19 = vmax.f32 %v11134_v51, %v11357_v25  ;;  %v15778_v24 = vld [vmem:[#allocation9 + $0x128] sm:$0xff]  }
 0x725   : > { %v11325_v39 = vmax.f32 %v11261_v46, %v11484_v30  ;;  %v11199_v13 = vmax.f32 %v11135_v47, %v11358_v22  ;;  %v11072_v8 = vmax.f32 %v11357_v25, %v11421_v2  ;;  %v11073_v49 = vmax.f32 %v11358_v22, %v11422_v42  ;;  %v11425_v18 = vld [vmem:[#allocation2 + $0x208] sm:$0xff] }
 0x726   : > { %14577 = vmatmul.mubr.msk.bf16.gmra.mrb[76].mxu0 %vm4502_vm3, %v19300_v15  ;;  %14778 = vmatprep.mubr.msk.bf16.mxu1 %vm644_vm0, %v11535_v54  ;;  %v11516_v20 = vmax.f32 %v11452_v36, %v11484_v30  ;;  %v11389_v9 = vmax.f32 %v11324_v41, %v11357_v25  ;;  %v11262_v26 = vmax.f32 %v11198_v19, %v11421_v2  ;;  %v11362_v30 = vld [vmem:[#allocation2 + $0x20f] sm:$0xff] }
 0x727   : > { %14592 = vmatprep.mubr.msk.bf16.mxu0 %vm4502_vm3, %v18526_v35  ;;  %v11074_v4 = vmax.f32 %v11359_v58, %v11423_v23  ;;  %v11390_v31 = vmax.f32 %v11325_v39, %v11358_v22  ;;  %v11263_v35 = vmax.f32 %v11199_v13, %v11422_v42  ;;  %v11136_v16 = vmax.f32 %v11072_v8, %v11485_v11  ;;  %v11426_v22 = vld [vmem:[#allocation2 + $0x210] sm:$0xff] }
 0x728   : > { %v11137_v7 = vmax.f32 %v11073_v49, %v11486_v17  ;;  %v11536_v61 = vpack.c.bf16 %v11516_v20, %v11515_v55  ;;  %v11453_v32 = vmax.f32 %v11389_v9, %v11421_v2  ;;  %v11326_v59 = vmax.f32 %v11262_v26, %v11485_v11  ;;  %v15779_v15 = vld [vmem:[#allocation9 + $0x130] sm:$0xff]   ;;  %v11427_v20 = vld [vmem:[#allocation2 + $0x228] sm:$0xff] }
 0x729   : > { %v11075_v33 = vmax.f32 %v11360_v60, %v11424_v5  ;;  %v11454_v57 = vmax.f32 %v11390_v31, %v11422_v42  ;;  %v11327_v12 = vmax.f32 %v11263_v35, %v11486_v17  ;;  %v11200_v1 = vmax.f32 %v11136_v16, %v11359_v58  ;;  %v11490_v36 = vld [vmem:[#allocation2 + $0x211] sm:$0xff] }
 0x72a   : > { %v11201_v37 = vmax.f32 %v11137_v7, %v11360_v60  ;;  %14779 = vmatmul.mubr.msk.bf16.gmra.mrb[164].mxu1 %vm644_vm0, %v11536_v61  ;;  %v11517_v21 = vmax.f32 %v11453_v32, %v11485_v11  ;;  %v11391_v45 = vmax.f32 %v11326_v59, %v11359_v58  ;;  %v11138_v3 = vmax.f32 %v11074_v4, %v11487_v43  ;;  %v11489_v58 = vld [vmem:[#allocation2 + $0x209] sm:$0xff]  ;;  %v15781_v61 = vld [vmem:[#allocation9 + $0x140] sm:$0xff]  }
 0x72b   : > { %v11139_v27 = vmax.f32 %v11075_v33, %v11488_v28  ;;  %v11518_v25 = vmax.f32 %v11454_v57, %v11486_v17  ;;  %v11392_v48 = vmax.f32 %v11327_v12, %v11360_v60  ;;  %v11264_v63 = vmax.f32 %v11200_v1, %v11423_v23  ;;  %v15780_v60 = vld [vmem:[#allocation9 + $0x138] sm:$0xff]   ;;  %v11428_v9 = vld [vmem:[#allocation2 + $0x230] sm:$0xff] }
 0x72c   : > { %v11265_v29 = vmax.f32 %v11201_v37, %v11424_v5  ;;  %v11455_v2 = vmax.f32 %v11391_v45, %v11423_v23  ;;  %v11202_v42 = vmax.f32 %v11138_v3, %v11361_v52  ;;  %v11364_v23 = vld [vmem:[#allocation2 + $0x22f] sm:$0xff]  ;;  %v19303_v57 = vld [vmem:[#allocation27_spill] sm:$0xff]  ;;  %v15785_v37 = vld [vmem:[#allocation9 + $0x160] sm:$0xff]  }
 0x72d   : > { %v11203_v51 = vmax.f32 %v11139_v27, %v11362_v30  ;;  %v11537_v54 = vpack.c.bf16 %v11518_v25, %v11517_v21  ;;  %v11456_v46 = vmax.f32 %v11392_v48, %v11424_v5  ;;  %v11328_v47 = vmax.f32 %v11264_v63, %v11487_v43  ;;  %v19305_v1 = vld [vmem:[#allocation23_spill] sm:$0xff]  ;;  %v9732_v21 = vld [vmem:[#allocation5 + $0xa7] sm:$0xff]  ;;  %v15787_v48 = vld [vmem:[#allocation9 + $0x170] sm:$0xff]  }
 0x72e   : > { %14593 = vmatmul.mubr.msk.bf16.vlgmr.msra.gmra.mrb[48].mxu0 %vm4502_vm3, %v18528_v50  ;;  %v11329_v50 = vmax.f32 %v11265_v29, %v11488_v28  ;;  %v11519_v55 = vmax.f32 %v11455_v2, %v11487_v43  ;;  %v11266_v41 = vmax.f32 %v11202_v42, %v11425_v18  ;;  %v11491_v43 = vld [vmem:[#allocation2 + $0x229] sm:$0xff]  ;;  %v15788_v42 = vld [vmem:[#allocation9 + $0x178] sm:$0xff]  }
 0x72f   : > { %14596 = vmatprep.mubr.msk.bf16.mxu0 %vm4502_vm3, %v18534_v44  ;;  %14625 = vmatpush3.bf16.msra.mxu0 %v18642_v14  ;;  %v11267_v11 = vmax.f32 %v11203_v51, %v11426_v22  ;;  %v11520_v17 = vmax.f32 %v11456_v46, %v11488_v28  ;;  %v11393_v44 = vmax.f32 %v11328_v47, %v11361_v52  ;;  %v11363_v14 = vld [vmem:[#allocation2 + $0x227] sm:$0xff]  ;;  %v11492_v28 = vld [vmem:[#allocation2 + $0x231] sm:$0xff] }
 0x730   : > { %14626 = vmatprep.subr.bf16.mxu0 %v15778_v24  ;;  %14782 = vmatprep.mubr.msk.bf16.mxu1 %vm644_vm0, %v11537_v54  ;;  %v11394_v19 = vmax.f32 %v11329_v50, %v11362_v30  ;;  %v11330_v39 = vmax.f32 %v11266_v41, %v11489_v58  ;;  %v9733_v52 = vld [vmem:[#allocation5 + $0xaf] sm:$0xff]  ;;  %v9734_v3 = vld [vmem:[#allocation5 + $0xc7] sm:$0xff] }
 0x731   : > { %v11331_v13 = vmax.f32 %v11267_v11, %v11490_v36  ;;  %v11538_v5 = vpack.c.bf16 %v11520_v17, %v11519_v55  ;;  %v11457_v8 = vmax.f32 %v11393_v44, %v11425_v18  ;;  %v9735_v30 = vld [vmem:[#allocation5 + $0xcf] sm:$0xff]  ;;  %v9761_v45 = vpack.c.bf16 %v9733_v52, %v9732_v21  ;;  %v9736_v18 = vld [vmem:[#allocation5 + $0xe7] sm:$0xff] }
 0x732   : > { %v11458_v49 = vmax.f32 %v11394_v19, %v11426_v22  ;;  %v11395_v26 = vmax.f32 %v11330_v39, %v11363_v14  ;;  %v15786_v27 = vld [vmem:[#allocation9 + $0x168] sm:$0xff]   ;;  %v9762_v25 = vpack.c.bf16 %v9735_v30, %v9734_v3 }
 0x733   : > { %14627 = vmatpush3.bf16.msra.mxu0 %v15778_v24  ;;  %v11396_v4 = vmax.f32 %v11331_v13, %v11364_v23  ;;  %14783 = vmatmul.mubr.msk.bf16.gmra.mrb[168].mxu1 %vm644_vm0, %v11538_v5  ;;  %v11521_v31 = vmax.f32 %v11457_v8, %v11489_v58  ;;  %v15782_v24 = vld [vmem:[#allocation9 + $0x148] sm:$0xff]  }
 0x734   : > { %14628 = vmatprep.subr.bf16.mxu0 %v15779_v15  ;;  %v11522_v35 = vmax.f32 %v11458_v49, %v11490_v36  ;;  %v11459_v16 = vmax.f32 %v11395_v26, %v11427_v20  ;;  %v9737_v63 = vld [vmem:[#allocation5 + $0xef] sm:$0xff]  ;;  %v9738_v2 = vld [vmem:[#allocation5 + $0x107] sm:$0xff] }
 0x735   : > { %v11460_v7 = vmax.f32 %v11396_v4, %v11428_v9  ;;  %v9739_v29 = vld [vmem:[#allocation5 + $0x10f] sm:$0xff]  ;;  %v9763_v22 = vpack.c.bf16 %v9737_v63, %v9736_v18  ;;  %v9740_v47 = vld [vmem:[#allocation5 + $0x127] sm:$0xff] }
 0x736   : > { %14597 = vmatmul.mubr.msk.bf16.gmra.mrb[52].mxu0 %vm4502_vm3, %v18536_v62  ;;  %v11539_v32 = vpack.c.bf16 %v11522_v35, %v11521_v31  ;;  %v11523_v59 = vmax.f32 %v11459_v16, %v11491_v43  ;;  %v9764_v51 = vpack.c.bf16 %v9739_v29, %v9738_v2  ;;  %v9741_v54 = vld [vmem:[#allocation5 + $0x12f] sm:$0xff]  ;;  %v9742_v58 = vld [vmem:[#allocation5 + $0x147] sm:$0xff] }
 0x737   : > { %14600 = vmatprep.mubr.msk.bf16.mxu0 %vm4502_vm3, %v18542_v6  ;;  %14629 = vmatpush3.bf16.msra.mxu0 %v15779_v15  ;;  %v11524_v33 = vmax.f32 %v11460_v7, %v11492_v28  ;;  %v15783_v6 = vld [vmem:[#allocation9 + $0x150] sm:$0xff]   ;;  %v15789_v15 = vld [vmem:[#allocation9 + $0x180] sm:$0xff]   ;;  %v9765_v50 = vpack.c.bf16 %v9741_v54, %v9740_v47  ;;  %v10064_v16 = vld [vmem:[#allocation5 + $0x48] sm:$0xff] }
 0x738   : > { %14630 = vmatprep.subr.bf16.mxu0 %v15780_v60  ;;  %14786 = vmatprep.mubr.msk.bf16.mxu1 %vm644_vm0, %v11539_v32  ;;  %v9743_v46 = vld [vmem:[#allocation5 + $0x14f] sm:$0xff]  ;;  %v9744_v11 = vld [vmem:[#allocation5 + $0x167] sm:$0xff] }
 0x739   : > { %v11540_v62 = vpack.c.bf16 %v11524_v33, %v11523_v59  ;;  %v9766_v36 = vpack.c.bf16 %v9743_v46, %v9742_v58  ;;  %v9745_v55 = vld [vmem:[#allocation5 + $0x16f] sm:$0xff]  ;;  %v9746_v44 = vld [vmem:[#allocation5 + $0x187] sm:$0xff] }
 0x73a   : > { %v9747_v41 = vld [vmem:[#allocation5 + $0x18f] sm:$0xff]  ;;  %v9767_v17 = vpack.c.bf16 %v9745_v55, %v9744_v11  ;;  %v9748_v39 = vld [vmem:[#allocation5 + $0x1a7] sm:$0xff] }
 0x73b   : > { %14631 = vmatpush3.bf16.msra.mxu0 %v15780_v60  ;;  %14787 = vmatmul.mubr.msk.bf16.gmra.mrb[172].mxu1 %vm644_vm0, %v11540_v62  ;;  %v9768_v19 = vpack.c.bf16 %v9747_v41, %v9746_v44  ;;  %v9749_v14 = vld [vmem:[#allocation5 + $0x1af] sm:$0xff]  ;;  %v9750_v60 = vld [vmem:[#allocation5 + $0x1c7] sm:$0xff] }
 0x73c   : > { %14632 = vmatprep.subr.bf16.mxu0 %v15781_v61  ;;  %v9751_v23 = vld [vmem:[#allocation5 + $0x1cf] sm:$0xff]  ;;  %v9769_v13 = vpack.c.bf16 %v9749_v14, %v9748_v39  ;;  %v9752_v20 = vld [vmem:[#allocation5 + $0x1e7] sm:$0xff] }
 0x73d   : > { %v9770_v5 = vpack.c.bf16 %v9751_v23, %v9750_v60  ;;  %v9753_v8 = vld [vmem:[#allocation5 + $0x1ef] sm:$0xff]  ;;  %v9754_v26 = vld [vmem:[#allocation5 + $0x207] sm:$0xff] }
 0x73e   : > { %14601 = vmatmul.mubr.msk.bf16.gmra.mrb[56].mxu0 %vm4502_vm3, %v18544_v0  ;;  %v19301_v0 = vld [vmem:[#allocation25_spill] sm:$0xff]  ;;  %v9771_v9 = vpack.c.bf16 %v9753_v8, %v9752_v20  ;;  %v10065_v28 = vld [vmem:[#allocation5 + $0x50] sm:$0xff] }
 0x73f   : > { %14604 = vmatprep.mubr.msk.bf16.mxu0 %vm4502_vm3, %v18550_v53  ;;  %14633 = vmatpush3.bf16.msra.mxu0 %v15781_v61  ;;  %v19302_v53 = vld [vmem:[#allocation26_spill] sm:$0xff]  ;;  %v9756_v31 = vld [vmem:[#allocation5 + $0x227] sm:$0xff]  ;;  %v10096_v7 = vpack.c.bf16 %v10065_v28, %v10064_v16 }
 0x740   : > { %14634 = vmatprep.subr.bf16.mxu0 %v15782_v24  ;;  %v9755_v49 = vld [vmem:[#allocation5 + $0x20f] sm:$0xff] }
 0x741   : > { %v9772_v4 = vpack.c.bf16 %v9755_v49, %v9754_v26  ;;  %v9757_v35 = vld [vmem:[#allocation5 + $0x22f] sm:$0xff] }
 0x742   : > { %v9773_v43 = vpack.c.bf16 %v9757_v35, %v9756_v31  ;;  %v10067_v61 = vld [vmem:[#allocation5 + $0x70] sm:$0xff]  ;;  %v10066_v59 = vld [vmem:[#allocation5 + $0x68] sm:$0xff] }
 0x743   : > { %14635 = vmatpush3.bf16.msra.mxu0 %v15782_v24  ;;  %v10069_v32 = vld [vmem:[#allocation5 + $0x90] sm:$0xff]  ;;  %v10097_v33 = vpack.c.bf16 %v10067_v61, %v10066_v59  ;;  %v10068_v62 = vld [vmem:[#allocation5 + $0x88] sm:$0xff] }
 0x744   : > { %14668 = vmatprep.subr.bf16.mxu0 %v15783_v6  ;;  %v15790_v24 = vld [vmem:[#allocation9 + $0x188] sm:$0xff]   ;;  %v10085_v2 = vld [vmem:[#allocation5 + $0x190] sm:$0xff] }
 0x745   : > { %v10074_v52 = vld [vmem:[#allocation5 + $0xe8] sm:$0xff]  ;;  %v10087_v46 = vld [vmem:[#allocation5 + $0x1b0] sm:$0xff] }
 0x746   : > { %14605 = vmatmul.mubr.msk.bf16.gmra.mrb[60].mxu0 %vm4502_vm3, %v18552_v10  ;;  %v9417_v10 = vld [vmem:[#allocation5 + $0x209] sm:$0xff] }
 0x747   : > { %14608 = vmatprep.mubr.msk.bf16.mxu0 %vm4502_vm3, %v18558_v38  ;;  %v9418_v38 = vld [vmem:[#allocation5 + $0x211] sm:$0xff]  ;;  %v10076_v21 = vld [vmem:[#allocation5 + $0x108] sm:$0xff] }
 0x748   : > { %v9434_v12 = vpack.c.bf16 %v9418_v38, %v9417_v10  ;;  %v10070_v10 = vld [vmem:[#allocation5 + $0xa8] sm:$0xff]  ;;  %v10089_v47 = vld [vmem:[#allocation5 + $0x1d0] sm:$0xff] }
 0x749   : > { %v10080_v29 = vld [vmem:[#allocation5 + $0x148] sm:$0xff]  ;;  %v10093_v20 = vld [vmem:[#allocation5 + $0x210] sm:$0xff] }
 0x74a   : > { %v10086_v58 = vld [vmem:[#allocation5 + $0x1a8] sm:$0xff]  ;;  %v10095_v59 = vld [vmem:[#allocation5 + $0x230] sm:$0xff] }
 0x74b   : > { %v10088_v55 = vld [vmem:[#allocation5 + $0x1c8] sm:$0xff] }
 0x74c   : > { %v10108_v11 = vpack.c.bf16 %v10089_v47, %v10088_v55  ;;  %v10092_v31 = vld [vmem:[#allocation5 + $0x208] sm:$0xff]  ;;  %v10409_v47 = vld [vmem:[#allocation5 + $0xb1] sm:$0xff] }
 0x74d   : > { %v10410_v55 = vld [vmem:[#allocation5 + $0xc9] sm:$0xff] }
 0x74e   : > { %14609 = vmatmul.mubr.msk.bf16.gmra.mrb[64].mxu0 %vm4502_vm3, %v18560_v40  ;;  %v19304_v40 = vld [vmem:[#allocation22_spill] sm:$0xff] }
 0x74f   : > { %14612 = vmatprep.mubr.msk.bf16.mxu0 %vm4502_vm3, %v18566_v34  ;;  %v15784_v34 = vld [vmem:[#allocation9 + $0x158] sm:$0xff]  }
 0x756   : > { %14613 = vmatmul.mubr.msk.bf16.gmra.mrb[68].mxu0 %vm4502_vm3, %v18568_v56  ;;  %v19306_v56 = vld [vmem:[#allocation24_spill] sm:$0xff] }
 0x757   : > { %14616 = vmatprep.mubr.msk.bf16.mxu0 %vm4502_vm3, %v19301_v0  ;;  %v15791_v0 = vld [vmem:[#allocation9 + $0x190] sm:$0xff]  }
 0x75e   : > { %14617 = vmatmul.mubr.msk.bf16.gmra.mrb[72].mxu0 %vm4502_vm3, %v19302_v53  ;;  %v10071_v53 = vld [vmem:[#allocation5 + $0xb0] sm:$0xff] }
 0x75f   : > { %14620 = vmatprep.mubr.msk.bf16.mxu0 %vm4502_vm3, %v19303_v57  ;;  %v10073_v57 = vld [vmem:[#allocation5 + $0xd0] sm:$0xff]  ;;  %v10099_v38 = vpack.c.bf16 %v10071_v53, %v10070_v10 }
 0x760   : > { %v10402_v10 = vld [vmem:[#allocation5 + $0x49] sm:$0xff] }
 0x766   : > { %14621 = vmatmul.mubr.msk.bf16.gmra.mrb[76].mxu0 %vm4502_vm3, %v9434_v12  ;;  %v10072_v12 = vld [vmem:[#allocation5 + $0xc8] sm:$0xff] }
 0x767   : > { %14636 = vmatprep.mubr.msk.bf16.mxu0 %vm4502_vm3, %v19304_v40  ;;  %v15792_v40 = vld [vmem:[#allocation9 + $0x198] sm:$0xff]  }
 0x76e   : > { %14637 = vmatmul.mubr.msk.bf16.vlgmr.msra.gmra.mrb[48].mxu0 %vm4502_vm3, %v19305_v1  ;;  %v15793_v1 = vld [vmem:[#allocation9 + $0x1a0] sm:$0xff]  }
 0x76f   : > { %14640 = vmatprep.mubr.msk.bf16.mxu0 %vm4502_vm3, %v19306_v56  ;;  %14669 = vmatpush3.bf16.msra.mxu0 %v15783_v6  ;;  %v10098_v6 = vpack.c.bf16 %v10069_v32, %v10068_v62  ;;  %v10075_v56 = vld [vmem:[#allocation5 + $0xf0] sm:$0xff]  ;;  %v10094_v32 = vld [vmem:[#allocation5 + $0x228] sm:$0xff] }
 0x770   : > { %14670 = vmatprep.subr.bf16.mxu0 %v15784_v34  ;;  %v10101_v30 = vpack.c.bf16 %v10075_v56, %v10074_v52  ;;  %v10405_v52 = vld [vmem:[#allocation5 + $0x71] sm:$0xff] }
 0x773   : > { %14671 = vmatpush3.bf16.msra.mxu0 %v15784_v34  ;;  %v10100_v34 = vpack.c.bf16 %v10073_v57, %v10072_v12  ;;  %v10111_v57 = vpack.c.bf16 %v10095_v59, %v10094_v32 }
 0x774   : > { %14672 = vmatprep.subr.bf16.mxu0 %v15785_v37 }
 0x776   : > { %14641 = vmatmul.mubr.msk.bf16.gmra.mrb[52].mxu0 %vm4502_vm3, %v9761_v45  ;;  %v15794_v45 = vld [vmem:[#allocation9 + $0x1a8] sm:$0xff]  }
 0x777   : > { %14644 = vmatprep.mubr.msk.bf16.mxu0 %vm4502_vm3, %v9762_v25  ;;  %14673 = vmatpush3.bf16.msra.mxu0 %v15785_v37  ;;  %v10077_v37 = vld [vmem:[#allocation5 + $0x110] sm:$0xff] }
 0x778   : > { %14674 = vmatprep.subr.bf16.mxu0 %v15786_v27  ;;  %v10102_v3 = vpack.c.bf16 %v10077_v37, %v10076_v21  ;;  %v10081_v25 = vld [vmem:[#allocation5 + $0x150] sm:$0xff] }
 0x779   : > { %v10104_v18 = vpack.c.bf16 %v10081_v25, %v10080_v29  ;;  %v10404_v37 = vld [vmem:[#allocation5 + $0x69] sm:$0xff] }
 0x77a   : > { %v10435_v29 = vpack.c.bf16 %v10405_v52, %v10404_v37 }
 0x77b   : > { %14675 = vmatpush3.bf16.msra.mxu0 %v15786_v27  ;;  %v10079_v27 = vld [vmem:[#allocation5 + $0x130] sm:$0xff] }
 0x77c   : > { %14676 = vmatprep.subr.bf16.mxu0 %v15787_v48 }
 0x77e   : > { %14645 = vmatmul.mubr.msk.bf16.gmra.mrb[56].mxu0 %vm4502_vm3, %v9763_v22  ;;  %v10083_v22 = vld [vmem:[#allocation5 + $0x170] sm:$0xff] }
 0x77f   : > { %14648 = vmatprep.mubr.msk.bf16.mxu0 %vm4502_vm3, %v9764_v51  ;;  %14677 = vmatpush3.bf16.msra.mxu0 %v15787_v48  ;;  %v10078_v48 = vld [vmem:[#allocation5 + $0x128] sm:$0xff] }
 0x780   : > { %14678 = vmatprep.subr.bf16.mxu0 %v15788_v42  ;;  %v10103_v63 = vpack.c.bf16 %v10079_v27, %v10078_v48 }
 0x783   : > { %14679 = vmatpush3.bf16.msra.mxu0 %v15788_v42  ;;  %v10082_v42 = vld [vmem:[#allocation5 + $0x168] sm:$0xff] }
 0x784   : > { %14712 = vmatprep.subr.bf16.mxu0 %v15789_v15  ;;  %v10105_v51 = vpack.c.bf16 %v10083_v22, %v10082_v42 }
 0x786   : > { %14649 = vmatmul.mubr.msk.bf16.gmra.mrb[60].mxu0 %vm4502_vm3, %v9765_v50  ;;  %v18746_v50 = vld [vmem:[%s19256_s14] ss:$0 sm:$0xff] }
 0x787   : > { %14652 = vmatprep.mubr.msk.bf16.mxu0 %vm4502_vm3, %v9766_v36  ;;  %v10107_v36 = vpack.c.bf16 %v10087_v46, %v10086_v58  ;;  %v10408_v46 = vld [vmem:[#allocation5 + $0xa9] sm:$0xff] }
 0x78e   : > { %14653 = vmatmul.mubr.msk.bf16.gmra.mrb[64].mxu0 %vm4502_vm3, %v9767_v17 }
 0x78f   : > { %14656 = vmatprep.mubr.msk.bf16.mxu0 %vm4502_vm3, %v9768_v19 }
 0x796   : > { %14657 = vmatmul.mubr.msk.bf16.gmra.mrb[68].mxu0 %vm4502_vm3, %v9769_v13 }
 0x797   : > { %14660 = vmatprep.mubr.msk.bf16.mxu0 %vm4502_vm3, %v9770_v5  ;;  %v10091_v5 = vld [vmem:[#allocation5 + $0x1f0] sm:$0xff] }
 0x79e   : > { %14661 = vmatmul.mubr.msk.bf16.gmra.mrb[72].mxu0 %vm4502_vm3, %v9771_v9  ;;  %v10090_v9 = vld [vmem:[#allocation5 + $0x1e8] sm:$0xff] }
 0x79f   : > { %14664 = vmatprep.mubr.msk.bf16.mxu0 %vm4502_vm3, %v9772_v4  ;;  %v10109_v4 = vpack.c.bf16 %v10091_v5, %v10090_v9 }
 0x7a6   : > { %14665 = vmatmul.mubr.msk.bf16.gmra.mrb[76].mxu0 %vm4502_vm3, %v9773_v43  ;;  %v10110_v43 = vpack.c.bf16 %v10093_v20, %v10092_v31 }
 0x7a7   : > { %14680 = vmatprep.mubr.msk.bf16.mxu0 %vm4502_vm3, %v10096_v7 }
 0x7ae   : > { %14681 = vmatmul.mubr.msk.bf16.vlgmr.msra.gmra.mrb[48].mxu0 %vm4502_vm3, %v10097_v33 }
 0x7af   : > { %14684 = vmatprep.mubr.msk.bf16.mxu0 %vm4502_vm3, %v10098_v6  ;;  %14713 = vmatpush3.bf16.msra.mxu0 %v15789_v15  ;;  %v10084_v15 = vld [vmem:[#allocation5 + $0x188] sm:$0xff] }
 0x7b0   : > { %14714 = vmatprep.subr.bf16.mxu0 %v15790_v24  ;;  %v10106_v54 = vpack.c.bf16 %v10085_v2, %v10084_v15 }
 0x7b3   : > { %14715 = vmatpush3.bf16.msra.mxu0 %v15790_v24 }
 0x7b4   : > { %14716 = vmatprep.subr.bf16.mxu0 %v15791_v0 }
 0x7b6   : > { %14685 = vmatmul.mubr.msk.bf16.gmra.mrb[52].mxu0 %vm4502_vm3, %v10099_v38  ;;  %v10403_v38 = vld [vmem:[#allocation5 + $0x51] sm:$0xff] }
 0x7b7   : > { %14688 = vmatprep.mubr.msk.bf16.mxu0 %vm4502_vm3, %v10100_v34  ;;  %14717 = vmatpush3.bf16.msra.mxu0 %v15791_v0 }
 0x7b8   : > { %14718 = vmatprep.subr.bf16.mxu0 %v15792_v40 }
 0x7bb   : > { %14719 = vmatpush3.bf16.msra.mxu0 %v15792_v40  ;;  %v10434_v40 = vpack.c.bf16 %v10403_v38, %v10402_v10  ;;  %v10418_v10 = vld [vmem:[#allocation5 + $0x149] sm:$0xff]  ;;  %v10419_v38 = vld [vmem:[#allocation5 + $0x151] sm:$0xff] }
 0x7bc   : > { %14720 = vmatprep.subr.bf16.mxu0 %v15793_v1 }
 0x7be   : > { %14689 = vmatmul.mubr.msk.bf16.gmra.mrb[56].mxu0 %vm4502_vm3, %v10101_v30 }
 0x7bf   : > { %14692 = vmatprep.mubr.msk.bf16.mxu0 %vm4502_vm3, %v10102_v3  ;;  %14721 = vmatpush3.bf16.msra.mxu0 %v15793_v1  ;;  %v10407_v3 = vld [vmem:[#allocation5 + $0x91] sm:$0xff] }
 0x7c0   : > { %14722 = vmatprep.subr.bf16.mxu0 %v15794_v45 }
 0x7c3   : > { %14723 = vmatpush3.bf16.msra.mxu0 %v15794_v45  ;;  %v10406_v45 = vld [vmem:[#allocation5 + $0x89] sm:$0xff] }
 0x7c4   : > { %v10436_v2 = vpack.c.bf16 %v10407_v3, %v10406_v45 }
 0x7c6   : > { %14693 = vmatmul.mubr.msk.bf16.gmra.mrb[60].mxu0 %vm4502_vm3, %v10103_v63 }
 0x7c7   : > { %14696 = vmatprep.mubr.msk.bf16.mxu0 %vm4502_vm3, %v10104_v18 }
 0x7ce   : > { %14697 = vmatmul.mubr.msk.bf16.gmra.mrb[64].mxu0 %vm4502_vm3, %v10105_v51 }
 0x7cf   : > { %14700 = vmatprep.mubr.msk.bf16.mxu0 %vm4502_vm3, %v10106_v54 }
 0x7d1   : > { %v14760_v41 = vpop.f32.mrb[144].mxu1 }
 0x7d2   : > { %v11643_v17 = vadd.f32 %v14760_v41, %v18746_v50  ;;  %v11634_v44 = vpop.f32.mrb[145].mxu1  ;;  %v10411_v41 = vld [vmem:[#allocation5 + $0xd1] sm:$0xff] }
 0x7d3   : > { %v11635_v19 = vadd.f32 %v18746_v50, %v11634_v44  ;;  %v14761_v14 = vpop.f32.mrb[146].mxu1 }
 0x7d4   : > { %v11763_v23 = vmax.f32 %v11643_v17, 0.0  ;;  %v11646_v39 = vadd.f32 %v14761_v14, %v18746_v50  ;;  %v11637_v13 = vpop.f32.mrb[147].mxu1  ;;  %v10437_v14 = vpack.c.bf16 %v10409_v47, %v10408_v46 }
 0x7d5   : > { %v11638_v60 = vadd.f32 %v18746_v50, %v11637_v13  ;;  %v11761_v8 = vmax.f32 %v11635_v19, 0.0  ;;  %v10438_v13 = vpack.c.bf16 %v10411_v41, %v10410_v55 }
 0x7d6   : > { %14701 = vmatmul.mubr.msk.bf16.gmra.mrb[68].mxu0 %vm4502_vm3, %v10107_v36  ;;  %v11764_v49 = vmax.f32 %v11646_v39, 0.0  ;;  %11829 = vrot.lane.b32.xlu0 %v11763_v23, %s15947_s21 }
 0x7d7   : > { %14704 = vmatprep.mubr.msk.bf16.mxu0 %vm4502_vm3, %v10108_v11  ;;  %v11762_v26 = vmax.f32 %v11638_v60, 0.0 }
 0x7d8   : > { %11831 = vrot.lane.b32.xlu1 %v11764_v49, %s15947_s21  ;;  %v10413_v49 = vld [vmem:[#allocation5 + $0xf1] sm:$0xff] }
 0x7d9   : > { %v14764_v35 = vpop.f32.mrb[148].mxu1 }
 0x7da   : > { %v11659_v28 = vadd.f32 %v14764_v35, %v18746_v50  ;;  %v11650_v16 = vpop.f32.mrb[149].mxu1  ;;  %11825 = vrot.lane.b32.xlu0 %v11761_v8, %s15947_s21  ;;  %v10412_v8 = vld [vmem:[#allocation5 + $0xe9] sm:$0xff] }
 0x7db   : > { %v11651_v7 = vadd.f32 %v18746_v50, %v11650_v16  ;;  %v14765_v61 = vpop.f32.mrb[150].mxu1 }
 0x7dc   : > { %v11767_v33 = vmax.f32 %v11659_v28, 0.0  ;;  %v11662_v62 = vadd.f32 %v14765_v61, %v18746_v50  ;;  %11827 = vrot.lane.b32.xlu1 %v11762_v26, %s15947_s21  ;;  %v11653_v24 = vpop.f32.mrb[151].mxu1  ;;  %v10414_v26 = vld [vmem:[#allocation5 + $0x109] sm:$0xff] }
 0x7dd   : > { %v11654_v6 = vadd.f32 %v18746_v50, %v11653_v24  ;;  %v11765_v0 = vmax.f32 %v11651_v7, 0.0  ;;  %v10439_v7 = vpack.c.bf16 %v10413_v49, %v10412_v8 }
 0x7de   : > { %14705 = vmatmul.mubr.msk.bf16.gmra.mrb[72].mxu0 %vm4502_vm3, %v10109_v4  ;;  %v11768_v53 = vmax.f32 %v11662_v62, 0.0  ;;  %11837 = vrot.lane.b32.xlu0 %v11767_v33, %s15947_s21  ;;  %v10415_v4 = vld [vmem:[#allocation5 + $0x111] sm:$0xff] }
 0x7df   : > { %14708 = vmatprep.mubr.msk.bf16.mxu0 %vm4502_vm3, %v10110_v43  ;;  %v11766_v12 = vmax.f32 %v11654_v6, 0.0  ;;  %v10440_v32 = vpack.c.bf16 %v10415_v4, %v10414_v26  ;;  %v10416_v6 = vld [vmem:[#allocation5 + $0x129] sm:$0xff] }
 0x7e0   : > { %11839 = vrot.lane.b32.xlu1 %v11768_v53, %s15947_s21 }
 0x7e2   : > { %11833 = vrot.lane.b32.xlu0 %v11765_v0, %s15947_s21  ;;  %v10417_v0 = vld [vmem:[#allocation5 + $0x131] sm:$0xff] }
 0x7e3   : > { %v10441_v37 = vpack.c.bf16 %v10417_v0, %v10416_v6 }
 0x7e4   : > { %v14768_v34 = vpop.f32.mrb[152].mxu1  ;;  %11835 = vrot.lane.b32.xlu1 %v11766_v12, %s15947_s21 }
 0x7e5   : > { %v11675_v1 = vadd.f32 %v14768_v34, %v18746_v50  ;;  %v11666_v56 = vpop.f32.mrb[153].mxu1 }
 0x7e6   : > { %14709 = vmatmul.mubr.msk.bf16.gmra.mrb[76].mxu0 %vm4502_vm3, %v10111_v57  ;;  %v11667_v30 = vadd.f32 %v18746_v50, %v11666_v56  ;;  %v14769_v21 = vpop.f32.mrb[154].mxu1 }
 0x7e7   : > { %14724 = vmatprep.mubr.msk.bf16.mxu0 %vm4502_vm3, %v10434_v40  ;;  %v11771_v27 = vmax.f32 %v11675_v1, 0.0  ;;  %v11678_v25 = vadd.f32 %v14769_v21, %v18746_v50  ;;  %v11669_v48 = vpop.f32.mrb[155].mxu1 }
 0x7e8   : > { %v11670_v63 = vadd.f32 %v18746_v50, %v11669_v48  ;;  %v11769_v18 = vmax.f32 %v11667_v30, 0.0  ;;  %v10442_v30 = vpack.c.bf16 %v10419_v38, %v10418_v10 }
 0x7e9   : > { %v11772_v22 = vmax.f32 %v11678_v25, 0.0  ;;  %11845 = vrot.lane.b32.xlu0 %v11771_v27, %s15947_s21  ;;  %v10420_v27 = vld [vmem:[#allocation5 + $0x169] sm:$0xff]  ;;  %v10421_v25 = vld [vmem:[#allocation5 + $0x171] sm:$0xff] }
 0x7ea   : > { %v11770_v42 = vmax.f32 %v11670_v63, 0.0  ;;  %v10422_v63 = vld [vmem:[#allocation5 + $0x189] sm:$0xff] }
 0x7eb   : > { %11847 = vrot.lane.b32.xlu1 %v11772_v22, %s15947_s21 }
 0x7ec   : > { %v14772_v51 = vpop.f32.mrb[156].mxu1 }
 0x7ed   : > { %v11691_v15 = vadd.f32 %v14772_v51, %v18746_v50  ;;  %v11682_v54 = vpop.f32.mrb[157].mxu1  ;;  %11841 = vrot.lane.b32.xlu0 %v11769_v18, %s15947_s21  ;;  %v10443_v51 = vpack.c.bf16 %v10421_v25, %v10420_v27 }
 0x7ee   : > { %14725 = vmatmul.mubr.msk.bf16.vlgmr.msra.gmra.mrb[48].mxu0 %vm4502_vm3, %v10435_v29  ;;  %v11683_v58 = vadd.f32 %v18746_v50, %v11682_v54  ;;  %v14773_v36 = vpop.f32.mrb[158].mxu1  ;;  %v10423_v29 = vld [vmem:[#allocation5 + $0x191] sm:$0xff] }
 0x7ef   : > { %14728 = vmatprep.mubr.msk.bf16.mxu0 %vm4502_vm3, %v10436_v2  ;;  %v11775_v11 = vmax.f32 %v11691_v15, 0.0  ;;  %v11694_v17 = vadd.f32 %v14773_v36, %v18746_v50  ;;  %11843 = vrot.lane.b32.xlu1 %v11770_v42, %s15947_s21  ;;  %v11685_v44 = vpop.f32.mrb[159].mxu1  ;;  %v10444_v47 = vpack.c.bf16 %v10423_v29, %v10422_v63 }
 0x7f0   : > { %v11686_v19 = vadd.f32 %v18746_v50, %v11685_v44  ;;  %v11773_v23 = vmax.f32 %v11683_v58, 0.0 }
 0x7f1   : > { %v11776_v39 = vmax.f32 %v11694_v17, 0.0  ;;  %11853 = vrot.lane.b32.xlu0 %v11775_v11, %s15947_s21  ;;  %v10424_v11 = vld [vmem:[#allocation5 + $0x1a9] sm:$0xff]  ;;  %v10425_v17 = vld [vmem:[#allocation5 + $0x1b1] sm:$0xff] }
 0x7f2   : > { %v11774_v60 = vmax.f32 %v11686_v19, 0.0  ;;  %v10426_v19 = vld [vmem:[#allocation5 + $0x1c9] sm:$0xff] }
 0x7f3   : > { %11855 = vrot.lane.b32.xlu1 %v11776_v39, %s15947_s21 }
 0x7f5   : > { %v14776_v5 = vpop.f32.mrb[160].mxu1  ;;  %11849 = vrot.lane.b32.xlu0 %v11773_v23, %s15947_s21 }
 0x7f6   : > { %14729 = vmatmul.mubr.msk.bf16.gmra.mrb[52].mxu0 %vm4502_vm3, %v10437_v14  ;;  %v11707_v20 = vadd.f32 %v14776_v5, %v18746_v50  ;;  %v11698_v9 = vpop.f32.mrb[161].mxu1  ;;  %v10427_v14 = vld [vmem:[#allocation5 + $0x1d1] sm:$0xff]  ;;  %v10445_v5 = vpack.c.bf16 %v10425_v17, %v10424_v11 }
 0x7f7   : > { %14732 = vmatprep.mubr.msk.bf16.mxu0 %vm4502_vm3, %v10438_v13  ;;  %v11699_v31 = vadd.f32 %v18746_v50, %v11698_v9  ;;  %v14777_v35 = vpop.f32.mrb[162].mxu1  ;;  %11851 = vrot.lane.b32.xlu1 %v11774_v60, %s15947_s21 }
 0x7f8   : > { %v11779_v43 = vmax.f32 %v11707_v20, 0.0  ;;  %v11710_v28 = vadd.f32 %v14777_v35, %v18746_v50  ;;  %v11701_v16 = vpop.f32.mrb[163].mxu1  ;;  %v10446_v20 = vpack.c.bf16 %v10427_v14, %v10426_v19  ;;  %v10428_v35 = vld [vmem:[#allocation5 + $0x1e9] sm:$0xff] }
 0x7f9   : > { %v11702_v61 = vadd.f32 %v18746_v50, %v11701_v16  ;;  %v11777_v59 = vmax.f32 %v11699_v31, 0.0  ;;  %v10430_v16 = vld [vmem:[#allocation5 + $0x209] sm:$0xff] }
 0x7fa   : > { %v11780_v33 = vmax.f32 %v11710_v28, 0.0  ;;  %11861 = vrot.lane.b32.xlu0 %v11779_v43, %s15947_s21  ;;  %v10429_v43 = vld [vmem:[#allocation5 + $0x1f1] sm:$0xff] }
 0x7fb   : > { %v11778_v62 = vmax.f32 %v11702_v61, 0.0 }
 0x7fc   : > { %11863 = vrot.lane.b32.xlu1 %v11780_v33, %s15947_s21 }
 0x7fd   : > { %v14780_v24 = vpop.f32.mrb[164].mxu1 }
 0x7fe   : > { %14733 = vmatmul.mubr.msk.bf16.gmra.mrb[56].mxu0 %vm4502_vm3, %v10439_v7  ;;  %v11723_v53 = vadd.f32 %v14780_v24, %v18746_v50  ;;  %v11714_v57 = vpop.f32.mrb[165].mxu1  ;;  %11857 = vrot.lane.b32.xlu0 %v11777_v59, %s15947_s21  ;;  %v10431_v7 = vld [vmem:[#allocation5 + $0x211] sm:$0xff] }
 0x7ff   : > { %14736 = vmatprep.mubr.msk.bf16.mxu0 %vm4502_vm3, %v10440_v32  ;;  %v11715_v12 = vadd.f32 %v18746_v50, %v11714_v57  ;;  %v14781_v40 = vpop.f32.mrb[166].mxu1  ;;  %v10448_v61 = vpack.c.bf16 %v10431_v7, %v10430_v16  ;;  %v10432_v32 = vld [vmem:[#allocation5 + $0x229] sm:$0xff]  ;;  %v10433_v59 = vld [vmem:[#allocation5 + $0x231] sm:$0xff] }
 0x800   : > { %v11783_v34 = vmax.f32 %v11723_v53, 0.0  ;;  %v11726_v1 = vadd.f32 %v14781_v40, %v18746_v50  ;;  %11859 = vrot.lane.b32.xlu1 %v11778_v62, %s15947_s21  ;;  %v11717_v56 = vpop.f32.mrb[167].mxu1  ;;  %v10449_v33 = vpack.c.bf16 %v10433_v59, %v10432_v32 }
 0x801   : > { %v11718_v52 = vadd.f32 %v18746_v50, %v11717_v56  ;;  %v11781_v21 = vmax.f32 %v11715_v12, 0.0 }
 0x802   : > { %v11784_v45 = vmax.f32 %v11726_v1, 0.0  ;;  %11869 = vrot.lane.b32.xlu0 %v11783_v34, %s15947_s21 }
 0x803   : > { %v11782_v3 = vmax.f32 %v11718_v52, 0.0 }
 0x804   : > { %11871 = vrot.lane.b32.xlu1 %v11784_v45, %s15947_s21 }
 0x806   : > { %14737 = vmatmul.mubr.msk.bf16.gmra.mrb[60].mxu0 %vm4502_vm3, %v10441_v37  ;;  %v14784_v48 = vpop.f32.mrb[168].mxu1  ;;  %11865 = vrot.lane.b32.xlu0 %v11781_v21, %s15947_s21 }
 0x807   : > { %14740 = vmatprep.mubr.msk.bf16.mxu0 %vm4502_vm3, %v10442_v30  ;;  %v11739_v18 = vadd.f32 %v14784_v48, %v18746_v50  ;;  %v11730_v22 = vpop.f32.mrb[169].mxu1 }
 0x808   : > { %v11731_v2 = vadd.f32 %v18746_v50, %v11730_v22  ;;  %v14785_v42 = vpop.f32.mrb[170].mxu1  ;;  %11867 = vrot.lane.b32.xlu1 %v11782_v3, %s15947_s21 }
 0x809   : > { %v11787_v15 = vmax.f32 %v11739_v18, 0.0  ;;  %v11742_v54 = vadd.f32 %v14785_v42, %v18746_v50  ;;  %v11733_v46 = vpop.f32.mrb[171].mxu1 }
 0x80a   : > { %v11734_v58 = vadd.f32 %v18746_v50, %v11733_v46  ;;  %v11785_v36 = vmax.f32 %v11731_v2, 0.0 }
 0x80b   : > { %v11788_v55 = vmax.f32 %v11742_v54, 0.0  ;;  %11877 = vrot.lane.b32.xlu0 %v11787_v15, %s15947_s21 }
 0x80c   : > { %v11786_v41 = vmax.f32 %v11734_v58, 0.0 }
 0x80d   : > { %11879 = vrot.lane.b32.xlu1 %v11788_v55, %s15947_s21 }
 0x80e   : > { %14741 = vmatmul.mubr.msk.bf16.gmra.mrb[64].mxu0 %vm4502_vm3, %v10443_v51  ;;  %v14788_v44 = vpop.f32.mrb[172].mxu1 }
 0x80f   : > { %14744 = vmatprep.mubr.msk.bf16.mxu0 %vm4502_vm3, %v10444_v47  ;;  %v11755_v23 = vadd.f32 %v14788_v44, %v18746_v50  ;;  %v11746_v39 = vpop.f32.mrb[173].mxu1  ;;  %11873 = vrot.lane.b32.xlu0 %v11785_v36, %s15947_s21  ;;  %v18996_v47 = vld [vmem:[%s19307_s24] ss:$0 sm:$0xff] }
 0x810   : > { %v11747_v13 = vadd.f32 %v18746_v50, %v11746_v39  ;;  %v14789_v60 = vpop.f32.mrb[174].mxu1 }
 0x811   : > { %v11758_v8 = vadd.f32 %v14789_v60, %v18746_v50  ;;  %v11749_v49 = vpop.f32.mrb[175].mxu1  ;;  %11875 = vrot.lane.b32.xlu1 %v11786_v41, %s15947_s21  ;;  %v11791_v4 = vmax.f32 %v11755_v23, 0.0 }
 0x812   : > { %v11789_v9 = vmax.f32 %v11747_v13, 0.0  ;;  %v11750_v26 = vadd.f32 %v18746_v50, %v11749_v49  ;;  %v10447_v50 = vpack.c.bf16 %v10429_v43, %v10428_v35 }
 0x813   : > { %v11792_v28 = vmax.f32 %v11758_v8, 0.0 }
 0x814   : > { %v11790_v31 = vmax.f32 %v11750_v26, 0.0  ;;  %11881 = vrot.lane.b32.xlu0 %v11789_v9, %s15947_s21 }
 0x816   : > { %14745 = vmatmul.mubr.msk.bf16.gmra.mrb[68].mxu0 %vm4502_vm3, %v10445_v5  ;;  %11883 = vrot.lane.b32.xlu1 %v11790_v31, %s15947_s21 }
 0x817   : > { %14748 = vmatprep.mubr.msk.bf16.mxu0 %vm4502_vm3, %v10446_v20 }
 0x818   : > { %11885 = vrot.lane.b32.xlu0 %v11791_v4, %s15947_s21 }
 0x81a   : > { %11887 = vrot.lane.b32.xlu1 %v11792_v28, %s15947_s21  ;;  %s15872_s21 = sshll.u32 %s15948_s18, 4  ;;  %s15873_s21 = int_to_ptr.vmem [resolvable:$false] %s15872_s21 }
 0x81b   : > { %s15874_s16 = scalar_lea.vmem %s15873_s21, 24576  ;;  %p15875_p4 = scmp.lt.s32.totalorder %s19189_s15, %s15873_s21 }
 0x81c   : > { %p15876_p7 = scmp.lt.s32.totalorder %s15874_s16, %s15868_s27 }
 0x81e   : > { %14749 = vmatmul.mubr.msk.bf16.gmra.mrb[72].mxu0 %vm4502_vm3, %v10447_v50  ;;  %p15877_p8 = por %p15876_p7, %p15875_p4 }
 0x81f   : > { %14752 = vmatprep.mubr.msk.bf16.mxu0 %vm4502_vm3, %v10448_v61 }
 0x820   : > { %p15878_p11 = pnand %p15877_p8, %p15871_p3 }
 0x826   : > { %14753 = vmatmul.mubr.msk.bf16.gmra.mrb[76].mxu0 %vm4502_vm3, %v10449_v33 }
 0x848   : > { %v18833_v62 = vpop.permute.xlu0 %11829 }
 0x849   : > { %11928 = vst.msk [vmem:[%s16656_s12 + $0x40] sm:$0xff] %vm11923_vm5, %v18833_v62 }
 0x84a   : > { %v18838_v24 = vpop.permute.xlu1 %11831 }
 0x84b   : > { %11930 = vst.msk [vmem:[%s16656_s12 + $0x58] sm:$0xff] %vm11923_vm5, %v18838_v24 }
 0x84c   : > { %v18843_v6 = vpop.permute.xlu0 %11825 }
 0x84d   : > { %11924 = vst.msk [vmem:[%s16656_s12 + $0x10] sm:$0xff] %vm11923_vm5, %v18843_v6 }
 0x84e   : > { %v18848_v0 = vpop.permute.xlu1 %11827 }
 0x84f   : > { %11926 = vst.msk [vmem:[%s16656_s12 + $0x28] sm:$0xff] %vm11923_vm5, %v18848_v0 }
 0x850   : > { %v18853_v53 = vpop.permute.xlu0 %11837 }
 0x851   : > { %11936 = vst.msk [vmem:[%s16656_s12 + $0xa0] sm:$0xff] %vm11923_vm5, %v18853_v53 }
 0x852   : > { %v18858_v57 = vpop.permute.xlu1 %11839 }
 0x853   : > { %11938 = vst.msk [vmem:[%s16656_s12 + $0xb8] sm:$0xff] %vm11923_vm5, %v18858_v57 }
 0x854   : > { %v18863_v10 = vpop.permute.xlu0 %11833 }
 0x855   : > { %11932 = vst.msk [vmem:[%s16656_s12 + $0x70] sm:$0xff] %vm11923_vm5, %v18863_v10 }
 0x856   : > { %v18868_v38 = vpop.permute.xlu1 %11835 }
 0x857   : > { %11934 = vst.msk [vmem:[%s16656_s12 + $0x88] sm:$0xff] %vm11923_vm5, %v18868_v38 }
 0x85b   : > { %v18873_v12 = vpop.permute.xlu0 %11845 }
 0x85c   : > { %11944 = vst.msk [vmem:[%s16656_s12 + $0x100] sm:$0xff] %vm11923_vm5, %v18873_v12 }
 0x85d   : > { %v18878_v40 = vpop.permute.xlu1 %11847 }
 0x85e   : > { %11946 = vst.msk [vmem:[%s16656_s12 + $0x118] sm:$0xff] %vm11923_vm5, %v18878_v40 }
 0x85f   : > { %v18883_v34 = vpop.permute.xlu0 %11841 }
 0x860   : > { %11940 = vst.msk [vmem:[%s16656_s12 + $0xd0] sm:$0xff] %vm11923_vm5, %v18883_v34 }
 0x861   : > { %v18888_v1 = vpop.permute.xlu1 %11843 }
 0x862   : > { %11942 = vst.msk [vmem:[%s16656_s12 + $0xe8] sm:$0xff] %vm11923_vm5, %v18888_v1 }
 0x863   : > { %v18893_v56 = vpop.permute.xlu0 %11853 }
 0x864   : > { %11952 = vst.msk [vmem:[%s16656_s12 + $0x160] sm:$0xff] %vm11923_vm5, %v18893_v56 }
 0x865   : > { %v18898_v37 = vpop.permute.xlu1 %11855 }
 0x866   : > { %11954 = vst.msk [vmem:[%s16656_s12 + $0x178] sm:$0xff] %vm11923_vm5, %v18898_v37 }
 0x867   : > { %v18903_v52 = vpop.permute.xlu0 %11849 }
 0x868   : > { %11948 = vst.msk [vmem:[%s16656_s12 + $0x130] sm:$0xff] %vm11923_vm5, %v18903_v52 }
 0x869   : > { %v18908_v30 = vpop.permute.xlu1 %11851 }
 0x86a   : > { %11950 = vst.msk [vmem:[%s16656_s12 + $0x148] sm:$0xff] %vm11923_vm5, %v18908_v30 }
 0x86c   : > { %v18913_v21 = vpop.permute.xlu0 %11861 }
 0x86d   : > { %11960 = vst.msk [vmem:[%s16656_s12 + $0x1c0] sm:$0xff] %vm11923_vm5, %v18913_v21 }
 0x86e   : > { %v18918_v45 = vpop.permute.xlu1 %11863 }
 0x86f   : > { %11962 = vst.msk [vmem:[%s16656_s12 + $0x1d8] sm:$0xff] %vm11923_vm5, %v18918_v45 }
 0x870   : > { %v18923_v3 = vpop.permute.xlu0 %11857 }
 0x871   : > { %11956 = vst.msk [vmem:[%s16656_s12 + $0x190] sm:$0xff] %vm11923_vm5, %v18923_v3 }
 0x872   : > { %v18928_v27 = vpop.permute.xlu1 %11859 }
 0x873   : > { %11958 = vst.msk [vmem:[%s16656_s12 + $0x1a8] sm:$0xff] %vm11923_vm5, %v18928_v27 }
 0x874   : > { %v18933_v25 = vpop.permute.xlu0 %11869 }
 0x875   : > { %11968 = vst.msk [vmem:[%s16656_s12 + $0x220] sm:$0xff] %vm11923_vm5, %v18933_v25 }
 0x876   : > { %v18938_v48 = vpop.permute.xlu1 %11871 }
 0x877   : > { %11970 = vst.msk [vmem:[%s16656_s12 + $0x238] sm:$0xff] %vm11923_vm5, %v18938_v48 }
 0x878   : > { %v18943_v63 = vpop.permute.xlu0 %11865 }
 0x879   : > { %11964 = vst.msk [vmem:[%s16656_s12 + $0x1f0] sm:$0xff] %vm11923_vm5, %v18943_v63 }
 0x87a   : > { %v18948_v29 = vpop.permute.xlu1 %11867 }
 0x87b   : > { %11966 = vst.msk [vmem:[%s16656_s12 + $0x208] sm:$0xff] %vm11923_vm5, %v18948_v29 }
 0x87d   : > { %v18953_v18 = vpop.permute.xlu0 %11877 }
 0x87e   : > { %11976 = vst.msk [vmem:[%s16656_s12 + $0x280] sm:$0xff] %vm11923_vm5, %v18953_v18 }
 0x87f   : > { %v18958_v22 = vpop.permute.xlu1 %11879 }
 0x880   : > { %11978 = vst.msk [vmem:[%s16656_s12 + $0x298] sm:$0xff] %vm11923_vm5, %v18958_v22 }
 0x881   : > { %v18963_v2 = vpop.permute.xlu0 %11873 }
 0x882   : > { %11972 = vst.msk [vmem:[%s16656_s12 + $0x250] sm:$0xff] %vm11923_vm5, %v18963_v2 }
 0x883   : > { %v18968_v42 = vpop.permute.xlu1 %11875 }
 0x884   : > { %11974 = vst.msk [vmem:[%s16656_s12 + $0x268] sm:$0xff] %vm11923_vm5, %v18968_v42 }
 0x886   : > { %v18973_v51 = vpop.permute.xlu0 %11881 }
 0x887   : > { %11980 = vst.msk [vmem:[%s16656_s12 + $0x2b0] sm:$0xff] %vm11923_vm5, %v18973_v51 }
 0x888   : > { %v18978_v15 = vpop.permute.xlu1 %11883 }
 0x889   : > { %11982 = vst.msk [vmem:[%s16656_s12 + $0x2c8] sm:$0xff] %vm11923_vm5, %v18978_v15 }
 0x88a   : > { %v18983_v54 = vpop.permute.xlu0 %11885 }
 0x88b   : > { %11984 = vst.msk [vmem:[%s16656_s12 + $0x2e0] sm:$0xff] %vm11923_vm5, %v18983_v54 }
 0x88c   : > { %v18988_v46 = vpop.permute.xlu1 %11887 }
 0x88d   : > { %11986 = vst.msk [vmem:[%s16656_s12 + $0x2f8] sm:$0xff] %vm11923_vm5, %v18988_v46 }
 0x8c1   : > { %v14726_v58 = vpop.f32.mrb[48].mxu0 }
 0x8c2   : > { %v10749_v36 = vadd.f32 %v14726_v58, %v18996_v47  ;;  %v10581_v55 = vpop.f32.mrb[49].mxu0 }
 0x8c3   : > { %v10747_v41 = vadd.f32 %v18996_v47, %v10581_v55  ;;  %v14727_v11 = vpop.f32.mrb[50].mxu0 }
 0x8c4   : > { %v10781_v17 = vmax.f32 %v10749_v36, 0.0  ;;  %v10750_v44 = vadd.f32 %v14727_v11, %v18996_v47  ;;  %v10584_v19 = vpop.f32.mrb[51].mxu0 }
 0x8c5   : > { %v10779_v14 = vmax.f32 %v10747_v41, 0.0  ;;  %v10748_v23 = vadd.f32 %v18996_v47, %v10584_v19 }
 0x8c6   : > { %10813 = vst.msk [vmem:[%s16656_s12 + $0x38] sm:$0xff] %vm4502_vm3, %v10781_v17  ;;  %v10782_v39 = vmax.f32 %v10750_v44, 0.0 }
 0x8c7   : > { %11927 = vst.msk [vmem:[%s16656_s12 + $0x38] sm:$0xff] %vm11921_vm6, %v18833_v62  ;;  %v10780_v13 = vmax.f32 %v10748_v23, 0.0 }
 0x8c8   : > { %10811 = vst.msk [vmem:[%s16656_s12 + $0x8] sm:$0xff] %vm4502_vm3, %v10779_v14  ;;  %10814 = vst.msk [vmem:[%s16656_s12 + $0x50] sm:$0xff] %vm4502_vm3, %v10782_v39 }
 0x8c9   : > { %11922 = vst.msk [vmem:[%s16656_s12 + $0x8] sm:$0xff] %vm11921_vm6, %v18843_v6  ;;  %11929 = vst.msk [vmem:[%s16656_s12 + $0x50] sm:$0xff] %vm11921_vm6, %v18838_v24  ;;  %v14730_v60 = vpop.f32.mrb[52].mxu0 }
 0x8ca   : > { %10812 = vst.msk [vmem:[%s16656_s12 + $0x20] sm:$0xff] %vm4502_vm3, %v10780_v13  ;;  %v10753_v5 = vadd.f32 %v14730_v60, %v18996_v47  ;;  %v10597_v8 = vpop.f32.mrb[53].mxu0 }
 0x8cb   : > { %11925 = vst.msk [vmem:[%s16656_s12 + $0x20] sm:$0xff] %vm11921_vm6, %v18848_v0  ;;  %v10751_v49 = vadd.f32 %v18996_v47, %v10597_v8  ;;  %v14731_v20 = vpop.f32.mrb[54].mxu0 }
 0x8cc   : > { %v10785_v9 = vmax.f32 %v10753_v5, 0.0  ;;  %v10754_v26 = vadd.f32 %v14731_v20, %v18996_v47  ;;  %v10600_v4 = vpop.f32.mrb[55].mxu0 }
 0x8cd   : > { %v10783_v31 = vmax.f32 %v10751_v49, 0.0  ;;  %v10752_v35 = vadd.f32 %v18996_v47, %v10600_v4 }
 0x8ce   : > { %10817 = vst.msk [vmem:[%s16656_s12 + $0x98] sm:$0xff] %vm4502_vm3, %v10785_v9  ;;  %v10786_v43 = vmax.f32 %v10754_v26, 0.0 }
 0x8cf   : > { %11935 = vst.msk [vmem:[%s16656_s12 + $0x98] sm:$0xff] %vm11921_vm6, %v18853_v53  ;;  %v10784_v28 = vmax.f32 %v10752_v35, 0.0 }
 0x8d0   : > { %10815 = vst.msk [vmem:[%s16656_s12 + $0x68] sm:$0xff] %vm4502_vm3, %v10783_v31  ;;  %10818 = vst.msk [vmem:[%s16656_s12 + $0xb0] sm:$0xff] %vm4502_vm3, %v10786_v43 }
 0x8d1   : > { %11931 = vst.msk [vmem:[%s16656_s12 + $0x68] sm:$0xff] %vm11921_vm6, %v18863_v10  ;;  %11937 = vst.msk [vmem:[%s16656_s12 + $0xb0] sm:$0xff] %vm11921_vm6, %v18858_v57  ;;  %v14734_v16 = vpop.f32.mrb[56].mxu0 }
 0x8d2   : > { %10816 = vst.msk [vmem:[%s16656_s12 + $0x80] sm:$0xff] %vm4502_vm3, %v10784_v28  ;;  %v10757_v7 = vadd.f32 %v14734_v16, %v18996_v47  ;;  %v10613_v50 = vpop.f32.mrb[57].mxu0 }
 0x8d3   : > { %11933 = vst.msk [vmem:[%s16656_s12 + $0x80] sm:$0xff] %vm11921_vm6, %v18868_v38  ;;  %v10755_v61 = vadd.f32 %v18996_v47, %v10613_v50  ;;  %v14735_v32 = vpop.f32.mrb[58].mxu0 }
 0x8d4   : > { %v10789_v59 = vmax.f32 %v10757_v7, 0.0  ;;  %v10758_v33 = vadd.f32 %v14735_v32, %v18996_v47  ;;  %v10616_v62 = vpop.f32.mrb[59].mxu0 }
 0x8d5   : > { %v10787_v24 = vmax.f32 %v10755_v61, 0.0  ;;  %v10756_v6 = vadd.f32 %v18996_v47, %v10616_v62 }
 0x8d6   : > { %10821 = vst.msk [vmem:[%s16656_s12 + $0xf8] sm:$0xff] %vm4502_vm3, %v10789_v59  ;;  %v10790_v0 = vmax.f32 %v10758_v33, 0.0 }
 0x8d7   : > { %11943 = vst.msk [vmem:[%s16656_s12 + $0xf8] sm:$0xff] %vm11921_vm6, %v18873_v12  ;;  %v10788_v53 = vmax.f32 %v10756_v6, 0.0 }
 0x8d8   : > { %10819 = vst.msk [vmem:[%s16656_s12 + $0xc8] sm:$0xff] %vm4502_vm3, %v10787_v24  ;;  %10822 = vst.msk [vmem:[%s16656_s12 + $0x110] sm:$0xff] %vm4502_vm3, %v10790_v0 }
 0x8d9   : > { %11939 = vst.msk [vmem:[%s16656_s12 + $0xc8] sm:$0xff] %vm11921_vm6, %v18883_v34  ;;  %11945 = vst.msk [vmem:[%s16656_s12 + $0x110] sm:$0xff] %vm11921_vm6, %v18878_v40  ;;  %v14738_v57 = vpop.f32.mrb[60].mxu0 }
 0x8da   : > { %10820 = vst.msk [vmem:[%s16656_s12 + $0xe0] sm:$0xff] %vm4502_vm3, %v10788_v53  ;;  %v10761_v10 = vadd.f32 %v14738_v57, %v18996_v47  ;;  %v10629_v38 = vpop.f32.mrb[61].mxu0 }
 0x8db   : > { %11941 = vst.msk [vmem:[%s16656_s12 + $0xe0] sm:$0xff] %vm11921_vm6, %v18888_v1  ;;  %v10759_v12 = vadd.f32 %v18996_v47, %v10629_v38  ;;  %v14739_v34 = vpop.f32.mrb[62].mxu0 }
 0x8dc   : > { %v10793_v58 = vmax.f32 %v10761_v10, 0.0  ;;  %v10762_v40 = vadd.f32 %v14739_v34, %v18996_v47  ;;  %v10632_v36 = vpop.f32.mrb[63].mxu0 }
 0x8dd   : > { %v10791_v55 = vmax.f32 %v10759_v12, 0.0  ;;  %v10760_v41 = vadd.f32 %v18996_v47, %v10632_v36 }
 0x8de   : > { %10825 = vst.msk [vmem:[%s16656_s12 + $0x158] sm:$0xff] %vm4502_vm3, %v10793_v58  ;;  %v10794_v1 = vmax.f32 %v10762_v40, 0.0 }
 0x8df   : > { %11951 = vst.msk [vmem:[%s16656_s12 + $0x158] sm:$0xff] %vm11921_vm6, %v18893_v56  ;;  %v10792_v11 = vmax.f32 %v10760_v41, 0.0 }
 0x8e0   : > { %10823 = vst.msk [vmem:[%s16656_s12 + $0x128] sm:$0xff] %vm4502_vm3, %v10791_v55  ;;  %10826 = vst.msk [vmem:[%s16656_s12 + $0x170] sm:$0xff] %vm4502_vm3, %v10794_v1 }
 0x8e1   : > { %11947 = vst.msk [vmem:[%s16656_s12 + $0x128] sm:$0xff] %vm11921_vm6, %v18903_v52  ;;  %11953 = vst.msk [vmem:[%s16656_s12 + $0x170] sm:$0xff] %vm11921_vm6, %v18898_v37  ;;  %v14742_v17 = vpop.f32.mrb[64].mxu0 }
 0x8e2   : > { %10824 = vst.msk [vmem:[%s16656_s12 + $0x140] sm:$0xff] %vm4502_vm3, %v10792_v11  ;;  %v10765_v56 = vadd.f32 %v14742_v17, %v18996_v47  ;;  %v10645_v44 = vpop.f32.mrb[65].mxu0 }
 0x8e3   : > { %11949 = vst.msk [vmem:[%s16656_s12 + $0x140] sm:$0xff] %vm11921_vm6, %v18908_v30  ;;  %v10763_v52 = vadd.f32 %v18996_v47, %v10645_v44  ;;  %v14743_v19 = vpop.f32.mrb[66].mxu0 }
 0x8e4   : > { %v10797_v14 = vmax.f32 %v10765_v56, 0.0  ;;  %v10766_v37 = vadd.f32 %v14743_v19, %v18996_v47  ;;  %v10648_v23 = vpop.f32.mrb[67].mxu0 }
 0x8e5   : > { %v10795_v39 = vmax.f32 %v10763_v52, 0.0  ;;  %v10764_v13 = vadd.f32 %v18996_v47, %v10648_v23 }
 0x8e6   : > { %10829 = vst.msk [vmem:[%s16656_s12 + $0x1b8] sm:$0xff] %vm4502_vm3, %v10797_v14  ;;  %v10798_v30 = vmax.f32 %v10766_v37, 0.0 }
 0x8e7   : > { %11959 = vst.msk [vmem:[%s16656_s12 + $0x1b8] sm:$0xff] %vm11921_vm6, %v18913_v21  ;;  %v10796_v60 = vmax.f32 %v10764_v13, 0.0 }
 0x8e8   : > { %10827 = vst.msk [vmem:[%s16656_s12 + $0x188] sm:$0xff] %vm4502_vm3, %v10795_v39  ;;  %10830 = vst.msk [vmem:[%s16656_s12 + $0x1d0] sm:$0xff] %vm4502_vm3, %v10798_v30 }
 0x8e9   : > { %11955 = vst.msk [vmem:[%s16656_s12 + $0x188] sm:$0xff] %vm11921_vm6, %v18923_v3  ;;  %11961 = vst.msk [vmem:[%s16656_s12 + $0x1d0] sm:$0xff] %vm11921_vm6, %v18918_v45  ;;  %v14746_v5 = vpop.f32.mrb[68].mxu0 }
 0x8ea   : > { %10828 = vst.msk [vmem:[%s16656_s12 + $0x1a0] sm:$0xff] %vm4502_vm3, %v10796_v60  ;;  %v10769_v21 = vadd.f32 %v14746_v5, %v18996_v47  ;;  %v10661_v8 = vpop.f32.mrb[69].mxu0 }
 0x8eb   : > { %11957 = vst.msk [vmem:[%s16656_s12 + $0x1a0] sm:$0xff] %vm11921_vm6, %v18928_v27  ;;  %v10767_v3 = vadd.f32 %v18996_v47, %v10661_v8  ;;  %v14747_v49 = vpop.f32.mrb[70].mxu0 }
 0x8ec   : > { %v10801_v20 = vmax.f32 %v10769_v21, 0.0  ;;  %v10770_v45 = vadd.f32 %v14747_v49, %v18996_v47  ;;  %v10664_v9 = vpop.f32.mrb[71].mxu0 }
 0x8ed   : > { %v10799_v26 = vmax.f32 %v10767_v3, 0.0  ;;  %v10768_v4 = vadd.f32 %v18996_v47, %v10664_v9 }
 0x8ee   : > { %10833 = vst.msk [vmem:[%s16656_s12 + $0x218] sm:$0xff] %vm4502_vm3, %v10801_v20  ;;  %v10802_v27 = vmax.f32 %v10770_v45, 0.0 }
 0x8ef   : > { %11967 = vst.msk [vmem:[%s16656_s12 + $0x218] sm:$0xff] %vm11921_vm6, %v18933_v25  ;;  %v10800_v31 = vmax.f32 %v10768_v4, 0.0 }
 0x8f0   : > { %10831 = vst.msk [vmem:[%s16656_s12 + $0x1e8] sm:$0xff] %vm4502_vm3, %v10799_v26  ;;  %10834 = vst.msk [vmem:[%s16656_s12 + $0x230] sm:$0xff] %vm4502_vm3, %v10802_v27 }
 0x8f1   : > { %11963 = vst.msk [vmem:[%s16656_s12 + $0x1e8] sm:$0xff] %vm11921_vm6, %v18943_v63  ;;  %11969 = vst.msk [vmem:[%s16656_s12 + $0x230] sm:$0xff] %vm11921_vm6, %v18938_v48  ;;  %v14750_v35 = vpop.f32.mrb[72].mxu0 }
 0x8f2   : > { %10832 = vst.msk [vmem:[%s16656_s12 + $0x200] sm:$0xff] %vm4502_vm3, %v10800_v31  ;;  %v10773_v25 = vadd.f32 %v14750_v35, %v18996_v47  ;;  %v10677_v43 = vpop.f32.mrb[73].mxu0 }
 0x8f3   : > { %11965 = vst.msk [vmem:[%s16656_s12 + $0x200] sm:$0xff] %vm11921_vm6, %v18948_v29  ;;  %v10771_v63 = vadd.f32 %v18996_v47, %v10677_v43  ;;  %v14751_v28 = vpop.f32.mrb[74].mxu0 }
 0x8f4   : > { %v10805_v16 = vmax.f32 %v10773_v25, 0.0  ;;  %v10774_v48 = vadd.f32 %v14751_v28, %v18996_v47  ;;  %v10680_v7 = vpop.f32.mrb[75].mxu0 }
 0x8f5   : > { %v10803_v50 = vmax.f32 %v10771_v63, 0.0  ;;  %v10772_v61 = vadd.f32 %v18996_v47, %v10680_v7 }
 0x8f6   : > { %10837 = vst.msk [vmem:[%s16656_s12 + $0x278] sm:$0xff] %vm4502_vm3, %v10805_v16  ;;  %v10806_v29 = vmax.f32 %v10774_v48, 0.0 }
 0x8f7   : > { %11975 = vst.msk [vmem:[%s16656_s12 + $0x278] sm:$0xff] %vm11921_vm6, %v18953_v18  ;;  %v10804_v32 = vmax.f32 %v10772_v61, 0.0 }
 0x8f8   : > { %10835 = vst.msk [vmem:[%s16656_s12 + $0x248] sm:$0xff] %vm4502_vm3, %v10803_v50  ;;  %10838 = vst.msk [vmem:[%s16656_s12 + $0x290] sm:$0xff] %vm4502_vm3, %v10806_v29 }
 0x8f9   : > { %11971 = vst.msk [vmem:[%s16656_s12 + $0x248] sm:$0xff] %vm11921_vm6, %v18963_v2  ;;  %11977 = vst.msk [vmem:[%s16656_s12 + $0x290] sm:$0xff] %vm11921_vm6, %v18958_v22  ;;  %v14754_v59 = vpop.f32.mrb[76].mxu0 }
 0x8fa   : > { %10836 = vst.msk [vmem:[%s16656_s12 + $0x260] sm:$0xff] %vm4502_vm3, %v10804_v32  ;;  %v10777_v18 = vadd.f32 %v14754_v59, %v18996_v47  ;;  %v10693_v33 = vpop.f32.mrb[77].mxu0 }
 0x8fb   : > { %11973 = vst.msk [vmem:[%s16656_s12 + $0x260] sm:$0xff] %vm11921_vm6, %v18968_v42  ;;  %v10775_v2 = vadd.f32 %v18996_v47, %v10693_v33  ;;  %v14755_v62 = vpop.f32.mrb[78].mxu0 }
 0x8fc   : > { %v10809_v24 = vmax.f32 %v10777_v18, 0.0  ;;  %v10778_v22 = vadd.f32 %v14755_v62, %v18996_v47  ;;  %v10696_v6 = vpop.f32.mrb[79].mxu0 }
 0x8fd   : > { %v10807_v0 = vmax.f32 %v10775_v2, 0.0  ;;  %v10776_v42 = vadd.f32 %v18996_v47, %v10696_v6 }
 0x8fe   : > { %10841 = vst.msk [vmem:[%s16656_s12 + $0x2d8] sm:$0xff] %vm4502_vm3, %v10809_v24  ;;  %v10810_v53 = vmax.f32 %v10778_v22, 0.0 }
 0x8ff   : > { %10839 = vst.msk [vmem:[%s16656_s12 + $0x2a8] sm:$0xff] %vm4502_vm3, %v10807_v0  ;;  %v10808_v57 = vmax.f32 %v10776_v42, 0.0 }
 0x900   : > { %11983 = vst.msk [vmem:[%s16656_s12 + $0x2d8] sm:$0xff] %vm11921_vm6, %v18983_v54  ;;  %11979 = vst.msk [vmem:[%s16656_s12 + $0x2a8] sm:$0xff] %vm11921_vm6, %v18973_v51 }
 0x901   : > { %10842 = vst.msk [vmem:[%s16656_s12 + $0x2f0] sm:$0xff] %vm4502_vm3, %v10810_v53  ;;  %10840 = vst.msk [vmem:[%s16656_s12 + $0x2c0] sm:$0xff] %vm4502_vm3, %v10808_v57 }
 0x902   : > { %11985 = vst.msk [vmem:[%s16656_s12 + $0x2f0] sm:$0xff] %vm11921_vm6, %v18988_v46  ;;  %11981 = vst.msk [vmem:[%s16656_s12 + $0x2c0] sm:$0xff] %vm11921_vm6, %v18978_v15 }
 0x903   : > { %15881 = shalt.err (!%p15878_p11)
}
 0x904   : > { %s15882_s29 = scalar_lea.hbm %s19182_s26, 12288  ;;  %s15886_s24 = scalar_lea.hbm %s19309_s23, 24576 }
 0x905   : > { %p15883_p13 = scmp.ne.s32.totalorder %s19182_s26, %s15882_s29  ;;  %p15887_p6 = scmp.lt.u32.totalorder %s19182_s26, %s19309_s23 }
 0x906   : > { %p15888_p9 = scmp.lt.u32.totalorder %s15886_s24, %s15882_s29  ;;  %p15890_p12 = scmp.lt.u32.totalorder %s15882_s29, %s19182_s26 }
 0x907   : > { %p15884_p5 = pnand %p15883_p13, %p19310_p1 }
 0x908   : > { %p15889_p10 = por %p15888_p9, %p15887_p6 }
 0x909   : > { %p15885_p0 = pneg %p15884_p5 }
 0x90a   : > { %p15891_p2 = por %p15890_p12, %p15889_p10 }
 0x90c   : > { %p15892_p3 = pnand %p15891_p2, %p15885_p0 }
 0x90e   : > { %15895 = shalt.err (!%p15892_p3)
}
 0x90f   : > { %s15949_s30 = smov 384   ;;  %s15950_s27 = smov 24  }
 0x910   : > { %15575 = dma.vmem_to_hbm [thread:$0]  (%p19310_p1), %s19189_s15, 12288, %s19182_s26, %s19201_s20, %s15949_s30, %s15949_s30, %s15950_s27  }
 0x911 PF: > { %s19311_s18 = sld [smem:[#allocation17_spill]]  ;;  %s19312_s21 = sld [smem:[#allocation15_spill]] }
 0x912   : > { %s19313_s16 = sld [smem:[#allocation21_spill]] }
 0x917   : > { %p15592_p4 = scmp.ge.s32.totalorder %s19311_s18, 2  ;;  %s12016_s12 = sand.u32 1, %s19312_s21  }
 0x918   : > { %p19314_p7 = scmp.ne.s32.totalorder %s19313_s16, 0  ;;  %s12017_s29 = scalar_lea.sflag [#allocation8], %s12016_s12 }
 0x91a   : > { %p15585_p8 = pnand %p15592_p4, %p19314_p7 }
 0x91c   : > { %15921 = dma.done.wait (!%p15585_p8), %s12017_s29, 12288  }
 0x91d   : > { %15923 = vsyncadd (!%p15585_p8), %s12017_s29, 4294955008  ;;  %s19315_s21 = sld [smem:[#allocation18_spill]]  ;;  %s19316_s25 = sld [smem:[#allocation16_spill]] }
 0x91e   : > { %s19317_s20 = sld [smem:[#allocation19_spill]]  ;;  %s19318_s18 = smov %s15930_s19 }
 0x923   : > { %p27_p11 = scmp.ge.s32.totalorder %s19315_s21, 4   ;;  %s19319_s19 = smov %s19316_s25 }
 0x925   :  { %29 = sbr.rel (!%p27_p11) target bundleno = 8 (0x8), region = 156 }
 0x92c   :  { %12022 = vsyncpa [#allocation7], 1 }
 0x92d   :  { %12024 = vsyncpa [#allocation7 + $0x1], 1 }
 0x92e   :  { %12025 = vsyncpa [#allocation10], 1 }
 0x92f   :  { %12026 = vsyncpa [#allocation8], 1 }
 0x930   :  { %12028 = vsyncpa [#allocation8 + $0x1], 1 }

</bundles_post_ra>
